<compile_context>
chip_gen: v7x
topology: tpu7x:2x2x1
jax: 0.10.0
libtpu: 0.0.40
codegen_flags: <defaults>
</compile_context>

<pallas_src>
import jax
import jax.numpy as jnp
from jax.experimental import pallas as pl
from jax.experimental.pallas import tpu as pltpu


def smooth_dilated_residual_block(x, params, dilation=1):
    """Fused forward pass of SmoothDilatedResidualBlock (group=1), NHWC."""
    N, H, W, C = x.shape
    C8 = max(C // 8, 1)
    HW = H * W
    K = dilation * 2 - 1            # ShareSepConv kernel size (odd)
    PS = (K - 1) // 2               # ShareSepConv padding
    PMAX = max(dilation, 1)         # largest halo any conv in the block needs
    EPS = 1e-5
    INV_HW = 1.0 / float(HW)

    def kernel(ps1_s, ps2_s, bc1_s, bp1_s, wp2_s, bp2_s,      # SMEM params
               x_ref, w1_ref, w2_ref, w3_ref,
               g1_ref, b1_ref, g2_ref, b2_ref,
               wc1_ref, wc2_ref, bc2_ref, wp1_ref,
               o_ref,
               pbuf):                                          # VMEM scratch

        def xflat():
            # Re-read the resident input block instead of keeping it live.
            return x_ref[0].astype(jnp.float32).reshape(HW, C)

        def write_padded(a_hwc):
            # Zero the whole halo buffer, then write the interior.
            pbuf[...] = jnp.zeros_like(pbuf)
            pbuf[PMAX:PMAX + H, PMAX:PMAX + W, :] = a_hwc

        def patch(kh, kw, p, d):
            # Shifted (H, W, C) window as if padded by p with dilation d.
            h0 = PMAX - p + kh * d
            w0 = PMAX - p + kw * d
            return pbuf[h0:h0 + H, w0:w0 + W, :]

        def share_sep(a_hwc, w_s):
            # ShareSepConv: depthwise conv, one shared (K, K) kernel (SMEM).
            if K == 1:
                return a_hwc * w_s[0, 0]        # degenerate 1x1 shared kernel
            write_padded(a_hwc)
            acc = jnp.zeros((H, W, C), jnp.float32)
            for kh in range(K):
                for kw in range(K):
                    acc = acc + w_s[kh, kw] * patch(kh, kw, PS, 1)
            return acc

        def conv3x3(a_hwc, w_ref_, p, d):
            # 3x3 dense conv as 9 shifted (HW, C) x (C, C) MXU dots with an
            # f32 accumulator kept live in VMEM/vregs (no HBM round trip).
            write_padded(a_hwc)
            acc = jnp.zeros((HW, C), jnp.float32)
            for kh in range(3):
                for kw in range(3):
                    idx = kh * 3 + kw
                    acc = acc + jnp.dot(
                        patch(kh, kw, p, d).reshape(HW, C),
                        w_ref_[idx * C:(idx + 1) * C, :],
                        preferred_element_type=jnp.float32)
            return acc                                         # (HW, C)

        def inorm(a_flat, g_ref_, b_ref_):
            # InstanceNorm2d(affine=True): biased variance over H*W per (n, c).
            mean = jnp.sum(a_flat, axis=0, keepdims=True) * INV_HW     # (1, C)
            xc = a_flat - mean
            var = jnp.sum(xc * xc, axis=0, keepdims=True) * INV_HW
            return xc * jax.lax.rsqrt(var + EPS) * g_ref_[...] + b_ref_[...]

        # ---- branch 1: relu(norm1(conv1(pre_conv1(x)))) ----
        y = share_sep(x_ref[0].astype(jnp.float32), ps1_s)     # (H, W, C)
        y = conv3x3(y, w1_ref, dilation, dilation)             # (HW, C)
        y = jnp.maximum(inorm(y, g1_ref, b1_ref), 0.0)

        # ---- branch 2: norm2(conv2(pre_conv2(y))) + x ----
        y = share_sep(y.reshape(H, W, C), ps2_s)
        y = conv3x3(y, w2_ref, dilation, dilation)
        y = inorm(y, g2_ref, b2_ref) + xflat()                 # fused residual

        # ---- conv3 ----
        y = conv3x3(y.reshape(H, W, C), w3_ref, 1, 1)          # (HW, C)

        # ---- CALayer: GAP -> two tiny FCs -> sigmoid channel gate (VPU) ----
        gap = jnp.sum(y, axis=0, keepdims=True) * INV_HW       # (1, C)
        wc1 = wc1_ref[...]                                     # (C8, C)
        wc2 = wc2_ref[...]                                     # (C8, C)
        ca_logit = bc2_ref[...]                                # (1, C)
        for j in range(C8):
            hj = jnp.sum(gap * wc1[j:j + 1, :], axis=1, keepdims=True) + bc1_s[j]
            ca_logit = ca_logit + jnp.maximum(hj, 0.0) * wc2[j:j + 1, :]
        y = y * jax.nn.sigmoid(ca_logit)                       # (HW, C)

        # ---- PALayer: per-pixel gate via broadcast-mul + lane reduce (VPU) ----
        wp1 = wp1_ref[...]                                     # (C8, C)
        pa_logit = jnp.zeros((HW, 1), jnp.float32) + bp2_s[0]
        for j in range(C8):
            pj = jnp.sum(y * wp1[j:j + 1, :], axis=1, keepdims=True) + bp1_s[j]
            pa_logit = pa_logit + jnp.maximum(pj, 0.0) * wp2_s[j]
        y = y * jax.nn.sigmoid(pa_logit)                       # (HW, C)

        # ---- final residual + relu ----
        out = jnp.maximum(xflat() + y, 0.0)
        o_ref[0] = out.reshape(H, W, C).astype(o_ref.dtype)

    smem = pl.BlockSpec(memory_space=pltpu.MemorySpace.SMEM)
    img = pl.BlockSpec((1, H, W, C), lambda n: (n, 0, 0, 0))

    def resident(shape):
        nd = len(shape)
        return pl.BlockSpec(shape, lambda n, _nd=nd: (0,) * _nd)

    in_specs = (
        [smem] * 6 +                                   # presep1/2, bc1, bp1, wp2, bp2
        [img] +                                        # x
        [resident((9 * C, C))] * 3 +                   # conv1/2/3
        [resident((1, C))] * 4 +                       # gamma1, beta1, gamma2, beta2
        [resident((C8, C)), resident((C8, C)),         # wc1, wc2
         resident((1, C)), resident((C8, C))]          # bc2, wp1
    )

    return pl.pallas_call(
        kernel,
        out_shape=jax.ShapeDtypeStruct((N, H, W, C), x.dtype),
        grid=(N,),
        in_specs=in_specs,
        out_specs=img,
        scratch_shapes=[
            pltpu.VMEM((H + 2 * PMAX, W + 2 * PMAX, C), jnp.float32),  # halo buffer
        ],
        compiler_params=pltpu.CompilerParams(
            dimension_semantics=("parallel",)),        # megacore split on v7x
    )(params['presep1'], params['presep2'], params['bc1'], params['bp1'],
      params['wp2'], params['bp2'],
      x, params['conv1'], params['conv2'], params['conv3'],
      params['gamma1'], params['beta1'], params['gamma2'], params['beta2'],
      params['wc1'], params['wc2'], params['bc2'], params['wp1'])


# ------------------------------ parameter init ------------------------------

def init_params(key, C, dilation=1):
    K = dilation * 2 - 1
    C8 = max(C // 8, 1)
    keys = jax.random.split(key, 16)
    center = (K - 1) // 2
    # ShareSepConv weight init exactly as in __init__: delta kernel.
    presep = jnp.zeros((K, K), jnp.float32).at[center, center].set(1.0)

    def nrm(kk, shape, scale=0.1):
        return scale * jax.random.normal(kk, shape, jnp.float32)

    return dict(
        presep1=presep,
        presep2=presep,
        # Dense 3x3 conv weights, row index = (kh*3 + kw)*Cin + cin, col = cout.
        conv1=nrm(keys[0], (9 * C, C)),
        conv2=nrm(keys[1], (9 * C, C)),
        conv3=nrm(keys[2], (9 * C, C)),
        gamma1=1.0 + nrm(keys[3], (1, C)),
        beta1=nrm(keys[4], (1, C)),
        gamma2=1.0 + nrm(keys[5], (1, C)),
        beta2=nrm(keys[6], (1, C)),
        # CALayer 1x1 convs: wc1[j, c] = W1[out=j, in=c]; wc2[j, c] = W2[out=c, in=j].
        wc1=nrm(keys[7], (C8, C)),
        bc1=nrm(keys[8], (C8,)),
        wc2=nrm(keys[9], (C8, C)),
        bc2=nrm(keys[10], (1, C)),
        # PALayer 1x1 convs: wp1[j, c] = W1[out=j, in=c]; wp2[j] = W2[out=0, in=j].
        wp1=nrm(keys[11], (C8, C)),
        bp1=nrm(keys[12], (C8,)),
        wp2=nrm(keys[13], (C8,)),
        bp2=nrm(keys[14], (1,)),
    )


if __name__ == "__main__":
    key = jax.random.PRNGKey(0)
    kx, kp = jax.random.split(key)

    N, H, W, C = 2, 16, 16, 16       # NHWC; C must be >= 8 (PyTorch uses C // 8)
    dilation = 1                     # module defaults: dilation=1, group=1

    x = jax.random.normal(kx, (N, H, W, C), jnp.float32)
    params = init_params(kp, C, dilation=dilation)

    out = smooth_dilated_residual_block(x, params, dilation=dilation)
    out = jax.block_until_ready(out)

    assert out.shape == (N, H, W, C)
    assert bool(jnp.all(jnp.isfinite(out)))
    assert bool(jnp.all(out >= 0.0))    # final op is ReLU
    print("KERNEL_OK")
</pallas_src>

<mosaic_0001>
module attributes {stable_mosaic.version = 11 : i64} {
  func.func @kernel(%arg0: i32, %arg1: memref<1x1xf32, #tpu.memory_space<smem>>, %arg2: memref<1x1xf32, #tpu.memory_space<smem>>, %arg3: memref<2xf32, #tpu.memory_space<smem>>, %arg4: memref<2xf32, #tpu.memory_space<smem>>, %arg5: memref<2xf32, #tpu.memory_space<smem>>, %arg6: memref<1xf32, #tpu.memory_space<smem>>, %arg7: memref<1x16x16x16xf32, #tpu.memory_space<vmem>>, %arg8: memref<144x16xf32, #tpu.memory_space<vmem>>, %arg9: memref<144x16xf32, #tpu.memory_space<vmem>>, %arg10: memref<144x16xf32, #tpu.memory_space<vmem>>, %arg11: memref<1x16xf32, #tpu.memory_space<vmem>>, %arg12: memref<1x16xf32, #tpu.memory_space<vmem>>, %arg13: memref<1x16xf32, #tpu.memory_space<vmem>>, %arg14: memref<1x16xf32, #tpu.memory_space<vmem>>, %arg15: memref<2x16xf32, #tpu.memory_space<vmem>>, %arg16: memref<2x16xf32, #tpu.memory_space<vmem>>, %arg17: memref<1x16xf32, #tpu.memory_space<vmem>>, %arg18: memref<2x16xf32, #tpu.memory_space<vmem>>, %arg19: memref<1x16x16x16xf32, #tpu.memory_space<vmem>>, %arg20: memref<18x18x16xf32, #tpu.memory_space<vmem>>) attributes {dimension_semantics = [#tpu.dimension_semantics<parallel>], iteration_bounds = array<i64: 2>, scalar_prefetch = 0 : i64, scratch_operands = 1 : i64, tpu.core_type = #tpu.core_type<tc>, window_params = [{transform_indices = @transform_0, window_bounds = array<i64: 1, 1>}, {transform_indices = @transform_1, window_bounds = array<i64: 1, 1>}, {transform_indices = @transform_2, window_bounds = array<i64: 2>}, {transform_indices = @transform_3, window_bounds = array<i64: 2>}, {transform_indices = @transform_4, window_bounds = array<i64: 2>}, {transform_indices = @transform_5, window_bounds = array<i64: 1>}, {transform_indices = @transform_6, window_bounds = array<i64: 1, 16, 16, 16>}, {pipeline_mode = #tpu.pipeline_mode<synchronous>, transform_indices = @transform_7, window_bounds = array<i64: 144, 16>}, {pipeline_mode = #tpu.pipeline_mode<synchronous>, transform_indices = @transform_8, window_bounds = array<i64: 144, 16>}, {pipeline_mode = #tpu.pipeline_mode<synchronous>, transform_indices = @transform_9, window_bounds = array<i64: 144, 16>}, {pipeline_mode = #tpu.pipeline_mode<synchronous>, transform_indices = @transform_10, window_bounds = array<i64: 1, 16>}, {pipeline_mode = #tpu.pipeline_mode<synchronous>, transform_indices = @transform_11, window_bounds = array<i64: 1, 16>}, {pipeline_mode = #tpu.pipeline_mode<synchronous>, transform_indices = @transform_12, window_bounds = array<i64: 1, 16>}, {pipeline_mode = #tpu.pipeline_mode<synchronous>, transform_indices = @transform_13, window_bounds = array<i64: 1, 16>}, {pipeline_mode = #tpu.pipeline_mode<synchronous>, transform_indices = @transform_14, window_bounds = array<i64: 2, 16>}, {pipeline_mode = #tpu.pipeline_mode<synchronous>, transform_indices = @transform_15, window_bounds = array<i64: 2, 16>}, {pipeline_mode = #tpu.pipeline_mode<synchronous>, transform_indices = @transform_16, window_bounds = array<i64: 1, 16>}, {pipeline_mode = #tpu.pipeline_mode<synchronous>, transform_indices = @transform_17, window_bounds = array<i64: 2, 16>}, {transform_indices = @transform_18, window_bounds = array<i64: 1, 16, 16, 16>}]} {
    %c0 = arith.constant 0 : index
    %c0_0 = arith.constant 0 : index
    %c0_1 = arith.constant 0 : index
    %c0_2 = arith.constant 0 : index
    %0 = vector.load %arg7[%c0, %c0_0, %c0_1, %c0_2] : memref<1x16x16x16xf32, #tpu.memory_space<vmem>>, vector<1x16x16x16xf32>
    %1 = vector.shape_cast %0 : vector<1x16x16x16xf32> to vector<16x16x16xf32>
    %c0_3 = arith.constant 0 : index
    %c0_4 = arith.constant 0 : index
    %2 = memref.load %arg1[%c0_3, %c0_4] : memref<1x1xf32, #tpu.memory_space<smem>>
    %3 = vector.broadcast %2 : f32 to vector<16x16x16xf32>
    %4 = arith.mulf %1, %3 : vector<16x16x16xf32>
    %cst = arith.constant 0.000000e+00 : f32
    %5 = vector.broadcast %cst : f32 to vector<18x18x16xf32>
    %c0_5 = arith.constant 0 : index
    %c0_6 = arith.constant 0 : index
    %c0_7 = arith.constant 0 : index
    %6 = vector.load %arg20[%c0_5, %c0_6, %c0_7] : memref<18x18x16xf32, #tpu.memory_space<vmem>>, vector<18x18x16xf32>
    tpu.vector_store %arg20[%c0_5, %c0_6, %c0_7], %5 {strides = array<i32>} : memref<18x18x16xf32, #tpu.memory_space<vmem>>, vector<18x18x16xf32>,
    %c1 = arith.constant 1 : index
    %c1_8 = arith.constant 1 : index
    %c0_9 = arith.constant 0 : index
    %7 = vector.load %arg20[%c1, %c1_8, %c0_9] : memref<18x18x16xf32, #tpu.memory_space<vmem>>, vector<16x16x16xf32>
    tpu.vector_store %arg20[%c1, %c1_8, %c0_9], %4 {strides = array<i32>} : memref<18x18x16xf32, #tpu.memory_space<vmem>>, vector<16x16x16xf32>,
    %cst_10 = arith.constant 0.000000e+00 : f32
    %8 = vector.broadcast %cst_10 : f32 to vector<256x16xf32>
    %c0_11 = arith.constant 0 : index
    %c0_12 = arith.constant 0 : index
    %c0_13 = arith.constant 0 : index
    %9 = vector.load %arg20[%c0_11, %c0_12, %c0_13] : memref<18x18x16xf32, #tpu.memory_space<vmem>>, vector<16x16x16xf32>
    %10 = vector.shape_cast %9 : vector<16x16x16xf32> to vector<256x16xf32>
    %c0_14 = arith.constant 0 : index
    %c0_15 = arith.constant 0 : index
    %11 = vector.load %arg8[%c0_14, %c0_15] : memref<144x16xf32, #tpu.memory_space<vmem>>, vector<16x16xf32>
    %cst_16 = arith.constant dense<0.000000e+00> : vector<256x16xf32>
    %12 = tpu.matmul %10, %11, %cst_16 {dimension_numbers = #tpu.dot_dimension_numbers<[1], [0], [0], [1], [0, 0, 1, 1], [], []>} : vector<256x16xf32>, vector<16x16xf32>, vector<256x16xf32> -> vector<256x16xf32>
    %13 = arith.addf %8, %12 : vector<256x16xf32>
    %c0_17 = arith.constant 0 : index
    %c1_18 = arith.constant 1 : index
    %c0_19 = arith.constant 0 : index
    %14 = vector.load %arg20[%c0_17, %c1_18, %c0_19] : memref<18x18x16xf32, #tpu.memory_space<vmem>>, vector<16x16x16xf32>
    %15 = vector.shape_cast %14 : vector<16x16x16xf32> to vector<256x16xf32>
    %c16 = arith.constant 16 : index
    %c0_20 = arith.constant 0 : index
    %16 = vector.load %arg8[%c16, %c0_20] : memref<144x16xf32, #tpu.memory_space<vmem>>, vector<16x16xf32>
    %cst_21 = arith.constant dense<0.000000e+00> : vector<256x16xf32>
    %17 = tpu.matmul %15, %16, %cst_21 {dimension_numbers = #tpu.dot_dimension_numbers<[1], [0], [0], [1], [0, 0, 1, 1], [], []>} : vector<256x16xf32>, vector<16x16xf32>, vector<256x16xf32> -> vector<256x16xf32>
    %18 = arith.addf %13, %17 : vector<256x16xf32>
    %c0_22 = arith.constant 0 : index
    %c2 = arith.constant 2 : index
    %c0_23 = arith.constant 0 : index
    %19 = vector.load %arg20[%c0_22, %c2, %c0_23] : memref<18x18x16xf32, #tpu.memory_space<vmem>>, vector<16x16x16xf32>
    %20 = vector.shape_cast %19 : vector<16x16x16xf32> to vector<256x16xf32>
    %c32 = arith.constant 32 : index
    %c0_24 = arith.constant 0 : index
    %21 = vector.load %arg8[%c32, %c0_24] : memref<144x16xf32, #tpu.memory_space<vmem>>, vector<16x16xf32>
    %cst_25 = arith.constant dense<0.000000e+00> : vector<256x16xf32>
    %22 = tpu.matmul %20, %21, %cst_25 {dimension_numbers = #tpu.dot_dimension_numbers<[1], [0], [0], [1], [0, 0, 1, 1], [], []>} : vector<256x16xf32>, vector<16x16xf32>, vector<256x16xf32> -> vector<256x16xf32>
    %23 = arith.addf %18, %22 : vector<256x16xf32>
    %c1_26 = arith.constant 1 : index
    %c0_27 = arith.constant 0 : index
    %c0_28 = arith.constant 0 : index
    %24 = vector.load %arg20[%c1_26, %c0_27, %c0_28] : memref<18x18x16xf32, #tpu.memory_space<vmem>>, vector<16x16x16xf32>
    %25 = vector.shape_cast %24 : vector<16x16x16xf32> to vector<256x16xf32>
    %c48 = arith.constant 48 : index
    %c0_29 = arith.constant 0 : index
    %26 = vector.load %arg8[%c48, %c0_29] : memref<144x16xf32, #tpu.memory_space<vmem>>, vector<16x16xf32>
    %cst_30 = arith.constant dense<0.000000e+00> : vector<256x16xf32>
    %27 = tpu.matmul %25, %26, %cst_30 {dimension_numbers = #tpu.dot_dimension_numbers<[1], [0], [0], [1], [0, 0, 1, 1], [], []>} : vector<256x16xf32>, vector<16x16xf32>, vector<256x16xf32> -> vector<256x16xf32>
    %28 = arith.addf %23, %27 : vector<256x16xf32>
    %c1_31 = arith.constant 1 : index
    %c1_32 = arith.constant 1 : index
    %c0_33 = arith.constant 0 : index
    %29 = vector.load %arg20[%c1_31, %c1_32, %c0_33] : memref<18x18x16xf32, #tpu.memory_space<vmem>>, vector<16x16x16xf32>
    %30 = vector.shape_cast %29 : vector<16x16x16xf32> to vector<256x16xf32>
    %c64 = arith.constant 64 : index
    %c0_34 = arith.constant 0 : index
    %31 = vector.load %arg8[%c64, %c0_34] : memref<144x16xf32, #tpu.memory_space<vmem>>, vector<16x16xf32>
    %cst_35 = arith.constant dense<0.000000e+00> : vector<256x16xf32>
    %32 = tpu.matmul %30, %31, %cst_35 {dimension_numbers = #tpu.dot_dimension_numbers<[1], [0], [0], [1], [0, 0, 1, 1], [], []>} : vector<256x16xf32>, vector<16x16xf32>, vector<256x16xf32> -> vector<256x16xf32>
    %33 = arith.addf %28, %32 : vector<256x16xf32>
    %c1_36 = arith.constant 1 : index
    %c2_37 = arith.constant 2 : index
    %c0_38 = arith.constant 0 : index
    %34 = vector.load %arg20[%c1_36, %c2_37, %c0_38] : memref<18x18x16xf32, #tpu.memory_space<vmem>>, vector<16x16x16xf32>
    %35 = vector.shape_cast %34 : vector<16x16x16xf32> to vector<256x16xf32>
    %c80 = arith.constant 80 : index
    %c0_39 = arith.constant 0 : index
    %36 = vector.load %arg8[%c80, %c0_39] : memref<144x16xf32, #tpu.memory_space<vmem>>, vector<16x16xf32>
    %cst_40 = arith.constant dense<0.000000e+00> : vector<256x16xf32>
    %37 = tpu.matmul %35, %36, %cst_40 {dimension_numbers = #tpu.dot_dimension_numbers<[1], [0], [0], [1], [0, 0, 1, 1], [], []>} : vector<256x16xf32>, vector<16x16xf32>, vector<256x16xf32> -> vector<256x16xf32>
    %38 = arith.addf %33, %37 : vector<256x16xf32>
    %c2_41 = arith.constant 2 : index
    %c0_42 = arith.constant 0 : index
    %c0_43 = arith.constant 0 : index
    %39 = vector.load %arg20[%c2_41, %c0_42, %c0_43] : memref<18x18x16xf32, #tpu.memory_space<vmem>>, vector<16x16x16xf32>
    %40 = vector.shape_cast %39 : vector<16x16x16xf32> to vector<256x16xf32>
    %c96 = arith.constant 96 : index
    %c0_44 = arith.constant 0 : index
    %41 = vector.load %arg8[%c96, %c0_44] : memref<144x16xf32, #tpu.memory_space<vmem>>, vector<16x16xf32>
    %cst_45 = arith.constant dense<0.000000e+00> : vector<256x16xf32>
    %42 = tpu.matmul %40, %41, %cst_45 {dimension_numbers = #tpu.dot_dimension_numbers<[1], [0], [0], [1], [0, 0, 1, 1], [], []>} : vector<256x16xf32>, vector<16x16xf32>, vector<256x16xf32> -> vector<256x16xf32>
    %43 = arith.addf %38, %42 : vector<256x16xf32>
    %c2_46 = arith.constant 2 : index
    %c1_47 = arith.constant 1 : index
    %c0_48 = arith.constant 0 : index
    %44 = vector.load %arg20[%c2_46, %c1_47, %c0_48] : memref<18x18x16xf32, #tpu.memory_space<vmem>>, vector<16x16x16xf32>
    %45 = vector.shape_cast %44 : vector<16x16x16xf32> to vector<256x16xf32>
    %c112 = arith.constant 112 : index
    %c0_49 = arith.constant 0 : index
    %46 = vector.load %arg8[%c112, %c0_49] : memref<144x16xf32, #tpu.memory_space<vmem>>, vector<16x16xf32>
    %cst_50 = arith.constant dense<0.000000e+00> : vector<256x16xf32>
    %47 = tpu.matmul %45, %46, %cst_50 {dimension_numbers = #tpu.dot_dimension_numbers<[1], [0], [0], [1], [0, 0, 1, 1], [], []>} : vector<256x16xf32>, vector<16x16xf32>, vector<256x16xf32> -> vector<256x16xf32>
    %48 = arith.addf %43, %47 : vector<256x16xf32>
    %c2_51 = arith.constant 2 : index
    %c2_52 = arith.constant 2 : index
    %c0_53 = arith.constant 0 : index
    %49 = vector.load %arg20[%c2_51, %c2_52, %c0_53] : memref<18x18x16xf32, #tpu.memory_space<vmem>>, vector<16x16x16xf32>
    %50 = vector.shape_cast %49 : vector<16x16x16xf32> to vector<256x16xf32>
    %c128 = arith.constant 128 : index
    %c0_54 = arith.constant 0 : index
    %51 = vector.load %arg8[%c128, %c0_54] : memref<144x16xf32, #tpu.memory_space<vmem>>, vector<16x16xf32>
    %cst_55 = arith.constant dense<0.000000e+00> : vector<256x16xf32>
    %52 = tpu.matmul %50, %51, %cst_55 {dimension_numbers = #tpu.dot_dimension_numbers<[1], [0], [0], [1], [0, 0, 1, 1], [], []>} : vector<256x16xf32>, vector<16x16xf32>, vector<256x16xf32> -> vector<256x16xf32>
    %53 = arith.addf %48, %52 : vector<256x16xf32>
    %cst_56 = arith.constant dense<0.000000e+00> : vector<16xf32>
    %54 = vector.multi_reduction <add>, %53, %cst_56 [0] : vector<256x16xf32> to vector<16xf32>
    %55 = vector.shape_cast %54 : vector<16xf32> to vector<1x16xf32>
    %cst_57 = arith.constant 3.906250e-03 : f32
    %56 = vector.broadcast %cst_57 : f32 to vector<1x16xf32>
    %57 = arith.mulf %55, %56 : vector<1x16xf32>
    %58 = vector.broadcast %57 : vector<1x16xf32> to vector<256x16xf32>
    %59 = arith.subf %53, %58 : vector<256x16xf32>
    %60 = arith.mulf %59, %59 : vector<256x16xf32>
    %cst_58 = arith.constant dense<0.000000e+00> : vector<16xf32>
    %61 = vector.multi_reduction <add>, %60, %cst_58 [0] : vector<256x16xf32> to vector<16xf32>
    %62 = vector.shape_cast %61 : vector<16xf32> to vector<1x16xf32>
    %cst_59 = arith.constant 3.906250e-03 : f32
    %63 = vector.broadcast %cst_59 : f32 to vector<1x16xf32>
    %64 = arith.mulf %62, %63 : vector<1x16xf32>
    %cst_60 = arith.constant 9.99999974E-6 : f32
    %65 = vector.broadcast %cst_60 : f32 to vector<1x16xf32>
    %66 = arith.addf %64, %65 : vector<1x16xf32>
    %67 = math.rsqrt %66 : vector<1x16xf32>
    %68 = vector.broadcast %67 : vector<1x16xf32> to vector<256x16xf32>
    %69 = arith.mulf %59, %68 : vector<256x16xf32>
    %c0_61 = arith.constant 0 : index
    %c0_62 = arith.constant 0 : index
    %70 = vector.load %arg11[%c0_61, %c0_62] : memref<1x16xf32, #tpu.memory_space<vmem>>, vector<1x16xf32>
    %71 = vector.broadcast %70 : vector<1x16xf32> to vector<256x16xf32>
    %72 = arith.mulf %69, %71 : vector<256x16xf32>
    %c0_63 = arith.constant 0 : index
    %c0_64 = arith.constant 0 : index
    %73 = vector.load %arg12[%c0_63, %c0_64] : memref<1x16xf32, #tpu.memory_space<vmem>>, vector<1x16xf32>
    %74 = vector.broadcast %73 : vector<1x16xf32> to vector<256x16xf32>
    %75 = arith.addf %72, %74 : vector<256x16xf32>
    %cst_65 = arith.constant 0.000000e+00 : f32
    %76 = vector.broadcast %cst_65 : f32 to vector<256x16xf32>
    %77 = arith.maximumf %75, %76 : vector<256x16xf32>
    %78 = vector.shape_cast %77 : vector<256x16xf32> to vector<16x16x16xf32>
    %c0_66 = arith.constant 0 : index
    %c0_67 = arith.constant 0 : index
    %79 = memref.load %arg2[%c0_66, %c0_67] : memref<1x1xf32, #tpu.memory_space<smem>>
    %80 = vector.broadcast %79 : f32 to vector<16x16x16xf32>
    %81 = arith.mulf %78, %80 : vector<16x16x16xf32>
    %cst_68 = arith.constant 0.000000e+00 : f32
    %82 = vector.broadcast %cst_68 : f32 to vector<18x18x16xf32>
    %c0_69 = arith.constant 0 : index
    %c0_70 = arith.constant 0 : index
    %c0_71 = arith.constant 0 : index
    %83 = vector.load %arg20[%c0_69, %c0_70, %c0_71] : memref<18x18x16xf32, #tpu.memory_space<vmem>>, vector<18x18x16xf32>
    tpu.vector_store %arg20[%c0_69, %c0_70, %c0_71], %82 {strides = array<i32>} : memref<18x18x16xf32, #tpu.memory_space<vmem>>, vector<18x18x16xf32>,
    %c1_72 = arith.constant 1 : index
    %c1_73 = arith.constant 1 : index
    %c0_74 = arith.constant 0 : index
    %84 = vector.load %arg20[%c1_72, %c1_73, %c0_74] : memref<18x18x16xf32, #tpu.memory_space<vmem>>, vector<16x16x16xf32>
    tpu.vector_store %arg20[%c1_72, %c1_73, %c0_74], %81 {strides = array<i32>} : memref<18x18x16xf32, #tpu.memory_space<vmem>>, vector<16x16x16xf32>,
    %cst_75 = arith.constant 0.000000e+00 : f32
    %85 = vector.broadcast %cst_75 : f32 to vector<256x16xf32>
    %c0_76 = arith.constant 0 : index
    %c0_77 = arith.constant 0 : index
    %c0_78 = arith.constant 0 : index
    %86 = vector.load %arg20[%c0_76, %c0_77, %c0_78] : memref<18x18x16xf32, #tpu.memory_space<vmem>>, vector<16x16x16xf32>
    %87 = vector.shape_cast %86 : vector<16x16x16xf32> to vector<256x16xf32>
    %c0_79 = arith.constant 0 : index
    %c0_80 = arith.constant 0 : index
    %88 = vector.load %arg9[%c0_79, %c0_80] : memref<144x16xf32, #tpu.memory_space<vmem>>, vector<16x16xf32>
    %cst_81 = arith.constant dense<0.000000e+00> : vector<256x16xf32>
    %89 = tpu.matmul %87, %88, %cst_81 {dimension_numbers = #tpu.dot_dimension_numbers<[1], [0], [0], [1], [0, 0, 1, 1], [], []>} : vector<256x16xf32>, vector<16x16xf32>, vector<256x16xf32> -> vector<256x16xf32>
    %90 = arith.addf %85, %89 : vector<256x16xf32>
    %c0_82 = arith.constant 0 : index
    %c1_83 = arith.constant 1 : index
    %c0_84 = arith.constant 0 : index
    %91 = vector.load %arg20[%c0_82, %c1_83, %c0_84] : memref<18x18x16xf32, #tpu.memory_space<vmem>>, vector<16x16x16xf32>
    %92 = vector.shape_cast %91 : vector<16x16x16xf32> to vector<256x16xf32>
    %c16_85 = arith.constant 16 : index
    %c0_86 = arith.constant 0 : index
    %93 = vector.load %arg9[%c16_85, %c0_86] : memref<144x16xf32, #tpu.memory_space<vmem>>, vector<16x16xf32>
    %cst_87 = arith.constant dense<0.000000e+00> : vector<256x16xf32>
    %94 = tpu.matmul %92, %93, %cst_87 {dimension_numbers = #tpu.dot_dimension_numbers<[1], [0], [0], [1], [0, 0, 1, 1], [], []>} : vector<256x16xf32>, vector<16x16xf32>, vector<256x16xf32> -> vector<256x16xf32>
    %95 = arith.addf %90, %94 : vector<256x16xf32>
    %c0_88 = arith.constant 0 : index
    %c2_89 = arith.constant 2 : index
    %c0_90 = arith.constant 0 : index
    %96 = vector.load %arg20[%c0_88, %c2_89, %c0_90] : memref<18x18x16xf32, #tpu.memory_space<vmem>>, vector<16x16x16xf32>
    %97 = vector.shape_cast %96 : vector<16x16x16xf32> to vector<256x16xf32>
    %c32_91 = arith.constant 32 : index
    %c0_92 = arith.constant 0 : index
    %98 = vector.load %arg9[%c32_91, %c0_92] : memref<144x16xf32, #tpu.memory_space<vmem>>, vector<16x16xf32>
    %cst_93 = arith.constant dense<0.000000e+00> : vector<256x16xf32>
    %99 = tpu.matmul %97, %98, %cst_93 {dimension_numbers = #tpu.dot_dimension_numbers<[1], [0], [0], [1], [0, 0, 1, 1], [], []>} : vector<256x16xf32>, vector<16x16xf32>, vector<256x16xf32> -> vector<256x16xf32>
    %100 = arith.addf %95, %99 : vector<256x16xf32>
    %c1_94 = arith.constant 1 : index
    %c0_95 = arith.constant 0 : index
    %c0_96 = arith.constant 0 : index
    %101 = vector.load %arg20[%c1_94, %c0_95, %c0_96] : memref<18x18x16xf32, #tpu.memory_space<vmem>>, vector<16x16x16xf32>
    %102 = vector.shape_cast %101 : vector<16x16x16xf32> to vector<256x16xf32>
    %c48_97 = arith.constant 48 : index
    %c0_98 = arith.constant 0 : index
    %103 = vector.load %arg9[%c48_97, %c0_98] : memref<144x16xf32, #tpu.memory_space<vmem>>, vector<16x16xf32>
    %cst_99 = arith.constant dense<0.000000e+00> : vector<256x16xf32>
    %104 = tpu.matmul %102, %103, %cst_99 {dimension_numbers = #tpu.dot_dimension_numbers<[1], [0], [0], [1], [0, 0, 1, 1], [], []>} : vector<256x16xf32>, vector<16x16xf32>, vector<256x16xf32> -> vector<256x16xf32>
    %105 = arith.addf %100, %104 : vector<256x16xf32>
    %c1_100 = arith.constant 1 : index
    %c1_101 = arith.constant 1 : index
    %c0_102 = arith.constant 0 : index
    %106 = vector.load %arg20[%c1_100, %c1_101, %c0_102] : memref<18x18x16xf32, #tpu.memory_space<vmem>>, vector<16x16x16xf32>
    %107 = vector.shape_cast %106 : vector<16x16x16xf32> to vector<256x16xf32>
    %c64_103 = arith.constant 64 : index
    %c0_104 = arith.constant 0 : index
    %108 = vector.load %arg9[%c64_103, %c0_104] : memref<144x16xf32, #tpu.memory_space<vmem>>, vector<16x16xf32>
    %cst_105 = arith.constant dense<0.000000e+00> : vector<256x16xf32>
    %109 = tpu.matmul %107, %108, %cst_105 {dimension_numbers = #tpu.dot_dimension_numbers<[1], [0], [0], [1], [0, 0, 1, 1], [], []>} : vector<256x16xf32>, vector<16x16xf32>, vector<256x16xf32> -> vector<256x16xf32>
    %110 = arith.addf %105, %109 : vector<256x16xf32>
    %c1_106 = arith.constant 1 : index
    %c2_107 = arith.constant 2 : index
    %c0_108 = arith.constant 0 : index
    %111 = vector.load %arg20[%c1_106, %c2_107, %c0_108] : memref<18x18x16xf32, #tpu.memory_space<vmem>>, vector<16x16x16xf32>
    %112 = vector.shape_cast %111 : vector<16x16x16xf32> to vector<256x16xf32>
    %c80_109 = arith.constant 80 : index
    %c0_110 = arith.constant 0 : index
    %113 = vector.load %arg9[%c80_109, %c0_110] : memref<144x16xf32, #tpu.memory_space<vmem>>, vector<16x16xf32>
    %cst_111 = arith.constant dense<0.000000e+00> : vector<256x16xf32>
    %114 = tpu.matmul %112, %113, %cst_111 {dimension_numbers = #tpu.dot_dimension_numbers<[1], [0], [0], [1], [0, 0, 1, 1], [], []>} : vector<256x16xf32>, vector<16x16xf32>, vector<256x16xf32> -> vector<256x16xf32>
    %115 = arith.addf %110, %114 : vector<256x16xf32>
    %c2_112 = arith.constant 2 : index
    %c0_113 = arith.constant 0 : index
    %c0_114 = arith.constant 0 : index
    %116 = vector.load %arg20[%c2_112, %c0_113, %c0_114] : memref<18x18x16xf32, #tpu.memory_space<vmem>>, vector<16x16x16xf32>
    %117 = vector.shape_cast %116 : vector<16x16x16xf32> to vector<256x16xf32>
    %c96_115 = arith.constant 96 : index
    %c0_116 = arith.constant 0 : index
    %118 = vector.load %arg9[%c96_115, %c0_116] : memref<144x16xf32, #tpu.memory_space<vmem>>, vector<16x16xf32>
    %cst_117 = arith.constant dense<0.000000e+00> : vector<256x16xf32>
    %119 = tpu.matmul %117, %118, %cst_117 {dimension_numbers = #tpu.dot_dimension_numbers<[1], [0], [0], [1], [0, 0, 1, 1], [], []>} : vector<256x16xf32>, vector<16x16xf32>, vector<256x16xf32> -> vector<256x16xf32>
    %120 = arith.addf %115, %119 : vector<256x16xf32>
    %c2_118 = arith.constant 2 : index
    %c1_119 = arith.constant 1 : index
    %c0_120 = arith.constant 0 : index
    %121 = vector.load %arg20[%c2_118, %c1_119, %c0_120] : memref<18x18x16xf32, #tpu.memory_space<vmem>>, vector<16x16x16xf32>
    %122 = vector.shape_cast %121 : vector<16x16x16xf32> to vector<256x16xf32>
    %c112_121 = arith.constant 112 : index
    %c0_122 = arith.constant 0 : index
    %123 = vector.load %arg9[%c112_121, %c0_122] : memref<144x16xf32, #tpu.memory_space<vmem>>, vector<16x16xf32>
    %cst_123 = arith.constant dense<0.000000e+00> : vector<256x16xf32>
    %124 = tpu.matmul %122, %123, %cst_123 {dimension_numbers = #tpu.dot_dimension_numbers<[1], [0], [0], [1], [0, 0, 1, 1], [], []>} : vector<256x16xf32>, vector<16x16xf32>, vector<256x16xf32> -> vector<256x16xf32>
    %125 = arith.addf %120, %124 : vector<256x16xf32>
    %c2_124 = arith.constant 2 : index
    %c2_125 = arith.constant 2 : index
    %c0_126 = arith.constant 0 : index
    %126 = vector.load %arg20[%c2_124, %c2_125, %c0_126] : memref<18x18x16xf32, #tpu.memory_space<vmem>>, vector<16x16x16xf32>
    %127 = vector.shape_cast %126 : vector<16x16x16xf32> to vector<256x16xf32>
    %c128_127 = arith.constant 128 : index
    %c0_128 = arith.constant 0 : index
    %128 = vector.load %arg9[%c128_127, %c0_128] : memref<144x16xf32, #tpu.memory_space<vmem>>, vector<16x16xf32>
    %cst_129 = arith.constant dense<0.000000e+00> : vector<256x16xf32>
    %129 = tpu.matmul %127, %128, %cst_129 {dimension_numbers = #tpu.dot_dimension_numbers<[1], [0], [0], [1], [0, 0, 1, 1], [], []>} : vector<256x16xf32>, vector<16x16xf32>, vector<256x16xf32> -> vector<256x16xf32>
    %130 = arith.addf %125, %129 : vector<256x16xf32>
    %cst_130 = arith.constant dense<0.000000e+00> : vector<16xf32>
    %131 = vector.multi_reduction <add>, %130, %cst_130 [0] : vector<256x16xf32> to vector<16xf32>
    %132 = vector.shape_cast %131 : vector<16xf32> to vector<1x16xf32>
    %cst_131 = arith.constant 3.906250e-03 : f32
    %133 = vector.broadcast %cst_131 : f32 to vector<1x16xf32>
    %134 = arith.mulf %132, %133 : vector<1x16xf32>
    %135 = vector.broadcast %134 : vector<1x16xf32> to vector<256x16xf32>
    %136 = arith.subf %130, %135 : vector<256x16xf32>
    %137 = arith.mulf %136, %136 : vector<256x16xf32>
    %cst_132 = arith.constant dense<0.000000e+00> : vector<16xf32>
    %138 = vector.multi_reduction <add>, %137, %cst_132 [0] : vector<256x16xf32> to vector<16xf32>
    %139 = vector.shape_cast %138 : vector<16xf32> to vector<1x16xf32>
    %cst_133 = arith.constant 3.906250e-03 : f32
    %140 = vector.broadcast %cst_133 : f32 to vector<1x16xf32>
    %141 = arith.mulf %139, %140 : vector<1x16xf32>
    %cst_134 = arith.constant 9.99999974E-6 : f32
    %142 = vector.broadcast %cst_134 : f32 to vector<1x16xf32>
    %143 = arith.addf %141, %142 : vector<1x16xf32>
    %144 = math.rsqrt %143 : vector<1x16xf32>
    %145 = vector.broadcast %144 : vector<1x16xf32> to vector<256x16xf32>
    %146 = arith.mulf %136, %145 : vector<256x16xf32>
    %c0_135 = arith.constant 0 : index
    %c0_136 = arith.constant 0 : index
    %147 = vector.load %arg13[%c0_135, %c0_136] : memref<1x16xf32, #tpu.memory_space<vmem>>, vector<1x16xf32>
    %148 = vector.broadcast %147 : vector<1x16xf32> to vector<256x16xf32>
    %149 = arith.mulf %146, %148 : vector<256x16xf32>
    %c0_137 = arith.constant 0 : index
    %c0_138 = arith.constant 0 : index
    %150 = vector.load %arg14[%c0_137, %c0_138] : memref<1x16xf32, #tpu.memory_space<vmem>>, vector<1x16xf32>
    %151 = vector.broadcast %150 : vector<1x16xf32> to vector<256x16xf32>
    %152 = arith.addf %149, %151 : vector<256x16xf32>
    %c0_139 = arith.constant 0 : index
    %c0_140 = arith.constant 0 : index
    %c0_141 = arith.constant 0 : index
    %c0_142 = arith.constant 0 : index
    %153 = vector.load %arg7[%c0_139, %c0_140, %c0_141, %c0_142] : memref<1x16x16x16xf32, #tpu.memory_space<vmem>>, vector<1x16x16x16xf32>
    %154 = vector.shape_cast %153 : vector<1x16x16x16xf32> to vector<16x16x16xf32>
    %155 = vector.shape_cast %154 : vector<16x16x16xf32> to vector<256x16xf32>
    %156 = arith.addf %152, %155 : vector<256x16xf32>
    %157 = vector.shape_cast %156 : vector<256x16xf32> to vector<16x16x16xf32>
    %cst_143 = arith.constant 0.000000e+00 : f32
    %158 = vector.broadcast %cst_143 : f32 to vector<18x18x16xf32>
    %c0_144 = arith.constant 0 : index
    %c0_145 = arith.constant 0 : index
    %c0_146 = arith.constant 0 : index
    %159 = vector.load %arg20[%c0_144, %c0_145, %c0_146] : memref<18x18x16xf32, #tpu.memory_space<vmem>>, vector<18x18x16xf32>
    tpu.vector_store %arg20[%c0_144, %c0_145, %c0_146], %158 {strides = array<i32>} : memref<18x18x16xf32, #tpu.memory_space<vmem>>, vector<18x18x16xf32>,
    %c1_147 = arith.constant 1 : index
    %c1_148 = arith.constant 1 : index
    %c0_149 = arith.constant 0 : index
    %160 = vector.load %arg20[%c1_147, %c1_148, %c0_149] : memref<18x18x16xf32, #tpu.memory_space<vmem>>, vector<16x16x16xf32>
    tpu.vector_store %arg20[%c1_147, %c1_148, %c0_149], %157 {strides = array<i32>} : memref<18x18x16xf32, #tpu.memory_space<vmem>>, vector<16x16x16xf32>,
    %cst_150 = arith.constant 0.000000e+00 : f32
    %161 = vector.broadcast %cst_150 : f32 to vector<256x16xf32>
    %c0_151 = arith.constant 0 : index
    %c0_152 = arith.constant 0 : index
    %c0_153 = arith.constant 0 : index
    %162 = vector.load %arg20[%c0_151, %c0_152, %c0_153] : memref<18x18x16xf32, #tpu.memory_space<vmem>>, vector<16x16x16xf32>
    %163 = vector.shape_cast %162 : vector<16x16x16xf32> to vector<256x16xf32>
    %c0_154 = arith.constant 0 : index
    %c0_155 = arith.constant 0 : index
    %164 = vector.load %arg10[%c0_154, %c0_155] : memref<144x16xf32, #tpu.memory_space<vmem>>, vector<16x16xf32>
    %cst_156 = arith.constant dense<0.000000e+00> : vector<256x16xf32>
    %165 = tpu.matmul %163, %164, %cst_156 {dimension_numbers = #tpu.dot_dimension_numbers<[1], [0], [0], [1], [0, 0, 1, 1], [], []>} : vector<256x16xf32>, vector<16x16xf32>, vector<256x16xf32> -> vector<256x16xf32>
    %166 = arith.addf %161, %165 : vector<256x16xf32>
    %c0_157 = arith.constant 0 : index
    %c1_158 = arith.constant 1 : index
    %c0_159 = arith.constant 0 : index
    %167 = vector.load %arg20[%c0_157, %c1_158, %c0_159] : memref<18x18x16xf32, #tpu.memory_space<vmem>>, vector<16x16x16xf32>
    %168 = vector.shape_cast %167 : vector<16x16x16xf32> to vector<256x16xf32>
    %c16_160 = arith.constant 16 : index
    %c0_161 = arith.constant 0 : index
    %169 = vector.load %arg10[%c16_160, %c0_161] : memref<144x16xf32, #tpu.memory_space<vmem>>, vector<16x16xf32>
    %cst_162 = arith.constant dense<0.000000e+00> : vector<256x16xf32>
    %170 = tpu.matmul %168, %169, %cst_162 {dimension_numbers = #tpu.dot_dimension_numbers<[1], [0], [0], [1], [0, 0, 1, 1], [], []>} : vector<256x16xf32>, vector<16x16xf32>, vector<256x16xf32> -> vector<256x16xf32>
    %171 = arith.addf %166, %170 : vector<256x16xf32>
    %c0_163 = arith.constant 0 : index
    %c2_164 = arith.constant 2 : index
    %c0_165 = arith.constant 0 : index
    %172 = vector.load %arg20[%c0_163, %c2_164, %c0_165] : memref<18x18x16xf32, #tpu.memory_space<vmem>>, vector<16x16x16xf32>
    %173 = vector.shape_cast %172 : vector<16x16x16xf32> to vector<256x16xf32>
    %c32_166 = arith.constant 32 : index
    %c0_167 = arith.constant 0 : index
    %174 = vector.load %arg10[%c32_166, %c0_167] : memref<144x16xf32, #tpu.memory_space<vmem>>, vector<16x16xf32>
    %cst_168 = arith.constant dense<0.000000e+00> : vector<256x16xf32>
    %175 = tpu.matmul %173, %174, %cst_168 {dimension_numbers = #tpu.dot_dimension_numbers<[1], [0], [0], [1], [0, 0, 1, 1], [], []>} : vector<256x16xf32>, vector<16x16xf32>, vector<256x16xf32> -> vector<256x16xf32>
    %176 = arith.addf %171, %175 : vector<256x16xf32>
    %c1_169 = arith.constant 1 : index
    %c0_170 = arith.constant 0 : index
    %c0_171 = arith.constant 0 : index
    %177 = vector.load %arg20[%c1_169, %c0_170, %c0_171] : memref<18x18x16xf32, #tpu.memory_space<vmem>>, vector<16x16x16xf32>
    %178 = vector.shape_cast %177 : vector<16x16x16xf32> to vector<256x16xf32>
    %c48_172 = arith.constant 48 : index
    %c0_173 = arith.constant 0 : index
    %179 = vector.load %arg10[%c48_172, %c0_173] : memref<144x16xf32, #tpu.memory_space<vmem>>, vector<16x16xf32>
    %cst_174 = arith.constant dense<0.000000e+00> : vector<256x16xf32>
    %180 = tpu.matmul %178, %179, %cst_174 {dimension_numbers = #tpu.dot_dimension_numbers<[1], [0], [0], [1], [0, 0, 1, 1], [], []>} : vector<256x16xf32>, vector<16x16xf32>, vector<256x16xf32> -> vector<256x16xf32>
    %181 = arith.addf %176, %180 : vector<256x16xf32>
    %c1_175 = arith.constant 1 : index
    %c1_176 = arith.constant 1 : index
    %c0_177 = arith.constant 0 : index
    %182 = vector.load %arg20[%c1_175, %c1_176, %c0_177] : memref<18x18x16xf32, #tpu.memory_space<vmem>>, vector<16x16x16xf32>
    %183 = vector.shape_cast %182 : vector<16x16x16xf32> to vector<256x16xf32>
    %c64_178 = arith.constant 64 : index
    %c0_179 = arith.constant 0 : index
    %184 = vector.load %arg10[%c64_178, %c0_179] : memref<144x16xf32, #tpu.memory_space<vmem>>, vector<16x16xf32>
    %cst_180 = arith.constant dense<0.000000e+00> : vector<256x16xf32>
    %185 = tpu.matmul %183, %184, %cst_180 {dimension_numbers = #tpu.dot_dimension_numbers<[1], [0], [0], [1], [0, 0, 1, 1], [], []>} : vector<256x16xf32>, vector<16x16xf32>, vector<256x16xf32> -> vector<256x16xf32>
    %186 = arith.addf %181, %185 : vector<256x16xf32>
    %c1_181 = arith.constant 1 : index
    %c2_182 = arith.constant 2 : index
    %c0_183 = arith.constant 0 : index
    %187 = vector.load %arg20[%c1_181, %c2_182, %c0_183] : memref<18x18x16xf32, #tpu.memory_space<vmem>>, vector<16x16x16xf32>
    %188 = vector.shape_cast %187 : vector<16x16x16xf32> to vector<256x16xf32>
    %c80_184 = arith.constant 80 : index
    %c0_185 = arith.constant 0 : index
    %189 = vector.load %arg10[%c80_184, %c0_185] : memref<144x16xf32, #tpu.memory_space<vmem>>, vector<16x16xf32>
    %cst_186 = arith.constant dense<0.000000e+00> : vector<256x16xf32>
    %190 = tpu.matmul %188, %189, %cst_186 {dimension_numbers = #tpu.dot_dimension_numbers<[1], [0], [0], [1], [0, 0, 1, 1], [], []>} : vector<256x16xf32>, vector<16x16xf32>, vector<256x16xf32> -> vector<256x16xf32>
    %191 = arith.addf %186, %190 : vector<256x16xf32>
    %c2_187 = arith.constant 2 : index
    %c0_188 = arith.constant 0 : index
    %c0_189 = arith.constant 0 : index
    %192 = vector.load %arg20[%c2_187, %c0_188, %c0_189] : memref<18x18x16xf32, #tpu.memory_space<vmem>>, vector<16x16x16xf32>
    %193 = vector.shape_cast %192 : vector<16x16x16xf32> to vector<256x16xf32>
    %c96_190 = arith.constant 96 : index
    %c0_191 = arith.constant 0 : index
    %194 = vector.load %arg10[%c96_190, %c0_191] : memref<144x16xf32, #tpu.memory_space<vmem>>, vector<16x16xf32>
    %cst_192 = arith.constant dense<0.000000e+00> : vector<256x16xf32>
    %195 = tpu.matmul %193, %194, %cst_192 {dimension_numbers = #tpu.dot_dimension_numbers<[1], [0], [0], [1], [0, 0, 1, 1], [], []>} : vector<256x16xf32>, vector<16x16xf32>, vector<256x16xf32> -> vector<256x16xf32>
    %196 = arith.addf %191, %195 : vector<256x16xf32>
    %c2_193 = arith.constant 2 : index
    %c1_194 = arith.constant 1 : index
    %c0_195 = arith.constant 0 : index
    %197 = vector.load %arg20[%c2_193, %c1_194, %c0_195] : memref<18x18x16xf32, #tpu.memory_space<vmem>>, vector<16x16x16xf32>
    %198 = vector.shape_cast %197 : vector<16x16x16xf32> to vector<256x16xf32>
    %c112_196 = arith.constant 112 : index
    %c0_197 = arith.constant 0 : index
    %199 = vector.load %arg10[%c112_196, %c0_197] : memref<144x16xf32, #tpu.memory_space<vmem>>, vector<16x16xf32>
    %cst_198 = arith.constant dense<0.000000e+00> : vector<256x16xf32>
    %200 = tpu.matmul %198, %199, %cst_198 {dimension_numbers = #tpu.dot_dimension_numbers<[1], [0], [0], [1], [0, 0, 1, 1], [], []>} : vector<256x16xf32>, vector<16x16xf32>, vector<256x16xf32> -> vector<256x16xf32>
    %201 = arith.addf %196, %200 : vector<256x16xf32>
    %c2_199 = arith.constant 2 : index
    %c2_200 = arith.constant 2 : index
    %c0_201 = arith.constant 0 : index
    %202 = vector.load %arg20[%c2_199, %c2_200, %c0_201] : memref<18x18x16xf32, #tpu.memory_space<vmem>>, vector<16x16x16xf32>
    %203 = vector.shape_cast %202 : vector<16x16x16xf32> to vector<256x16xf32>
    %c128_202 = arith.constant 128 : index
    %c0_203 = arith.constant 0 : index
    %204 = vector.load %arg10[%c128_202, %c0_203] : memref<144x16xf32, #tpu.memory_space<vmem>>, vector<16x16xf32>
    %cst_204 = arith.constant dense<0.000000e+00> : vector<256x16xf32>
    %205 = tpu.matmul %203, %204, %cst_204 {dimension_numbers = #tpu.dot_dimension_numbers<[1], [0], [0], [1], [0, 0, 1, 1], [], []>} : vector<256x16xf32>, vector<16x16xf32>, vector<256x16xf32> -> vector<256x16xf32>
    %206 = arith.addf %201, %205 : vector<256x16xf32>
    %cst_205 = arith.constant dense<0.000000e+00> : vector<16xf32>
    %207 = vector.multi_reduction <add>, %206, %cst_205 [0] : vector<256x16xf32> to vector<16xf32>
    %208 = vector.shape_cast %207 : vector<16xf32> to vector<1x16xf32>
    %cst_206 = arith.constant 3.906250e-03 : f32
    %209 = vector.broadcast %cst_206 : f32 to vector<1x16xf32>
    %210 = arith.mulf %208, %209 : vector<1x16xf32>
    %c0_207 = arith.constant 0 : index
    %c0_208 = arith.constant 0 : index
    %211 = vector.load %arg15[%c0_207, %c0_208] : memref<2x16xf32, #tpu.memory_space<vmem>>, vector<2x16xf32>
    %c0_209 = arith.constant 0 : index
    %c0_210 = arith.constant 0 : index
    %212 = vector.load %arg16[%c0_209, %c0_210] : memref<2x16xf32, #tpu.memory_space<vmem>>, vector<2x16xf32>
    %c0_211 = arith.constant 0 : index
    %c0_212 = arith.constant 0 : index
    %213 = vector.load %arg17[%c0_211, %c0_212] : memref<1x16xf32, #tpu.memory_space<vmem>>, vector<1x16xf32>
    %214 = vector.extract_strided_slice %211 {offsets = [0, 0], sizes = [1, 16], strides = [1, 1]} : vector<2x16xf32> to vector<1x16xf32>
    %215 = arith.mulf %210, %214 : vector<1x16xf32>
    %cst_213 = arith.constant dense<0.000000e+00> : vector<1xf32>
    %216 = vector.multi_reduction <add>, %215, %cst_213 [1] : vector<1x16xf32> to vector<1xf32>
    %217 = vector.shape_cast %216 : vector<1xf32> to vector<1x1xf32>
    %c0_214 = arith.constant 0 : index
    %218 = memref.load %arg3[%c0_214] : memref<2xf32, #tpu.memory_space<smem>>
    %219 = vector.broadcast %218 : f32 to vector<1x1xf32>
    %220 = arith.addf %217, %219 : vector<1x1xf32>
    %cst_215 = arith.constant 0.000000e+00 : f32
    %221 = vector.broadcast %cst_215 : f32 to vector<1x1xf32>
    %222 = arith.maximumf %220, %221 : vector<1x1xf32>
    %223 = vector.extract_strided_slice %212 {offsets = [0, 0], sizes = [1, 16], strides = [1, 1]} : vector<2x16xf32> to vector<1x16xf32>
    %224 = vector.broadcast %222 : vector<1x1xf32> to vector<1x16xf32>
    %225 = arith.mulf %224, %223 : vector<1x16xf32>
    %226 = arith.addf %213, %225 : vector<1x16xf32>
    %227 = vector.extract_strided_slice %211 {offsets = [1, 0], sizes = [1, 16], strides = [1, 1]} : vector<2x16xf32> to vector<1x16xf32>
    %228 = arith.mulf %210, %227 : vector<1x16xf32>
    %cst_216 = arith.constant dense<0.000000e+00> : vector<1xf32>
    %229 = vector.multi_reduction <add>, %228, %cst_216 [1] : vector<1x16xf32> to vector<1xf32>
    %230 = vector.shape_cast %229 : vector<1xf32> to vector<1x1xf32>
    %c1_217 = arith.constant 1 : index
    %231 = memref.load %arg3[%c1_217] : memref<2xf32, #tpu.memory_space<smem>>
    %232 = vector.broadcast %231 : f32 to vector<1x1xf32>
    %233 = arith.addf %230, %232 : vector<1x1xf32>
    %cst_218 = arith.constant 0.000000e+00 : f32
    %234 = vector.broadcast %cst_218 : f32 to vector<1x1xf32>
    %235 = arith.maximumf %233, %234 : vector<1x1xf32>
    %236 = vector.extract_strided_slice %212 {offsets = [1, 0], sizes = [1, 16], strides = [1, 1]} : vector<2x16xf32> to vector<1x16xf32>
    %237 = vector.broadcast %235 : vector<1x1xf32> to vector<1x16xf32>
    %238 = arith.mulf %237, %236 : vector<1x16xf32>
    %239 = arith.addf %226, %238 : vector<1x16xf32>
    %240 = arith.negf %239 : vector<1x16xf32>
    %241 = math.exp %240 : vector<1x16xf32>
    %cst_219 = arith.constant 1.000000e+00 : f32
    %242 = vector.broadcast %cst_219 : f32 to vector<1x16xf32>
    %243 = arith.addf %242, %241 : vector<1x16xf32>
    %244 = arith.divf %242, %243 : vector<1x16xf32>
    %245 = vector.broadcast %244 : vector<1x16xf32> to vector<256x16xf32>
    %246 = arith.mulf %206, %245 : vector<256x16xf32>
    %c0_220 = arith.constant 0 : index
    %c0_221 = arith.constant 0 : index
    %247 = vector.load %arg18[%c0_220, %c0_221] : memref<2x16xf32, #tpu.memory_space<vmem>>, vector<2x16xf32>
    %cst_222 = arith.constant 0.000000e+00 : f32
    %248 = vector.broadcast %cst_222 : f32 to vector<256x1xf32>
    %c0_223 = arith.constant 0 : index
    %249 = memref.load %arg6[%c0_223] : memref<1xf32, #tpu.memory_space<smem>>
    %250 = vector.broadcast %249 : f32 to vector<256x1xf32>
    %251 = arith.addf %248, %250 : vector<256x1xf32>
    %252 = vector.extract_strided_slice %247 {offsets = [0, 0], sizes = [1, 16], strides = [1, 1]} : vector<2x16xf32> to vector<1x16xf32>
    %253 = vector.broadcast %252 : vector<1x16xf32> to vector<256x16xf32>
    %254 = arith.mulf %246, %253 : vector<256x16xf32>
    %cst_224 = arith.constant dense<0.000000e+00> : vector<256xf32>
    %255 = vector.multi_reduction <add>, %254, %cst_224 [1] : vector<256x16xf32> to vector<256xf32>
    %256 = vector.shape_cast %255 : vector<256xf32> to vector<256x1xf32>
    %c0_225 = arith.constant 0 : index
    %257 = memref.load %arg4[%c0_225] : memref<2xf32, #tpu.memory_space<smem>>
    %258 = vector.broadcast %257 : f32 to vector<256x1xf32>
    %259 = arith.addf %256, %258 : vector<256x1xf32>
    %cst_226 = arith.constant 0.000000e+00 : f32
    %260 = vector.broadcast %cst_226 : f32 to vector<256x1xf32>
    %261 = arith.maximumf %259, %260 : vector<256x1xf32>
    %c0_227 = arith.constant 0 : index
    %262 = memref.load %arg5[%c0_227] : memref<2xf32, #tpu.memory_space<smem>>
    %263 = vector.broadcast %262 : f32 to vector<256x1xf32>
    %264 = arith.mulf %261, %263 : vector<256x1xf32>
    %265 = arith.addf %251, %264 : vector<256x1xf32>
    %266 = vector.extract_strided_slice %247 {offsets = [1, 0], sizes = [1, 16], strides = [1, 1]} : vector<2x16xf32> to vector<1x16xf32>
    %267 = vector.broadcast %266 : vector<1x16xf32> to vector<256x16xf32>
    %268 = arith.mulf %246, %267 : vector<256x16xf32>
    %cst_228 = arith.constant dense<0.000000e+00> : vector<256xf32>
    %269 = vector.multi_reduction <add>, %268, %cst_228 [1] : vector<256x16xf32> to vector<256xf32>
    %270 = vector.shape_cast %269 : vector<256xf32> to vector<256x1xf32>
    %c1_229 = arith.constant 1 : index
    %271 = memref.load %arg4[%c1_229] : memref<2xf32, #tpu.memory_space<smem>>
    %272 = vector.broadcast %271 : f32 to vector<256x1xf32>
    %273 = arith.addf %270, %272 : vector<256x1xf32>
    %cst_230 = arith.constant 0.000000e+00 : f32
    %274 = vector.broadcast %cst_230 : f32 to vector<256x1xf32>
    %275 = arith.maximumf %273, %274 : vector<256x1xf32>
    %c1_231 = arith.constant 1 : index
    %276 = memref.load %arg5[%c1_231] : memref<2xf32, #tpu.memory_space<smem>>
    %277 = vector.broadcast %276 : f32 to vector<256x1xf32>
    %278 = arith.mulf %275, %277 : vector<256x1xf32>
    %279 = arith.addf %265, %278 : vector<256x1xf32>
    %280 = arith.negf %279 : vector<256x1xf32>
    %281 = math.exp %280 : vector<256x1xf32>
    %cst_232 = arith.constant 1.000000e+00 : f32
    %282 = vector.broadcast %cst_232 : f32 to vector<256x1xf32>
    %283 = arith.addf %282, %281 : vector<256x1xf32>
    %284 = arith.divf %282, %283 : vector<256x1xf32>
    %285 = vector.broadcast %284 : vector<256x1xf32> to vector<256x16xf32>
    %286 = arith.mulf %246, %285 : vector<256x16xf32>
    %c0_233 = arith.constant 0 : index
    %c0_234 = arith.constant 0 : index
    %c0_235 = arith.constant 0 : index
    %c0_236 = arith.constant 0 : index
    %287 = vector.load %arg7[%c0_233, %c0_234, %c0_235, %c0_236] : memref<1x16x16x16xf32, #tpu.memory_space<vmem>>, vector<1x16x16x16xf32>
    %288 = vector.shape_cast %287 : vector<1x16x16x16xf32> to vector<16x16x16xf32>
    %289 = vector.shape_cast %288 : vector<16x16x16xf32> to vector<256x16xf32>
    %290 = arith.addf %289, %286 : vector<256x16xf32>
    %cst_237 = arith.constant 0.000000e+00 : f32
    %291 = vector.broadcast %cst_237 : f32 to vector<256x16xf32>
    %292 = arith.maximumf %290, %291 : vector<256x16xf32>
    %293 = vector.shape_cast %292 : vector<256x16xf32> to vector<16x16x16xf32>
    %c0_238 = arith.constant 0 : index
    %c0_239 = arith.constant 0 : index
    %c0_240 = arith.constant 0 : index
    %c0_241 = arith.constant 0 : index
    %294 = vector.load %arg19[%c0_238, %c0_239, %c0_240, %c0_241] : memref<1x16x16x16xf32, #tpu.memory_space<vmem>>, vector<1x16x16x16xf32>
    %295 = vector.shape_cast %294 : vector<1x16x16x16xf32> to vector<16x16x16xf32>
    %296 = vector.shape_cast %293 : vector<16x16x16xf32> to vector<1x16x16x16xf32>
    tpu.vector_store %arg19[%c0_238, %c0_239, %c0_240, %c0_241], %296 {strides = array<i32>} : memref<1x16x16x16xf32, #tpu.memory_space<vmem>>, vector<1x16x16x16xf32>,
    return
  }
  func.func @transform_0(%arg0: i32) -> (i32, i32) {
    %c0_i32 = arith.constant 0 : i32
    %c0_i32_0 = arith.constant 0 : i32
    %c0_i32_1 = arith.constant 0 : i32
    return %c0_i32, %c0_i32_0 : i32, i32
  }
  func.func @transform_1(%arg0: i32) -> (i32, i32) {
    %c0_i32 = arith.constant 0 : i32
    %c0_i32_0 = arith.constant 0 : i32
    %c0_i32_1 = arith.constant 0 : i32
    return %c0_i32, %c0_i32_0 : i32, i32
  }
  func.func @transform_2(%arg0: i32) -> i32 {
    %c0_i32 = arith.constant 0 : i32
    %c0_i32_0 = arith.constant 0 : i32
    return %c0_i32 : i32
  }
  func.func @transform_3(%arg0: i32) -> i32 {
    %c0_i32 = arith.constant 0 : i32
    %c0_i32_0 = arith.constant 0 : i32
    return %c0_i32 : i32
  }
  func.func @transform_4(%arg0: i32) -> i32 {
    %c0_i32 = arith.constant 0 : i32
    %c0_i32_0 = arith.constant 0 : i32
    return %c0_i32 : i32
  }
  func.func @transform_5(%arg0: i32) -> i32 {
    %c0_i32 = arith.constant 0 : i32
    %c0_i32_0 = arith.constant 0 : i32
    return %c0_i32 : i32
  }
  func.func @transform_6(%arg0: i32) -> (i32, i32, i32, i32) {
    %c0_i32 = arith.constant 0 : i32
    %c0_i32_0 = arith.constant 0 : i32
    %c0_i32_1 = arith.constant 0 : i32
    %c0_i32_2 = arith.constant 0 : i32
    return %arg0, %c0_i32, %c0_i32_0, %c0_i32_1 : i32, i32, i32, i32
  }
  func.func @transform_7(%arg0: i32) -> (i32, i32) {
    %c0_i32 = arith.constant 0 : i32
    %c0_i32_0 = arith.constant 0 : i32
    %c0_i32_1 = arith.constant 0 : i32
    return %c0_i32, %c0_i32_0 : i32, i32
  }
  func.func @transform_8(%arg0: i32) -> (i32, i32) {
    %c0_i32 = arith.constant 0 : i32
    %c0_i32_0 = arith.constant 0 : i32
    %c0_i32_1 = arith.constant 0 : i32
    return %c0_i32, %c0_i32_0 : i32, i32
  }
  func.func @transform_9(%arg0: i32) -> (i32, i32) {
    %c0_i32 = arith.constant 0 : i32
    %c0_i32_0 = arith.constant 0 : i32
    %c0_i32_1 = arith.constant 0 : i32
    return %c0_i32, %c0_i32_0 : i32, i32
  }
  func.func @transform_10(%arg0: i32) -> (i32, i32) {
    %c0_i32 = arith.constant 0 : i32
    %c0_i32_0 = arith.constant 0 : i32
    %c0_i32_1 = arith.constant 0 : i32
    return %c0_i32, %c0_i32_0 : i32, i32
  }
  func.func @transform_11(%arg0: i32) -> (i32, i32) {
    %c0_i32 = arith.constant 0 : i32
    %c0_i32_0 = arith.constant 0 : i32
    %c0_i32_1 = arith.constant 0 : i32
    return %c0_i32, %c0_i32_0 : i32, i32
  }
  func.func @transform_12(%arg0: i32) -> (i32, i32) {
    %c0_i32 = arith.constant 0 : i32
    %c0_i32_0 = arith.constant 0 : i32
    %c0_i32_1 = arith.constant 0 : i32
    return %c0_i32, %c0_i32_0 : i32, i32
  }
  func.func @transform_13(%arg0: i32) -> (i32, i32) {
    %c0_i32 = arith.constant 0 : i32
    %c0_i32_0 = arith.constant 0 : i32
    %c0_i32_1 = arith.constant 0 : i32
    return %c0_i32, %c0_i32_0 : i32, i32
  }
  func.func @transform_14(%arg0: i32) -> (i32, i32) {
    %c0_i32 = arith.constant 0 : i32
    %c0_i32_0 = arith.constant 0 : i32
    %c0_i32_1 = arith.constant 0 : i32
    return %c0_i32, %c0_i32_0 : i32, i32
  }
  func.func @transform_15(%arg0: i32) -> (i32, i32) {
    %c0_i32 = arith.constant 0 : i32
    %c0_i32_0 = arith.constant 0 : i32
    %c0_i32_1 = arith.constant 0 : i32
    return %c0_i32, %c0_i32_0 : i32, i32
  }
  func.func @transform_16(%arg0: i32) -> (i32, i32) {
    %c0_i32 = arith.constant 0 : i32
    %c0_i32_0 = arith.constant 0 : i32
    %c0_i32_1 = arith.constant 0 : i32
    return %c0_i32, %c0_i32_0 : i32, i32
  }
  func.func @transform_17(%arg0: i32) -> (i32, i32) {
    %c0_i32 = arith.constant 0 : i32
    %c0_i32_0 = arith.constant 0 : i32
    %c0_i32_1 = arith.constant 0 : i32
    return %c0_i32, %c0_i32_0 : i32, i32
  }
  func.func @transform_18(%arg0: i32) -> (i32, i32, i32, i32) {
    %c0_i32 = arith.constant 0 : i32
    %c0_i32_0 = arith.constant 0 : i32
    %c0_i32_1 = arith.constant 0 : i32
    %c0_i32_2 = arith.constant 0 : i32
    return %arg0, %c0_i32, %c0_i32_0, %c0_i32_1 : i32, i32, i32, i32
  }
}

</mosaic_0001>

<bundles_post_ra>
// kernel: tpu_custom_call.1
= control target key start
LH: loop header
LB: loop body
LE: loop exit
PB: predicated region body
PF: predicated region fallthrough
CT: control target
= control target key end

     0   :  { %s22756_s0 = inlined_call_operand.<no memory space> [shape: f32[1,1], index: 0, kind: input, shape index: {}]   ;;  %s22757_s1 = inlined_call_operand.<no memory space> [shape: f32[1,1], index: 1, kind: input, shape index: {}]   ;;  %s22758_s2 = inlined_call_operand.vmem [shape: f32[2], index: 2, kind: input, shape index: {}]   ;;  %s22759_s3 = inlined_call_operand.vmem [shape: f32[2], index: 3, kind: input, shape index: {}]   ;;  %s22760_s4 = inlined_call_operand.vmem [shape: f32[2], index: 4, kind: input, shape index: {}]   ;;  %s22761_s5 = inlined_call_operand.<no memory space> [shape: f32[1], index: 5, kind: input, shape index: {}]   ;;  %s22762_s6 = inlined_call_operand.vmem [shape: f32[2,16,16,16], index: 6, kind: input, shape index: {}]   ;;  %s22763_s7 = inlined_call_operand.vmem [shape: f32[144,16], index: 7, kind: input, shape index: {}]   ;;  %s22764_s8 = inlined_call_operand.vmem [shape: f32[144,16], index: 8, kind: input, shape index: {}]   ;;  %s22765_s9 = inlined_call_operand.vmem [shape: f32[144,16], index: 9, kind: input, shape index: {}]   ;;  %s22766_s10 = inlined_call_operand.vmem [shape: f32[1,16], index: 10, kind: input, shape index: {}]   ;;  %s22767_s11 = inlined_call_operand.vmem [shape: f32[1,16], index: 11, kind: input, shape index: {}]   ;;  %s22768_s12 = inlined_call_operand.vmem [shape: f32[1,16], index: 12, kind: input, shape index: {}]   ;;  %s22769_s13 = inlined_call_operand.vmem [shape: f32[1,16], index: 13, kind: input, shape index: {}]   ;;  %s22770_s14 = inlined_call_operand.vmem [shape: f32[2,16], index: 14, kind: input, shape index: {}]   ;;  %s22771_s15 = inlined_call_operand.vmem [shape: f32[2,16], index: 15, kind: input, shape index: {}]   ;;  %s22772_s16 = inlined_call_operand.vmem [shape: f32[1,16], index: 16, kind: input, shape index: {}]   ;;  %s22773_s17 = inlined_call_operand.vmem [shape: f32[2,16], index: 17, kind: input, shape index: {}]   ;;  %s22774_s18 = inlined_call_operand.hbm [shape: f32[2,16,16,16], index: 18, kind: output, shape index: {}]  }
   0x1   :  { %22984 = sst [smem:[#allocation74_spill]] %s22756_s0 }
   0x2   :  { %22985 = sst [smem:[#allocation75_spill]] %s22757_s1  ;;  %s22988_s29 = sld [smem:[#allocation74_spill]] }
   0x3   :  { %22986 = sst [smem:[#allocation76_spill]] %s22758_s2 }
   0x4   :  { %22987 = sst [smem:[#allocation77_spill]] %s22769_s13  ;;  %s22989_s13 = sld [smem:[#allocation75_spill]] }
   0x5   :  { %25 = sst [smem:[#allocation5]] %s22761_s5 }
   0x8   :  { %23 = sst [smem:[#allocation3]] %s22988_s29 }
   0xa   :  { %24 = sst [smem:[#allocation4]] %s22989_s13 }
   0xb   :  { %26 = vsyncpa [#allocation8], 0 }
   0xc   :  { %27 = vsyncpa [#allocation10], 0 }
   0xd   :  { %28 = vsyncpa [#allocation7], 0 }
   0xe   :  { %30 = vsyncpa [#allocation7 + $0x1], 0  ;;  %s17672_s20 = smov 0   ;;  %s17674_s21 = smov 0  }
   0xf   :  { %s17676_s22 = smov 0   ;;  %s17678_s2 = smov 0  }
  0x10 LB: > { %22990 = sst [smem:[#allocation16_spill]] %s17554_s22  ;;  %s17693_s5 = sadd.s32 4294967295, %s17558_s2   ;;  %s17558_s2 = sphi %s17678_s2, %s23397_s2   ;;  %s17554_s22 = sphi %s17676_s22, %s23399_s22   ;;  %s17550_s21 = sphi %s17674_s21, %s23401_s21   ;;  %s17546_s20 = sphi %s17672_s20, %s23400_s20  }
  0x11   : > { %s13109_s13 = sadd.s32 4294967294, %s17558_s2   ;;  %s17697_s23 = sadd.s32 1, %s17558_s2  }
  0x12   : > { %22991 = sst [smem:[#allocation17_spill]] %s17697_s23  ;;  %s426_s24 = sadd.s32 1, %s17554_s22 }
  0x13   : > { %s423_s25 = ssub.s32 %s17558_s2, %s17697_s23  ;;  %p436_p0 = scmp.ne.s32.totalorder %s17554_s22, %s17550_s21 }
  0x14   : > { %p424_p1 = scmp.eq.s32.totalorder %s423_s25, 0  ;;  %p437_p2 = scmp.eq.s32.totalorder %s17693_s5, 1 }
  0x15   : > { %p442_p3 = scmp.ne.s32.totalorder %s17550_s21, %s17546_s20  ;;  %p443_p4 = scmp.eq.s32.totalorder %s13109_s13, 1 }
  0x16   : > { %s17708_s26 = scalar_select %p424_p1, %s17554_s22, %s426_s24  }
  0x17   : > { %p17710_p5 = por %p437_p2, %p436_p0  ;;  %p17714_p6 = por %p443_p4, %p442_p3 }
  0x18   : > { %22992 = sst [smem:[#allocation18_spill]] %s17708_s26  ;;  %p13110_p7 = scmp.ge.s32.totalorder %s17558_s2, 1 }
  0x19   : > { %s22993_s27 = scalar_select %p17710_p5, 1, 0 }
  0x1a   : > { %s22994_s28 = scalar_select %p17714_p6, 1, 0 }
  0x1b   : > { %p450_p8 = scmp.lt.s32.totalorder %s17558_s2, 3  ;;  %p22778_p9 = scmp.eq.s32.totalorder %s17693_s5, 0 }
  0x1c   : > { %s480_s19 = sshll.u32 %s22759_s3, 4  ;;  %s22996_s24 = sld [smem:[#allocation76_spill]]  ;;  %s481_s19 = int_to_ptr.vmem [resolvable:$true] %s480_s19 }
  0x1d   : > { %p17721_p10 = pnand %p13110_p7, %p450_p8  ;;  %s491_s30 = sshll.u32 %s22760_s4, 4  ;;  %s17742_s30 = int_to_ptr.vmem [resolvable:$true] %s491_s30 }
  0x1e   : > { %s17443_s0 = scalar_lea.vmem %s481_s19, 16  ;;  %p17451_p3 = scmp.lt.s32.totalorder %s481_s19, %s481_s19 }
  0x1f   : > { %s22995_s29 = scalar_select %p17721_p10, 1, 0 }
  0x20   : > { %p17247_p11 = pneg %p17721_p10  ;;  %p17444_p13 = scmp.ne.s32.totalorder %s481_s19, %s17443_s0 }
  0x21   : > { %p17452_p4 = scmp.lt.s32.totalorder %s17443_s0, %s17443_s0 }
  0x22   : > { %s469_s25 = sshll.u32 %s22996_s24, 4  ;;  %p17735_p12 = pnand %p22778_p9, %p17247_p11  ;;  %s470_s25 = int_to_ptr.vmem [resolvable:$true] %s469_s25 }
  0x23   : > { %p17453_p7 = por %p17452_p4, %p17451_p3 }
  0x24   : > { %p17445_p0 = pneg %p17735_p12 }
  0x26   : > { %p17446_p1 = pnand %p17445_p0, %p17444_p13 }
  0x28   : > { %p17447_p2 = pneg %p17446_p1 }
  0x2a   : > { %p17454_p8 = pnand %p17453_p7, %p17447_p2 }
  0x2c   : > { %17457 = shalt.err (!%p17454_p8)
}
  0x2d   : > { %s17560_s1 = smov [#allocation9]   ;;  %s17458_s22 = scalar_lea.vmem %s470_s25, 16 }
  0x2e   : > { %17253 = dma.vmem_to_smem (!%p17735_p12), %s481_s19, 16, %s17560_s1, [#allocation10]  }
  0x2f   : > { %p17459_p11 = scmp.ne.s32.totalorder %s470_s25, %s17458_s22  ;;  %p17466_p5 = scmp.lt.s32.totalorder %s470_s25, %s470_s25 }
  0x30   : > { %p17467_p10 = scmp.lt.s32.totalorder %s17458_s22, %s17458_s22 }
  0x31   : > { %p17461_p9 = pnand %p17459_p11, %p17445_p0 }
  0x32   : > { %p17468_p13 = por %p17467_p10, %p17466_p5 }
  0x33   : > { %p17462_p6 = pneg %p17461_p9 }
  0x35   : > { %p17469_p1 = pnand %p17468_p13, %p17462_p6 }
  0x37   : > { %17472 = shalt.err (!%p17469_p1)
}
  0x38   : > { %s17561_s23 = smov [#allocation6]   ;;  %s17473_s19 = scalar_lea.vmem %s17742_s30, 16 }
  0x39   : > { %17250 = dma.vmem_to_smem (!%p17735_p12), %s470_s25, 16, %s17561_s23, [#allocation8]  }
  0x3a   : > { %p17474_p2 = scmp.ne.s32.totalorder %s17742_s30, %s17473_s19  ;;  %p17481_p9 = scmp.lt.s32.totalorder %s17742_s30, %s17742_s30 }
  0x3b   : > { %p17482_p7 = scmp.lt.s32.totalorder %s17473_s19, %s17473_s19 }
  0x3c   : > { %p17476_p3 = pnand %p17474_p2, %p17445_p0 }
  0x3d   : > { %p17483_p5 = por %p17482_p7, %p17481_p9 }
  0x3e   : > { %p17477_p4 = pneg %p17476_p3 }
  0x40   : > { %p17484_p6 = pnand %p17483_p5, %p17477_p4 }
  0x42   : > { %17487 = shalt.err (!%p17484_p6)
}
  0x43   : > { %s17562_s13 = smov [#allocation11]   ;;  %p22998_p10 = scmp.ne.s32.totalorder %s22995_s29, 0 }
  0x44   : > { %17256 = dma.vmem_to_smem (!%p17735_p12), %s17742_s30, 16, %s17562_s13, [#allocation10]  }
  0x45   : > { %548 = sbr.rel (%p22998_p10) target bundleno = 3049 (0xbe9), region = 92 }
  0x4c   : > { %p22999_p8 = scmp.eq.s32.totalorder %s17693_s5, 0 }
  0x4e   : > { %17533 = dma.done.wait (%p22999_p8), [#allocation8], 16   ;;  %p23000_p0 = pmov %p22999_p8 }
  0x50   : > { %17535 = vsyncadd (%p23000_p0), [#allocation8], 4294967280  ;;  %p23001_p11 = pmov %p23000_p0 }
  0x51   : > { %p23002_p13 = pmov %p23000_p0 }
  0x52   : > { %17537 = dma.done.wait (%p23001_p11), [#allocation10], 32  }
  0x53   : > { %17539 = vsyncadd (%p23002_p13), [#allocation10], 4294967264 }
  0x54   : > { %562 = sfence }
  0x55   : > { %v837_v0 = vld [vmem:[%s22763_s7 + $0x10] sm:$0xff]  ;;  %v838_v1 = vld [vmem:[%s22763_s7 + $0x18] sm:$0xff]  ;;  %vm682_vm0 = vcmask 130048   ;;  %v17785_v2 = vld [vmem:[%s22763_s7 + $0x40] sm:$0xff]  ;;  %vm685_vm1 = vcmask 123904   ;;  %v22781_v4 = vmov 0.0  }
  0x56   : > { %v17787_v3 = vpack.c.bf16 %v838_v1, %v837_v0  ;;  %683 = vst.msk [vmem:[#allocation2] sm:$0xff] %vm682_vm0, %v22781_v4  ;;  %684 = vst.msk [vmem:[#allocation2 + $0x8] sm:$0xff] %vm682_vm0, %v22781_v4  ;;  %v2288_v5 = vld [vmem:[%s22763_s7 + $0x48] sm:$0xff]  ;;  %p611_p12 = scmp.lt.s32.totalorder %s17693_s5, 1  ;;  %s648_s23 = sld [smem:[#allocation3]]  ;;  %v803_v6 = vld [vmem:[%s22763_s7] sm:$0xff] }
  0x57   : > { %687 = vst.msk [vmem:[#allocation2 + $0x18] sm:$0xff] %vm682_vm0, %v22781_v4  ;;  %688 = vst.msk [vmem:[#allocation2 + $0x20] sm:$0xff] %vm682_vm0, %v22781_v4  ;;  %v804_v7 = vld [vmem:[%s22763_s7 + $0x8] sm:$0xff]  ;;  %v17908_v8 = vpack.c.bf16 %v2288_v5, %v17785_v2  ;;  %v2674_v10 = vld [vmem:[%s22763_s7 + $0x50] sm:$0xff]  ;;  %s4539_s25 = sld [smem:[#allocation4]]  ;;  %vm12047_vm2 = vcmask 123905  }
  0x58   : > { %690 = vst.msk [vmem:[#allocation2 + $0x30] sm:$0xff] %vm682_vm0, %v22781_v4  ;;  %691 = vst.msk [vmem:[#allocation2 + $0x38] sm:$0xff] %vm682_vm0, %v22781_v4  ;;  %v16359_v9 = vpack.c.bf16 %v804_v7, %v803_v6  ;;  %v2675_v11 = vld [vmem:[%s22763_s7 + $0x58] sm:$0xff]  ;;  %16356 = vmatprep.subr.bf16.mxu1 %v17787_v3  ;;  %s612_s1 = scalar_select %p611_p12, %s17693_s5, 1  ;;  %v1513_v13 = vld [vmem:[%s22763_s7 + $0x20] sm:$0xff]  ;;  %vm12037_vm3 = vcmask 122880  }
  0x59   : > { %693 = vst.msk [vmem:[#allocation2 + $0x48] sm:$0xff] %vm682_vm0, %v22781_v4  ;;  %694 = vst.msk [vmem:[#allocation2 + $0x50] sm:$0xff] %vm682_vm0, %v22781_v4  ;;  %v17918_v12 = vpack.c.bf16 %v2675_v11, %v2674_v10  ;;  %16358 = vmatpush3.bf16.msra.mxu1 %v17787_v3  ;;  %16372 = vmatprep.subr.bf16.mxu0 %v17908_v8  ;;  %v1514_v14 = vld [vmem:[%s22763_s7 + $0x28] sm:$0xff]  ;;  %v3062_v48 = vld [vmem:[%s22763_s7 + $0x60] sm:$0xff]  ;;  %s12041_s0 = sld [smem:[#allocation6]]  ;;  %s14032_s24 = sshll.u32 %s17693_s5, 12 }
  0x5a   : > { %696 = vst.msk [vmem:[#allocation2 + $0x60] sm:$0xff] %vm682_vm0, %v22781_v4  ;;  %697 = vst.msk [vmem:[#allocation2 + $0x68] sm:$0xff] %vm682_vm0, %v22781_v4  ;;  %16374 = vmatpush3.bf16.msra.mxu0 %v17908_v8  ;;  %s14031_s22 = sshll.u32 %s612_s1, 8  ;;  %16360 = vmatprep.subr.bf16.mxu1 %v16359_v9  ;;  %v17944_v25 = vpack.c.bf16 %v1514_v14, %v1513_v13  ;;  %v3063_v49 = vld [vmem:[%s22763_s7 + $0x68] sm:$0xff]  ;;  %s12320_s29 = sld [smem:[#allocation11]] }
  0x5b   : > { %699 = vst.msk [vmem:[#allocation2 + $0x78] sm:$0xff] %vm682_vm0, %v22781_v4  ;;  %700 = vst.msk [vmem:[#allocation2 + $0x80] sm:$0xff] %vm682_vm0, %v22781_v4  ;;  %s17932_s30 = scalar_lea.vmem %s22762_s6, %s14031_s22  ;;  %16376 = vmatprep.subr.bf16.mxu0 %v17918_v12  ;;  %s23249_s22 = sld [smem:[#allocation77_spill]] }
  0x5c   : > { %702 = vst.msk [vmem:[#allocation2 + $0x90] sm:$0xff] %vm682_vm0, %v22781_v4  ;;  %703 = vst.msk [vmem:[#allocation2 + $0x98] sm:$0xff] %vm682_vm0, %v22781_v4  ;;  %v616_v15 = vld [vmem:[%s17932_s30] sm:$0xff]  ;;  %v17936_v16 = vstv %s648_s23  ;;  %v617_v17 = vld [vmem:[%s17932_s30 + $0x8] sm:$0xff]  ;;  %s13990_s23 = sld [smem:[#allocation6 + $0x1]]  ;;  %p23395_p2 = scmp.ne.s32.totalorder %s22993_s27, 0 }
  0x5d   : > { %705 = vst.msk [vmem:[#allocation2 + $0xa8] sm:$0xff] %vm682_vm0, %v22781_v4  ;;  %706 = vst.msk [vmem:[#allocation2 + $0xb0] sm:$0xff] %vm682_vm0, %v22781_v4  ;;  %v618_v18 = vld [vmem:[%s17932_s30 + $0x10] sm:$0xff]  ;;  %v805_v19 = vld [vmem:[#allocation2 + $0x1] sm:$0xff]  ;;  %v650_v21 = vmul.f32 %v17936_v16, %v616_v15  ;;  %v651_v22 = vmul.f32 %v17936_v16, %v617_v17  ;;  %v18022_v17 = vpack.c.bf16 %v3063_v49, %v3062_v48  ;;  %s13993_s1 = sld [smem:[#allocation11 + $0x1]] }
  0x5e   : > { %708 = vst.msk [vmem:[#allocation2 + $0xc0] sm:$0xff] %vm682_vm0, %v22781_v4  ;;  %709 = vst.msk [vmem:[#allocation2 + $0xc8] sm:$0xff] %vm682_vm0, %v22781_v4  ;;  %v652_v23 = vmul.f32 %v17936_v16, %v618_v18  ;;  %v619_v24 = vld [vmem:[%s17932_s30 + $0x18] sm:$0xff]  ;;  %14955 = vmatprep.mubr.msk.f32.mxu1 %vm682_vm0, %v805_v19  ;;  %v620_v27 = vld [vmem:[%s17932_s30 + $0x20] sm:$0xff] }
  0x5f   : > { %711 = vst.msk [vmem:[#allocation2 + $0xd8] sm:$0xff] %vm682_vm0, %v22781_v4  ;;  %712 = vst.msk [vmem:[#allocation2 + $0xe0] sm:$0xff] %vm682_vm0, %v22781_v4  ;;  %v653_v26 = vmul.f32 %v17936_v16, %v619_v24  ;;  %v621_v28 = vld [vmem:[%s17932_s30 + $0x28] sm:$0xff]  ;;  %v622_v29 = vld [vmem:[%s17932_s30 + $0x30] sm:$0xff]  ;;  %v654_v30 = vmul.f32 %v17936_v16, %v620_v27 }
  0x60   : > { %714 = vst.msk [vmem:[#allocation2 + $0xf0] sm:$0xff] %vm682_vm0, %v22781_v4  ;;  %715 = vst.msk [vmem:[#allocation2 + $0xf8] sm:$0xff] %vm682_vm0, %v22781_v4  ;;  %v655_v31 = vmul.f32 %v17936_v16, %v621_v28  ;;  %v656_v32 = vmul.f32 %v17936_v16, %v622_v29  ;;  %v623_v33 = vld [vmem:[%s17932_s30 + $0x38] sm:$0xff]  ;;  %v624_v34 = vld [vmem:[%s17932_s30 + $0x40] sm:$0xff] }
  0x61   : > { %717 = vst.msk [vmem:[#allocation2 + $0x108] sm:$0xff] %vm682_vm0, %v22781_v4  ;;  %718 = vst.msk [vmem:[#allocation2 + $0x110] sm:$0xff] %vm682_vm0, %v22781_v4  ;;  %v625_v35 = vld [vmem:[%s17932_s30 + $0x48] sm:$0xff]  ;;  %v657_v36 = vmul.f32 %v17936_v16, %v623_v33  ;;  %v658_v37 = vmul.f32 %v17936_v16, %v624_v34  ;;  %v626_v39 = vld [vmem:[%s17932_s30 + $0x50] sm:$0xff] }
  0x62   : > { %720 = vst.msk [vmem:[#allocation2 + $0x120] sm:$0xff] %vm682_vm0, %v22781_v4  ;;  %721 = vst.msk [vmem:[#allocation2 + $0x128] sm:$0xff] %vm682_vm0, %v22781_v4  ;;  %v659_v38 = vmul.f32 %v17936_v16, %v625_v35  ;;  %v627_v40 = vld [vmem:[%s17932_s30 + $0x58] sm:$0xff]  ;;  %v628_v41 = vld [vmem:[%s17932_s30 + $0x60] sm:$0xff]  ;;  %v660_v42 = vmul.f32 %v17936_v16, %v626_v39 }
  0x63   : > { %723 = vst.msk [vmem:[#allocation2 + $0x138] sm:$0xff] %vm682_vm0, %v22781_v4  ;;  %724 = vst.msk [vmem:[#allocation2 + $0x140] sm:$0xff] %vm682_vm0, %v22781_v4  ;;  %v661_v43 = vmul.f32 %v17936_v16, %v627_v40  ;;  %v662_v44 = vmul.f32 %v17936_v16, %v628_v41  ;;  %v629_v45 = vld [vmem:[%s17932_s30 + $0x68] sm:$0xff]  ;;  %v630_v46 = vld [vmem:[%s17932_s30 + $0x70] sm:$0xff] }
  0x64   : > { %726 = vst.msk [vmem:[#allocation2 + $0x150] sm:$0xff] %vm682_vm0, %v22781_v4  ;;  %727 = vst.msk [vmem:[#allocation2 + $0x158] sm:$0xff] %vm682_vm0, %v22781_v4  ;;  %v631_v47 = vld [vmem:[%s17932_s30 + $0x78] sm:$0xff]  ;;  %v663_v50 = vmul.f32 %v17936_v16, %v629_v45  ;;  %v664_v51 = vmul.f32 %v17936_v16, %v630_v46  ;;  %v632_v53 = vld [vmem:[%s17932_s30 + $0x80] sm:$0xff] }
  0x65   : > { %729 = vst.msk [vmem:[#allocation2 + $0x168] sm:$0xff] %vm682_vm0, %v22781_v4  ;;  %730 = vst.msk [vmem:[#allocation2 + $0x170] sm:$0xff] %vm682_vm0, %v22781_v4  ;;  %v665_v52 = vmul.f32 %v17936_v16, %v631_v47  ;;  %v633_v54 = vld [vmem:[%s17932_s30 + $0x88] sm:$0xff]  ;;  %v634_v55 = vld [vmem:[%s17932_s30 + $0x90] sm:$0xff]  ;;  %v666_v56 = vmul.f32 %v17936_v16, %v632_v53 }
  0x66   : > { %732 = vst.msk [vmem:[#allocation2 + $0x180] sm:$0xff] %vm682_vm0, %v22781_v4  ;;  %733 = vst.msk [vmem:[#allocation2 + $0x188] sm:$0xff] %vm682_vm0, %v22781_v4  ;;  %v667_v57 = vmul.f32 %v17936_v16, %v633_v54  ;;  %v668_v58 = vmul.f32 %v17936_v16, %v634_v55  ;;  %v635_v59 = vld [vmem:[%s17932_s30 + $0x98] sm:$0xff]  ;;  %v636_v60 = vld [vmem:[%s17932_s30 + $0xa0] sm:$0xff] }
  0x67   : > { %735 = vst.msk [vmem:[#allocation2 + $0x198] sm:$0xff] %vm682_vm0, %v22781_v4  ;;  %736 = vst.msk [vmem:[#allocation2 + $0x1a0] sm:$0xff] %vm682_vm0, %v22781_v4  ;;  %v637_v61 = vld [vmem:[%s17932_s30 + $0xa8] sm:$0xff]  ;;  %v669_v62 = vmul.f32 %v17936_v16, %v635_v59  ;;  %v670_v63 = vmul.f32 %v17936_v16, %v636_v60  ;;  %v638_v1 = vld [vmem:[%s17932_s30 + $0xb0] sm:$0xff] }
  0x68   : > { %686 = vst.msk [vmem:[#allocation2 + $0x10] sm:$0x3] %vm685_vm1, %v22781_v4  ;;  %689 = vst.msk [vmem:[#allocation2 + $0x28] sm:$0x3] %vm685_vm1, %v22781_v4  ;;  %v671_v0 = vmul.f32 %v17936_v16, %v637_v61  ;;  %v639_v2 = vld [vmem:[%s17932_s30 + $0xb8] sm:$0xff]  ;;  %v640_v3 = vld [vmem:[%s17932_s30 + $0xc0] sm:$0xff]  ;;  %v672_v5 = vmul.f32 %v17936_v16, %v638_v1 }
  0x69   : > { %692 = vst.msk [vmem:[#allocation2 + $0x40] sm:$0x3] %vm685_vm1, %v22781_v4  ;;  %695 = vst.msk [vmem:[#allocation2 + $0x58] sm:$0x3] %vm685_vm1, %v22781_v4  ;;  %v673_v6 = vmul.f32 %v17936_v16, %v639_v2  ;;  %v674_v7 = vmul.f32 %v17936_v16, %v640_v3  ;;  %v642_v10 = vld [vmem:[%s17932_s30 + $0xd0] sm:$0xff]  ;;  %v643_v11 = vld [vmem:[%s17932_s30 + $0xd8] sm:$0xff] }
  0x6a   : > { %698 = vst.msk [vmem:[#allocation2 + $0x70] sm:$0x3] %vm685_vm1, %v22781_v4  ;;  %701 = vst.msk [vmem:[#allocation2 + $0x88] sm:$0x3] %vm685_vm1, %v22781_v4  ;;  %v676_v19 = vmul.f32 %v17936_v16, %v642_v10  ;;  %v644_v35 = vld [vmem:[%s17932_s30 + $0xe0] sm:$0xff] }
  0x6b   : > { %704 = vst.msk [vmem:[#allocation2 + $0xa0] sm:$0x3] %vm685_vm1, %v22781_v4  ;;  %707 = vst.msk [vmem:[#allocation2 + $0xb8] sm:$0x3] %vm685_vm1, %v22781_v4 }
  0x6c   : > { %710 = vst.msk [vmem:[#allocation2 + $0xd0] sm:$0x3] %vm685_vm1, %v22781_v4  ;;  %713 = vst.msk [vmem:[#allocation2 + $0xe8] sm:$0x3] %vm685_vm1, %v22781_v4 }
  0x6d   : > { %716 = vst.msk [vmem:[#allocation2 + $0x100] sm:$0x3] %vm685_vm1, %v22781_v4  ;;  %719 = vst.msk [vmem:[#allocation2 + $0x118] sm:$0x3] %vm685_vm1, %v22781_v4 }
  0x6e   : > { %722 = vst.msk [vmem:[#allocation2 + $0x130] sm:$0x3] %vm685_vm1, %v22781_v4  ;;  %725 = vst.msk [vmem:[#allocation2 + $0x148] sm:$0x3] %vm685_vm1, %v22781_v4 }
  0x6f   : > { %728 = vst.msk [vmem:[#allocation2 + $0x160] sm:$0x3] %vm685_vm1, %v22781_v4  ;;  %731 = vst.msk [vmem:[#allocation2 + $0x178] sm:$0x3] %vm685_vm1, %v22781_v4  ;;  %v806_v20 = vld [vmem:[#allocation2 + $0x9] sm:$0xff] }
  0x70   : > { %734 = vst.msk [vmem:[#allocation2 + $0x190] sm:$0x3] %vm685_vm1, %v22781_v4  ;;  %737 = vst.msk [vmem:[#allocation2 + $0x1a8] sm:$0x3] %vm685_vm1, %v22781_v4  ;;  %14956 = vmatmul.mubr.msk.f32.vlgmr.msra.gmra.mrb[0].mxu1 %vm682_vm0, %v806_v20  ;;  %v677_v20 = vmul.f32 %v17936_v16, %v643_v11 }
  0x71   : > { %739 = vst.msk [vmem:[#allocation2 + $0x19] sm:$0xff] %vm682_vm0, %v650_v21  ;;  %740 = vst.msk [vmem:[#allocation2 + $0x21] sm:$0xff] %vm682_vm0, %v651_v22  ;;  %16362 = vmatpush3.bf16.msra.mxu1 %v16359_v9  ;;  %v641_v9 = vld [vmem:[%s17932_s30 + $0xc8] sm:$0xff] }
  0x72   : > { %741 = vst.msk [vmem:[#allocation2 + $0x31] sm:$0xff] %vm682_vm0, %v652_v23  ;;  %742 = vst.msk [vmem:[#allocation2 + $0x39] sm:$0xff] %vm682_vm0, %v653_v26  ;;  %16364 = vmatprep.subr.bf16.mxu1 %v17944_v25  ;;  %v675_v18 = vmul.f32 %v17936_v16, %v641_v9 }
  0x73   : > { %743 = vst.msk [vmem:[#allocation2 + $0x49] sm:$0xff] %vm682_vm0, %v654_v30  ;;  %744 = vst.msk [vmem:[#allocation2 + $0x51] sm:$0xff] %vm682_vm0, %v655_v31 }
  0x74   : > { %745 = vst.msk [vmem:[#allocation2 + $0x61] sm:$0xff] %vm682_vm0, %v656_v32  ;;  %746 = vst.msk [vmem:[#allocation2 + $0x69] sm:$0xff] %vm682_vm0, %v657_v36 }
  0x75   : > { %747 = vst.msk [vmem:[#allocation2 + $0x79] sm:$0xff] %vm682_vm0, %v658_v37  ;;  %748 = vst.msk [vmem:[#allocation2 + $0x81] sm:$0xff] %vm682_vm0, %v659_v38  ;;  %v678_v37 = vmul.f32 %v17936_v16, %v644_v35  ;;  %v645_v38 = vld [vmem:[%s17932_s30 + $0xe8] sm:$0xff] }
  0x76   : > { %749 = vst.msk [vmem:[#allocation2 + $0x91] sm:$0xff] %vm682_vm0, %v660_v42  ;;  %750 = vst.msk [vmem:[#allocation2 + $0x99] sm:$0xff] %vm682_vm0, %v661_v43  ;;  %v679_v42 = vmul.f32 %v17936_v16, %v645_v38  ;;  %v772_v35 = vld [vmem:[#allocation2 + $0x8] sm:$0xff] }
  0x77   : > { %751 = vst.msk [vmem:[#allocation2 + $0xa9] sm:$0xff] %vm682_vm0, %v662_v44  ;;  %752 = vst.msk [vmem:[#allocation2 + $0xb1] sm:$0xff] %vm682_vm0, %v663_v50  ;;  %v18266_v38 = vld [vmem:[#allocation2 + $0x2] sm:$0xff] }
  0x78   : > { %753 = vst.msk [vmem:[#allocation2 + $0xc1] sm:$0xff] %vm682_vm0, %v664_v51  ;;  %754 = vst.msk [vmem:[#allocation2 + $0xc9] sm:$0xff] %vm682_vm0, %v665_v52  ;;  %v807_v13 = vld [vmem:[#allocation2 + $0x19] sm:$0xff]  ;;  %v808_v14 = vld [vmem:[#allocation2 + $0x21] sm:$0xff] }
  0x79   : > { %755 = vst.msk [vmem:[#allocation2 + $0xd9] sm:$0xff] %vm682_vm0, %v666_v56  ;;  %756 = vst.msk [vmem:[#allocation2 + $0xe1] sm:$0xff] %vm682_vm0, %v667_v57  ;;  %v18020_v15 = vld [vmem:[#allocation2 + $0x31] sm:$0xff]  ;;  %14958 = vmatprep.mubr.msk.f32.mxu1 %vm682_vm0, %v807_v13  ;;  %15163 = vmatprep.mubr.msk.f32.mxu0 %vm682_vm0, %v807_v13  ;;  %v18032_v21 = vld [vmem:[#allocation2 + $0x22] sm:$0xff] }
  0x7a   : > { %757 = vst.msk [vmem:[#allocation2 + $0xf1] sm:$0xff] %vm682_vm0, %v668_v58  ;;  %758 = vst.msk [vmem:[#allocation2 + $0xf9] sm:$0xff] %vm682_vm0, %v669_v62  ;;  %14959 = vmatmul.mubr.msk.f32.gmra.mrb[2].mxu1 %vm682_vm0, %v808_v14  ;;  %15164 = vmatmul.mubr.msk.f32.vlgmr.msra.gmra.mrb[0].mxu0 %vm682_vm0, %v808_v14  ;;  %v18047_v22 = vld [vmem:[#allocation2 + $0x39] sm:$0xff]  ;;  %v18051_v23 = vld [vmem:[#allocation2 + $0x49] sm:$0xff] }
  0x7b   : > { %759 = vst.msk [vmem:[#allocation2 + $0x109] sm:$0xff] %vm682_vm0, %v670_v63  ;;  %760 = vst.msk [vmem:[#allocation2 + $0x111] sm:$0xff] %vm682_vm0, %v671_v0  ;;  %16378 = vmatpush3.bf16.msra.mxu0 %v17918_v12  ;;  %14961 = vmatprep.mubr.msk.f32.mxu1 %vm682_vm0, %v18020_v15  ;;  %v18062_v12 = vld [vmem:[#allocation2 + $0x51] sm:$0xff]  ;;  %v18064_v24 = vld [vmem:[#allocation2 + $0x3a] sm:$0xff] }
  0x7c   : > { %761 = vst.msk [vmem:[#allocation2 + $0x121] sm:$0xff] %vm682_vm0, %v672_v5  ;;  %762 = vst.msk [vmem:[#allocation2 + $0x129] sm:$0xff] %vm682_vm0, %v673_v6  ;;  %15166 = vmatprep.mubr.msk.f32.mxu0 %vm682_vm0, %v18020_v15  ;;  %16380 = vmatprep.subr.bf16.mxu0 %v18022_v17  ;;  %v18066_v26 = vld [vmem:[#allocation2 + $0x61] sm:$0xff]  ;;  %v18070_v27 = vld [vmem:[#allocation2 + $0x52] sm:$0xff] }
  0x7d   : > { %763 = vst.msk [vmem:[#allocation2 + $0x139] sm:$0xff] %vm682_vm0, %v674_v7  ;;  %764 = vst.msk [vmem:[#allocation2 + $0x141] sm:$0xff] %vm682_vm0, %v675_v18  ;;  %v18076_v28 = vld [vmem:[#allocation2 + $0x69] sm:$0xff]  ;;  %v18086_v30 = vld [vmem:[#allocation2 + $0x81] sm:$0xff] }
  0x7e   : > { %765 = vst.msk [vmem:[#allocation2 + $0x151] sm:$0xff] %vm682_vm0, %v676_v19  ;;  %766 = vst.msk [vmem:[#allocation2 + $0x159] sm:$0xff] %vm682_vm0, %v677_v20  ;;  %14962 = vmatmul.mubr.msk.f32.gmra.mrb[4].mxu1 %vm682_vm0, %v18047_v22  ;;  %15167 = vmatmul.mubr.msk.f32.gmra.mrb[2].mxu0 %vm682_vm0, %v18047_v22  ;;  %v18078_v29 = vld [vmem:[#allocation2 + $0x6a] sm:$0xff]  ;;  %v18088_v31 = vld [vmem:[#allocation2 + $0x82] sm:$0xff] }
  0x7f   : > { %4578 = vst.msk [vmem:[#allocation2 + $0x28] sm:$0x3] %vm685_vm1, %v22781_v4  ;;  %14964 = vmatprep.mubr.msk.f32.mxu1 %vm682_vm0, %v18051_v23  ;;  %15169 = vmatprep.mubr.msk.f32.mxu0 %vm682_vm0, %v18051_v23  ;;  %4581 = vst.msk [vmem:[#allocation2 + $0x40] sm:$0x3] %vm685_vm1, %v22781_v4  ;;  %v18092_v32 = vld [vmem:[#allocation2 + $0x79] sm:$0xff]  ;;  %v18105_v36 = vld [vmem:[#allocation2 + $0xb1] sm:$0xff] }
  0x80   : > { %4584 = vst.msk [vmem:[#allocation2 + $0x58] sm:$0x3] %vm685_vm1, %v22781_v4  ;;  %4587 = vst.msk [vmem:[#allocation2 + $0x70] sm:$0x3] %vm685_vm1, %v22781_v4  ;;  %v18096_v33 = vld [vmem:[#allocation2 + $0x99] sm:$0xff]  ;;  %v18117_v40 = vld [vmem:[#allocation2 + $0xc9] sm:$0xff] }
  0x81   : > { %4590 = vst.msk [vmem:[#allocation2 + $0x88] sm:$0x3] %vm685_vm1, %v22781_v4  ;;  %23003 = vst [vmem:[#allocation19_spill] sm:$0xff] %v18096_v33  ;;  %v18098_v34 = vld [vmem:[#allocation2 + $0x9a] sm:$0xff]  ;;  %v18109_v39 = vld [vmem:[#allocation2 + $0xb2] sm:$0xff] }
  0x82   : > { %14965 = vmatmul.mubr.msk.f32.gmra.mrb[6].mxu1 %vm682_vm0, %v18062_v12  ;;  %15170 = vmatmul.mubr.msk.f32.gmra.mrb[4].mxu0 %vm682_vm0, %v18062_v12  ;;  %23004 = vst [vmem:[#allocation20_spill] sm:$0xff] %v18105_v36  ;;  %4593 = vst.msk [vmem:[#allocation2 + $0xa0] sm:$0x3] %vm685_vm1, %v22781_v4  ;;  %v18119_v41 = vld [vmem:[#allocation2 + $0x1a] sm:$0xff]  ;;  %v18122_v43 = vld [vmem:[#allocation2 + $0xca] sm:$0xff] }
  0x83   : > { %14967 = vmatprep.mubr.msk.f32.mxu1 %vm682_vm0, %v18066_v26  ;;  %15172 = vmatprep.mubr.msk.f32.mxu0 %vm682_vm0, %v18066_v26  ;;  %23005 = vst [vmem:[#allocation21_spill] sm:$0xff] %v18117_v40  ;;  %4596 = vst.msk [vmem:[#allocation2 + $0xb8] sm:$0x3] %vm685_vm1, %v22781_v4  ;;  %v18126_v44 = vld [vmem:[#allocation2 + $0x91] sm:$0xff]  ;;  %v18131_v46 = vld [vmem:[#allocation2 + $0x20] sm:$0xff] }
  0x84   : > { %767 = vst.msk [vmem:[#allocation2 + $0x169] sm:$0xff] %vm682_vm0, %v678_v37  ;;  %v18129_v45 = vld [vmem:[#allocation2 + $0x18] sm:$0xff]  ;;  %23007 = vst [vmem:[#allocation23_spill] sm:$0xff] %v18131_v46  ;;  %v18138_v48 = vld [vmem:[#allocation2 + $0x30] sm:$0xff] }
  0x85   : > { %23006 = vst [vmem:[#allocation22_spill] sm:$0xff] %v18129_v45  ;;  %4599 = vst.msk [vmem:[#allocation2 + $0xd0] sm:$0x3] %vm685_vm1, %v22781_v4  ;;  %v18135_v47 = vld [vmem:[#allocation2 + $0x32] sm:$0xff]  ;;  %v18148_v49 = vld [vmem:[#allocation2 + $0x4a] sm:$0xff] }
  0x86   : > { %14968 = vmatmul.mubr.msk.f32.gmra.mrb[8].mxu1 %vm682_vm0, %v18076_v28  ;;  %15173 = vmatmul.mubr.msk.f32.gmra.mrb[6].mxu0 %vm682_vm0, %v18076_v28  ;;  %768 = vst.msk [vmem:[#allocation2 + $0x171] sm:$0xff] %vm682_vm0, %v679_v42  ;;  %23008 = vst [vmem:[#allocation24_spill] sm:$0xff] %v18138_v48  ;;  %v18150_v50 = vld [vmem:[#allocation2 + $0x38] sm:$0xff]  ;;  %v18152_v51 = vld [vmem:[#allocation2 + $0x48] sm:$0xff] }
  0x87   : > { %14970 = vmatprep.mubr.msk.f32.mxu1 %vm682_vm0, %v18092_v32  ;;  %15175 = vmatprep.mubr.msk.f32.mxu0 %vm682_vm0, %v18092_v32  ;;  %4576 = vst.msk [vmem:[#allocation2 + $0x18] sm:$0xff] %vm682_vm0, %v22781_v4  ;;  %4577 = vst.msk [vmem:[#allocation2 + $0x20] sm:$0xff] %vm682_vm0, %v22781_v4  ;;  %v18160_v52 = vld [vmem:[#allocation2 + $0xa9] sm:$0xff]  ;;  %v18170_v55 = vld [vmem:[#allocation2 + $0x60] sm:$0xff] }
  0x88   : > { %4579 = vst.msk [vmem:[#allocation2 + $0x30] sm:$0xff] %vm682_vm0, %v22781_v4  ;;  %23009 = vst [vmem:[#allocation25_spill] sm:$0xff] %v18160_v52  ;;  %v18162_v53 = vld [vmem:[#allocation2 + $0x50] sm:$0xff]  ;;  %v18168_v54 = vld [vmem:[#allocation2 + $0x62] sm:$0xff] }
  0x89   : > { %23010 = vst [vmem:[#allocation26_spill] sm:$0xff] %v18162_v53  ;;  %4580 = vst.msk [vmem:[#allocation2 + $0x38] sm:$0xff] %vm682_vm0, %v22781_v4  ;;  %v18172_v56 = vld [vmem:[#allocation2 + $0x68] sm:$0xff]  ;;  %v18176_v57 = vld [vmem:[#allocation2 + $0x7a] sm:$0xff] }
  0x8a   : > { %14971 = vmatmul.mubr.msk.f32.gmra.mrb[10].mxu1 %vm682_vm0, %v18086_v30  ;;  %15176 = vmatmul.mubr.msk.f32.gmra.mrb[8].mxu0 %vm682_vm0, %v18086_v30  ;;  %4582 = vst.msk [vmem:[#allocation2 + $0x48] sm:$0xff] %vm682_vm0, %v22781_v4  ;;  %23011 = vst [vmem:[#allocation27_spill] sm:$0xff] %v18170_v55  ;;  %v18178_v58 = vld [vmem:[#allocation2 + $0x78] sm:$0xff]  ;;  %v18190_v60 = vld [vmem:[#allocation2 + $0x80] sm:$0xff] }
  0x8b   : > { %14973 = vmatprep.mubr.msk.f32.mxu1 %vm682_vm0, %v18126_v44  ;;  %15178 = vmatprep.mubr.msk.f32.mxu0 %vm682_vm0, %v18126_v44  ;;  %23012 = vst [vmem:[#allocation28_spill] sm:$0xff] %v18172_v56  ;;  %4583 = vst.msk [vmem:[#allocation2 + $0x50] sm:$0xff] %vm682_vm0, %v22781_v4  ;;  %v18188_v59 = vld [vmem:[#allocation2 + $0x92] sm:$0xff]  ;;  %v18206_v63 = vld [vmem:[#allocation2 + $0xc1] sm:$0xff] }
  0x8c   : > { %23013 = vst [vmem:[#allocation29_spill] sm:$0xff] %v18178_v58  ;;  %4585 = vst.msk [vmem:[#allocation2 + $0x60] sm:$0xff] %vm682_vm0, %v22781_v4  ;;  %v18192_v61 = vld [vmem:[#allocation2 + $0x90] sm:$0xff]  ;;  %v18200_v62 = vld [vmem:[#allocation2 + $0x98] sm:$0xff] }
  0x8d   : > { %4586 = vst.msk [vmem:[#allocation2 + $0x68] sm:$0xff] %vm682_vm0, %v22781_v4  ;;  %23014 = vst [vmem:[#allocation30_spill] sm:$0xff] %v18190_v60  ;;  %v18208_v0 = vld [vmem:[#allocation2 + $0xaa] sm:$0xff]  ;;  %v18214_v2 = vld [vmem:[#allocation2 + $0xc2] sm:$0xff] }
  0x8e   : > { %14974 = vmatmul.mubr.msk.f32.gmra.mrb[12].mxu1 %vm682_vm0, %v18096_v33  ;;  %15179 = vmatmul.mubr.msk.f32.gmra.mrb[10].mxu0 %vm682_vm0, %v18096_v33  ;;  %4588 = vst.msk [vmem:[#allocation2 + $0x78] sm:$0xff] %vm682_vm0, %v22781_v4  ;;  %23015 = vst [vmem:[#allocation31_spill] sm:$0xff] %v18200_v62  ;;  %v18210_v1 = vld [vmem:[#allocation2 + $0xa8] sm:$0xff]  ;;  %v18216_v3 = vld [vmem:[#allocation2 + $0xb0] sm:$0xff] }
  0x8f   : > { %14976 = vmatprep.mubr.msk.f32.mxu1 %vm682_vm0, %v18160_v52  ;;  %15181 = vmatprep.mubr.msk.f32.mxu0 %vm682_vm0, %v18160_v52  ;;  %4589 = vst.msk [vmem:[#allocation2 + $0x80] sm:$0xff] %vm682_vm0, %v22781_v4  ;;  %4591 = vst.msk [vmem:[#allocation2 + $0x90] sm:$0xff] %vm682_vm0, %v22781_v4  ;;  %v18224_v5 = vld [vmem:[#allocation2 + $0xc0] sm:$0xff]  ;;  %v646_v6 = vld [vmem:[%s17932_s30 + $0xf0] sm:$0xff] }
  0x90   : > { %23016 = vst [vmem:[#allocation32_spill] sm:$0xff] %v18206_v63  ;;  %23017 = vst [vmem:[#allocation33_spill] sm:$0xff] %v18210_v1  ;;  %v647_v7 = vld [vmem:[%s17932_s30 + $0xf8] sm:$0xff]  ;;  %v680_v9 = vmul.f32 %v17936_v16, %v646_v6  ;;  %v18236_v11 = vld [vmem:[#allocation2 + $0xc8] sm:$0xff] }
  0x91   : > { %4592 = vst.msk [vmem:[#allocation2 + $0x98] sm:$0xff] %vm682_vm0, %v22781_v4  ;;  %4594 = vst.msk [vmem:[#allocation2 + $0xa8] sm:$0xff] %vm682_vm0, %v22781_v4  ;;  %v681_v10 = vmul.f32 %v17936_v16, %v647_v7  ;;  %v18240_v13 = vld [vmem:[#allocation2 + $0xd9] sm:$0xff]  ;;  %v3449_v14 = vld [vmem:[%s22763_s7 + $0x70] sm:$0xff] }
  0x92   : > { %14977 = vmatmul.mubr.msk.f32.gmra.mrb[14].mxu1 %vm682_vm0, %v18105_v36  ;;  %15182 = vmatmul.mubr.msk.f32.gmra.mrb[12].mxu0 %vm682_vm0, %v18105_v36  ;;  %23018 = vst [vmem:[#allocation34_spill] sm:$0xff] %v18224_v5  ;;  %4595 = vst.msk [vmem:[#allocation2 + $0xb0] sm:$0xff] %vm682_vm0, %v22781_v4  ;;  %v3450_v16 = vld [vmem:[%s22763_s7 + $0x78] sm:$0xff]  ;;  %v18260_v18 = vld [vmem:[#allocation2 + $0xe1] sm:$0xff]  ;;  %v23039_v36 = vmov 0.0  }
  0x93   : > { %14979 = vmatprep.mubr.msk.f32.mxu1 %vm682_vm0, %v18206_v63  ;;  %15184 = vmatprep.mubr.msk.f32.mxu0 %vm682_vm0, %v18206_v63  ;;  %4597 = vst.msk [vmem:[#allocation2 + $0xc0] sm:$0xff] %vm682_vm0, %v22781_v4  ;;  %23019 = vst [vmem:[#allocation35_spill] sm:$0xff] %v18240_v13  ;;  %v18262_v19 = vld [vmem:[#allocation2 + $0xf1] sm:$0xff]  ;;  %v771_v20 = vld [vmem:[#allocation2] sm:$0xff]  ;;  %v18264_v37 = vpack.c.bf16 %v3450_v16, %v3449_v14 }
  0x94   : > { %4598 = vst.msk [vmem:[#allocation2 + $0xc8] sm:$0xff] %vm682_vm0, %v22781_v4  ;;  %769 = vst.msk [vmem:[#allocation2 + $0x181] sm:$0xff] %vm682_vm0, %v680_v9  ;;  %v18268_v42 = vld [vmem:[#allocation2 + $0xa] sm:$0xff]  ;;  %v18283_v6 = vld [vmem:[#allocation2 + $0xf9] sm:$0xff] }
  0x95   : > { %770 = vst.msk [vmem:[#allocation2 + $0x189] sm:$0xff] %vm682_vm0, %v681_v10  ;;  %23020 = vst [vmem:[#allocation36_spill] sm:$0xff] %v18260_v18  ;;  %v18287_v7 = vld [vmem:[#allocation2 + $0x109] sm:$0xff]  ;;  %v18300_v9 = vld [vmem:[#allocation2 + $0x121] sm:$0xff] }
  0x96   : > { %14980 = vmatmul.mubr.msk.f32.gmra.mrb[16].mxu1 %vm682_vm0, %v18117_v40  ;;  %15185 = vmatmul.mubr.msk.f32.gmra.mrb[14].mxu0 %vm682_vm0, %v18117_v40  ;;  %23021 = vst [vmem:[#allocation37_spill] sm:$0xff] %v18262_v19  ;;  %4573 = vst.msk [vmem:[#allocation2] sm:$0xff] %vm682_vm0, %v22781_v4  ;;  %v18310_v10 = vld [vmem:[#allocation2 + $0x129] sm:$0xff]  ;;  %v18312_v14 = vld [vmem:[#allocation2 + $0x139] sm:$0xff] }
  0x97   : > { %14982 = vmatprep.mubr.msk.f32.mxu1 %vm682_vm0, %v18240_v13  ;;  %15215 = vmatprep.mubr.msk.f32.mxu0 %vm682_vm0, %v18119_v41  ;;  %4574 = vst.msk [vmem:[#allocation2 + $0x8] sm:$0xff] %vm682_vm0, %v22781_v4  ;;  %23022 = vst [vmem:[#allocation38_spill] sm:$0xff] %v18283_v6  ;;  %v18322_v16 = vld [vmem:[#allocation2 + $0x141] sm:$0xff]  ;;  %v18442_v13 = vld [vmem:[#allocation2 + $0x172] sm:$0xff] }
  0x98   : > { %4575 = vst.msk [vmem:[#allocation2 + $0x10] sm:$0x3] %vm685_vm1, %v22781_v4  ;;  %23023 = vst [vmem:[#allocation39_spill] sm:$0xff] %v18287_v7  ;;  %v18324_v4 = vld [vmem:[#allocation2 + $0x151] sm:$0xff] }
  0x99   : > { %23025 = vst [vmem:[#allocation41_spill] sm:$0xff] %v18300_v9  ;;  %23026 = vst [vmem:[#allocation42_spill] sm:$0xff] %v18310_v10 }
  0x9a   : > { %14983 = vmatmul.mubr.msk.f32.gmra.mrb[18].mxu1 %vm682_vm0, %v18260_v18  ;;  %15216 = vmatmul.mubr.msk.f32.vlgmr.msra.gmra.mrb[0].mxu0 %vm682_vm0, %v18032_v21  ;;  %23027 = vst [vmem:[#allocation43_spill] sm:$0xff] %v18312_v14  ;;  %23028 = vst [vmem:[#allocation44_spill] sm:$0xff] %v18322_v16  ;;  %v18434_v18 = vld [vmem:[#allocation2 + $0x15a] sm:$0xff] }
  0x9b   : > { %16382 = vmatpush3.bf16.msra.mxu0 %v18022_v17  ;;  %14985 = vmatprep.mubr.msk.f32.mxu1 %vm682_vm0, %v18262_v19  ;;  %v18298_v17 = vld [vmem:[#allocation2 + $0x111] sm:$0xff]  ;;  %23029 = vst [vmem:[#allocation45_spill] sm:$0xff] %v18324_v4  ;;  %23034 = vst [vmem:[#allocation50_spill] sm:$0xff] %v18434_v18  ;;  %v18450_v40 = vld [vmem:[#allocation2 + $0x180] sm:$0xff] }
  0x9c   : > { %15218 = vmatprep.mubr.msk.f32.mxu0 %vm682_vm0, %v18135_v47  ;;  %16384 = vmatprep.subr.bf16.mxu0 %v18264_v37  ;;  %23024 = vst [vmem:[#allocation40_spill] sm:$0xff] %v18298_v17  ;;  %v18424_v19 = vld [vmem:[#allocation2 + $0x152] sm:$0xff]  ;;  %23036 = vst [vmem:[#allocation52_spill] sm:$0xff] %v18442_v13  ;;  %v18452_v63 = vld [vmem:[#allocation2 + $0x181] sm:$0xff] }
  0x9d   : > { %23033 = vst [vmem:[#allocation49_spill] sm:$0xff] %v18424_v19  ;;  %23038 = vst [vmem:[#allocation54_spill] sm:$0xff] %v18452_v63  ;;  %v18456_v52 = vld [vmem:[#allocation2 + $0x18a] sm:$0xff]  ;;  %v18474_v63 = vld [vmem:[#allocation2 + $0xd8] sm:$0xff] }
  0x9e   : > { %14986 = vmatmul.mubr.msk.f32.gmra.mrb[20].mxu1 %vm682_vm0, %v18283_v6  ;;  %15219 = vmatmul.mubr.msk.f32.gmra.mrb[2].mxu0 %vm682_vm0, %v18064_v24  ;;  %v18422_v6 = vld [vmem:[#allocation2 + $0x142] sm:$0xff]  ;;  %23040 = vst [vmem:[#allocation55_spill] sm:$0xff] %v18456_v52 }
  0x9f   : > { %14988 = vmatprep.mubr.msk.f32.mxu1 %vm682_vm0, %v18287_v7  ;;  %15221 = vmatprep.mubr.msk.f32.mxu0 %vm682_vm0, %v18148_v49  ;;  %v18412_v7 = vld [vmem:[#allocation2 + $0x13a] sm:$0xff] }
  0xa2   : > { %14989 = vmatmul.mubr.msk.f32.gmra.mrb[22].mxu1 %vm682_vm0, %v18298_v17  ;;  %15222 = vmatmul.mubr.msk.f32.gmra.mrb[4].mxu0 %vm682_vm0, %v18070_v27  ;;  %v18410_v17 = vld [vmem:[#allocation2 + $0x12a] sm:$0xff] }
  0xa3   : > { %14991 = vmatprep.mubr.msk.f32.mxu1 %vm682_vm0, %v18300_v9  ;;  %15224 = vmatprep.mubr.msk.f32.mxu0 %vm682_vm0, %v18168_v54 }
  0xa6   : > { %14992 = vmatmul.mubr.msk.f32.gmra.mrb[24].mxu1 %vm682_vm0, %v18310_v10  ;;  %15225 = vmatmul.mubr.msk.f32.gmra.mrb[6].mxu0 %vm682_vm0, %v18078_v29  ;;  %v18336_v10 = vld [vmem:[#allocation2 + $0x169] sm:$0xff] }
  0xa7   : > { %14994 = vmatprep.mubr.msk.f32.mxu1 %vm682_vm0, %v18312_v14  ;;  %15227 = vmatprep.mubr.msk.f32.mxu0 %vm682_vm0, %v18176_v57  ;;  %v18334_v14 = vld [vmem:[#allocation2 + $0x159] sm:$0xff]  ;;  %23031 = vst [vmem:[#allocation47_spill] sm:$0xff] %v18336_v10 }
  0xa8   : > { %23030 = vst [vmem:[#allocation46_spill] sm:$0xff] %v18334_v14 }
  0xaa   : > { %14995 = vmatmul.mubr.msk.f32.gmra.mrb[26].mxu1 %vm682_vm0, %v18322_v16  ;;  %15228 = vmatmul.mubr.msk.f32.gmra.mrb[8].mxu0 %vm682_vm0, %v18088_v31  ;;  %v1901_v16 = vld [vmem:[%s22763_s7 + $0x38] sm:$0xff] }
  0xab   : > { %14997 = vmatprep.mubr.msk.f32.mxu1 %vm682_vm0, %v18324_v4  ;;  %15230 = vmatprep.mubr.msk.f32.mxu0 %vm682_vm0, %v18188_v59  ;;  %v18346_v4 = vld [vmem:[#allocation2 + $0x171] sm:$0xff] }
  0xac   : > { %23032 = vst [vmem:[#allocation48_spill] sm:$0xff] %v18346_v4 }
  0xae   : > { %14998 = vmatmul.mubr.msk.f32.gmra.mrb[28].mxu1 %vm682_vm0, %v18334_v14  ;;  %15231 = vmatmul.mubr.msk.f32.gmra.mrb[10].mxu0 %vm682_vm0, %v18098_v34  ;;  %v1900_v14 = vld [vmem:[%s22763_s7 + $0x30] sm:$0xff] }
  0xaf   : > { %15000 = vmatprep.mubr.msk.f32.mxu1 %vm682_vm0, %v18336_v10  ;;  %15233 = vmatprep.mubr.msk.f32.mxu0 %vm682_vm0, %v18208_v0  ;;  %v18361_v10 = vld [vmem:[#allocation2 + $0xda] sm:$0xff]  ;;  %v18363_v9 = vpack.c.bf16 %v1901_v16, %v1900_v14  ;;  %v18388_v14 = vld [vmem:[#allocation2 + $0x10a] sm:$0xff]  ;;  %v18400_v16 = vld [vmem:[#allocation2 + $0x122] sm:$0xff] }
  0xb2   : > { %15001 = vmatmul.mubr.msk.f32.gmra.mrb[30].mxu1 %vm682_vm0, %v18346_v4  ;;  %15234 = vmatmul.mubr.msk.f32.gmra.mrb[12].mxu0 %vm682_vm0, %v18109_v39  ;;  %v18372_v4 = vld [vmem:[#allocation2 + $0xe2] sm:$0xff] }
  0xb3   : > { %15007 = vmatprep.mubr.msk.f32.mxu1 %vm682_vm0, %v771_v20  ;;  %15236 = vmatprep.mubr.msk.f32.mxu0 %vm682_vm0, %v18214_v2  ;;  %v18375_v20 = vld [vmem:[#allocation2 + $0xf2] sm:$0xff] }
  0xb6   : > { %15008 = vmatmul.mubr.msk.f32.vlgmr.msra.gmra.mrb[0].mxu1 %vm682_vm0, %v772_v35  ;;  %15237 = vmatmul.mubr.msk.f32.gmra.mrb[14].mxu0 %vm682_vm0, %v18122_v43  ;;  %v18386_v35 = vld [vmem:[#allocation2 + $0xfa] sm:$0xff] }
  0xb7   : > { %15010 = vmatprep.mubr.msk.f32.mxu1 %vm682_vm0, %v18129_v45  ;;  %15239 = vmatprep.mubr.msk.f32.mxu0 %vm682_vm0, %v18361_v10  ;;  %v18448_v45 = vld [vmem:[#allocation2 + $0x182] sm:$0xff] }
  0xb8   : > { %16366 = vmatpush3.bf16.msra.mxu1 %v17944_v25  ;;  %v18398_v25 = vld [vmem:[#allocation2 + $0x112] sm:$0xff]  ;;  %23037 = vst [vmem:[#allocation53_spill] sm:$0xff] %v18448_v45  ;;  %4621 = vst.msk [vmem:[#allocation2 + $0x180] sm:$0xff] %vm682_vm0, %v23039_v36 }
  0xb9   : > { %16368 = vmatprep.subr.bf16.mxu1 %v18363_v9 }
  0xba   : > { %15011 = vmatmul.mubr.msk.f32.gmra.mrb[2].mxu1 %vm682_vm0, %v18131_v46  ;;  %15240 = vmatmul.mubr.msk.f32.gmra.mrb[16].mxu0 %vm682_vm0, %v18372_v4  ;;  %v18436_v46 = vld [vmem:[#allocation2 + $0x16a] sm:$0xff] }
  0xbb   : > { %15013 = vmatprep.mubr.msk.f32.mxu1 %vm682_vm0, %v18138_v48  ;;  %15242 = vmatprep.mubr.msk.f32.mxu0 %vm682_vm0, %v18375_v20  ;;  %23035 = vst [vmem:[#allocation51_spill] sm:$0xff] %v18436_v46 }
  0xbe   : > { %15014 = vmatmul.mubr.msk.f32.gmra.mrb[4].mxu1 %vm682_vm0, %v18150_v50  ;;  %15243 = vmatmul.mubr.msk.f32.gmra.mrb[18].mxu0 %vm682_vm0, %v18386_v35 }
  0xbf   : > { %15016 = vmatprep.mubr.msk.f32.mxu1 %vm682_vm0, %v18152_v51  ;;  %15245 = vmatprep.mubr.msk.f32.mxu0 %vm682_vm0, %v18388_v14 }
  0xc2   : > { %15017 = vmatmul.mubr.msk.f32.gmra.mrb[6].mxu1 %vm682_vm0, %v18162_v53  ;;  %15246 = vmatmul.mubr.msk.f32.gmra.mrb[20].mxu0 %vm682_vm0, %v18398_v25 }
  0xc3   : > { %15019 = vmatprep.mubr.msk.f32.mxu1 %vm682_vm0, %v18170_v55  ;;  %15248 = vmatprep.mubr.msk.f32.mxu0 %vm682_vm0, %v18400_v16 }
  0xc6   : > { %15020 = vmatmul.mubr.msk.f32.gmra.mrb[8].mxu1 %vm682_vm0, %v18172_v56  ;;  %15249 = vmatmul.mubr.msk.f32.gmra.mrb[22].mxu0 %vm682_vm0, %v18410_v17 }
  0xc7   : > { %15022 = vmatprep.mubr.msk.f32.mxu1 %vm682_vm0, %v18178_v58  ;;  %15251 = vmatprep.mubr.msk.f32.mxu0 %vm682_vm0, %v18412_v7 }
  0xca   : > { %15023 = vmatmul.mubr.msk.f32.gmra.mrb[10].mxu1 %vm682_vm0, %v18190_v60  ;;  %15252 = vmatmul.mubr.msk.f32.gmra.mrb[24].mxu0 %vm682_vm0, %v18422_v6 }
  0xcb   : > { %15025 = vmatprep.mubr.msk.f32.mxu1 %vm682_vm0, %v18192_v61  ;;  %15254 = vmatprep.mubr.msk.f32.mxu0 %vm682_vm0, %v18424_v19  ;;  %v18460_v19 = vld [vmem:[#allocation2 + $0x189] sm:$0xff] }
  0xcc   : > { %23041 = vst [vmem:[#allocation56_spill] sm:$0xff] %v18460_v19  ;;  %4623 = vst.msk [vmem:[#allocation2 + $0x190] sm:$0x3] %vm685_vm1, %v23039_v36  ;;  %v3836_v19 = vld [vmem:[%s22763_s7 + $0x80] sm:$0xff] }
  0xce   : > { %15026 = vmatmul.mubr.msk.f32.gmra.mrb[12].mxu1 %vm682_vm0, %v18200_v62  ;;  %15255 = vmatmul.mubr.msk.f32.gmra.mrb[26].mxu0 %vm682_vm0, %v18434_v18  ;;  %v18458_v18 = vld [vmem:[#allocation2 + $0x188] sm:$0xff] }
  0xcf   : > { %15028 = vmatprep.mubr.msk.f32.mxu1 %vm682_vm0, %v18210_v1  ;;  %15257 = vmatprep.mubr.msk.f32.mxu0 %vm682_vm0, %v18436_v46  ;;  %4622 = vst.msk [vmem:[#allocation2 + $0x188] sm:$0xff] %vm682_vm0, %v23039_v36  ;;  %v18492_v46 = vld [vmem:[#allocation2 + $0xf0] sm:$0xff] }
  0xd2   : > { %15029 = vmatmul.mubr.msk.f32.gmra.mrb[14].mxu1 %vm682_vm0, %v18216_v3  ;;  %15258 = vmatmul.mubr.msk.f32.gmra.mrb[28].mxu0 %vm682_vm0, %v18442_v13  ;;  %v3837_v13 = vld [vmem:[%s22763_s7 + $0x88] sm:$0xff] }
  0xd3   : > { %15031 = vmatprep.mubr.msk.f32.mxu1 %vm682_vm0, %v18224_v5  ;;  %15260 = vmatprep.mubr.msk.f32.mxu0 %vm682_vm0, %v18448_v45  ;;  %v18490_v45 = vld [vmem:[#allocation2 + $0xe0] sm:$0xff]  ;;  %v18494_v33 = vpack.c.bf16 %v3837_v13, %v3836_v19  ;;  %v18518_v13 = vld [vmem:[#allocation2 + $0x110] sm:$0xff] }
  0xd4   : > { %v18520_v19 = vld [vmem:[#allocation2 + $0x120] sm:$0xff] }
  0xd6   : > { %15032 = vmatmul.mubr.msk.f32.gmra.mrb[16].mxu1 %vm682_vm0, %v18236_v11  ;;  %15261 = vmatmul.mubr.msk.f32.gmra.mrb[30].mxu0 %vm682_vm0, %v18456_v52  ;;  %v18503_v52 = vld [vmem:[#allocation2 + $0xf8] sm:$0xff] }
  0xd7   : > { %15034 = vmatprep.mubr.msk.f32.mxu1 %vm682_vm0, %v18474_v63  ;;  %15267 = vmatprep.mubr.msk.f32.mxu0 %vm682_vm0, %v18138_v48  ;;  %v18507_v48 = vld [vmem:[#allocation2 + $0x108] sm:$0xff] }
  0xda   : > { %15035 = vmatmul.mubr.msk.f32.gmra.mrb[18].mxu1 %vm682_vm0, %v18490_v45  ;;  %15268 = vmatmul.mubr.msk.f32.vlgmr.msra.gmra.mrb[0].mxu0 %vm682_vm0, %v18150_v50 }
  0xdb   : > { %16386 = vmatpush3.bf16.msra.mxu0 %v18264_v37  ;;  %15037 = vmatprep.mubr.msk.f32.mxu1 %vm682_vm0, %v18492_v46  ;;  %v18530_v37 = vld [vmem:[#allocation2 + $0x128] sm:$0xff] }
  0xdc   : > { %15270 = vmatprep.mubr.msk.f32.mxu0 %vm682_vm0, %v18152_v51  ;;  %16388 = vmatprep.subr.bf16.mxu0 %v18494_v33 }
  0xde   : > { %15038 = vmatmul.mubr.msk.f32.gmra.mrb[20].mxu1 %vm682_vm0, %v18503_v52  ;;  %15271 = vmatmul.mubr.msk.f32.gmra.mrb[2].mxu0 %vm682_vm0, %v18162_v53  ;;  %v18532_v53 = vld [vmem:[#allocation2 + $0x138] sm:$0xff] }
  0xdf   : > { %15040 = vmatprep.mubr.msk.f32.mxu1 %vm682_vm0, %v18507_v48  ;;  %15273 = vmatprep.mubr.msk.f32.mxu0 %vm682_vm0, %v18170_v55  ;;  %v18544_v55 = vld [vmem:[#allocation2 + $0x150] sm:$0xff] }
  0xe2   : > { %15041 = vmatmul.mubr.msk.f32.gmra.mrb[22].mxu1 %vm682_vm0, %v18518_v13  ;;  %15274 = vmatmul.mubr.msk.f32.gmra.mrb[4].mxu0 %vm682_vm0, %v18172_v56  ;;  %v18542_v56 = vld [vmem:[#allocation2 + $0x140] sm:$0xff] }
  0xe3   : > { %15043 = vmatprep.mubr.msk.f32.mxu1 %vm682_vm0, %v18520_v19  ;;  %15276 = vmatprep.mubr.msk.f32.mxu0 %vm682_vm0, %v18178_v58  ;;  %v18556_v58 = vld [vmem:[#allocation2 + $0x168] sm:$0xff] }
  0xe6   : > { %15044 = vmatmul.mubr.msk.f32.gmra.mrb[24].mxu1 %vm682_vm0, %v18530_v37  ;;  %15277 = vmatmul.mubr.msk.f32.gmra.mrb[6].mxu0 %vm682_vm0, %v18190_v60  ;;  %v18554_v60 = vld [vmem:[#allocation2 + $0x158] sm:$0xff] }
  0xe7   : > { %15046 = vmatprep.mubr.msk.f32.mxu1 %vm682_vm0, %v18532_v53  ;;  %15279 = vmatprep.mubr.msk.f32.mxu0 %vm682_vm0, %v18192_v61 }
  0xea   : > { %15047 = vmatmul.mubr.msk.f32.gmra.mrb[26].mxu1 %vm682_vm0, %v18542_v56  ;;  %15280 = vmatmul.mubr.msk.f32.gmra.mrb[8].mxu0 %vm682_vm0, %v18200_v62  ;;  %v18566_v62 = vld [vmem:[#allocation2 + $0x170] sm:$0xff] }
  0xeb   : > { %15049 = vmatprep.mubr.msk.f32.mxu1 %vm682_vm0, %v18544_v55  ;;  %15282 = vmatprep.mubr.msk.f32.mxu0 %vm682_vm0, %v18210_v1  ;;  %v18572_v1 = vld [vmem:[#allocation2 + $0xd9] sm:$0xff] }
  0xec   : > { %4600 = vst.msk [vmem:[#allocation2 + $0xd8] sm:$0xff] %vm682_vm0, %v23039_v36 }
  0xee   : > { %15050 = vmatmul.mubr.msk.f32.gmra.mrb[28].mxu1 %vm682_vm0, %v18554_v60  ;;  %15283 = vmatmul.mubr.msk.f32.gmra.mrb[10].mxu0 %vm682_vm0, %v18216_v3 }
  0xef   : > { %15052 = vmatprep.mubr.msk.f32.mxu1 %vm682_vm0, %v18556_v58  ;;  %15285 = vmatprep.mubr.msk.f32.mxu0 %vm682_vm0, %v18224_v5  ;;  %v18580_v5 = vld [vmem:[#allocation2 + $0xe1] sm:$0xff] }
  0xf0   : > { %23042 = vst [vmem:[#allocation57_spill] sm:$0xff] %v18580_v5  ;;  %4602 = vst.msk [vmem:[#allocation2 + $0xe8] sm:$0x3] %vm685_vm1, %v23039_v36  ;;  %v18598_v5 = vld [vmem:[#allocation2 + $0xf9] sm:$0xff] }
  0xf1   : > { %4601 = vst.msk [vmem:[#allocation2 + $0xe0] sm:$0xff] %vm682_vm0, %v23039_v36  ;;  %23044 = vst [vmem:[#allocation59_spill] sm:$0xff] %v18598_v5  ;;  %v18715_v5 = vld [vmem:[#allocation2 + $0x1a1] sm:$0xff] }
  0xf2   : > { %15053 = vmatmul.mubr.msk.f32.gmra.mrb[30].mxu1 %vm682_vm0, %v18566_v62  ;;  %15286 = vmatmul.mubr.msk.f32.gmra.mrb[12].mxu0 %vm682_vm0, %v18236_v11  ;;  %4605 = vst.msk [vmem:[#allocation2 + $0x100] sm:$0x3] %vm685_vm1, %v23039_v36 }
  0xf3   : > { %15059 = vmatprep.mubr.msk.f32.mxu1 %vm682_vm0, %v18266_v38  ;;  %15288 = vmatprep.mubr.msk.f32.mxu0 %vm682_vm0, %v18474_v63  ;;  %v18590_v38 = vld [vmem:[#allocation2 + $0xf1] sm:$0xff] }
  0xf4   : > { %23043 = vst [vmem:[#allocation58_spill] sm:$0xff] %v18590_v38  ;;  %4603 = vst.msk [vmem:[#allocation2 + $0xf0] sm:$0xff] %vm682_vm0, %v23039_v36  ;;  %v18719_v38 = vld [vmem:[#allocation2 + $0x1a2] sm:$0xff] }
  0xf5   : > { %4604 = vst.msk [vmem:[#allocation2 + $0xf8] sm:$0xff] %vm682_vm0, %v23039_v36 }
  0xf6   : > { %15060 = vmatmul.mubr.msk.f32.vlgmr.msra.gmra.mrb[0].mxu1 %vm682_vm0, %v18268_v42  ;;  %15289 = vmatmul.mubr.msk.f32.gmra.mrb[14].mxu0 %vm682_vm0, %v18490_v45  ;;  %v18618_v42 = vld [vmem:[#allocation2 + $0x111] sm:$0xff]  ;;  %4626 = vst.msk [vmem:[#allocation2 + $0x1a8] sm:$0x3] %vm685_vm1, %v23039_v36 }
  0xf7   : > { %15062 = vmatprep.mubr.msk.f32.mxu1 %vm682_vm0, %v18119_v41  ;;  %15291 = vmatprep.mubr.msk.f32.mxu0 %vm682_vm0, %v18492_v46  ;;  %v18610_v41 = vld [vmem:[#allocation2 + $0x109] sm:$0xff]  ;;  %23046 = vst [vmem:[#allocation61_spill] sm:$0xff] %v18618_v42  ;;  %4608 = vst.msk [vmem:[#allocation2 + $0x118] sm:$0x3] %vm685_vm1, %v23039_v36  ;;  %v18710_v42 = vld [vmem:[#allocation2 + $0x19a] sm:$0xff] }
  0xf8   : > { %16370 = vmatpush3.bf16.msra.mxu1 %v18363_v9  ;;  %23045 = vst [vmem:[#allocation60_spill] sm:$0xff] %v18610_v41  ;;  %4606 = vst.msk [vmem:[#allocation2 + $0x108] sm:$0xff] %vm682_vm0, %v23039_v36  ;;  %v18636_v9 = vld [vmem:[#allocation2 + $0x129] sm:$0xff]  ;;  %v3061_v41 = vld [vmem:[#allocation2 + $0x1a0] sm:$0xff] }
  0xf9   : > { %16463 = vmatprep.subr.bf16.mxu1 %v17908_v8  ;;  %4607 = vst.msk [vmem:[#allocation2 + $0x110] sm:$0xff] %vm682_vm0, %v23039_v36  ;;  %23048 = vst [vmem:[#allocation63_spill] sm:$0xff] %v18636_v9  ;;  %v18654_v9 = vld [vmem:[#allocation2 + $0x141] sm:$0xff] }
  0xfa   : > { %15063 = vmatmul.mubr.msk.f32.gmra.mrb[2].mxu1 %vm682_vm0, %v18032_v21  ;;  %15292 = vmatmul.mubr.msk.f32.gmra.mrb[16].mxu0 %vm682_vm0, %v18503_v52  ;;  %v18628_v21 = vld [vmem:[#allocation2 + $0x121] sm:$0xff]  ;;  %4611 = vst.msk [vmem:[#allocation2 + $0x130] sm:$0x3] %vm685_vm1, %v23039_v36  ;;  %23050 = vst [vmem:[#allocation65_spill] sm:$0xff] %v18654_v9  ;;  %v18672_v9 = vld [vmem:[#allocation2 + $0x159] sm:$0xff] }
  0xfb   : > { %15065 = vmatprep.mubr.msk.f32.mxu1 %vm682_vm0, %v18135_v47  ;;  %15294 = vmatprep.mubr.msk.f32.mxu0 %vm682_vm0, %v18507_v48  ;;  %23047 = vst [vmem:[#allocation62_spill] sm:$0xff] %v18628_v21  ;;  %4609 = vst.msk [vmem:[#allocation2 + $0x120] sm:$0xff] %vm682_vm0, %v23039_v36  ;;  %v18646_v21 = vld [vmem:[#allocation2 + $0x139] sm:$0xff] }
  0xfc   : > { %4610 = vst.msk [vmem:[#allocation2 + $0x128] sm:$0xff] %vm682_vm0, %v23039_v36  ;;  %23049 = vst [vmem:[#allocation64_spill] sm:$0xff] %v18646_v21  ;;  %v18664_v21 = vld [vmem:[#allocation2 + $0x151] sm:$0xff] }
  0xfd   : > { %4612 = vst.msk [vmem:[#allocation2 + $0x138] sm:$0xff] %vm682_vm0, %v23039_v36  ;;  %4613 = vst.msk [vmem:[#allocation2 + $0x140] sm:$0xff] %vm682_vm0, %v23039_v36 }
  0xfe   : > { %15066 = vmatmul.mubr.msk.f32.gmra.mrb[4].mxu1 %vm682_vm0, %v18064_v24  ;;  %15295 = vmatmul.mubr.msk.f32.gmra.mrb[18].mxu0 %vm682_vm0, %v18518_v13  ;;  %4614 = vst.msk [vmem:[#allocation2 + $0x148] sm:$0x3] %vm685_vm1, %v23039_v36  ;;  %23051 = vst [vmem:[#allocation66_spill] sm:$0xff] %v18664_v21  ;;  %v18682_v21 = vld [vmem:[#allocation2 + $0x169] sm:$0xff] }
  0xff   : > { %15068 = vmatprep.mubr.msk.f32.mxu1 %vm682_vm0, %v18148_v49  ;;  %15297 = vmatprep.mubr.msk.f32.mxu0 %vm682_vm0, %v18520_v19  ;;  %4615 = vst.msk [vmem:[#allocation2 + $0x150] sm:$0xff] %vm682_vm0, %v23039_v36  ;;  %23052 = vst [vmem:[#allocation67_spill] sm:$0xff] %v18672_v9  ;;  %v18690_v9 = vld [vmem:[#allocation2 + $0x171] sm:$0xff] }
 0x100   : > { %4617 = vst.msk [vmem:[#allocation2 + $0x160] sm:$0x3] %vm685_vm1, %v23039_v36  ;;  %23053 = vst [vmem:[#allocation68_spill] sm:$0xff] %v18682_v21  ;;  %v3060_v21 = vld [vmem:[#allocation2 + $0x198] sm:$0xff] }
 0x101   : > { %4616 = vst.msk [vmem:[#allocation2 + $0x158] sm:$0xff] %vm682_vm0, %v23039_v36  ;;  %4618 = vst.msk [vmem:[#allocation2 + $0x168] sm:$0xff] %vm682_vm0, %v23039_v36 }
 0x102   : > { %15069 = vmatmul.mubr.msk.f32.gmra.mrb[6].mxu1 %vm682_vm0, %v18070_v27  ;;  %15298 = vmatmul.mubr.msk.f32.gmra.mrb[20].mxu0 %vm682_vm0, %v18530_v37  ;;  %23054 = vst [vmem:[#allocation69_spill] sm:$0xff] %v18690_v9  ;;  %4620 = vst.msk [vmem:[#allocation2 + $0x178] sm:$0x3] %vm685_vm1, %v23039_v36  ;;  %v18708_v9 = vld [vmem:[#allocation2 + $0x199] sm:$0xff] }
 0x103   : > { %15071 = vmatprep.mubr.msk.f32.mxu1 %vm682_vm0, %v18168_v54  ;;  %15300 = vmatprep.mubr.msk.f32.mxu0 %vm682_vm0, %v18532_v53  ;;  %4619 = vst.msk [vmem:[#allocation2 + $0x170] sm:$0xff] %vm682_vm0, %v23039_v36  ;;  %4624 = vst.msk [vmem:[#allocation2 + $0x198] sm:$0xff] %vm682_vm0, %v23039_v36 }
 0x104   : > { %4625 = vst.msk [vmem:[#allocation2 + $0x1a0] sm:$0xff] %vm682_vm0, %v23039_v36 }
 0x106   : > { %15072 = vmatmul.mubr.msk.f32.gmra.mrb[8].mxu1 %vm682_vm0, %v18078_v29  ;;  %15301 = vmatmul.mubr.msk.f32.gmra.mrb[22].mxu0 %vm682_vm0, %v18542_v56 }
 0x107   : > { %15074 = vmatprep.mubr.msk.f32.mxu1 %vm682_vm0, %v18176_v57  ;;  %15303 = vmatprep.mubr.msk.f32.mxu0 %vm682_vm0, %v18544_v55 }
 0x10a   : > { %15075 = vmatmul.mubr.msk.f32.gmra.mrb[10].mxu1 %vm682_vm0, %v18088_v31  ;;  %15304 = vmatmul.mubr.msk.f32.gmra.mrb[24].mxu0 %vm682_vm0, %v18554_v60 }
 0x10b   : > { %15077 = vmatprep.mubr.msk.f32.mxu1 %vm682_vm0, %v18188_v59  ;;  %15306 = vmatprep.mubr.msk.f32.mxu0 %vm682_vm0, %v18556_v58 }
 0x10e   : > { %15078 = vmatmul.mubr.msk.f32.gmra.mrb[12].mxu1 %vm682_vm0, %v18098_v34  ;;  %15307 = vmatmul.mubr.msk.f32.gmra.mrb[26].mxu0 %vm682_vm0, %v18566_v62 }
 0x10f   : > { %15080 = vmatprep.mubr.msk.f32.mxu1 %vm682_vm0, %v18208_v0  ;;  %15309 = vmatprep.mubr.msk.f32.mxu0 %vm682_vm0, %v18450_v40 }
 0x112   : > { %15081 = vmatmul.mubr.msk.f32.gmra.mrb[14].mxu1 %vm682_vm0, %v18109_v39  ;;  %15310 = vmatmul.mubr.msk.f32.gmra.mrb[28].mxu0 %vm682_vm0, %v18458_v18 }
 0x113   : > { %15083 = vmatprep.mubr.msk.f32.mxu1 %vm682_vm0, %v18214_v2  ;;  %15312 = vmatprep.mubr.msk.f32.mxu0 %vm682_vm0, %v3060_v21  ;;  %v23066_v21 = vld [vmem:[#allocation23_spill] sm:$0xff] }
 0x116   : > { %15084 = vmatmul.mubr.msk.f32.gmra.mrb[16].mxu1 %vm682_vm0, %v18122_v43  ;;  %15313 = vmatmul.mubr.msk.f32.gmra.mrb[30].mxu0 %vm682_vm0, %v3061_v41  ;;  %v23065_v41 = vld [vmem:[#allocation35_spill] sm:$0xff] }
 0x117   : > { %15086 = vmatprep.mubr.msk.f32.mxu1 %vm682_vm0, %v18361_v10  ;;  %15319 = vmatprep.mubr.msk.f32.mxu0 %vm682_vm0, %v18020_v15  ;;  %v23055_v15 = vld [vmem:[#allocation19_spill] sm:$0xff] }
 0x11a   : > { %15087 = vmatmul.mubr.msk.f32.gmra.mrb[18].mxu1 %vm682_vm0, %v18372_v4  ;;  %15320 = vmatmul.mubr.msk.f32.vlgmr.msra.gmra.mrb[0].mxu0 %vm682_vm0, %v18047_v22  ;;  %v23056_v22 = vld [vmem:[#allocation49_spill] sm:$0xff] }
 0x11b   : > { %16390 = vmatpush3.bf16.msra.mxu0 %v18494_v33  ;;  %15089 = vmatprep.mubr.msk.f32.mxu1 %vm682_vm0, %v18375_v20  ;;  %v23063_v33 = vld [vmem:[#allocation21_spill] sm:$0xff] }
 0x11c   : > { %15322 = vmatprep.mubr.msk.f32.mxu0 %vm682_vm0, %v18051_v23  ;;  %v23057_v23 = vld [vmem:[#allocation25_spill] sm:$0xff] }
 0x11e   : > { %15090 = vmatmul.mubr.msk.f32.gmra.mrb[20].mxu1 %vm682_vm0, %v18386_v35  ;;  %15323 = vmatmul.mubr.msk.f32.gmra.mrb[2].mxu0 %vm682_vm0, %v18062_v12  ;;  %v23058_v12 = vld [vmem:[#allocation50_spill] sm:$0xff] }
 0x11f   : > { %15092 = vmatprep.mubr.msk.f32.mxu1 %vm682_vm0, %v18388_v14  ;;  %15325 = vmatprep.mubr.msk.f32.mxu0 %vm682_vm0, %v18066_v26  ;;  %v23059_v26 = vld [vmem:[#allocation20_spill] sm:$0xff] }
 0x122   : > { %15093 = vmatmul.mubr.msk.f32.gmra.mrb[22].mxu1 %vm682_vm0, %v18398_v25  ;;  %15326 = vmatmul.mubr.msk.f32.gmra.mrb[4].mxu0 %vm682_vm0, %v18076_v28  ;;  %v23060_v28 = vld [vmem:[#allocation51_spill] sm:$0xff] }
 0x123   : > { %15095 = vmatprep.mubr.msk.f32.mxu1 %vm682_vm0, %v18400_v16  ;;  %15328 = vmatprep.mubr.msk.f32.mxu0 %vm682_vm0, %v18092_v32  ;;  %v23062_v32 = vld [vmem:[#allocation52_spill] sm:$0xff] }
 0x126   : > { %15096 = vmatmul.mubr.msk.f32.gmra.mrb[24].mxu1 %vm682_vm0, %v18410_v17  ;;  %15329 = vmatmul.mubr.msk.f32.gmra.mrb[6].mxu0 %vm682_vm0, %v18086_v30  ;;  %v23061_v30 = vld [vmem:[#allocation32_spill] sm:$0xff] }
 0x127   : > { %15098 = vmatprep.mubr.msk.f32.mxu1 %vm682_vm0, %v18412_v7  ;;  %15331 = vmatprep.mubr.msk.f32.mxu0 %vm682_vm0, %v18126_v44  ;;  %v23064_v44 = vld [vmem:[#allocation22_spill] sm:$0xff] }
 0x12a   : > { %15099 = vmatmul.mubr.msk.f32.gmra.mrb[26].mxu1 %vm682_vm0, %v18422_v6  ;;  %15332 = vmatmul.mubr.msk.f32.gmra.mrb[8].mxu0 %vm682_vm0, %v23055_v15  ;;  %v23067_v15 = vld [vmem:[#allocation36_spill] sm:$0xff] }
 0x12b   : > { %15101 = vmatprep.mubr.msk.f32.mxu1 %vm682_vm0, %v23056_v22  ;;  %15334 = vmatprep.mubr.msk.f32.mxu0 %vm682_vm0, %v23057_v23  ;;  %v23068_v23 = vld [vmem:[#allocation24_spill] sm:$0xff] }
 0x12e   : > { %15102 = vmatmul.mubr.msk.f32.gmra.mrb[28].mxu1 %vm682_vm0, %v23058_v12  ;;  %15335 = vmatmul.mubr.msk.f32.gmra.mrb[10].mxu0 %vm682_vm0, %v23059_v26  ;;  %v23069_v26 = vld [vmem:[#allocation37_spill] sm:$0xff] }
 0x12f   : > { %15104 = vmatprep.mubr.msk.f32.mxu1 %vm682_vm0, %v23060_v28  ;;  %15337 = vmatprep.mubr.msk.f32.mxu0 %vm682_vm0, %v23061_v30  ;;  %v23070_v30 = vld [vmem:[#allocation38_spill] sm:$0xff] }
 0x132   : > { %15105 = vmatmul.mubr.msk.f32.gmra.mrb[30].mxu1 %vm682_vm0, %v23062_v32  ;;  %15338 = vmatmul.mubr.msk.f32.gmra.mrb[12].mxu0 %vm682_vm0, %v23063_v33  ;;  %v23071_v33 = vld [vmem:[#allocation39_spill] sm:$0xff] }
 0x133   : > { %15111 = vmatprep.mubr.msk.f32.mxu1 %vm682_vm0, %v23064_v44  ;;  %15340 = vmatprep.mubr.msk.f32.mxu0 %vm682_vm0, %v23065_v41  ;;  %v23072_v44 = vld [vmem:[#allocation26_spill] sm:$0xff]  ;;  %v23073_v41 = vld [vmem:[#allocation40_spill] sm:$0xff] }
 0x136   : > { %15112 = vmatmul.mubr.msk.f32.vlgmr.msra.gmra.mrb[0].mxu1 %vm682_vm0, %v23066_v21  ;;  %15341 = vmatmul.mubr.msk.f32.gmra.mrb[14].mxu0 %vm682_vm0, %v23067_v15  ;;  %v23074_v21 = vld [vmem:[#allocation27_spill] sm:$0xff]  ;;  %v23077_v15 = vld [vmem:[#allocation42_spill] sm:$0xff] }
 0x137   : > { %15114 = vmatprep.mubr.msk.f32.mxu1 %vm682_vm0, %v23068_v23  ;;  %15343 = vmatprep.mubr.msk.f32.mxu0 %vm682_vm0, %v23069_v26  ;;  %v23079_v23 = vld [vmem:[#allocation43_spill] sm:$0xff]  ;;  %v23080_v26 = vld [vmem:[#allocation30_spill] sm:$0xff] }
 0x138   : > { %16464 = vmatpush3.bf16.msra.mxu1 %v17908_v8  ;;  %v23075_v8 = vld [vmem:[#allocation41_spill] sm:$0xff] }
 0x13a   : > { %15115 = vmatmul.mubr.msk.f32.gmra.mrb[2].mxu1 %vm682_vm0, %v18150_v50  ;;  %15344 = vmatmul.mubr.msk.f32.gmra.mrb[16].mxu0 %vm682_vm0, %v23070_v30  ;;  %v23076_v50 = vld [vmem:[#allocation28_spill] sm:$0xff] }
 0x13b   : > { %15117 = vmatprep.mubr.msk.f32.mxu1 %vm682_vm0, %v18152_v51  ;;  %15346 = vmatprep.mubr.msk.f32.mxu0 %vm682_vm0, %v23071_v33  ;;  %v23078_v51 = vld [vmem:[#allocation29_spill] sm:$0xff]  ;;  %v23081_v30 = vld [vmem:[#allocation44_spill] sm:$0xff] }
 0x13c   : > { %v23082_v33 = vld [vmem:[#allocation45_spill] sm:$0xff] }
 0x13e   : > { %15118 = vmatmul.mubr.msk.f32.gmra.mrb[4].mxu1 %vm682_vm0, %v23072_v44  ;;  %15347 = vmatmul.mubr.msk.f32.gmra.mrb[18].mxu0 %vm682_vm0, %v23073_v41  ;;  %v23083_v44 = vld [vmem:[#allocation31_spill] sm:$0xff]  ;;  %v23084_v41 = vld [vmem:[#allocation46_spill] sm:$0xff] }
 0x13f   : > { %15120 = vmatprep.mubr.msk.f32.mxu1 %vm682_vm0, %v23074_v21  ;;  %15349 = vmatprep.mubr.msk.f32.mxu0 %vm682_vm0, %v23075_v8  ;;  %v23085_v21 = vld [vmem:[#allocation33_spill] sm:$0xff]  ;;  %v23086_v8 = vld [vmem:[#allocation47_spill] sm:$0xff] }
 0x142   : > { %15121 = vmatmul.mubr.msk.f32.gmra.mrb[6].mxu1 %vm682_vm0, %v23076_v50  ;;  %15350 = vmatmul.mubr.msk.f32.gmra.mrb[20].mxu0 %vm682_vm0, %v23077_v15  ;;  %v23087_v50 = vld [vmem:[#allocation48_spill] sm:$0xff]  ;;  %v23089_v15 = vld [vmem:[#allocation54_spill] sm:$0xff] }
 0x143   : > { %15123 = vmatprep.mubr.msk.f32.mxu1 %vm682_vm0, %v23078_v51  ;;  %15352 = vmatprep.mubr.msk.f32.mxu0 %vm682_vm0, %v23079_v23  ;;  %v23090_v51 = vld [vmem:[#allocation56_spill] sm:$0xff] }
 0x146   : > { %15124 = vmatmul.mubr.msk.f32.gmra.mrb[8].mxu1 %vm682_vm0, %v23080_v26  ;;  %15353 = vmatmul.mubr.msk.f32.gmra.mrb[22].mxu0 %vm682_vm0, %v23081_v30 }
 0x147   : > { %15126 = vmatprep.mubr.msk.f32.mxu1 %vm682_vm0, %v18192_v61  ;;  %15355 = vmatprep.mubr.msk.f32.mxu0 %vm682_vm0, %v23082_v33  ;;  %v23088_v61 = vld [vmem:[#allocation34_spill] sm:$0xff] }
 0x14a   : > { %15127 = vmatmul.mubr.msk.f32.gmra.mrb[10].mxu1 %vm682_vm0, %v23083_v44  ;;  %15356 = vmatmul.mubr.msk.f32.gmra.mrb[24].mxu0 %vm682_vm0, %v23084_v41 }
 0x14b   : > { %15129 = vmatprep.mubr.msk.f32.mxu1 %vm682_vm0, %v23085_v21  ;;  %15358 = vmatprep.mubr.msk.f32.mxu0 %vm682_vm0, %v23086_v8 }
 0x14e   : > { %15130 = vmatmul.mubr.msk.f32.gmra.mrb[12].mxu1 %vm682_vm0, %v18216_v3  ;;  %15359 = vmatmul.mubr.msk.f32.gmra.mrb[26].mxu0 %vm682_vm0, %v23087_v50 }
 0x14f   : > { %15132 = vmatprep.mubr.msk.f32.mxu1 %vm682_vm0, %v23088_v61  ;;  %15361 = vmatprep.mubr.msk.f32.mxu0 %vm682_vm0, %v23089_v15 }
 0x152   : > { %15133 = vmatmul.mubr.msk.f32.gmra.mrb[14].mxu1 %vm682_vm0, %v18236_v11  ;;  %15362 = vmatmul.mubr.msk.f32.gmra.mrb[28].mxu0 %vm682_vm0, %v23090_v51 }
 0x153   : > { %15135 = vmatprep.mubr.msk.f32.mxu1 %vm682_vm0, %v18474_v63  ;;  %15364 = vmatprep.mubr.msk.f32.mxu0 %vm682_vm0, %v18708_v9 }
 0x156   : > { %15136 = vmatmul.mubr.msk.f32.gmra.mrb[16].mxu1 %vm682_vm0, %v18490_v45  ;;  %15365 = vmatmul.mubr.msk.f32.gmra.mrb[30].mxu0 %vm682_vm0, %v18715_v5  ;;  %v23100_v45 = vld [vmem:[#allocation66_spill] sm:$0xff] }
 0x157   : > { %15138 = vmatprep.mubr.msk.f32.mxu1 %vm682_vm0, %v18492_v46  ;;  %15371 = vmatprep.mubr.msk.f32.mxu0 %vm682_vm0, %v18135_v47  ;;  %v23101_v46 = vld [vmem:[#allocation67_spill] sm:$0xff]  ;;  %v23102_v47 = vld [vmem:[#allocation68_spill] sm:$0xff] }
 0x15a   : > { %15139 = vmatmul.mubr.msk.f32.gmra.mrb[18].mxu1 %vm682_vm0, %v18503_v52  ;;  %15372 = vmatmul.mubr.msk.f32.vlgmr.msra.gmra.mrb[0].mxu0 %vm682_vm0, %v18064_v24  ;;  %v23091_v24 = vld [vmem:[#allocation57_spill] sm:$0xff]  ;;  %v23105_v52 = vld [vmem:[#allocation55_spill] sm:$0xff] }
 0x15b   : > { %15141 = vmatprep.mubr.msk.f32.mxu1 %vm682_vm0, %v18507_v48  ;;  %15374 = vmatprep.mubr.msk.f32.mxu0 %vm682_vm0, %v18148_v49  ;;  %v23103_v48 = vld [vmem:[#allocation69_spill] sm:$0xff] }
 0x15c   : > { %v23104_v49 = vld [vmem:[#allocation53_spill] sm:$0xff] }
 0x15e   : > { %15142 = vmatmul.mubr.msk.f32.gmra.mrb[20].mxu1 %vm682_vm0, %v18518_v13  ;;  %15375 = vmatmul.mubr.msk.f32.gmra.mrb[2].mxu0 %vm682_vm0, %v18070_v27  ;;  %v23092_v27 = vld [vmem:[#allocation58_spill] sm:$0xff] }
 0x15f   : > { %15144 = vmatprep.mubr.msk.f32.mxu1 %vm682_vm0, %v18520_v19  ;;  %15377 = vmatprep.mubr.msk.f32.mxu0 %vm682_vm0, %v18168_v54 }
 0x162   : > { %15145 = vmatmul.mubr.msk.f32.gmra.mrb[22].mxu1 %vm682_vm0, %v18530_v37  ;;  %15378 = vmatmul.mubr.msk.f32.gmra.mrb[4].mxu0 %vm682_vm0, %v18078_v29  ;;  %v23093_v29 = vld [vmem:[#allocation59_spill] sm:$0xff] }
 0x163   : > { %15147 = vmatprep.mubr.msk.f32.mxu1 %vm682_vm0, %v18532_v53  ;;  %15380 = vmatprep.mubr.msk.f32.mxu0 %vm682_vm0, %v18176_v57 }
 0x166   : > { %15148 = vmatmul.mubr.msk.f32.gmra.mrb[24].mxu1 %vm682_vm0, %v18542_v56  ;;  %15381 = vmatmul.mubr.msk.f32.gmra.mrb[6].mxu0 %vm682_vm0, %v18088_v31  ;;  %v23094_v31 = vld [vmem:[#allocation60_spill] sm:$0xff] }
 0x167   : > { %15150 = vmatprep.mubr.msk.f32.mxu1 %vm682_vm0, %v18544_v55  ;;  %15383 = vmatprep.mubr.msk.f32.mxu0 %vm682_vm0, %v18188_v59 }
 0x16a   : > { %15151 = vmatmul.mubr.msk.f32.gmra.mrb[26].mxu1 %vm682_vm0, %v18554_v60  ;;  %15384 = vmatmul.mubr.msk.f32.gmra.mrb[8].mxu0 %vm682_vm0, %v18098_v34  ;;  %v23095_v34 = vld [vmem:[#allocation61_spill] sm:$0xff] }
 0x16b   : > { %15153 = vmatprep.mubr.msk.f32.mxu1 %vm682_vm0, %v18556_v58  ;;  %15386 = vmatprep.mubr.msk.f32.mxu0 %vm682_vm0, %v18208_v0 }
 0x16e   : > { %15154 = vmatmul.mubr.msk.f32.gmra.mrb[28].mxu1 %vm682_vm0, %v18566_v62  ;;  %15387 = vmatmul.mubr.msk.f32.gmra.mrb[10].mxu0 %vm682_vm0, %v18109_v39  ;;  %v23097_v39 = vld [vmem:[#allocation63_spill] sm:$0xff] }
 0x16f   : > { %15156 = vmatprep.mubr.msk.f32.mxu1 %vm682_vm0, %v18450_v40  ;;  %15389 = vmatprep.mubr.msk.f32.mxu0 %vm682_vm0, %v18214_v2  ;;  %v23098_v40 = vld [vmem:[#allocation64_spill] sm:$0xff] }
 0x172   : > { %15157 = vmatmul.mubr.msk.f32.gmra.mrb[30].mxu1 %vm682_vm0, %v18458_v18  ;;  %15390 = vmatmul.mubr.msk.f32.gmra.mrb[12].mxu0 %vm682_vm0, %v18122_v43  ;;  %v23099_v43 = vld [vmem:[#allocation65_spill] sm:$0xff] }
 0x173   : > { %15187 = vmatprep.mubr.msk.f32.mxu1 %vm682_vm0, %v18572_v1  ;;  %15392 = vmatprep.mubr.msk.f32.mxu0 %vm682_vm0, %v18361_v10 }
 0x176   : > { %15188 = vmatmul.mubr.msk.f32.vlgmr.msra.gmra.mrb[16].mxu1 %vm682_vm0, %v23091_v24  ;;  %15393 = vmatmul.mubr.msk.f32.gmra.mrb[14].mxu0 %vm682_vm0, %v18372_v4  ;;  %v23096_v4 = vld [vmem:[#allocation62_spill] sm:$0xff] }
 0x177   : > { %15190 = vmatprep.mubr.msk.f32.mxu1 %vm682_vm0, %v23092_v27  ;;  %15395 = vmatprep.mubr.msk.f32.mxu0 %vm682_vm0, %v18375_v20 }
 0x17a   : > { %15191 = vmatmul.mubr.msk.f32.gmra.mrb[18].mxu1 %vm682_vm0, %v23093_v29  ;;  %15396 = vmatmul.mubr.msk.f32.gmra.mrb[16].mxu0 %vm682_vm0, %v18386_v35 }
 0x17b   : > { %15193 = vmatprep.mubr.msk.f32.mxu1 %vm682_vm0, %v23094_v31  ;;  %15398 = vmatprep.mubr.msk.f32.mxu0 %vm682_vm0, %v18388_v14 }
 0x17e   : > { %15194 = vmatmul.mubr.msk.f32.gmra.mrb[20].mxu1 %vm682_vm0, %v23095_v34  ;;  %15399 = vmatmul.mubr.msk.f32.gmra.mrb[18].mxu0 %vm682_vm0, %v18398_v25 }
 0x17f   : > { %15196 = vmatprep.mubr.msk.f32.mxu1 %vm682_vm0, %v23096_v4  ;;  %15401 = vmatprep.mubr.msk.f32.mxu0 %vm682_vm0, %v18400_v16 }
 0x182   : > { %15197 = vmatmul.mubr.msk.f32.gmra.mrb[22].mxu1 %vm682_vm0, %v23097_v39  ;;  %15402 = vmatmul.mubr.msk.f32.gmra.mrb[20].mxu0 %vm682_vm0, %v18410_v17 }
 0x183   : > { %15199 = vmatprep.mubr.msk.f32.mxu1 %vm682_vm0, %v23098_v40  ;;  %15404 = vmatprep.mubr.msk.f32.mxu0 %vm682_vm0, %v18412_v7 }
 0x186   : > { %15200 = vmatmul.mubr.msk.f32.gmra.mrb[24].mxu1 %vm682_vm0, %v23099_v43  ;;  %15405 = vmatmul.mubr.msk.f32.gmra.mrb[22].mxu0 %vm682_vm0, %v18422_v6 }
 0x187   : > { %15202 = vmatprep.mubr.msk.f32.mxu1 %vm682_vm0, %v23100_v45  ;;  %15407 = vmatprep.mubr.msk.f32.mxu0 %vm682_vm0, %v23056_v22 }
 0x18a   : > { %15203 = vmatmul.mubr.msk.f32.gmra.mrb[26].mxu1 %vm682_vm0, %v23101_v46  ;;  %15408 = vmatmul.mubr.msk.f32.gmra.mrb[24].mxu0 %vm682_vm0, %v23058_v12 }
 0x18b   : > { %15205 = vmatprep.mubr.msk.f32.mxu1 %vm682_vm0, %v23102_v47  ;;  %15410 = vmatprep.mubr.msk.f32.mxu0 %vm682_vm0, %v23060_v28 }
 0x18e   : > { %15206 = vmatmul.mubr.msk.f32.gmra.mrb[28].mxu1 %vm682_vm0, %v23103_v48  ;;  %15411 = vmatmul.mubr.msk.f32.gmra.mrb[26].mxu0 %vm682_vm0, %v23062_v32 }
 0x18f   : > { %15208 = vmatprep.mubr.msk.f32.mxu1 %vm682_vm0, %v23089_v15  ;;  %15413 = vmatprep.mubr.msk.f32.mxu0 %vm682_vm0, %v23104_v49 }
 0x192   : > { %15209 = vmatmul.mubr.msk.f32.gmra.mrb[30].mxu1 %vm682_vm0, %v23090_v51  ;;  %15414 = vmatmul.mubr.msk.f32.gmra.mrb[28].mxu0 %vm682_vm0, %v23105_v52 }
 0x193   : > { %15416 = vmatprep.mubr.msk.f32.mxu0 %vm682_vm0, %v18710_v42 }
 0x196   : > { %15417 = vmatmul.mubr.msk.f32.gmra.mrb[30].mxu0 %vm682_vm0, %v18719_v38 }
 0x209   : > { %v15113_v53 = vpop.f32.mrb[0].mxu1 }
 0x20a   : > { %v2064_v54 = vpop.f32.mrb[1].mxu1 }
 0x20d   : > { %v15116_v55 = vpop.f32.mrb[2].mxu1 }
 0x20e   : > { %v2074_v56 = vpop.f32.mrb[3].mxu1 }
 0x211   : > { %v15119_v57 = vpop.f32.mrb[4].mxu1 }
 0x212   : > { %v2084_v58 = vpop.f32.mrb[5].mxu1 }
 0x215   : > { %v15122_v59 = vpop.f32.mrb[6].mxu1 }
 0x216   : > { %v2094_v60 = vpop.f32.mrb[7].mxu1 }
 0x219   : > { %v15125_v62 = vpop.f32.mrb[8].mxu1 }
 0x21a   : > { %v2104_v63 = vpop.f32.mrb[9].mxu1 }
 0x21d   : > { %v15128_v0 = vpop.f32.mrb[10].mxu1 }
 0x21e   : > { %v2114_v1 = vpop.f32.mrb[11].mxu1 }
 0x221   : > { %v15131_v2 = vpop.f32.mrb[12].mxu1 }
 0x222   : > { %v2124_v3 = vpop.f32.mrb[13].mxu1 }
 0x225   : > { %v15134_v5 = vpop.f32.mrb[14].mxu1 }
 0x226   : > { %v2134_v11 = vpop.f32.mrb[15].mxu1 }
 0x22d   : > { %v15373_v18 = vpop.f32.mrb[0].mxu0 }
 0x22e   : > { %v18982_v6 = vadd.f32 %v15373_v18, %v15113_v53  ;;  %v4000_v7 = vpop.f32.mrb[1].mxu0 }
 0x22f   : > { %v18984_v17 = vadd.f32 %v4000_v7, %v2064_v54 }
 0x230   : > { %v4192_v10 = vsel %vm682_vm0, %v18982_v6, 0.0 }
 0x231   : > { %v4191_v20 = vsel %vm682_vm0, %v18984_v17, 0.0  ;;  %v15376_v35 = vpop.f32.mrb[2].mxu0 }
 0x232   : > { %v18990_v14 = vadd.f32 %v15376_v35, %v15116_v55  ;;  %v4010_v25 = vpop.f32.mrb[3].mxu0  ;;  %v4193_v13 = vadd.f32 %v4192_v10, %v4191_v20 }
 0x233   : > { %v18992_v16 = vadd.f32 %v4010_v25, %v2074_v56 }
 0x234   : > { %v4196_v22 = vsel %vm682_vm0, %v18990_v14, 0.0 }
 0x235   : > { %v4194_v19 = vsel %vm682_vm0, %v18992_v16, 0.0  ;;  %v15379_v37 = vpop.f32.mrb[4].mxu0 }
 0x236   : > { %v4195_v38 = vadd.f32 %v4194_v19, %v4193_v13  ;;  %v18996_v42 = vadd.f32 %v15379_v37, %v15119_v57  ;;  %v4020_v9 = vpop.f32.mrb[5].mxu0 }
 0x237   : > { %v19000_v12 = vadd.f32 %v4020_v9, %v2084_v58 }
 0x238   : > { %v4197_v28 = vadd.f32 %v4196_v22, %v4195_v38  ;;  %v4200_v44 = vsel %vm682_vm0, %v18996_v42, 0.0 }
 0x239   : > { %v4198_v32 = vsel %vm682_vm0, %v19000_v12, 0.0  ;;  %v15382_v23 = vpop.f32.mrb[6].mxu0 }
 0x23a   : > { %v4199_v26 = vadd.f32 %v4198_v32, %v4197_v28  ;;  %v19004_v30 = vadd.f32 %v15382_v23, %v15122_v59  ;;  %v4030_v33 = vpop.f32.mrb[7].mxu0 }
 0x23b   : > { %v19008_v41 = vadd.f32 %v4030_v33, %v2094_v60 }
 0x23c   : > { %v4201_v21 = vadd.f32 %v4200_v44, %v4199_v26  ;;  %v4204_v24 = vsel %vm682_vm0, %v19004_v30, 0.0 }
 0x23d   : > { %v4202_v8 = vsel %vm682_vm0, %v19008_v41, 0.0  ;;  %v15385_v50 = vpop.f32.mrb[8].mxu0 }
 0x23e   : > { %v4203_v61 = vadd.f32 %v4202_v8, %v4201_v21  ;;  %v19012_v15 = vadd.f32 %v15385_v50, %v15125_v62  ;;  %v4040_v51 = vpop.f32.mrb[9].mxu0 }
 0x23f   : > { %v19016_v27 = vadd.f32 %v4040_v51, %v2104_v63 }
 0x240   : > { %v4205_v29 = vadd.f32 %v4204_v24, %v4203_v61  ;;  %v4208_v43 = vsel %vm682_vm0, %v19012_v15, 0.0 }
 0x241   : > { %v4206_v31 = vsel %vm682_vm0, %v19016_v27, 0.0  ;;  %v15388_v34 = vpop.f32.mrb[10].mxu0 }
 0x242   : > { %v4207_v4 = vadd.f32 %v4206_v31, %v4205_v29  ;;  %v19020_v39 = vadd.f32 %v15388_v34, %v15128_v0  ;;  %v4050_v40 = vpop.f32.mrb[11].mxu0 }
 0x243   : > { %v19024_v45 = vadd.f32 %v4050_v40, %v2114_v1 }
 0x244   : > { %v4209_v46 = vadd.f32 %v4208_v43, %v4207_v4  ;;  %v4212_v54 = vsel %vm682_vm0, %v19020_v39, 0.0 }
 0x245   : > { %v4210_v47 = vsel %vm682_vm0, %v19024_v45, 0.0  ;;  %v15391_v48 = vpop.f32.mrb[12].mxu0 }
 0x246   : > { %v4211_v49 = vadd.f32 %v4210_v47, %v4209_v46  ;;  %v19028_v52 = vadd.f32 %v15391_v48, %v15131_v2  ;;  %v4060_v53 = vpop.f32.mrb[13].mxu0 }
 0x247   : > { %v19032_v55 = vadd.f32 %v4060_v53, %v2124_v3 }
 0x248   : > { %v4213_v56 = vadd.f32 %v4212_v54, %v4211_v49  ;;  %v4216_v1 = vsel %vm682_vm0, %v19028_v52, 0.0 }
 0x249   : > { %v4214_v57 = vsel %vm682_vm0, %v19032_v55, 0.0  ;;  %v15189_v58 = vpop.f32.mrb[16].mxu1  ;;  %v15394_v59 = vpop.f32.mrb[14].mxu0 }
 0x24a   : > { %v4215_v60 = vadd.f32 %v4214_v57, %v4213_v56  ;;  %v19036_v62 = vadd.f32 %v15394_v59, %v15134_v5  ;;  %v2531_v63 = vpop.f32.mrb[17].mxu1  ;;  %v4070_v0 = vpop.f32.mrb[15].mxu0 }
 0x24b   : > { %v19040_v2 = vadd.f32 %v4070_v0, %v2134_v11 }
 0x24c   : > { %v4217_v18 = vadd.f32 %v4216_v1, %v4215_v60  ;;  %v4220_v5 = vsel %vm682_vm0, %v19036_v62, 0.0 }
 0x24d   : > { %v4218_v3 = vsel %vm682_vm0, %v19040_v2, 0.0  ;;  %v15192_v7 = vpop.f32.mrb[18].mxu1  ;;  %v15397_v10 = vpop.f32.mrb[16].mxu0 }
 0x24e   : > { %v4219_v20 = vadd.f32 %v4218_v3, %v4217_v18  ;;  %v19044_v35 = vadd.f32 %v15397_v10, %v15189_v58  ;;  %v2541_v25 = vpop.f32.mrb[19].mxu1  ;;  %v4080_v13 = vpop.f32.mrb[17].mxu0 }
 0x24f   : > { %v19048_v19 = vadd.f32 %v4080_v13, %v2531_v63 }
 0x250   : > { %v4221_v37 = vadd.f32 %v4220_v5, %v4219_v20  ;;  %v4224_v26 = vsel %vm682_vm0, %v19044_v35, 0.0 }
 0x251   : > { %v4222_v11 = vsel %vm682_vm0, %v19048_v19, 0.0  ;;  %v15195_v38 = vpop.f32.mrb[20].mxu1  ;;  %v15400_v9 = vpop.f32.mrb[18].mxu0 }
 0x252   : > { %v4223_v22 = vadd.f32 %v4222_v11, %v4221_v37  ;;  %v19052_v28 = vadd.f32 %v15400_v9, %v15192_v7  ;;  %v2551_v32 = vpop.f32.mrb[21].mxu1  ;;  %v4090_v23 = vpop.f32.mrb[19].mxu0 }
 0x253   : > { %v19056_v33 = vadd.f32 %v4090_v23, %v2541_v25 }
 0x254   : > { %v4225_v44 = vadd.f32 %v4224_v26, %v4223_v22  ;;  %v4228_v31 = vsel %vm682_vm0, %v19052_v28, 0.0 }
 0x255   : > { %v4226_v21 = vsel %vm682_vm0, %v19056_v33, 0.0  ;;  %v15198_v8 = vpop.f32.mrb[22].mxu1  ;;  %v15403_v50 = vpop.f32.mrb[20].mxu0 }
 0x256   : > { %v4227_v61 = vadd.f32 %v4226_v21, %v4225_v44  ;;  %v19060_v51 = vadd.f32 %v15403_v50, %v15195_v38  ;;  %v2561_v24 = vpop.f32.mrb[23].mxu1  ;;  %v4100_v29 = vpop.f32.mrb[21].mxu0 }
 0x257   : > { %v19064_v34 = vadd.f32 %v4100_v29, %v2551_v32 }
 0x258   : > { %v4229_v4 = vadd.f32 %v4228_v31, %v4227_v61  ;;  %v4232_v54 = vsel %vm682_vm0, %v19060_v51, 0.0 }
 0x259   : > { %v4230_v40 = vsel %vm682_vm0, %v19064_v34, 0.0  ;;  %v15201_v43 = vpop.f32.mrb[24].mxu1  ;;  %v15406_v46 = vpop.f32.mrb[22].mxu0 }
 0x25a   : > { %v4231_v47 = vadd.f32 %v4230_v40, %v4229_v4  ;;  %v19068_v48 = vadd.f32 %v15406_v46, %v15198_v8  ;;  %v2571_v49 = vpop.f32.mrb[25].mxu1  ;;  %v4110_v53 = vpop.f32.mrb[23].mxu0 }
 0x25b   : > { %v19072_v56 = vadd.f32 %v4110_v53, %v2561_v24 }
 0x25c   : > { %v4233_v57 = vadd.f32 %v4232_v54, %v4231_v47  ;;  %v4236_v3 = vsel %vm682_vm0, %v19068_v48, 0.0 }
 0x25d   : > { %v4234_v58 = vsel %vm682_vm0, %v19072_v56, 0.0  ;;  %v15204_v59 = vpop.f32.mrb[26].mxu1  ;;  %v15409_v60 = vpop.f32.mrb[24].mxu0 }
 0x25e   : > { %v4235_v63 = vadd.f32 %v4234_v58, %v4233_v57  ;;  %v16489_v0 = vadd.f32 %v15409_v60, %v15201_v43  ;;  %v2581_v1 = vpop.f32.mrb[27].mxu1  ;;  %v4120_v18 = vpop.f32.mrb[25].mxu0 }
 0x25f   : > { %v16490_v7 = vadd.f32 %v4120_v18, %v2571_v49 }
 0x260   : > { %v4237_v10 = vadd.f32 %v4236_v3, %v4235_v63  ;;  %v4240_v9 = vsel %vm682_vm0, %v16489_v0, 0.0 }
 0x261   : > { %v4238_v20 = vsel %vm682_vm0, %v16490_v7, 0.0  ;;  %v15207_v25 = vpop.f32.mrb[28].mxu1  ;;  %v15412_v13 = vpop.f32.mrb[26].mxu0 }
 0x262   : > { %v4239_v5 = vadd.f32 %v4238_v20, %v4237_v10  ;;  %v16491_v37 = vadd.f32 %v15412_v13, %v15204_v59  ;;  %v2591_v11 = vpop.f32.mrb[29].mxu1  ;;  %v4130_v38 = vpop.f32.mrb[27].mxu0 }
 0x263   : > { %v16492_v22 = vadd.f32 %v4130_v38, %v2581_v1 }
 0x264   : > { %v4241_v32 = vadd.f32 %v4240_v9, %v4239_v5  ;;  %v4244_v24 = vsel %vm682_vm0, %v16491_v37, 0.0 }
 0x265   : > { %v4242_v23 = vsel %vm682_vm0, %v16492_v22, 0.0  ;;  %v15210_v26 = vpop.f32.mrb[30].mxu1  ;;  %v15415_v44 = vpop.f32.mrb[28].mxu0 }
 0x266   : > { %v4243_v21 = vadd.f32 %v4242_v23, %v4241_v32  ;;  %v16493_v8 = vadd.f32 %v15415_v44, %v15207_v25  ;;  %v2601_v50 = vpop.f32.mrb[31].mxu1  ;;  %v4140_v61 = vpop.f32.mrb[29].mxu0 }
 0x267   : > { %v16494_v29 = vadd.f32 %v4140_v61, %v2591_v11 }
 0x268   : > { %v4245_v31 = vadd.f32 %v4244_v24, %v4243_v21  ;;  %v4248_v49 = vsel %vm682_vm0, %v16493_v8, 0.0 }
 0x269   : > { %v4246_v4 = vsel %vm682_vm0, %v16494_v29, 0.0  ;;  %v15418_v40 = vpop.f32.mrb[30].mxu0 }
 0x26a   : > { %v4247_v43 = vadd.f32 %v4246_v4, %v4245_v31  ;;  %v16495_v46 = vadd.f32 %v15418_v40, %v15210_v26  ;;  %v4150_v47 = vpop.f32.mrb[31].mxu0  ;;  %v4693_v4 = vld [vmem:[#allocation2 + $0x1] sm:$0xff] }
 0x26b   : > { %v16496_v53 = vadd.f32 %v4150_v47, %v2601_v50  ;;  %15423 = vmatprep.mubr.msk.f32.mxu1 %vm682_vm0, %v4693_v4 }
 0x26c   : > { %v4249_v54 = vadd.f32 %v4248_v49, %v4247_v43  ;;  %v4252_v59 = vsel %vm682_vm0, %v16495_v46, 0.0 }
 0x26d   : > { %v4250_v57 = vsel %vm682_vm0, %v16496_v53, 0.0 }
 0x26e   : > { %v4251_v58 = vadd.f32 %v4250_v57, %v4249_v54  ;;  %v4691_v54 = vld [vmem:[%s22764_s8] sm:$0xff]  ;;  %v4692_v57 = vld [vmem:[%s22764_s8 + $0x8] sm:$0xff] }
 0x270   : > { %v4253_v60 = vadd.f32 %v4252_v59, %v4251_v58 }
 0x272   : > { %v4254_v63 = vrot.slane %v4253_v60, 4 }
 0x274   : > { %v4255_v1 = vadd.f32 %v4254_v63, %v4253_v60 }
 0x276   : > { %v4256_v18 = vrot.slane %v4255_v1, 2 }
 0x278   : > { %v4257_v3 = vadd.f32 %v4256_v18, %v4255_v1  ;;  %v16395_v18 = vpack.c.bf16 %v4692_v57, %v4691_v54 }
 0x27a   : > { %v4258_v10 = vrot.slane %v4257_v3, 1 }
 0x27c   : > { %v4259_v20 = vadd.f32 %v4258_v10, %v4257_v3 }
 0x27e   : > { %v4260_v25 = vmul.f32 0.00390625, %v4259_v20 }
 0x280   : > { %v19087_v13 = vsub.f32 %v19024_v45, %v4260_v25  ;;  %v19090_v5 = vsub.f32 %v19020_v39, %v4260_v25  ;;  %v19093_v11 = vsub.f32 %v19032_v55, %v4260_v25  ;;  %v19096_v38 = vsub.f32 %v19028_v52, %v4260_v25 }
 0x281   : > { %v19099_v9 = vsub.f32 %v19040_v2, %v4260_v25  ;;  %v19102_v32 = vsub.f32 %v19036_v62, %v4260_v25  ;;  %v19105_v23 = vsub.f32 %v19048_v19, %v4260_v25  ;;  %v19108_v45 = vsub.f32 %v19044_v35, %v4260_v25 }
 0x282   : > { %v19111_v39 = vsub.f32 %v19056_v33, %v4260_v25  ;;  %v19114_v55 = vsub.f32 %v19052_v28, %v4260_v25  ;;  %v19117_v52 = vsub.f32 %v19064_v34, %v4260_v25  ;;  %v19120_v2 = vsub.f32 %v19060_v51, %v4260_v25 }
 0x283   : > { %v19123_v62 = vsub.f32 %v19072_v56, %v4260_v25  ;;  %v19126_v19 = vsub.f32 %v19068_v48, %v4260_v25  ;;  %v19128_v35 = vsub.f32 %v16490_v7, %v4260_v25  ;;  %v19130_v26 = vsub.f32 %v16489_v0, %v4260_v25 }
 0x284   : > { %v19132_v33 = vsub.f32 %v16492_v22, %v4260_v25  ;;  %v19134_v28 = vsub.f32 %v16491_v37, %v4260_v25  ;;  %v19136_v44 = vsub.f32 %v16494_v29, %v4260_v25  ;;  %v19138_v34 = vsub.f32 %v16493_v8, %v4260_v25 }
 0x285   : > { %v19140_v51 = vsub.f32 %v16496_v53, %v4260_v25  ;;  %v19142_v21 = vsub.f32 %v16495_v46, %v4260_v25  ;;  %v19145_v56 = vsub.f32 %v18984_v17, %v4260_v25  ;;  %v19148_v48 = vsub.f32 %v18982_v6, %v4260_v25  ;;  %v4726_v53 = vld [vmem:[%s22764_s8 + $0x18] sm:$0xff] }
 0x286   : > { %v19151_v0 = vsub.f32 %v18992_v16, %v4260_v25  ;;  %v19154_v7 = vsub.f32 %v18990_v14, %v4260_v25  ;;  %v19161_v8 = vsub.f32 %v19000_v12, %v4260_v25  ;;  %v19166_v6 = vsub.f32 %v18996_v42, %v4260_v25 }
 0x287   : > { %v4293_v37 = vmul.f32 %v19145_v56, %v19145_v56  ;;  %v4294_v22 = vmul.f32 %v19148_v48, %v19148_v48  ;;  %v19173_v24 = vsub.f32 %v19008_v41, %v4260_v25  ;;  %v19179_v42 = vsub.f32 %v19004_v30, %v4260_v25  ;;  %v4725_v41 = vld [vmem:[%s22764_s8 + $0x10] sm:$0xff] }
 0x288   : > { %v4295_v17 = vmul.f32 %v19151_v0, %v19151_v0  ;;  %v4296_v16 = vmul.f32 %v19154_v7, %v19154_v7  ;;  %v4297_v12 = vmul.f32 %v19161_v8, %v19161_v8  ;;  %v4298_v40 = vmul.f32 %v19166_v6, %v19166_v6 }
 0x289   : > { %v4325_v14 = vsel %vm682_vm0, %v4293_v37, 0.0  ;;  %v4326_v50 = vsel %vm682_vm0, %v4294_v22, 0.0  ;;  %v19189_v47 = vsub.f32 %v19016_v27, %v4260_v25  ;;  %v4299_v49 = vmul.f32 %v19173_v24, %v19173_v24 }
 0x28a   : > { %v4327_v61 = vadd.f32 %v4326_v50, %v4325_v14  ;;  %v4328_v29 = vsel %vm682_vm0, %v4295_v17, 0.0  ;;  %v4330_v43 = vsel %vm682_vm0, %v4296_v16, 0.0  ;;  %v4332_v30 = vsel %vm682_vm0, %v4297_v12, 0.0 }
 0x28b   : > { %v19204_v27 = vsub.f32 %v19012_v15, %v4260_v25  ;;  %v4300_v59 = vmul.f32 %v19179_v42, %v19179_v42  ;;  %v4334_v60 = vsel %vm682_vm0, %v4298_v40, 0.0  ;;  %v16391_v1 = vpack.c.bf16 %v4726_v53, %v4725_v41  ;;  %v4694_v25 = vld [vmem:[#allocation2 + $0x9] sm:$0xff] }
 0x28c   : > { %v4329_v31 = vadd.f32 %v4328_v29, %v4327_v61  ;;  %v4301_v3 = vmul.f32 %v19189_v47, %v19189_v47  ;;  %v4336_v10 = vsel %vm682_vm0, %v4299_v49, 0.0  ;;  %v4303_v17 = vmul.f32 %v19087_v13, %v19087_v13 }
 0x28d   : > { %16392 = vmatprep.subr.bf16.mxu1 %v16391_v1  ;;  %v4302_v37 = vmul.f32 %v19204_v27, %v19204_v27  ;;  %v4338_v15 = vsel %vm682_vm0, %v4300_v59, 0.0  ;;  %v4304_v50 = vmul.f32 %v19090_v5, %v19090_v5  ;;  %v4305_v29 = vmul.f32 %v19093_v11, %v19093_v11 }
 0x28e   : > { %v4331_v46 = vadd.f32 %v4330_v43, %v4329_v31  ;;  %16394 = vmatpush3.bf16.msra.mxu1 %v16391_v1  ;;  %v4340_v16 = vsel %vm682_vm0, %v4301_v3, 0.0  ;;  %v4344_v31 = vsel %vm682_vm0, %v4303_v17, 0.0  ;;  %v4306_v40 = vmul.f32 %v19096_v38, %v19096_v38 }
 0x28f   : > { %16396 = vmatprep.subr.bf16.mxu1 %v16395_v18  ;;  %v4342_v61 = vsel %vm682_vm0, %v4302_v37, 0.0  ;;  %v4346_v43 = vsel %vm682_vm0, %v4304_v50, 0.0  ;;  %v4307_v41 = vmul.f32 %v19099_v9, %v19099_v9  ;;  %v4348_v49 = vsel %vm682_vm0, %v4305_v29, 0.0 }
 0x290   : > { %v4333_v58 = vadd.f32 %v4332_v30, %v4331_v46  ;;  %v4308_v53 = vmul.f32 %v19102_v32, %v19102_v32  ;;  %v4350_v54 = vsel %vm682_vm0, %v4306_v40, 0.0  ;;  %v4311_v3 = vmul.f32 %v19111_v39, %v19111_v39 }
 0x291   : > { %15424 = vmatmul.mubr.msk.f32.vlgmr.msra.gmra.mrb[32].mxu1 %vm682_vm0, %v4694_v25  ;;  %v4352_v59 = vsel %vm682_vm0, %v4307_v41, 0.0  ;;  %v4312_v37 = vmul.f32 %v19114_v55, %v19114_v55 }
 0x292   : > { %v4335_v63 = vadd.f32 %v4334_v60, %v4333_v58  ;;  %16398 = vmatpush3.bf16.msra.mxu1 %v16395_v18  ;;  %v4309_v58 = vmul.f32 %v19105_v23, %v19105_v23  ;;  %v4354_v1 = vsel %vm682_vm0, %v4308_v53, 0.0  ;;  %v4360_v17 = vsel %vm682_vm0, %v4311_v3, 0.0 }
 0x293   : > { %v4362_v50 = vsel %vm682_vm0, %v4312_v37, 0.0 }
 0x294   : > { %v4337_v20 = vadd.f32 %v4336_v10, %v4335_v63  ;;  %v4310_v63 = vmul.f32 %v19108_v45, %v19108_v45  ;;  %v4356_v10 = vsel %vm682_vm0, %v4309_v58, 0.0 }
 0x296   : > { %v4339_v22 = vadd.f32 %v4338_v15, %v4337_v20  ;;  %v4358_v15 = vsel %vm682_vm0, %v4310_v63, 0.0 }
 0x298   : > { %v4341_v14 = vadd.f32 %v4340_v16, %v4339_v22  ;;  %v4313_v22 = vmul.f32 %v19117_v52, %v19117_v52 }
 0x29a   : > { %v4343_v12 = vadd.f32 %v4342_v61, %v4341_v14  ;;  %v4314_v14 = vmul.f32 %v19120_v2, %v19120_v2  ;;  %v4364_v29 = vsel %vm682_vm0, %v4313_v22, 0.0 }
 0x29c   : > { %v4345_v4 = vadd.f32 %v4344_v31, %v4343_v12  ;;  %v4315_v12 = vmul.f32 %v19123_v62, %v19123_v62  ;;  %v4366_v40 = vsel %vm682_vm0, %v4314_v14, 0.0 }
 0x29e   : > { %v4347_v46 = vadd.f32 %v4346_v43, %v4345_v4  ;;  %v4316_v4 = vmul.f32 %v19126_v19, %v19126_v19  ;;  %v4368_v41 = vsel %vm682_vm0, %v4315_v12, 0.0 }
 0x2a0   : > { %v4349_v30 = vadd.f32 %v4348_v49, %v4347_v46  ;;  %v4317_v46 = vmul.f32 %v19128_v35, %v19128_v35  ;;  %v4370_v53 = vsel %vm682_vm0, %v4316_v4, 0.0  ;;  %v5401_v4 = vld [vmem:[%s22764_s8 + $0x20] sm:$0xff] }
 0x2a2   : > { %v4351_v57 = vadd.f32 %v4350_v54, %v4349_v30  ;;  %v4318_v30 = vmul.f32 %v19130_v26, %v19130_v26  ;;  %v4372_v58 = vsel %vm682_vm0, %v4317_v46, 0.0 }
 0x2a4   : > { %v4353_v60 = vadd.f32 %v4352_v59, %v4351_v57  ;;  %v4319_v57 = vmul.f32 %v19132_v33, %v19132_v33  ;;  %v4374_v63 = vsel %vm682_vm0, %v4318_v30, 0.0 }
 0x2a6   : > { %v4355_v18 = vadd.f32 %v4354_v1, %v4353_v60  ;;  %v4320_v60 = vmul.f32 %v19134_v28, %v19134_v28  ;;  %v4376_v3 = vsel %vm682_vm0, %v4319_v57, 0.0 }
 0x2a8   : > { %v4357_v20 = vadd.f32 %v4356_v10, %v4355_v18  ;;  %v4321_v18 = vmul.f32 %v19136_v44, %v19136_v44  ;;  %v4378_v37 = vsel %vm682_vm0, %v4320_v60, 0.0  ;;  %v19296_v60 = vld [vmem:[%s22766_s10] ss:$0 sm:$0xff] }
 0x2aa   : > { %v4359_v25 = vadd.f32 %v4358_v15, %v4357_v20  ;;  %v4322_v20 = vmul.f32 %v19138_v34, %v19138_v34  ;;  %v4380_v22 = vsel %vm682_vm0, %v4321_v18, 0.0 }
 0x2ac   : > { %v4361_v16 = vadd.f32 %v4360_v17, %v4359_v25  ;;  %v4323_v25 = vmul.f32 %v19140_v51, %v19140_v51  ;;  %v4382_v14 = vsel %vm682_vm0, %v4322_v20, 0.0  ;;  %v19307_v20 = vld [vmem:[%s22767_s11] ss:$0 sm:$0xff] }
 0x2ae   : > { %v4363_v61 = vadd.f32 %v4362_v50, %v4361_v16  ;;  %v4324_v16 = vmul.f32 %v19142_v21, %v19142_v21 }
 0x2b0   : > { %v4365_v31 = vadd.f32 %v4364_v29, %v4363_v61  ;;  %v4384_v61 = vsel %vm682_vm0, %v4323_v25, 0.0  ;;  %v4386_v29 = vsel %vm682_vm0, %v4324_v16, 0.0 }
 0x2b2   : > { %v4367_v43 = vadd.f32 %v4366_v40, %v4365_v31  ;;  %v5402_v40 = vld [vmem:[%s22764_s8 + $0x28] sm:$0xff] }
 0x2b3   : > { %v19290_v46 = vpack.c.bf16 %v5402_v40, %v5401_v4 }
 0x2b4   : > { %v4369_v49 = vadd.f32 %v4368_v41, %v4367_v43 }
 0x2b5   : > { %16400 = vmatprep.subr.bf16.mxu1 %v19290_v46 }
 0x2b6   : > { %v4371_v54 = vadd.f32 %v4370_v53, %v4369_v49 }
 0x2b8   : > { %v4373_v59 = vadd.f32 %v4372_v58, %v4371_v54 }
 0x2ba   : > { %v4375_v1 = vadd.f32 %v4374_v63, %v4373_v59  ;;  %v19298_v63 = vstv %s4539_s25  ;;  %s12254_s25 = sld [smem:[#allocation9]] }
 0x2bc   : > { %v4377_v10 = vadd.f32 %v4376_v3, %v4375_v1 }
 0x2be   : > { %v4379_v15 = vadd.f32 %v4378_v37, %v4377_v10 }
 0x2c0   : > { %v4381_v17 = vadd.f32 %v4380_v22, %v4379_v15 }
 0x2c2   : > { %v4383_v50 = vadd.f32 %v4382_v14, %v4381_v17 }
 0x2c4   : > { %v4385_v12 = vadd.f32 %v4384_v61, %v4383_v50 }
 0x2c6   : > { %v4387_v31 = vadd.f32 %v4386_v29, %v4385_v12 }
 0x2c8   : > { %v4388_v43 = vrot.slane %v4387_v31, 4 }
 0x2ca   : > { %v4389_v41 = vadd.f32 %v4388_v43, %v4387_v31 }
 0x2cc   : > { %v4390_v49 = vrot.slane %v4389_v41, 2 }
 0x2ce   : > { %v4391_v30 = vadd.f32 %v4390_v49, %v4389_v41 }
 0x2d0   : > { %v4392_v53 = vrot.slane %v4391_v30, 1 }
 0x2d2   : > { %v4393_v54 = vadd.f32 %v4392_v53, %v4391_v30 }
 0x2d4   : > { %v4394_v57 = vmul.f32 0.00390625, %v4393_v54 }
 0x2d6   : > { %v4395_v58 = vadd.f32 1e-05, %v4394_v57 }
 0x2d8   : > { %17307 = vrsqrt.f32 %v4395_v58 }
 0x2e2   : > { %v17308_v59 = vpop.eup %17307 }
 0x2e3   : > { %v4427_v1 = vmul.f32 %v17308_v59, %v19140_v51  ;;  %v4397_v18 = vmul.f32 %v17308_v59, %v19145_v56  ;;  %v4398_v3 = vmul.f32 %v17308_v59, %v19148_v48  ;;  %v4399_v10 = vmul.f32 %v17308_v59, %v19151_v0 }
 0x2e4   : > { %v4400_v37 = vmul.f32 %v17308_v59, %v19154_v7  ;;  %v4401_v15 = vmul.f32 %v17308_v59, %v19161_v8  ;;  %v4402_v25 = vmul.f32 %v17308_v59, %v19166_v6  ;;  %v4403_v22 = vmul.f32 %v17308_v59, %v19173_v24 }
 0x2e5   : > { %v4466_v51 = vmul.f32 %v19296_v60, %v4427_v1  ;;  %v4404_v56 = vmul.f32 %v17308_v59, %v19179_v42  ;;  %v4405_v48 = vmul.f32 %v17308_v59, %v19189_v47  ;;  %v4406_v0 = vmul.f32 %v17308_v59, %v19204_v27 }
 0x2e6   : > { %v4407_v17 = vmul.f32 %v17308_v59, %v19087_v13  ;;  %v4408_v16 = vmul.f32 %v17308_v59, %v19090_v5  ;;  %v4409_v7 = vmul.f32 %v17308_v59, %v19093_v11  ;;  %v4410_v8 = vmul.f32 %v17308_v59, %v19096_v38 }
 0x2e7   : > { %v4505_v6 = vadd.f32 %v19307_v20, %v4466_v51  ;;  %v4411_v24 = vmul.f32 %v17308_v59, %v19099_v9  ;;  %v4412_v14 = vmul.f32 %v17308_v59, %v19102_v32  ;;  %v4413_v42 = vmul.f32 %v17308_v59, %v19105_v23 }
 0x2e8   : > { %v4414_v47 = vmul.f32 %v17308_v59, %v19108_v45  ;;  %v4415_v27 = vmul.f32 %v17308_v59, %v19111_v39  ;;  %v4416_v13 = vmul.f32 %v17308_v59, %v19114_v55  ;;  %v4417_v5 = vmul.f32 %v17308_v59, %v19117_v52 }
 0x2e9   : > { %v4537_v50 = vmax.f32 %v4505_v6, 0.0  ;;  %v4418_v11 = vmul.f32 %v17308_v59, %v19120_v2  ;;  %v4419_v38 = vmul.f32 %v17308_v59, %v19123_v62  ;;  %v4420_v61 = vmul.f32 %v17308_v59, %v19126_v19 }
 0x2ea   : > { %v4421_v9 = vmul.f32 %v17308_v59, %v19128_v35  ;;  %v4422_v32 = vmul.f32 %v17308_v59, %v19130_v26  ;;  %v4423_v23 = vmul.f32 %v17308_v59, %v19132_v33  ;;  %v4424_v45 = vmul.f32 %v17308_v59, %v19134_v28 }
 0x2eb   : > { %v4571_v39 = vmul.f32 %v19298_v63, %v4537_v50  ;;  %v4425_v55 = vmul.f32 %v17308_v59, %v19136_v44  ;;  %v4426_v52 = vmul.f32 %v17308_v59, %v19138_v34  ;;  %v4428_v2 = vmul.f32 %v17308_v59, %v19142_v21 }
 0x2ec   : > { %v4436_v62 = vmul.f32 %v19296_v60, %v4397_v18  ;;  %v4437_v19 = vmul.f32 %v19296_v60, %v4398_v3  ;;  %v4438_v35 = vmul.f32 %v19296_v60, %v4399_v10  ;;  %v4439_v26 = vmul.f32 %v19296_v60, %v4400_v37 }
 0x2ed   : > { %4657 = vst.msk [vmem:[#allocation2 + $0x181] sm:$0xff] %vm682_vm0, %v4571_v39  ;;  %v4440_v33 = vmul.f32 %v19296_v60, %v4401_v15  ;;  %v4441_v28 = vmul.f32 %v19296_v60, %v4402_v25  ;;  %v4442_v44 = vmul.f32 %v19296_v60, %v4403_v22  ;;  %v4443_v34 = vmul.f32 %v19296_v60, %v4404_v56 }
 0x2ee   : > { %v4444_v21 = vmul.f32 %v19296_v60, %v4405_v48  ;;  %v4445_v12 = vmul.f32 %v19296_v60, %v4406_v0  ;;  %v4446_v29 = vmul.f32 %v19296_v60, %v4407_v17  ;;  %v4447_v31 = vmul.f32 %v19296_v60, %v4408_v16 }
 0x2ef   : > { %v4448_v4 = vmul.f32 %v19296_v60, %v4409_v7  ;;  %v4449_v40 = vmul.f32 %v19296_v60, %v4410_v8  ;;  %v4450_v43 = vmul.f32 %v19296_v60, %v4411_v24  ;;  %v4451_v41 = vmul.f32 %v19296_v60, %v4412_v14 }
 0x2f0   : > { %v4452_v49 = vmul.f32 %v19296_v60, %v4413_v42  ;;  %v4453_v30 = vmul.f32 %v19296_v60, %v4414_v47  ;;  %v4454_v53 = vmul.f32 %v19296_v60, %v4415_v27  ;;  %v4455_v54 = vmul.f32 %v19296_v60, %v4416_v13 }
 0x2f1   : > { %v4456_v57 = vmul.f32 %v19296_v60, %v4417_v5  ;;  %v4457_v58 = vmul.f32 %v19296_v60, %v4418_v11  ;;  %v4458_v59 = vmul.f32 %v19296_v60, %v4419_v38  ;;  %v4459_v1 = vmul.f32 %v19296_v60, %v4420_v61 }
 0x2f2   : > { %v4460_v18 = vmul.f32 %v19296_v60, %v4421_v9  ;;  %v4461_v3 = vmul.f32 %v19296_v60, %v4422_v32  ;;  %v4462_v10 = vmul.f32 %v19296_v60, %v4423_v23  ;;  %v4463_v37 = vmul.f32 %v19296_v60, %v4424_v45 }
 0x2f3   : > { %v4464_v15 = vmul.f32 %v19296_v60, %v4425_v55  ;;  %v4465_v25 = vmul.f32 %v19296_v60, %v4426_v52  ;;  %v4467_v22 = vmul.f32 %v19296_v60, %v4428_v2  ;;  %v19373_v51 = vadd.f32 %v19307_v20, %v4436_v62 }
 0x2f4   : > { %v19376_v56 = vadd.f32 %v19307_v20, %v4437_v19  ;;  %v19379_v48 = vadd.f32 %v19307_v20, %v4438_v35  ;;  %v19382_v0 = vadd.f32 %v19307_v20, %v4439_v26  ;;  %v19385_v17 = vadd.f32 %v19307_v20, %v4440_v33 }
 0x2f5   : > { %v19388_v16 = vadd.f32 %v19307_v20, %v4441_v28  ;;  %v19391_v60 = vadd.f32 %v19307_v20, %v4442_v44  ;;  %v19394_v7 = vadd.f32 %v19307_v20, %v4443_v34  ;;  %v19397_v8 = vadd.f32 %v19307_v20, %v4444_v21 }
 0x2f6   : > { %v19400_v6 = vadd.f32 %v19307_v20, %v4445_v12  ;;  %v19403_v24 = vadd.f32 %v19307_v20, %v4446_v29  ;;  %v19406_v14 = vadd.f32 %v19307_v20, %v4447_v31  ;;  %v19409_v42 = vadd.f32 %v19307_v20, %v4448_v4 }
 0x2f7   : > { %v19412_v47 = vadd.f32 %v19307_v20, %v4449_v40  ;;  %v19415_v27 = vadd.f32 %v19307_v20, %v4450_v43  ;;  %v19418_v13 = vadd.f32 %v19307_v20, %v4451_v41  ;;  %v19421_v5 = vadd.f32 %v19307_v20, %v4452_v49 }
 0x2f8   : > { %v19424_v50 = vadd.f32 %v19307_v20, %v4453_v30  ;;  %v19427_v11 = vadd.f32 %v19307_v20, %v4454_v53  ;;  %v19430_v38 = vadd.f32 %v19307_v20, %v4455_v54  ;;  %v19433_v61 = vadd.f32 %v19307_v20, %v4456_v57 }
 0x2f9   : > { %v19436_v9 = vadd.f32 %v19307_v20, %v4457_v58  ;;  %v19439_v32 = vadd.f32 %v19307_v20, %v4458_v59  ;;  %v19442_v23 = vadd.f32 %v19307_v20, %v4459_v1  ;;  %v19445_v45 = vadd.f32 %v19307_v20, %v4460_v18 }
 0x2fa   : > { %v19448_v39 = vadd.f32 %v19307_v20, %v4461_v3  ;;  %v19451_v55 = vadd.f32 %v19307_v20, %v4462_v10  ;;  %v19454_v52 = vadd.f32 %v19307_v20, %v4463_v37  ;;  %v19457_v2 = vadd.f32 %v19307_v20, %v4464_v15 }
 0x2fb   : > { %v19460_v62 = vadd.f32 %v19307_v20, %v4465_v25  ;;  %v19463_v19 = vadd.f32 %v19307_v20, %v4467_v22  ;;  %v4507_v35 = vmax.f32 %v19373_v51, 0.0  ;;  %v4508_v26 = vmax.f32 %v19376_v56, 0.0 }
 0x2fc   : > { %v4509_v33 = vmax.f32 %v19379_v48, 0.0  ;;  %v4510_v28 = vmax.f32 %v19382_v0, 0.0  ;;  %v4511_v44 = vmax.f32 %v19385_v17, 0.0  ;;  %v4512_v34 = vmax.f32 %v19388_v16, 0.0 }
 0x2fd   : > { %v4513_v21 = vmax.f32 %v19391_v60, 0.0  ;;  %v4514_v12 = vmax.f32 %v19394_v7, 0.0  ;;  %v4515_v29 = vmax.f32 %v19397_v8, 0.0  ;;  %v4516_v20 = vmax.f32 %v19400_v6, 0.0 }
 0x2fe   : > { %v4517_v31 = vmax.f32 %v19403_v24, 0.0  ;;  %v4518_v4 = vmax.f32 %v19406_v14, 0.0  ;;  %v4519_v40 = vmax.f32 %v19409_v42, 0.0  ;;  %v4520_v43 = vmax.f32 %v19412_v47, 0.0 }
 0x2ff   : > { %v4521_v41 = vmax.f32 %v19415_v27, 0.0  ;;  %v4522_v49 = vmax.f32 %v19418_v13, 0.0  ;;  %v4523_v30 = vmax.f32 %v19421_v5, 0.0  ;;  %v4524_v53 = vmax.f32 %v19424_v50, 0.0  ;;  %v19518_v5 = vld [vmem:[#allocation2] sm:$0xff] }
 0x300   : > { %v4525_v54 = vmax.f32 %v19427_v11, 0.0  ;;  %v4526_v57 = vmax.f32 %v19430_v38, 0.0  ;;  %v4527_v58 = vmax.f32 %v19433_v61, 0.0  ;;  %v4528_v59 = vmax.f32 %v19436_v9, 0.0  ;;  %v19520_v50 = vld [vmem:[#allocation2 + $0x2] sm:$0xff] }
 0x301   : > { %v4529_v1 = vmax.f32 %v19439_v32, 0.0  ;;  %v4530_v18 = vmax.f32 %v19442_v23, 0.0  ;;  %v4531_v3 = vmax.f32 %v19445_v45, 0.0  ;;  %v4532_v10 = vmax.f32 %v19448_v39, 0.0  ;;  %v19530_v32 = vld [vmem:[#allocation2 + $0x8] sm:$0xff]  ;;  %8458 = vst.msk [vmem:[#allocation2] sm:$0xff] %vm682_vm0, %v23039_v36 }
 0x302   : > { %v4533_v37 = vmax.f32 %v19451_v55, 0.0  ;;  %v4534_v15 = vmax.f32 %v19454_v52, 0.0  ;;  %v4535_v25 = vmax.f32 %v19457_v2, 0.0  ;;  %v4536_v22 = vmax.f32 %v19460_v62, 0.0  ;;  %v19534_v23 = vld [vmem:[#allocation2 + $0xa] sm:$0xff] }
 0x303   : > { %v4538_v51 = vmax.f32 %v19463_v19, 0.0  ;;  %v4541_v56 = vmul.f32 %v19298_v63, %v4507_v35  ;;  %v4542_v48 = vmul.f32 %v19298_v63, %v4508_v26  ;;  %v4543_v0 = vmul.f32 %v19298_v63, %v4509_v33  ;;  %8460 = vst.msk [vmem:[#allocation2 + $0x10] sm:$0x3] %vm685_vm1, %v23039_v36 }
 0x304   : > { %v4544_v17 = vmul.f32 %v19298_v63, %v4510_v28  ;;  %v4545_v16 = vmul.f32 %v19298_v63, %v4511_v44  ;;  %v4546_v60 = vmul.f32 %v19298_v63, %v4512_v34  ;;  %v4547_v7 = vmul.f32 %v19298_v63, %v4513_v21  ;;  %8459 = vst.msk [vmem:[#allocation2 + $0x8] sm:$0xff] %vm682_vm0, %v23039_v36 }
 0x305   : > { %v4548_v8 = vmul.f32 %v19298_v63, %v4514_v12  ;;  %v4549_v6 = vmul.f32 %v19298_v63, %v4515_v29  ;;  %v4550_v24 = vmul.f32 %v19298_v63, %v4516_v20  ;;  %v4551_v14 = vmul.f32 %v19298_v63, %v4517_v31  ;;  %4627 = vst.msk [vmem:[#allocation2 + $0x19] sm:$0xff] %vm682_vm0, %v4541_v56 }
 0x306   : > { %4628 = vst.msk [vmem:[#allocation2 + $0x21] sm:$0xff] %vm682_vm0, %v4542_v48  ;;  %4629 = vst.msk [vmem:[#allocation2 + $0x31] sm:$0xff] %vm682_vm0, %v4543_v0  ;;  %v4552_v42 = vmul.f32 %v19298_v63, %v4518_v4  ;;  %v4553_v47 = vmul.f32 %v19298_v63, %v4519_v40  ;;  %v4554_v27 = vmul.f32 %v19298_v63, %v4520_v43 }
 0x307   : > { %v4555_v13 = vmul.f32 %v19298_v63, %v4521_v41  ;;  %4630 = vst.msk [vmem:[#allocation2 + $0x39] sm:$0xff] %vm682_vm0, %v4544_v17  ;;  %4631 = vst.msk [vmem:[#allocation2 + $0x49] sm:$0xff] %vm682_vm0, %v4545_v16  ;;  %v4556_v11 = vmul.f32 %v19298_v63, %v4522_v49  ;;  %v4557_v38 = vmul.f32 %v19298_v63, %v4523_v30 }
 0x308   : > { %4632 = vst.msk [vmem:[#allocation2 + $0x51] sm:$0xff] %vm682_vm0, %v4546_v60  ;;  %4633 = vst.msk [vmem:[#allocation2 + $0x61] sm:$0xff] %vm682_vm0, %v4547_v7  ;;  %v4558_v61 = vmul.f32 %v19298_v63, %v4524_v53  ;;  %v4559_v9 = vmul.f32 %v19298_v63, %v4525_v54  ;;  %v4560_v45 = vmul.f32 %v19298_v63, %v4526_v57 }
 0x309   : > { %4634 = vst.msk [vmem:[#allocation2 + $0x69] sm:$0xff] %vm682_vm0, %v4548_v8  ;;  %4635 = vst.msk [vmem:[#allocation2 + $0x79] sm:$0xff] %vm682_vm0, %v4549_v6  ;;  %v4561_v39 = vmul.f32 %v19298_v63, %v4527_v58  ;;  %v4562_v55 = vmul.f32 %v19298_v63, %v4528_v59  ;;  %v4563_v52 = vmul.f32 %v19298_v63, %v4529_v1 }
 0x30a   : > { %4636 = vst.msk [vmem:[#allocation2 + $0x81] sm:$0xff] %vm682_vm0, %v4550_v24  ;;  %4637 = vst.msk [vmem:[#allocation2 + $0x91] sm:$0xff] %vm682_vm0, %v4551_v14  ;;  %v4564_v2 = vmul.f32 %v19298_v63, %v4530_v18  ;;  %v4565_v62 = vmul.f32 %v19298_v63, %v4531_v3  ;;  %v4566_v19 = vmul.f32 %v19298_v63, %v4532_v10 }
 0x30b   : > { %4638 = vst.msk [vmem:[#allocation2 + $0x99] sm:$0xff] %vm682_vm0, %v4552_v42  ;;  %4639 = vst.msk [vmem:[#allocation2 + $0xa9] sm:$0xff] %vm682_vm0, %v4553_v47  ;;  %v4567_v35 = vmul.f32 %v19298_v63, %v4533_v37  ;;  %v4568_v26 = vmul.f32 %v19298_v63, %v4534_v15  ;;  %v4569_v33 = vmul.f32 %v19298_v63, %v4535_v25 }
 0x30c   : > { %4640 = vst.msk [vmem:[#allocation2 + $0xb1] sm:$0xff] %vm682_vm0, %v4554_v27  ;;  %4641 = vst.msk [vmem:[#allocation2 + $0xc1] sm:$0xff] %vm682_vm0, %v4555_v13  ;;  %v4570_v28 = vmul.f32 %v19298_v63, %v4536_v22  ;;  %v4572_v44 = vmul.f32 %v19298_v63, %v4538_v51  ;;  %v19572_v63 = vld [vmem:[#allocation2 + $0x19] sm:$0xff] }
 0x30d   : > { %4642 = vst.msk [vmem:[#allocation2 + $0xc9] sm:$0xff] %vm682_vm0, %v4556_v11  ;;  %4643 = vst.msk [vmem:[#allocation2 + $0xd9] sm:$0xff] %vm682_vm0, %v4557_v38  ;;  %v19574_v34 = vld [vmem:[#allocation2 + $0x21] sm:$0xff]  ;;  %15426 = vmatprep.mubr.msk.f32.mxu1 %vm682_vm0, %v19572_v63  ;;  %v19580_v21 = vld [vmem:[#allocation2 + $0x31] sm:$0xff] }
 0x30e   : > { %4644 = vst.msk [vmem:[#allocation2 + $0xe1] sm:$0xff] %vm682_vm0, %v4558_v61  ;;  %4645 = vst.msk [vmem:[#allocation2 + $0xf1] sm:$0xff] %vm682_vm0, %v4559_v9  ;;  %15427 = vmatmul.mubr.msk.f32.gmra.mrb[34].mxu1 %vm682_vm0, %v19574_v34  ;;  %v19584_v12 = vld [vmem:[#allocation2 + $0x39] sm:$0xff]  ;;  %v19588_v29 = vld [vmem:[#allocation2 + $0x49] sm:$0xff] }
 0x30f   : > { %4646 = vst.msk [vmem:[#allocation2 + $0xf9] sm:$0xff] %vm682_vm0, %v4560_v45  ;;  %4647 = vst.msk [vmem:[#allocation2 + $0x109] sm:$0xff] %vm682_vm0, %v4561_v39  ;;  %15429 = vmatprep.mubr.msk.f32.mxu1 %vm682_vm0, %v19580_v21  ;;  %v19592_v20 = vld [vmem:[#allocation2 + $0x51] sm:$0xff]  ;;  %v19596_v31 = vld [vmem:[#allocation2 + $0x61] sm:$0xff] }
 0x310   : > { %4648 = vst.msk [vmem:[#allocation2 + $0x111] sm:$0xff] %vm682_vm0, %v4562_v55  ;;  %4649 = vst.msk [vmem:[#allocation2 + $0x121] sm:$0xff] %vm682_vm0, %v4563_v52  ;;  %v19600_v4 = vld [vmem:[#allocation2 + $0x69] sm:$0xff]  ;;  %v19604_v40 = vld [vmem:[#allocation2 + $0x79] sm:$0xff] }
 0x311   : > { %4650 = vst.msk [vmem:[#allocation2 + $0x129] sm:$0xff] %vm682_vm0, %v4564_v2  ;;  %4651 = vst.msk [vmem:[#allocation2 + $0x139] sm:$0xff] %vm682_vm0, %v4565_v62  ;;  %v19608_v43 = vld [vmem:[#allocation2 + $0x81] sm:$0xff]  ;;  %v19610_v41 = vld [vmem:[#allocation2 + $0x91] sm:$0xff] }
 0x312   : > { %4652 = vst.msk [vmem:[#allocation2 + $0x141] sm:$0xff] %vm682_vm0, %v4566_v19  ;;  %4653 = vst.msk [vmem:[#allocation2 + $0x151] sm:$0xff] %vm682_vm0, %v4567_v35  ;;  %15430 = vmatmul.mubr.msk.f32.gmra.mrb[36].mxu1 %vm682_vm0, %v19584_v12  ;;  %v19614_v49 = vld [vmem:[#allocation2 + $0x18] sm:$0xff]  ;;  %v19616_v30 = vld [vmem:[#allocation2 + $0x20] sm:$0xff] }
 0x313   : > { %4654 = vst.msk [vmem:[#allocation2 + $0x159] sm:$0xff] %vm682_vm0, %v4568_v26  ;;  %4655 = vst.msk [vmem:[#allocation2 + $0x169] sm:$0xff] %vm682_vm0, %v4569_v33  ;;  %15432 = vmatprep.mubr.msk.f32.mxu1 %vm682_vm0, %v19588_v29  ;;  %v19618_v53 = vld [vmem:[#allocation2 + $0x30] sm:$0xff]  ;;  %v19622_v54 = vld [vmem:[#allocation2 + $0x99] sm:$0xff] }
 0x314   : > { %4656 = vst.msk [vmem:[#allocation2 + $0x171] sm:$0xff] %vm682_vm0, %v4570_v28  ;;  %4658 = vst.msk [vmem:[#allocation2 + $0x189] sm:$0xff] %vm682_vm0, %v4572_v44  ;;  %v19624_v57 = vld [vmem:[#allocation2 + $0x38] sm:$0xff]  ;;  %v19626_v58 = vld [vmem:[#allocation2 + $0x48] sm:$0xff] }
 0x315   : > { %23106 = vst [vmem:[#allocation19_spill] sm:$0xff] %v19572_v63  ;;  %23107 = vst [vmem:[#allocation49_spill] sm:$0xff] %v19574_v34  ;;  %v19628_v59 = vld [vmem:[#allocation2 + $0x50] sm:$0xff]  ;;  %v19632_v18 = vld [vmem:[#allocation2 + $0x60] sm:$0xff] }
 0x316   : > { %23108 = vst [vmem:[#allocation25_spill] sm:$0xff] %v19580_v21  ;;  %23109 = vst [vmem:[#allocation50_spill] sm:$0xff] %v19584_v12  ;;  %15433 = vmatmul.mubr.msk.f32.gmra.mrb[38].mxu1 %vm682_vm0, %v19592_v20  ;;  %v19630_v1 = vld [vmem:[#allocation2 + $0xa9] sm:$0xff]  ;;  %v19636_v10 = vld [vmem:[#allocation2 + $0x78] sm:$0xff] }
 0x317   : > { %23110 = vst [vmem:[#allocation20_spill] sm:$0xff] %v19588_v29  ;;  %23111 = vst [vmem:[#allocation51_spill] sm:$0xff] %v19592_v20  ;;  %15435 = vmatprep.mubr.msk.f32.mxu1 %vm682_vm0, %v19596_v31  ;;  %v19634_v3 = vld [vmem:[#allocation2 + $0x68] sm:$0xff]  ;;  %v19638_v37 = vld [vmem:[#allocation2 + $0x1a] sm:$0xff] }
 0x318   : > { %23112 = vst [vmem:[#allocation32_spill] sm:$0xff] %v19596_v31  ;;  %23113 = vst [vmem:[#allocation52_spill] sm:$0xff] %v19600_v4  ;;  %v19640_v15 = vld [vmem:[#allocation2 + $0x22] sm:$0xff]  ;;  %v19642_v25 = vld [vmem:[#allocation2 + $0x32] sm:$0xff] }
 0x319   : > { %23114 = vst [vmem:[#allocation21_spill] sm:$0xff] %v19604_v40  ;;  %23115 = vst [vmem:[#allocation22_spill] sm:$0xff] %v19608_v43  ;;  %v19644_v22 = vld [vmem:[#allocation2 + $0x80] sm:$0xff]  ;;  %v19646_v51 = vld [vmem:[#allocation2 + $0x90] sm:$0xff] }
 0x31a   : > { %15436 = vmatmul.mubr.msk.f32.gmra.mrb[40].mxu1 %vm682_vm0, %v19600_v4  ;;  %23116 = vst [vmem:[#allocation35_spill] sm:$0xff] %v19610_v41  ;;  %23117 = vst [vmem:[#allocation23_spill] sm:$0xff] %v19622_v54  ;;  %v19648_v56 = vld [vmem:[#allocation2 + $0x98] sm:$0xff]  ;;  %v19652_v0 = vld [vmem:[#allocation2 + $0x4a] sm:$0xff] }
 0x31b   : > { %15438 = vmatprep.mubr.msk.f32.mxu1 %vm682_vm0, %v19604_v40  ;;  %23118 = vst [vmem:[#allocation36_spill] sm:$0xff] %v19630_v1  ;;  %v19650_v48 = vld [vmem:[#allocation2 + $0x3a] sm:$0xff]  ;;  %23119 = vst [vmem:[#allocation24_spill] sm:$0xff] %v19652_v0  ;;  %v19654_v17 = vld [vmem:[#allocation2 + $0x52] sm:$0xff] }
 0x31c   : > { %23120 = vst [vmem:[#allocation37_spill] sm:$0xff] %v19654_v17  ;;  %8461 = vst.msk [vmem:[#allocation2 + $0x18] sm:$0xff] %vm682_vm0, %v23039_v36  ;;  %v19666_v16 = vld [vmem:[#allocation2 + $0xb1] sm:$0xff]  ;;  %v19668_v60 = vld [vmem:[#allocation2 + $0xc1] sm:$0xff] }
 0x31d   : > { %8463 = vst.msk [vmem:[#allocation2 + $0x28] sm:$0x3] %vm685_vm1, %v23039_v36  ;;  %23121 = vst [vmem:[#allocation38_spill] sm:$0xff] %v19666_v16  ;;  %v19670_v7 = vld [vmem:[#allocation2 + $0xa8] sm:$0xff]  ;;  %v19672_v8 = vld [vmem:[#allocation2 + $0xb0] sm:$0xff] }
 0x31e   : > { %15439 = vmatmul.mubr.msk.f32.gmra.mrb[42].mxu1 %vm682_vm0, %v19608_v43  ;;  %8462 = vst.msk [vmem:[#allocation2 + $0x20] sm:$0xff] %vm682_vm0, %v23039_v36  ;;  %8464 = vst.msk [vmem:[#allocation2 + $0x30] sm:$0xff] %vm682_vm0, %v23039_v36  ;;  %v19674_v6 = vld [vmem:[#allocation2 + $0xc0] sm:$0xff]  ;;  %v19678_v14 = vld [vmem:[#allocation2 + $0x6a] sm:$0xff] }
 0x31f   : > { %15441 = vmatprep.mubr.msk.f32.mxu1 %vm682_vm0, %v19610_v41  ;;  %23122 = vst [vmem:[#allocation39_spill] sm:$0xff] %v19668_v60  ;;  %v19676_v24 = vld [vmem:[#allocation2 + $0x62] sm:$0xff]  ;;  %23123 = vst [vmem:[#allocation26_spill] sm:$0xff] %v19678_v14  ;;  %v19680_v42 = vld [vmem:[#allocation2 + $0x7a] sm:$0xff] }
 0x320   : > { %23124 = vst [vmem:[#allocation40_spill] sm:$0xff] %v19680_v42  ;;  %8466 = vst.msk [vmem:[#allocation2 + $0x40] sm:$0x3] %vm685_vm1, %v23039_v36  ;;  %v19694_v47 = vld [vmem:[#allocation2 + $0xc9] sm:$0xff]  ;;  %v19696_v27 = vld [vmem:[#allocation2 + $0xd9] sm:$0xff] }
 0x321   : > { %8465 = vst.msk [vmem:[#allocation2 + $0x38] sm:$0xff] %vm682_vm0, %v23039_v36  ;;  %8467 = vst.msk [vmem:[#allocation2 + $0x48] sm:$0xff] %vm682_vm0, %v23039_v36  ;;  %v19698_v13 = vld [vmem:[#allocation2 + $0xe1] sm:$0xff]  ;;  %v19702_v38 = vld [vmem:[#allocation2 + $0xd8] sm:$0xff] }
 0x322   : > { %15442 = vmatmul.mubr.msk.f32.gmra.mrb[44].mxu1 %vm682_vm0, %v19622_v54  ;;  %8469 = vst.msk [vmem:[#allocation2 + $0x58] sm:$0x3] %vm685_vm1, %v23039_v36  ;;  %23125 = vst [vmem:[#allocation27_spill] sm:$0xff] %v19694_v47  ;;  %v19700_v11 = vld [vmem:[#allocation2 + $0xc8] sm:$0xff]  ;;  %v19704_v61 = vld [vmem:[#allocation2 + $0xe0] sm:$0xff] }
 0x323   : > { %8468 = vst.msk [vmem:[#allocation2 + $0x50] sm:$0xff] %vm682_vm0, %v23039_v36  ;;  %15444 = vmatprep.mubr.msk.f32.mxu1 %vm682_vm0, %v19630_v1  ;;  %v19706_v9 = vld [vmem:[#allocation2 + $0x82] sm:$0xff]  ;;  %v19708_v45 = vld [vmem:[#allocation2 + $0x92] sm:$0xff]  ;;  %v19710_v39 = vld [vmem:[#allocation2 + $0x9a] sm:$0xff] }
 0x324   : > { %23126 = vst [vmem:[#allocation41_spill] sm:$0xff] %v19706_v9  ;;  %23127 = vst [vmem:[#allocation28_spill] sm:$0xff] %v19708_v45  ;;  %v19720_v55 = vld [vmem:[#allocation2 + $0xf1] sm:$0xff]  ;;  %v19722_v52 = vld [vmem:[#allocation2 + $0xf9] sm:$0xff] }
 0x325   : > { %23128 = vst [vmem:[#allocation42_spill] sm:$0xff] %v19710_v39  ;;  %8470 = vst.msk [vmem:[#allocation2 + $0x60] sm:$0xff] %vm682_vm0, %v23039_v36  ;;  %v19724_v2 = vld [vmem:[#allocation2 + $0x109] sm:$0xff]  ;;  %v19728_v19 = vld [vmem:[#allocation2 + $0xf8] sm:$0xff] }
 0x326   : > { %8472 = vst.msk [vmem:[#allocation2 + $0x70] sm:$0x3] %vm685_vm1, %v23039_v36  ;;  %v19726_v62 = vld [vmem:[#allocation2 + $0xf0] sm:$0xff]  ;;  %v19730_v35 = vld [vmem:[#allocation2 + $0x108] sm:$0xff]  ;;  %8475 = vst.msk [vmem:[#allocation2 + $0x88] sm:$0x3] %vm685_vm1, %v23039_v36  ;;  %15445 = vmatmul.mubr.msk.f32.gmra.mrb[46].mxu1 %vm682_vm0, %v19666_v16 }
 0x327   : > { %8471 = vst.msk [vmem:[#allocation2 + $0x68] sm:$0xff] %vm682_vm0, %v23039_v36  ;;  %8473 = vst.msk [vmem:[#allocation2 + $0x78] sm:$0xff] %vm682_vm0, %v23039_v36  ;;  %v19732_v26 = vld [vmem:[#allocation2 + $0xaa] sm:$0xff]  ;;  %v19734_v33 = vld [vmem:[#allocation2 + $0xb2] sm:$0xff]  ;;  %15447 = vmatprep.mubr.msk.f32.mxu1 %vm682_vm0, %v19668_v60 }
 0x328   : > { %23129 = vst [vmem:[#allocation29_spill] sm:$0xff] %v19732_v26  ;;  %23130 = vst [vmem:[#allocation43_spill] sm:$0xff] %v19734_v33  ;;  %v19736_v28 = vld [vmem:[#allocation2 + $0xc2] sm:$0xff]  ;;  %v19748_v44 = vld [vmem:[#allocation2 + $0x111] sm:$0xff] }
 0x329   : > { %23131 = vst [vmem:[#allocation30_spill] sm:$0xff] %v19736_v28  ;;  %8474 = vst.msk [vmem:[#allocation2 + $0x80] sm:$0xff] %vm682_vm0, %v23039_v36  ;;  %v19750_v1 = vld [vmem:[#allocation2 + $0x121] sm:$0xff]  ;;  %v19752_v54 = vld [vmem:[#allocation2 + $0x129] sm:$0xff] }
 0x32a   : > { %8476 = vst.msk [vmem:[#allocation2 + $0x90] sm:$0xff] %vm682_vm0, %v23039_v36  ;;  %8477 = vst.msk [vmem:[#allocation2 + $0x98] sm:$0xff] %vm682_vm0, %v23039_v36  ;;  %v19754_v41 = vld [vmem:[#allocation2 + $0x110] sm:$0xff]  ;;  %v19756_v43 = vld [vmem:[#allocation2 + $0x120] sm:$0xff]  ;;  %15448 = vmatmul.mubr.msk.f32.gmra.mrb[48].mxu1 %vm682_vm0, %v19694_v47 }
 0x32b   : > { %8478 = vst.msk [vmem:[#allocation2 + $0xa0] sm:$0x3] %vm685_vm1, %v23039_v36  ;;  %23132 = vst [vmem:[#allocation44_spill] sm:$0xff] %v19750_v1  ;;  %v19758_v40 = vld [vmem:[#allocation2 + $0x128] sm:$0xff]  ;;  %v19762_v31 = vld [vmem:[#allocation2 + $0xda] sm:$0xff]  ;;  %15450 = vmatprep.mubr.msk.f32.mxu1 %vm682_vm0, %v19696_v27 }
 0x32c   : > { %v19760_v4 = vld [vmem:[#allocation2 + $0xca] sm:$0xff]  ;;  %23134 = vst [vmem:[#allocation31_spill] sm:$0xff] %v19762_v31  ;;  %v19764_v20 = vld [vmem:[#allocation2 + $0xe2] sm:$0xff]  ;;  %8479 = vst.msk [vmem:[#allocation2 + $0xa8] sm:$0xff] %vm682_vm0, %v23039_v36 }
 0x32d   : > { %23133 = vst [vmem:[#allocation45_spill] sm:$0xff] %v19760_v4  ;;  %23135 = vst [vmem:[#allocation46_spill] sm:$0xff] %v19764_v20  ;;  %v19776_v29 = vld [vmem:[#allocation2 + $0x139] sm:$0xff]  ;;  %v19778_v12 = vld [vmem:[#allocation2 + $0x141] sm:$0xff] }
 0x32e   : > { %8481 = vst.msk [vmem:[#allocation2 + $0xb8] sm:$0x3] %vm685_vm1, %v23039_v36  ;;  %23136 = vst [vmem:[#allocation33_spill] sm:$0xff] %v19776_v29  ;;  %v19780_v21 = vld [vmem:[#allocation2 + $0x151] sm:$0xff]  ;;  %v19784_v63 = vld [vmem:[#allocation2 + $0x140] sm:$0xff]  ;;  %15451 = vmatmul.mubr.msk.f32.gmra.mrb[50].mxu1 %vm682_vm0, %v19698_v13 }
 0x32f   : > { %8480 = vst.msk [vmem:[#allocation2 + $0xb0] sm:$0xff] %vm682_vm0, %v23039_v36  ;;  %8482 = vst.msk [vmem:[#allocation2 + $0xc0] sm:$0xff] %vm682_vm0, %v23039_v36  ;;  %v19782_v34 = vld [vmem:[#allocation2 + $0x138] sm:$0xff]  ;;  %v19786_v20 = vld [vmem:[#allocation2 + $0x150] sm:$0xff]  ;;  %15453 = vmatprep.mubr.msk.f32.mxu1 %vm682_vm0, %v19720_v55 }
 0x330   : > { %23137 = vst [vmem:[#allocation47_spill] sm:$0xff] %v19778_v12  ;;  %23138 = vst [vmem:[#allocation48_spill] sm:$0xff] %v19780_v21  ;;  %v19788_v31 = vld [vmem:[#allocation2 + $0xf2] sm:$0xff]  ;;  %v19790_v4 = vld [vmem:[#allocation2 + $0xfa] sm:$0xff] }
 0x331   : > { %23139 = vst [vmem:[#allocation34_spill] sm:$0xff] %v19788_v31  ;;  %23140 = vst [vmem:[#allocation54_spill] sm:$0xff] %v19790_v4  ;;  %v19792_v28 = vld [vmem:[#allocation2 + $0x10a] sm:$0xff]  ;;  %v19806_v16 = vld [vmem:[#allocation2 + $0x159] sm:$0xff] }
 0x332   : > { %23141 = vst [vmem:[#allocation56_spill] sm:$0xff] %v19792_v28  ;;  %8484 = vst.msk [vmem:[#allocation2 + $0xd0] sm:$0x3] %vm685_vm1, %v23039_v36  ;;  %v19808_v28 = vld [vmem:[#allocation2 + $0x169] sm:$0xff]  ;;  %v19810_v4 = vld [vmem:[#allocation2 + $0x171] sm:$0xff]  ;;  %15454 = vmatmul.mubr.msk.f32.gmra.mrb[52].mxu1 %vm682_vm0, %v19722_v52 }
 0x333   : > { %8483 = vst.msk [vmem:[#allocation2 + $0xc8] sm:$0xff] %vm682_vm0, %v23039_v36  ;;  %8485 = vst.msk [vmem:[#allocation2 + $0xd8] sm:$0xff] %vm682_vm0, %v23039_v36  ;;  %v19812_v31 = vld [vmem:[#allocation2 + $0x158] sm:$0xff]  ;;  %v19814_v33 = vld [vmem:[#allocation2 + $0x168] sm:$0xff]  ;;  %15456 = vmatprep.mubr.msk.f32.mxu1 %vm682_vm0, %v19724_v2 }
 0x334   : > { %8487 = vst.msk [vmem:[#allocation2 + $0xe8] sm:$0x3] %vm685_vm1, %v23039_v36  ;;  %23142 = vst [vmem:[#allocation57_spill] sm:$0xff] %v19808_v28  ;;  %v19816_v26 = vld [vmem:[#allocation2 + $0x170] sm:$0xff]  ;;  %v19820_v45 = vld [vmem:[#allocation2 + $0x122] sm:$0xff] }
 0x335   : > { %8486 = vst.msk [vmem:[#allocation2 + $0xe0] sm:$0xff] %vm682_vm0, %v23039_v36  ;;  %23143 = vst [vmem:[#allocation58_spill] sm:$0xff] %v19812_v31  ;;  %v19818_v39 = vld [vmem:[#allocation2 + $0x112] sm:$0xff]  ;;  %v19822_v9 = vld [vmem:[#allocation2 + $0x12a] sm:$0xff] }
 0x336   : > { %23144 = vst [vmem:[#allocation59_spill] sm:$0xff] %v19814_v33  ;;  %23145 = vst [vmem:[#allocation60_spill] sm:$0xff] %v19816_v26  ;;  %v19832_v60 = vld [vmem:[#allocation2 + $0x13a] sm:$0xff]  ;;  %v19834_v42 = vld [vmem:[#allocation2 + $0x142] sm:$0xff]  ;;  %15457 = vmatmul.mubr.msk.f32.gmra.mrb[54].mxu1 %vm682_vm0, %v19748_v44 }
 0x337   : > { %23146 = vst [vmem:[#allocation61_spill] sm:$0xff] %v19818_v39  ;;  %23147 = vst [vmem:[#allocation62_spill] sm:$0xff] %v19820_v45  ;;  %v19836_v39 = vld [vmem:[#allocation2 + $0x152] sm:$0xff]  ;;  %v19886_v47 = vld [vmem:[#allocation2 + $0x18a] sm:$0xff]  ;;  %15459 = vmatprep.mubr.msk.f32.mxu1 %vm682_vm0, %v19750_v1 }
 0x338   : > { %23148 = vst [vmem:[#allocation63_spill] sm:$0xff] %v19822_v9  ;;  %8488 = vst.msk [vmem:[#allocation2 + $0xf0] sm:$0xff] %vm682_vm0, %v23039_v36 }
 0x339   : > { %8490 = vst.msk [vmem:[#allocation2 + $0x100] sm:$0x3] %vm685_vm1, %v23039_v36  ;;  %23149 = vst [vmem:[#allocation64_spill] sm:$0xff] %v19832_v60  ;;  %v19848_v60 = vld [vmem:[#allocation2 + $0x15a] sm:$0xff] }
 0x33a   : > { %8489 = vst.msk [vmem:[#allocation2 + $0xf8] sm:$0xff] %vm682_vm0, %v23039_v36  ;;  %8491 = vst.msk [vmem:[#allocation2 + $0x108] sm:$0xff] %vm682_vm0, %v23039_v36  ;;  %15460 = vmatmul.mubr.msk.f32.gmra.mrb[56].mxu1 %vm682_vm0, %v19752_v54 }
 0x33b   : > { %23150 = vst [vmem:[#allocation65_spill] sm:$0xff] %v19834_v42  ;;  %23151 = vst [vmem:[#allocation66_spill] sm:$0xff] %v19836_v39  ;;  %v19850_v42 = vld [vmem:[#allocation2 + $0x16a] sm:$0xff]  ;;  %v19852_v39 = vld [vmem:[#allocation2 + $0x172] sm:$0xff]  ;;  %15462 = vmatprep.mubr.msk.f32.mxu1 %vm682_vm0, %v19776_v29 }
 0x33c   : > { %8493 = vst.msk [vmem:[#allocation2 + $0x118] sm:$0x3] %vm685_vm1, %v23039_v36  ;;  %8496 = vst.msk [vmem:[#allocation2 + $0x130] sm:$0x3] %vm685_vm1, %v23039_v36 }
 0x33d   : > { %8492 = vst.msk [vmem:[#allocation2 + $0x110] sm:$0xff] %vm682_vm0, %v23039_v36  ;;  %8494 = vst.msk [vmem:[#allocation2 + $0x120] sm:$0xff] %vm682_vm0, %v23039_v36 }
 0x33e   : > { %8495 = vst.msk [vmem:[#allocation2 + $0x128] sm:$0xff] %vm682_vm0, %v23039_v36  ;;  %23152 = vst [vmem:[#allocation67_spill] sm:$0xff] %v19848_v60  ;;  %v19864_v60 = vld [vmem:[#allocation2 + $0x180] sm:$0xff]  ;;  %15463 = vmatmul.mubr.msk.f32.gmra.mrb[58].mxu1 %vm682_vm0, %v19778_v12 }
 0x33f   : > { %23153 = vst [vmem:[#allocation68_spill] sm:$0xff] %v19850_v42  ;;  %23154 = vst [vmem:[#allocation69_spill] sm:$0xff] %v19852_v39  ;;  %v19866_v42 = vld [vmem:[#allocation2 + $0x181] sm:$0xff]  ;;  %15465 = vmatprep.mubr.msk.f32.mxu1 %vm682_vm0, %v19780_v21 }
 0x340   : > { %8497 = vst.msk [vmem:[#allocation2 + $0x138] sm:$0xff] %vm682_vm0, %v23039_v36  ;;  %8498 = vst.msk [vmem:[#allocation2 + $0x140] sm:$0xff] %vm682_vm0, %v23039_v36  ;;  %v19868_v39 = vld [vmem:[#allocation2 + $0x182] sm:$0xff] }
 0x341   : > { %8499 = vst.msk [vmem:[#allocation2 + $0x148] sm:$0x3] %vm685_vm1, %v23039_v36  ;;  %23155 = vst [vmem:[#allocation53_spill] sm:$0xff] %v19864_v60 }
 0x342   : > { %8500 = vst.msk [vmem:[#allocation2 + $0x150] sm:$0xff] %vm682_vm0, %v23039_v36  ;;  %23156 = vst [vmem:[#allocation55_spill] sm:$0xff] %v19866_v42  ;;  %v19882_v42 = vld [vmem:[#allocation2 + $0x188] sm:$0xff]  ;;  %15466 = vmatmul.mubr.msk.f32.gmra.mrb[60].mxu1 %vm682_vm0, %v19806_v16 }
 0x343   : > { %23157 = vst [vmem:[#allocation70_spill] sm:$0xff] %v19868_v39  ;;  %8502 = vst.msk [vmem:[#allocation2 + $0x160] sm:$0x3] %vm685_vm1, %v23039_v36  ;;  %v19884_v39 = vld [vmem:[#allocation2 + $0x189] sm:$0xff]  ;;  %15468 = vmatprep.mubr.msk.f32.mxu1 %vm682_vm0, %v19808_v28 }
 0x344   : > { %8501 = vst.msk [vmem:[#allocation2 + $0x158] sm:$0xff] %vm682_vm0, %v23039_v36  ;;  %8503 = vst.msk [vmem:[#allocation2 + $0x168] sm:$0xff] %vm682_vm0, %v23039_v36 }
 0x345   : > { %8505 = vst.msk [vmem:[#allocation2 + $0x178] sm:$0x3] %vm685_vm1, %v23039_v36  ;;  %23158 = vst [vmem:[#allocation71_spill] sm:$0xff] %v19882_v42 }
 0x346   : > { %8504 = vst.msk [vmem:[#allocation2 + $0x170] sm:$0xff] %vm682_vm0, %v23039_v36  ;;  %23159 = vst [vmem:[#allocation72_spill] sm:$0xff] %v19884_v39  ;;  %15469 = vmatmul.mubr.msk.f32.gmra.mrb[62].mxu1 %vm682_vm0, %v19810_v4 }
 0x347   : > { %23160 = vst [vmem:[#allocation73_spill] sm:$0xff] %v19886_v47  ;;  %8506 = vst.msk [vmem:[#allocation2 + $0x180] sm:$0xff] %vm682_vm0, %v23039_v36  ;;  %v5789_v47 = vld [vmem:[%s22764_s8 + $0x38] sm:$0xff]  ;;  %15475 = vmatprep.mubr.msk.f32.mxu1 %vm682_vm0, %v19518_v5 }
 0x348   : > { %8508 = vst.msk [vmem:[#allocation2 + $0x190] sm:$0x3] %vm685_vm1, %v23039_v36 }
 0x349   : > { %8507 = vst.msk [vmem:[#allocation2 + $0x188] sm:$0xff] %vm682_vm0, %v23039_v36  ;;  %v5788_v36 = vld [vmem:[%s22764_s8 + $0x30] sm:$0xff] }
 0x34a   : > { %v16403_v39 = vpack.c.bf16 %v5789_v47, %v5788_v36  ;;  %15476 = vmatmul.mubr.msk.f32.vlgmr.msra.gmra.mrb[32].mxu1 %vm682_vm0, %v19530_v32  ;;  %v6175_v36 = vld [vmem:[%s22764_s8 + $0x40] sm:$0xff]  ;;  %v23164_v47 = vld [vmem:[#allocation42_spill] sm:$0xff] }
 0x34b   : > { %16402 = vmatpush3.bf16.msra.mxu1 %v19290_v46  ;;  %15478 = vmatprep.mubr.msk.f32.mxu1 %vm682_vm0, %v19614_v49  ;;  %v6176_v46 = vld [vmem:[%s22764_s8 + $0x48] sm:$0xff]  ;;  %v23162_v32 = vld [vmem:[#allocation41_spill] sm:$0xff] }
 0x34c   : > { %16404 = vmatprep.subr.bf16.mxu1 %v16403_v39  ;;  %v16407_v5 = vpack.c.bf16 %v6176_v46, %v6175_v36  ;;  %v23166_v36 = vld [vmem:[#allocation43_spill] sm:$0xff]  ;;  %v23167_v46 = vld [vmem:[#allocation30_spill] sm:$0xff] }
 0x34e   : > { %15479 = vmatmul.mubr.msk.f32.gmra.mrb[34].mxu1 %vm682_vm0, %v19616_v30 }
 0x34f   : > { %15481 = vmatprep.mubr.msk.f32.mxu1 %vm682_vm0, %v19618_v53 }
 0x352   : > { %15482 = vmatmul.mubr.msk.f32.gmra.mrb[36].mxu1 %vm682_vm0, %v19624_v57 }
 0x353   : > { %15484 = vmatprep.mubr.msk.f32.mxu1 %vm682_vm0, %v19626_v58 }
 0x356   : > { %15485 = vmatmul.mubr.msk.f32.gmra.mrb[38].mxu1 %vm682_vm0, %v19628_v59 }
 0x357   : > { %15487 = vmatprep.mubr.msk.f32.mxu1 %vm682_vm0, %v19632_v18 }
 0x35a   : > { %15488 = vmatmul.mubr.msk.f32.gmra.mrb[40].mxu1 %vm682_vm0, %v19634_v3 }
 0x35b   : > { %15490 = vmatprep.mubr.msk.f32.mxu1 %vm682_vm0, %v19636_v10 }
 0x35e   : > { %15491 = vmatmul.mubr.msk.f32.gmra.mrb[42].mxu1 %vm682_vm0, %v19644_v22 }
 0x35f   : > { %15493 = vmatprep.mubr.msk.f32.mxu1 %vm682_vm0, %v19646_v51 }
 0x362   : > { %15494 = vmatmul.mubr.msk.f32.gmra.mrb[44].mxu1 %vm682_vm0, %v19648_v56 }
 0x363   : > { %15496 = vmatprep.mubr.msk.f32.mxu1 %vm682_vm0, %v19670_v7 }
 0x366   : > { %15497 = vmatmul.mubr.msk.f32.gmra.mrb[46].mxu1 %vm682_vm0, %v19672_v8 }
 0x367   : > { %15499 = vmatprep.mubr.msk.f32.mxu1 %vm682_vm0, %v19674_v6 }
 0x36a   : > { %15500 = vmatmul.mubr.msk.f32.gmra.mrb[48].mxu1 %vm682_vm0, %v19700_v11 }
 0x36b   : > { %15502 = vmatprep.mubr.msk.f32.mxu1 %vm682_vm0, %v19702_v38 }
 0x36e   : > { %15503 = vmatmul.mubr.msk.f32.gmra.mrb[50].mxu1 %vm682_vm0, %v19704_v61 }
 0x36f   : > { %15505 = vmatprep.mubr.msk.f32.mxu1 %vm682_vm0, %v19726_v62 }
 0x372   : > { %15506 = vmatmul.mubr.msk.f32.gmra.mrb[52].mxu1 %vm682_vm0, %v19728_v19 }
 0x373   : > { %15508 = vmatprep.mubr.msk.f32.mxu1 %vm682_vm0, %v19730_v35 }
 0x376   : > { %15509 = vmatmul.mubr.msk.f32.gmra.mrb[54].mxu1 %vm682_vm0, %v19754_v41 }
 0x377   : > { %15511 = vmatprep.mubr.msk.f32.mxu1 %vm682_vm0, %v19756_v43 }
 0x37a   : > { %15512 = vmatmul.mubr.msk.f32.gmra.mrb[56].mxu1 %vm682_vm0, %v19758_v40 }
 0x37b   : > { %15514 = vmatprep.mubr.msk.f32.mxu1 %vm682_vm0, %v19782_v34 }
 0x37e   : > { %15515 = vmatmul.mubr.msk.f32.gmra.mrb[58].mxu1 %vm682_vm0, %v19784_v63 }
 0x37f   : > { %15517 = vmatprep.mubr.msk.f32.mxu1 %vm682_vm0, %v19786_v20 }
 0x382   : > { %15518 = vmatmul.mubr.msk.f32.gmra.mrb[60].mxu1 %vm682_vm0, %v19812_v31 }
 0x383   : > { %15520 = vmatprep.mubr.msk.f32.mxu1 %vm682_vm0, %v19814_v33 }
 0x386   : > { %15521 = vmatmul.mubr.msk.f32.gmra.mrb[62].mxu1 %vm682_vm0, %v19816_v26 }
 0x387   : > { %15527 = vmatprep.mubr.msk.f32.mxu1 %vm682_vm0, %v19520_v50  ;;  %v23161_v50 = vld [vmem:[#allocation40_spill] sm:$0xff] }
 0x38a   : > { %15528 = vmatmul.mubr.msk.f32.vlgmr.msra.gmra.mrb[32].mxu1 %vm682_vm0, %v19534_v23  ;;  %v23163_v23 = vld [vmem:[#allocation28_spill] sm:$0xff] }
 0x38b   : > { %16406 = vmatpush3.bf16.msra.mxu1 %v16403_v39  ;;  %15530 = vmatprep.mubr.msk.f32.mxu1 %vm682_vm0, %v19638_v37  ;;  %v23165_v39 = vld [vmem:[#allocation29_spill] sm:$0xff] }
 0x38c   : > { %16408 = vmatprep.subr.bf16.mxu1 %v16407_v5 }
 0x38e   : > { %15531 = vmatmul.mubr.msk.f32.gmra.mrb[34].mxu1 %vm682_vm0, %v19640_v15 }
 0x38f   : > { %15533 = vmatprep.mubr.msk.f32.mxu1 %vm682_vm0, %v19642_v25 }
 0x392   : > { %15534 = vmatmul.mubr.msk.f32.gmra.mrb[36].mxu1 %vm682_vm0, %v19650_v48 }
 0x393   : > { %15536 = vmatprep.mubr.msk.f32.mxu1 %vm682_vm0, %v19652_v0 }
 0x396   : > { %15537 = vmatmul.mubr.msk.f32.gmra.mrb[38].mxu1 %vm682_vm0, %v19654_v17 }
 0x397   : > { %15539 = vmatprep.mubr.msk.f32.mxu1 %vm682_vm0, %v19676_v24 }
 0x39a   : > { %15540 = vmatmul.mubr.msk.f32.gmra.mrb[40].mxu1 %vm682_vm0, %v19678_v14  ;;  %v23168_v14 = vld [vmem:[#allocation45_spill] sm:$0xff] }
 0x39b   : > { %15542 = vmatprep.mubr.msk.f32.mxu1 %vm682_vm0, %v23161_v50  ;;  %v23169_v50 = vld [vmem:[#allocation31_spill] sm:$0xff] }
 0x39e   : > { %15543 = vmatmul.mubr.msk.f32.gmra.mrb[42].mxu1 %vm682_vm0, %v23162_v32  ;;  %v23170_v32 = vld [vmem:[#allocation46_spill] sm:$0xff] }
 0x39f   : > { %15545 = vmatprep.mubr.msk.f32.mxu1 %vm682_vm0, %v23163_v23  ;;  %v23171_v23 = vld [vmem:[#allocation34_spill] sm:$0xff] }
 0x3a2   : > { %15546 = vmatmul.mubr.msk.f32.gmra.mrb[44].mxu1 %vm682_vm0, %v23164_v47  ;;  %v23172_v47 = vld [vmem:[#allocation54_spill] sm:$0xff] }
 0x3a3   : > { %15548 = vmatprep.mubr.msk.f32.mxu1 %vm682_vm0, %v23165_v39  ;;  %v23173_v39 = vld [vmem:[#allocation56_spill] sm:$0xff] }
 0x3a6   : > { %15549 = vmatmul.mubr.msk.f32.gmra.mrb[46].mxu1 %vm682_vm0, %v23166_v36  ;;  %v23174_v36 = vld [vmem:[#allocation61_spill] sm:$0xff] }
 0x3a7   : > { %15551 = vmatprep.mubr.msk.f32.mxu1 %vm682_vm0, %v23167_v46 }
 0x3aa   : > { %15552 = vmatmul.mubr.msk.f32.gmra.mrb[48].mxu1 %vm682_vm0, %v23168_v14 }
 0x3ab   : > { %15554 = vmatprep.mubr.msk.f32.mxu1 %vm682_vm0, %v23169_v50  ;;  %v23175_v50 = vld [vmem:[#allocation64_spill] sm:$0xff] }
 0x3ae   : > { %15555 = vmatmul.mubr.msk.f32.gmra.mrb[50].mxu1 %vm682_vm0, %v23170_v32  ;;  %v23176_v32 = vld [vmem:[#allocation65_spill] sm:$0xff] }
 0x3af   : > { %15557 = vmatprep.mubr.msk.f32.mxu1 %vm682_vm0, %v23171_v23  ;;  %v23177_v23 = vld [vmem:[#allocation66_spill] sm:$0xff] }
 0x3b2   : > { %15558 = vmatmul.mubr.msk.f32.gmra.mrb[52].mxu1 %vm682_vm0, %v23172_v47  ;;  %v23178_v47 = vld [vmem:[#allocation67_spill] sm:$0xff] }
 0x3b3   : > { %15560 = vmatprep.mubr.msk.f32.mxu1 %vm682_vm0, %v23173_v39  ;;  %v23179_v39 = vld [vmem:[#allocation68_spill] sm:$0xff] }
 0x3b6   : > { %15561 = vmatmul.mubr.msk.f32.gmra.mrb[54].mxu1 %vm682_vm0, %v23174_v36 }
 0x3b7   : > { %15563 = vmatprep.mubr.msk.f32.mxu1 %vm682_vm0, %v19820_v45  ;;  %v6562_v45 = vld [vmem:[%s22764_s8 + $0x50] sm:$0xff] }
 0x3ba   : > { %15564 = vmatmul.mubr.msk.f32.gmra.mrb[56].mxu1 %vm682_vm0, %v19822_v9  ;;  %v23180_v9 = vld [vmem:[#allocation69_spill] sm:$0xff] }
 0x3bb   : > { %15566 = vmatprep.mubr.msk.f32.mxu1 %vm682_vm0, %v23175_v50  ;;  %v6563_v50 = vld [vmem:[%s22764_s8 + $0x58] sm:$0xff] }
 0x3be   : > { %15567 = vmatmul.mubr.msk.f32.gmra.mrb[58].mxu1 %vm682_vm0, %v23176_v32 }
 0x3bf   : > { %15569 = vmatprep.mubr.msk.f32.mxu1 %vm682_vm0, %v23177_v23  ;;  %v16411_v23 = vpack.c.bf16 %v6563_v50, %v6562_v45  ;;  %v23181_v45 = vld [vmem:[#allocation19_spill] sm:$0xff]  ;;  %v23182_v50 = vld [vmem:[#allocation49_spill] sm:$0xff] }
 0x3c2   : > { %15570 = vmatmul.mubr.msk.f32.gmra.mrb[60].mxu1 %vm682_vm0, %v23178_v47 }
 0x3c3   : > { %15572 = vmatprep.mubr.msk.f32.mxu1 %vm682_vm0, %v23179_v39 }
 0x3c6   : > { %15573 = vmatmul.mubr.msk.f32.gmra.mrb[62].mxu1 %vm682_vm0, %v23180_v9 }
 0x3c7   : > { %15579 = vmatprep.mubr.msk.f32.mxu1 %vm682_vm0, %v19614_v49  ;;  %v6949_v49 = vld [vmem:[%s22764_s8 + $0x60] sm:$0xff] }
 0x3ca   : > { %15580 = vmatmul.mubr.msk.f32.vlgmr.msra.gmra.mrb[32].mxu1 %vm682_vm0, %v19616_v30  ;;  %v6950_v30 = vld [vmem:[%s22764_s8 + $0x68] sm:$0xff] }
 0x3cb   : > { %16410 = vmatpush3.bf16.msra.mxu1 %v16407_v5  ;;  %15582 = vmatprep.mubr.msk.f32.mxu1 %vm682_vm0, %v19618_v53  ;;  %v16415_v5 = vpack.c.bf16 %v6950_v30, %v6949_v49  ;;  %v23188_v49 = vld [vmem:[#allocation52_spill] sm:$0xff]  ;;  %v23190_v30 = vld [vmem:[#allocation22_spill] sm:$0xff] }
 0x3cc   : > { %16412 = vmatprep.subr.bf16.mxu1 %v16411_v23 }
 0x3ce   : > { %15583 = vmatmul.mubr.msk.f32.gmra.mrb[34].mxu1 %vm682_vm0, %v19624_v57 }
 0x3cf   : > { %15585 = vmatprep.mubr.msk.f32.mxu1 %vm682_vm0, %v19626_v58 }
 0x3d2   : > { %15586 = vmatmul.mubr.msk.f32.gmra.mrb[36].mxu1 %vm682_vm0, %v19628_v59 }
 0x3d3   : > { %15588 = vmatprep.mubr.msk.f32.mxu1 %vm682_vm0, %v19632_v18 }
 0x3d6   : > { %15589 = vmatmul.mubr.msk.f32.gmra.mrb[38].mxu1 %vm682_vm0, %v19634_v3 }
 0x3d7   : > { %15591 = vmatprep.mubr.msk.f32.mxu1 %vm682_vm0, %v19636_v10 }
 0x3da   : > { %15592 = vmatmul.mubr.msk.f32.gmra.mrb[40].mxu1 %vm682_vm0, %v19644_v22 }
 0x3db   : > { %15594 = vmatprep.mubr.msk.f32.mxu1 %vm682_vm0, %v19646_v51 }
 0x3de   : > { %15595 = vmatmul.mubr.msk.f32.gmra.mrb[42].mxu1 %vm682_vm0, %v19648_v56 }
 0x3df   : > { %15597 = vmatprep.mubr.msk.f32.mxu1 %vm682_vm0, %v19670_v7 }
 0x3e2   : > { %15598 = vmatmul.mubr.msk.f32.gmra.mrb[44].mxu1 %vm682_vm0, %v19672_v8 }
 0x3e3   : > { %15600 = vmatprep.mubr.msk.f32.mxu1 %vm682_vm0, %v19674_v6 }
 0x3e6   : > { %15601 = vmatmul.mubr.msk.f32.gmra.mrb[46].mxu1 %vm682_vm0, %v19700_v11 }
 0x3e7   : > { %15603 = vmatprep.mubr.msk.f32.mxu1 %vm682_vm0, %v19702_v38 }
 0x3ea   : > { %15604 = vmatmul.mubr.msk.f32.gmra.mrb[48].mxu1 %vm682_vm0, %v19704_v61 }
 0x3eb   : > { %15606 = vmatprep.mubr.msk.f32.mxu1 %vm682_vm0, %v19726_v62 }
 0x3ee   : > { %15607 = vmatmul.mubr.msk.f32.gmra.mrb[50].mxu1 %vm682_vm0, %v19728_v19 }
 0x3ef   : > { %15609 = vmatprep.mubr.msk.f32.mxu1 %vm682_vm0, %v19730_v35 }
 0x3f2   : > { %15610 = vmatmul.mubr.msk.f32.gmra.mrb[52].mxu1 %vm682_vm0, %v19754_v41 }
 0x3f3   : > { %15612 = vmatprep.mubr.msk.f32.mxu1 %vm682_vm0, %v19756_v43 }
 0x3f6   : > { %15613 = vmatmul.mubr.msk.f32.gmra.mrb[54].mxu1 %vm682_vm0, %v19758_v40 }
 0x3f7   : > { %15615 = vmatprep.mubr.msk.f32.mxu1 %vm682_vm0, %v19782_v34 }
 0x3fa   : > { %15616 = vmatmul.mubr.msk.f32.gmra.mrb[56].mxu1 %vm682_vm0, %v19784_v63 }
 0x3fb   : > { %15618 = vmatprep.mubr.msk.f32.mxu1 %vm682_vm0, %v19786_v20 }
 0x3fe   : > { %15619 = vmatmul.mubr.msk.f32.gmra.mrb[58].mxu1 %vm682_vm0, %v19812_v31  ;;  %v23186_v31 = vld [vmem:[#allocation51_spill] sm:$0xff] }
 0x3ff   : > { %15621 = vmatprep.mubr.msk.f32.mxu1 %vm682_vm0, %v19814_v33  ;;  %v23185_v33 = vld [vmem:[#allocation20_spill] sm:$0xff] }
 0x402   : > { %15622 = vmatmul.mubr.msk.f32.gmra.mrb[60].mxu1 %vm682_vm0, %v19816_v26  ;;  %v23184_v26 = vld [vmem:[#allocation50_spill] sm:$0xff] }
 0x403   : > { %15624 = vmatprep.mubr.msk.f32.mxu1 %vm682_vm0, %v19864_v60  ;;  %v23183_v60 = vld [vmem:[#allocation25_spill] sm:$0xff] }
 0x406   : > { %15625 = vmatmul.mubr.msk.f32.gmra.mrb[62].mxu1 %vm682_vm0, %v19882_v42  ;;  %v23187_v42 = vld [vmem:[#allocation32_spill] sm:$0xff] }
 0x407   : > { %15631 = vmatprep.mubr.msk.f32.mxu1 %vm682_vm0, %v23181_v45  ;;  %v23191_v45 = vld [vmem:[#allocation35_spill] sm:$0xff] }
 0x40a   : > { %15632 = vmatmul.mubr.msk.f32.vlgmr.msra.gmra.mrb[32].mxu1 %vm682_vm0, %v23182_v50  ;;  %v23192_v50 = vld [vmem:[#allocation23_spill] sm:$0xff] }
 0x40b   : > { %16414 = vmatpush3.bf16.msra.mxu1 %v16411_v23  ;;  %15634 = vmatprep.mubr.msk.f32.mxu1 %vm682_vm0, %v23183_v60  ;;  %v23189_v23 = vld [vmem:[#allocation21_spill] sm:$0xff] }
 0x40c   : > { %16416 = vmatprep.subr.bf16.mxu1 %v16415_v5 }
 0x40e   : > { %15635 = vmatmul.mubr.msk.f32.gmra.mrb[34].mxu1 %vm682_vm0, %v23184_v26 }
 0x40f   : > { %15637 = vmatprep.mubr.msk.f32.mxu1 %vm682_vm0, %v23185_v33  ;;  %v23193_v33 = vld [vmem:[#allocation36_spill] sm:$0xff] }
 0x412   : > { %15638 = vmatmul.mubr.msk.f32.gmra.mrb[36].mxu1 %vm682_vm0, %v23186_v31  ;;  %v23194_v31 = vld [vmem:[#allocation38_spill] sm:$0xff] }
 0x413   : > { %15640 = vmatprep.mubr.msk.f32.mxu1 %vm682_vm0, %v23187_v42  ;;  %v23195_v42 = vld [vmem:[#allocation39_spill] sm:$0xff] }
 0x416   : > { %15641 = vmatmul.mubr.msk.f32.gmra.mrb[38].mxu1 %vm682_vm0, %v23188_v49  ;;  %v23196_v49 = vld [vmem:[#allocation27_spill] sm:$0xff] }
 0x417   : > { %15643 = vmatprep.mubr.msk.f32.mxu1 %vm682_vm0, %v23189_v23 }
 0x41a   : > { %15644 = vmatmul.mubr.msk.f32.gmra.mrb[40].mxu1 %vm682_vm0, %v23190_v30 }
 0x41b   : > { %15646 = vmatprep.mubr.msk.f32.mxu1 %vm682_vm0, %v23191_v45 }
 0x41e   : > { %15647 = vmatmul.mubr.msk.f32.gmra.mrb[42].mxu1 %vm682_vm0, %v23192_v50 }
 0x41f   : > { %15649 = vmatprep.mubr.msk.f32.mxu1 %vm682_vm0, %v23193_v33 }
 0x422   : > { %15650 = vmatmul.mubr.msk.f32.gmra.mrb[44].mxu1 %vm682_vm0, %v23194_v31 }
 0x423   : > { %15652 = vmatprep.mubr.msk.f32.mxu1 %vm682_vm0, %v23195_v42 }
 0x426   : > { %15653 = vmatmul.mubr.msk.f32.gmra.mrb[46].mxu1 %vm682_vm0, %v23196_v49 }
 0x427   : > { %15655 = vmatprep.mubr.msk.f32.mxu1 %vm682_vm0, %v19696_v27 }
 0x42a   : > { %15656 = vmatmul.mubr.msk.f32.gmra.mrb[48].mxu1 %vm682_vm0, %v19698_v13 }
 0x42b   : > { %15658 = vmatprep.mubr.msk.f32.mxu1 %vm682_vm0, %v19720_v55 }
 0x42e   : > { %15659 = vmatmul.mubr.msk.f32.gmra.mrb[50].mxu1 %vm682_vm0, %v19722_v52 }
 0x42f   : > { %15661 = vmatprep.mubr.msk.f32.mxu1 %vm682_vm0, %v19724_v2 }
 0x432   : > { %15662 = vmatmul.mubr.msk.f32.gmra.mrb[52].mxu1 %vm682_vm0, %v19748_v44 }
 0x433   : > { %15664 = vmatprep.mubr.msk.f32.mxu1 %vm682_vm0, %v19750_v1  ;;  %v23197_v1 = vld [vmem:[#allocation55_spill] sm:$0xff] }
 0x436   : > { %15665 = vmatmul.mubr.msk.f32.gmra.mrb[54].mxu1 %vm682_vm0, %v19752_v54 }
 0x437   : > { %15667 = vmatprep.mubr.msk.f32.mxu1 %vm682_vm0, %v19776_v29  ;;  %v7336_v29 = vld [vmem:[%s22764_s8 + $0x70] sm:$0xff] }
 0x43a   : > { %15668 = vmatmul.mubr.msk.f32.gmra.mrb[56].mxu1 %vm682_vm0, %v19778_v12  ;;  %v23198_v12 = vld [vmem:[#allocation72_spill] sm:$0xff] }
 0x43b   : > { %15670 = vmatprep.mubr.msk.f32.mxu1 %vm682_vm0, %v19780_v21  ;;  %v7337_v21 = vld [vmem:[%s22764_s8 + $0x78] sm:$0xff] }
 0x43e   : > { %15671 = vmatmul.mubr.msk.f32.gmra.mrb[58].mxu1 %vm682_vm0, %v19806_v16 }
 0x43f   : > { %15673 = vmatprep.mubr.msk.f32.mxu1 %vm682_vm0, %v19808_v28  ;;  %v16419_v28 = vpack.c.bf16 %v7337_v21, %v7336_v29  ;;  %v23199_v21 = vld [vmem:[#allocation26_spill] sm:$0xff]  ;;  %v23200_v29 = vld [vmem:[#allocation40_spill] sm:$0xff] }
 0x442   : > { %15674 = vmatmul.mubr.msk.f32.gmra.mrb[60].mxu1 %vm682_vm0, %v19810_v4 }
 0x443   : > { %15676 = vmatprep.mubr.msk.f32.mxu1 %vm682_vm0, %v23197_v1 }
 0x446   : > { %15677 = vmatmul.mubr.msk.f32.gmra.mrb[62].mxu1 %vm682_vm0, %v23198_v12 }
 0x447   : > { %15683 = vmatprep.mubr.msk.f32.mxu1 %vm682_vm0, %v19638_v37  ;;  %v23201_v37 = vld [vmem:[#allocation41_spill] sm:$0xff] }
 0x44a   : > { %15684 = vmatmul.mubr.msk.f32.vlgmr.msra.gmra.mrb[32].mxu1 %vm682_vm0, %v19640_v15  ;;  %v23202_v15 = vld [vmem:[#allocation28_spill] sm:$0xff] }
 0x44b   : > { %16418 = vmatpush3.bf16.msra.mxu1 %v16415_v5  ;;  %15686 = vmatprep.mubr.msk.f32.mxu1 %vm682_vm0, %v19642_v25  ;;  %v23203_v5 = vld [vmem:[#allocation42_spill] sm:$0xff] }
 0x44c   : > { %16420 = vmatprep.subr.bf16.mxu1 %v16419_v28 }
 0x44e   : > { %15687 = vmatmul.mubr.msk.f32.gmra.mrb[34].mxu1 %vm682_vm0, %v19650_v48 }
 0x44f   : > { %15689 = vmatprep.mubr.msk.f32.mxu1 %vm682_vm0, %v19652_v0  ;;  %v23204_v0 = vld [vmem:[#allocation29_spill] sm:$0xff] }
 0x452   : > { %15690 = vmatmul.mubr.msk.f32.gmra.mrb[36].mxu1 %vm682_vm0, %v19654_v17  ;;  %v23205_v17 = vld [vmem:[#allocation43_spill] sm:$0xff] }
 0x453   : > { %15692 = vmatprep.mubr.msk.f32.mxu1 %vm682_vm0, %v19676_v24 }
 0x456   : > { %15693 = vmatmul.mubr.msk.f32.gmra.mrb[38].mxu1 %vm682_vm0, %v23199_v21 }
 0x457   : > { %15695 = vmatprep.mubr.msk.f32.mxu1 %vm682_vm0, %v23200_v29  ;;  %v23206_v29 = vld [vmem:[#allocation31_spill] sm:$0xff] }
 0x45a   : > { %15696 = vmatmul.mubr.msk.f32.gmra.mrb[40].mxu1 %vm682_vm0, %v23201_v37  ;;  %v23207_v37 = vld [vmem:[#allocation46_spill] sm:$0xff] }
 0x45b   : > { %15698 = vmatprep.mubr.msk.f32.mxu1 %vm682_vm0, %v23202_v15  ;;  %v23208_v15 = vld [vmem:[#allocation34_spill] sm:$0xff] }
 0x45e   : > { %15699 = vmatmul.mubr.msk.f32.gmra.mrb[42].mxu1 %vm682_vm0, %v23203_v5  ;;  %v23209_v5 = vld [vmem:[#allocation54_spill] sm:$0xff] }
 0x45f   : > { %15701 = vmatprep.mubr.msk.f32.mxu1 %vm682_vm0, %v23204_v0  ;;  %v23210_v0 = vld [vmem:[#allocation56_spill] sm:$0xff] }
 0x462   : > { %15702 = vmatmul.mubr.msk.f32.gmra.mrb[44].mxu1 %vm682_vm0, %v23205_v17 }
 0x463   : > { %15704 = vmatprep.mubr.msk.f32.mxu1 %vm682_vm0, %v23167_v46  ;;  %v23211_v46 = vld [vmem:[#allocation62_spill] sm:$0xff] }
 0x466   : > { %15705 = vmatmul.mubr.msk.f32.gmra.mrb[46].mxu1 %vm682_vm0, %v23168_v14  ;;  %v23212_v14 = vld [vmem:[#allocation63_spill] sm:$0xff] }
 0x467   : > { %15707 = vmatprep.mubr.msk.f32.mxu1 %vm682_vm0, %v23206_v29  ;;  %v23213_v29 = vld [vmem:[#allocation64_spill] sm:$0xff] }
 0x46a   : > { %15708 = vmatmul.mubr.msk.f32.gmra.mrb[48].mxu1 %vm682_vm0, %v23207_v37 }
 0x46b   : > { %15710 = vmatprep.mubr.msk.f32.mxu1 %vm682_vm0, %v23208_v15  ;;  %v23214_v15 = vld [vmem:[#allocation66_spill] sm:$0xff] }
 0x46e   : > { %15711 = vmatmul.mubr.msk.f32.gmra.mrb[50].mxu1 %vm682_vm0, %v23209_v5 }
 0x46f   : > { %15713 = vmatprep.mubr.msk.f32.mxu1 %vm682_vm0, %v23210_v0 }
 0x472   : > { %15714 = vmatmul.mubr.msk.f32.gmra.mrb[52].mxu1 %vm682_vm0, %v23174_v36 }
 0x473   : > { %15716 = vmatprep.mubr.msk.f32.mxu1 %vm682_vm0, %v23211_v46  ;;  %v23215_v46 = vld [vmem:[#allocation70_spill] sm:$0xff] }
 0x476   : > { %15717 = vmatmul.mubr.msk.f32.gmra.mrb[54].mxu1 %vm682_vm0, %v23212_v14 }
 0x477   : > { %15719 = vmatprep.mubr.msk.f32.mxu1 %vm682_vm0, %v23213_v29  ;;  %v7723_v29 = vld [vmem:[%s22764_s8 + $0x80] sm:$0xff] }
 0x47a   : > { %15720 = vmatmul.mubr.msk.f32.gmra.mrb[56].mxu1 %vm682_vm0, %v23176_v32  ;;  %v23216_v32 = vld [vmem:[#allocation73_spill] sm:$0xff] }
 0x47b   : > { %15722 = vmatprep.mubr.msk.f32.mxu1 %vm682_vm0, %v23214_v15  ;;  %v7724_v15 = vld [vmem:[%s22764_s8 + $0x88] sm:$0xff] }
 0x47e   : > { %15723 = vmatmul.mubr.msk.f32.gmra.mrb[58].mxu1 %vm682_vm0, %v23178_v47 }
 0x47f   : > { %15725 = vmatprep.mubr.msk.f32.mxu1 %vm682_vm0, %v23179_v39  ;;  %v16423_v39 = vpack.c.bf16 %v7724_v15, %v7723_v29 }
 0x482   : > { %15726 = vmatmul.mubr.msk.f32.gmra.mrb[60].mxu1 %vm682_vm0, %v23180_v9 }
 0x483   : > { %15728 = vmatprep.mubr.msk.f32.mxu1 %vm682_vm0, %v23215_v46 }
 0x486   : > { %15729 = vmatmul.mubr.msk.f32.gmra.mrb[62].mxu1 %vm682_vm0, %v23216_v32 }
 0x487   : > { %15735 = vmatprep.mubr.msk.f32.mxu1 %vm682_vm0, %v19618_v53  ;;  %v23217_v53 = vld [vmem:[#allocation58_spill] sm:$0xff] }
 0x48a   : > { %15736 = vmatmul.mubr.msk.f32.vlgmr.msra.gmra.mrb[32].mxu1 %vm682_vm0, %v19624_v57  ;;  %v23218_v57 = vld [vmem:[#allocation59_spill] sm:$0xff] }
 0x48b   : > { %16422 = vmatpush3.bf16.msra.mxu1 %v16419_v28  ;;  %15738 = vmatprep.mubr.msk.f32.mxu1 %vm682_vm0, %v19626_v58  ;;  %v20337_v58 = vld [vmem:[#allocation2 + $0x19a] sm:$0xff] }
 0x48c   : > { %16424 = vmatprep.subr.bf16.mxu1 %v16423_v39 }
 0x48e   : > { %15739 = vmatmul.mubr.msk.f32.gmra.mrb[34].mxu1 %vm682_vm0, %v19628_v59  ;;  %v7335_v59 = vld [vmem:[#allocation2 + $0x1a1] sm:$0xff] }
 0x48f   : > { %15741 = vmatprep.mubr.msk.f32.mxu1 %vm682_vm0, %v19632_v18  ;;  %v23222_v18 = vmov 0.0  }
 0x492   : > { %15742 = vmatmul.mubr.msk.f32.gmra.mrb[36].mxu1 %vm682_vm0, %v19634_v3  ;;  %v20342_v3 = vld [vmem:[#allocation2 + $0x1a2] sm:$0xff] }
 0x493   : > { %15744 = vmatprep.mubr.msk.f32.mxu1 %vm682_vm0, %v19636_v10  ;;  %8511 = vst.msk [vmem:[#allocation2 + $0x1a8] sm:$0x3] %vm685_vm1, %v23222_v18  ;;  %v23223_v10 = vld [vmem:[#allocation20_spill] sm:$0xff] }
 0x496   : > { %15745 = vmatmul.mubr.msk.f32.gmra.mrb[38].mxu1 %vm682_vm0, %v19644_v22  ;;  %v23224_v22 = vld [vmem:[#allocation51_spill] sm:$0xff] }
 0x497   : > { %15747 = vmatprep.mubr.msk.f32.mxu1 %vm682_vm0, %v19646_v51  ;;  %v23225_v51 = vld [vmem:[#allocation32_spill] sm:$0xff] }
 0x49a   : > { %15748 = vmatmul.mubr.msk.f32.gmra.mrb[40].mxu1 %vm682_vm0, %v19648_v56  ;;  %v23226_v56 = vld [vmem:[#allocation52_spill] sm:$0xff] }
 0x49b   : > { %15750 = vmatprep.mubr.msk.f32.mxu1 %vm682_vm0, %v19670_v7  ;;  %v23229_v7 = vld [vmem:[#allocation47_spill] sm:$0xff] }
 0x49e   : > { %15751 = vmatmul.mubr.msk.f32.gmra.mrb[42].mxu1 %vm682_vm0, %v19672_v8  ;;  %v23230_v8 = vld [vmem:[#allocation48_spill] sm:$0xff] }
 0x49f   : > { %15753 = vmatprep.mubr.msk.f32.mxu1 %vm682_vm0, %v19674_v6  ;;  %v23231_v6 = vld [vmem:[#allocation57_spill] sm:$0xff] }
 0x4a2   : > { %15754 = vmatmul.mubr.msk.f32.gmra.mrb[44].mxu1 %vm682_vm0, %v19700_v11  ;;  %v23244_v11 = vld [vmem:[#allocation64_spill] sm:$0xff] }
 0x4a3   : > { %15756 = vmatprep.mubr.msk.f32.mxu1 %vm682_vm0, %v19702_v38  ;;  %v23245_v38 = vld [vmem:[#allocation65_spill] sm:$0xff] }
 0x4a6   : > { %15757 = vmatmul.mubr.msk.f32.gmra.mrb[46].mxu1 %vm682_vm0, %v19704_v61  ;;  %v23246_v61 = vld [vmem:[#allocation66_spill] sm:$0xff] }
 0x4a7   : > { %15759 = vmatprep.mubr.msk.f32.mxu1 %vm682_vm0, %v19726_v62 }
 0x4aa   : > { %15760 = vmatmul.mubr.msk.f32.gmra.mrb[48].mxu1 %vm682_vm0, %v19728_v19 }
 0x4ab   : > { %15762 = vmatprep.mubr.msk.f32.mxu1 %vm682_vm0, %v19730_v35 }
 0x4ae   : > { %15763 = vmatmul.mubr.msk.f32.gmra.mrb[50].mxu1 %vm682_vm0, %v19754_v41  ;;  %v23219_v41 = vld [vmem:[#allocation60_spill] sm:$0xff] }
 0x4af   : > { %15765 = vmatprep.mubr.msk.f32.mxu1 %vm682_vm0, %v19756_v43  ;;  %v23220_v43 = vld [vmem:[#allocation53_spill] sm:$0xff] }
 0x4b2   : > { %15766 = vmatmul.mubr.msk.f32.gmra.mrb[52].mxu1 %vm682_vm0, %v19758_v40  ;;  %v6947_v40 = vld [vmem:[#allocation2 + $0x198] sm:$0xff] }
 0x4b3   : > { %15768 = vmatprep.mubr.msk.f32.mxu1 %vm682_vm0, %v19782_v34  ;;  %v23221_v34 = vld [vmem:[#allocation71_spill] sm:$0xff] }
 0x4b6   : > { %15769 = vmatmul.mubr.msk.f32.gmra.mrb[54].mxu1 %vm682_vm0, %v19784_v63  ;;  %v7334_v63 = vld [vmem:[#allocation2 + $0x199] sm:$0xff] }
 0x4b7   : > { %15771 = vmatprep.mubr.msk.f32.mxu1 %vm682_vm0, %v19786_v20  ;;  %v6948_v20 = vld [vmem:[#allocation2 + $0x1a0] sm:$0xff]  ;;  %8509 = vst.msk [vmem:[#allocation2 + $0x198] sm:$0xff] %vm682_vm0, %v23222_v18 }
 0x4b8   : > { %8510 = vst.msk [vmem:[#allocation2 + $0x1a0] sm:$0xff] %vm682_vm0, %v23222_v18 }
 0x4ba   : > { %15772 = vmatmul.mubr.msk.f32.gmra.mrb[56].mxu1 %vm682_vm0, %v23217_v53 }
 0x4bb   : > { %15774 = vmatprep.mubr.msk.f32.mxu1 %vm682_vm0, %v23218_v57 }
 0x4be   : > { %15775 = vmatmul.mubr.msk.f32.gmra.mrb[58].mxu1 %vm682_vm0, %v23219_v41 }
 0x4bf   : > { %15777 = vmatprep.mubr.msk.f32.mxu1 %vm682_vm0, %v23220_v43 }
 0x4c2   : > { %15778 = vmatmul.mubr.msk.f32.gmra.mrb[60].mxu1 %vm682_vm0, %v23221_v34 }
 0x4c3   : > { %15780 = vmatprep.mubr.msk.f32.mxu1 %vm682_vm0, %v6947_v40 }
 0x4c6   : > { %15781 = vmatmul.mubr.msk.f32.gmra.mrb[62].mxu1 %vm682_vm0, %v6948_v20 }
 0x4c7   : > { %15787 = vmatprep.mubr.msk.f32.mxu1 %vm682_vm0, %v23183_v60  ;;  %v23228_v60 = vld [vmem:[#allocation33_spill] sm:$0xff] }
 0x4ca   : > { %15788 = vmatmul.mubr.msk.f32.vlgmr.msra.gmra.mrb[32].mxu1 %vm682_vm0, %v23184_v26 }
 0x4cb   : > { %16426 = vmatpush3.bf16.msra.mxu1 %v16423_v39  ;;  %15790 = vmatprep.mubr.msk.f32.mxu1 %vm682_vm0, %v23223_v10 }
 0x4ce   : > { %15791 = vmatmul.mubr.msk.f32.gmra.mrb[34].mxu1 %vm682_vm0, %v23224_v22 }
 0x4cf   : > { %15793 = vmatprep.mubr.msk.f32.mxu1 %vm682_vm0, %v23225_v51 }
 0x4d2   : > { %15794 = vmatmul.mubr.msk.f32.gmra.mrb[36].mxu1 %vm682_vm0, %v23226_v56 }
 0x4d3   : > { %15796 = vmatprep.mubr.msk.f32.mxu1 %vm682_vm0, %v23189_v23 }
 0x4d6   : > { %15797 = vmatmul.mubr.msk.f32.gmra.mrb[38].mxu1 %vm682_vm0, %v23190_v30 }
 0x4d7   : > { %15799 = vmatprep.mubr.msk.f32.mxu1 %vm682_vm0, %v23191_v45 }
 0x4da   : > { %15800 = vmatmul.mubr.msk.f32.gmra.mrb[40].mxu1 %vm682_vm0, %v23192_v50 }
 0x4db   : > { %15802 = vmatprep.mubr.msk.f32.mxu1 %vm682_vm0, %v23193_v33 }
 0x4de   : > { %15803 = vmatmul.mubr.msk.f32.gmra.mrb[42].mxu1 %vm682_vm0, %v23194_v31  ;;  %v23227_v31 = vld [vmem:[#allocation44_spill] sm:$0xff] }
 0x4df   : > { %15805 = vmatprep.mubr.msk.f32.mxu1 %vm682_vm0, %v23195_v42  ;;  %v23240_v42 = vld [vmem:[#allocation45_spill] sm:$0xff] }
 0x4e2   : > { %15806 = vmatmul.mubr.msk.f32.gmra.mrb[44].mxu1 %vm682_vm0, %v23196_v49 }
 0x4e3   : > { %15808 = vmatprep.mubr.msk.f32.mxu1 %vm682_vm0, %v19696_v27  ;;  %v23241_v27 = vld [vmem:[#allocation31_spill] sm:$0xff] }
 0x4e6   : > { %15809 = vmatmul.mubr.msk.f32.gmra.mrb[46].mxu1 %vm682_vm0, %v19698_v13  ;;  %v23242_v13 = vld [vmem:[#allocation34_spill] sm:$0xff] }
 0x4e7   : > { %15811 = vmatprep.mubr.msk.f32.mxu1 %vm682_vm0, %v19720_v55 }
 0x4ea   : > { %15812 = vmatmul.mubr.msk.f32.gmra.mrb[48].mxu1 %vm682_vm0, %v19722_v52 }
 0x4eb   : > { %15814 = vmatprep.mubr.msk.f32.mxu1 %vm682_vm0, %v19724_v2 }
 0x4ee   : > { %15815 = vmatmul.mubr.msk.f32.gmra.mrb[50].mxu1 %vm682_vm0, %v19748_v44 }
 0x4ef   : > { %15817 = vmatprep.mubr.msk.f32.mxu1 %vm682_vm0, %v23227_v31 }
 0x4f2   : > { %15818 = vmatmul.mubr.msk.f32.gmra.mrb[52].mxu1 %vm682_vm0, %v19752_v54  ;;  %v23232_v54 = vld [vmem:[#allocation24_spill] sm:$0xff] }
 0x4f3   : > { %15820 = vmatprep.mubr.msk.f32.mxu1 %vm682_vm0, %v23228_v60 }
 0x4f6   : > { %15821 = vmatmul.mubr.msk.f32.gmra.mrb[54].mxu1 %vm682_vm0, %v23229_v7 }
 0x4f7   : > { %15823 = vmatprep.mubr.msk.f32.mxu1 %vm682_vm0, %v23230_v8 }
 0x4fa   : > { %15824 = vmatmul.mubr.msk.f32.gmra.mrb[56].mxu1 %vm682_vm0, %v19806_v16  ;;  %v23238_v16 = vld [vmem:[#allocation29_spill] sm:$0xff] }
 0x4fb   : > { %15826 = vmatprep.mubr.msk.f32.mxu1 %vm682_vm0, %v23231_v6 }
 0x4fe   : > { %15827 = vmatmul.mubr.msk.f32.gmra.mrb[58].mxu1 %vm682_vm0, %v19810_v4  ;;  %v23233_v4 = vld [vmem:[#allocation37_spill] sm:$0xff] }
 0x4ff   : > { %15829 = vmatprep.mubr.msk.f32.mxu1 %vm682_vm0, %v23197_v1  ;;  %v23235_v1 = vld [vmem:[#allocation41_spill] sm:$0xff] }
 0x502   : > { %15830 = vmatmul.mubr.msk.f32.gmra.mrb[60].mxu1 %vm682_vm0, %v23198_v12  ;;  %v23234_v12 = vld [vmem:[#allocation40_spill] sm:$0xff] }
 0x503   : > { %15832 = vmatprep.mubr.msk.f32.mxu1 %vm682_vm0, %v7334_v63 }
 0x506   : > { %15833 = vmatmul.mubr.msk.f32.gmra.mrb[62].mxu1 %vm682_vm0, %v7335_v59 }
 0x507   : > { %15839 = vmatprep.mubr.msk.f32.mxu1 %vm682_vm0, %v19642_v25  ;;  %v23236_v25 = vld [vmem:[#allocation28_spill] sm:$0xff] }
 0x50a   : > { %15840 = vmatmul.mubr.msk.f32.vlgmr.msra.gmra.mrb[32].mxu1 %vm682_vm0, %v19650_v48  ;;  %v23237_v48 = vld [vmem:[#allocation42_spill] sm:$0xff] }
 0x50b   : > { %15842 = vmatprep.mubr.msk.f32.mxu1 %vm682_vm0, %v23232_v54 }
 0x50e   : > { %15843 = vmatmul.mubr.msk.f32.gmra.mrb[34].mxu1 %vm682_vm0, %v23233_v4 }
 0x50f   : > { %15845 = vmatprep.mubr.msk.f32.mxu1 %vm682_vm0, %v19676_v24  ;;  %v23239_v24 = vld [vmem:[#allocation30_spill] sm:$0xff] }
 0x512   : > { %15846 = vmatmul.mubr.msk.f32.gmra.mrb[36].mxu1 %vm682_vm0, %v23199_v21 }
 0x513   : > { %15848 = vmatprep.mubr.msk.f32.mxu1 %vm682_vm0, %v23234_v12 }
 0x516   : > { %15849 = vmatmul.mubr.msk.f32.gmra.mrb[38].mxu1 %vm682_vm0, %v23235_v1 }
 0x517   : > { %15851 = vmatprep.mubr.msk.f32.mxu1 %vm682_vm0, %v23236_v25 }
 0x51a   : > { %15852 = vmatmul.mubr.msk.f32.gmra.mrb[40].mxu1 %vm682_vm0, %v23237_v48 }
 0x51b   : > { %15854 = vmatprep.mubr.msk.f32.mxu1 %vm682_vm0, %v23238_v16 }
 0x51e   : > { %15855 = vmatmul.mubr.msk.f32.gmra.mrb[42].mxu1 %vm682_vm0, %v23205_v17  ;;  %v23243_v17 = vld [vmem:[#allocation62_spill] sm:$0xff] }
 0x51f   : > { %15857 = vmatprep.mubr.msk.f32.mxu1 %vm682_vm0, %v23239_v24 }
 0x522   : > { %15858 = vmatmul.mubr.msk.f32.gmra.mrb[44].mxu1 %vm682_vm0, %v23240_v42 }
 0x523   : > { %15860 = vmatprep.mubr.msk.f32.mxu1 %vm682_vm0, %v23241_v27 }
 0x526   : > { %15861 = vmatmul.mubr.msk.f32.gmra.mrb[46].mxu1 %vm682_vm0, %v23207_v37 }
 0x527   : > { %15863 = vmatprep.mubr.msk.f32.mxu1 %vm682_vm0, %v23242_v13 }
 0x52a   : > { %15864 = vmatmul.mubr.msk.f32.gmra.mrb[48].mxu1 %vm682_vm0, %v23209_v5 }
 0x52b   : > { %15866 = vmatprep.mubr.msk.f32.mxu1 %vm682_vm0, %v23210_v0  ;;  %v23247_v0 = vld [vmem:[#allocation68_spill] sm:$0xff] }
 0x52e   : > { %15867 = vmatmul.mubr.msk.f32.gmra.mrb[50].mxu1 %vm682_vm0, %v23174_v36 }
 0x52f   : > { %15869 = vmatprep.mubr.msk.f32.mxu1 %vm682_vm0, %v23243_v17 }
 0x532   : > { %15870 = vmatmul.mubr.msk.f32.gmra.mrb[52].mxu1 %vm682_vm0, %v23212_v14 }
 0x533   : > { %15872 = vmatprep.mubr.msk.f32.mxu1 %vm682_vm0, %v23244_v11 }
 0x536   : > { %15873 = vmatmul.mubr.msk.f32.gmra.mrb[54].mxu1 %vm682_vm0, %v23245_v38 }
 0x537   : > { %15875 = vmatprep.mubr.msk.f32.mxu1 %vm682_vm0, %v23246_v61 }
 0x53a   : > { %15876 = vmatmul.mubr.msk.f32.gmra.mrb[56].mxu1 %vm682_vm0, %v23178_v47 }
 0x53b   : > { %15878 = vmatprep.mubr.msk.f32.mxu1 %vm682_vm0, %v23247_v0 }
 0x53e   : > { %15879 = vmatmul.mubr.msk.f32.gmra.mrb[58].mxu1 %vm682_vm0, %v23180_v9 }
 0x53f   : > { %15881 = vmatprep.mubr.msk.f32.mxu1 %vm682_vm0, %v23215_v46 }
 0x542   : > { %15882 = vmatmul.mubr.msk.f32.gmra.mrb[60].mxu1 %vm682_vm0, %v23216_v32 }
 0x543   : > { %15884 = vmatprep.mubr.msk.f32.mxu1 %vm682_vm0, %v20337_v58 }
 0x546   : > { %15885 = vmatmul.mubr.msk.f32.gmra.mrb[62].mxu1 %vm682_vm0, %v20342_v3 }
 0x5dd   : > { %v20475_v14 = vpop.f32.mrb[32].mxu1 }
 0x5de   : > { %v8079_v55 = vsel %vm682_vm0, %v20475_v14, 0.0  ;;  %v20479_v52 = vpop.f32.mrb[33].mxu1 }
 0x5df   : > { %v8078_v9 = vsel %vm682_vm0, %v20479_v52, 0.0 }
 0x5e0   : > { %v8080_v2 = vadd.f32 %v8079_v55, %v8078_v9 }
 0x5e1   : > { %v20483_v62 = vpop.f32.mrb[34].mxu1 }
 0x5e2   : > { %v20485_v19 = vpop.f32.mrb[35].mxu1  ;;  %v8083_v33 = vsel %vm682_vm0, %v20483_v62, 0.0 }
 0x5e3   : > { %v8081_v35 = vsel %vm682_vm0, %v20485_v19, 0.0 }
 0x5e4   : > { %v8082_v26 = vadd.f32 %v8081_v35, %v8080_v2 }
 0x5e5   : > { %v20491_v28 = vpop.f32.mrb[36].mxu1 }
 0x5e6   : > { %v20493_v44 = vpop.f32.mrb[37].mxu1  ;;  %v8084_v32 = vadd.f32 %v8083_v33, %v8082_v26  ;;  %v8087_v36 = vsel %vm682_vm0, %v20491_v28, 0.0 }
 0x5e7   : > { %v8085_v47 = vsel %vm682_vm0, %v20493_v44, 0.0 }
 0x5e8   : > { %v8086_v39 = vadd.f32 %v8085_v47, %v8084_v32 }
 0x5e9   : > { %v20499_v46 = vpop.f32.mrb[38].mxu1 }
 0x5ea   : > { %v20501_v49 = vpop.f32.mrb[39].mxu1  ;;  %v8088_v23 = vadd.f32 %v8087_v36, %v8086_v39  ;;  %v8091_v50 = vsel %vm682_vm0, %v20499_v46, 0.0 }
 0x5eb   : > { %v8089_v30 = vsel %vm682_vm0, %v20501_v49, 0.0 }
 0x5ec   : > { %v8090_v45 = vadd.f32 %v8089_v30, %v8088_v23 }
 0x5ed   : > { %v20507_v21 = vpop.f32.mrb[40].mxu1 }
 0x5ee   : > { %v20509_v29 = vpop.f32.mrb[41].mxu1  ;;  %v8092_v37 = vadd.f32 %v8091_v50, %v8090_v45  ;;  %v8095_v53 = vsel %vm682_vm0, %v20507_v21, 0.0 }
 0x5ef   : > { %v8093_v15 = vsel %vm682_vm0, %v20509_v29, 0.0 }
 0x5f0   : > { %v8094_v5 = vadd.f32 %v8093_v15, %v8092_v37 }
 0x5f1   : > { %v20515_v57 = vpop.f32.mrb[42].mxu1 }
 0x5f2   : > { %v20517_v41 = vpop.f32.mrb[43].mxu1  ;;  %v8096_v43 = vadd.f32 %v8095_v53, %v8094_v5  ;;  %v8099_v63 = vsel %vm682_vm0, %v20515_v57, 0.0 }
 0x5f3   : > { %v8097_v40 = vsel %vm682_vm0, %v20517_v41, 0.0 }
 0x5f4   : > { %v8098_v34 = vadd.f32 %v8097_v40, %v8096_v43 }
 0x5f5   : > { %v20523_v58 = vpop.f32.mrb[44].mxu1 }
 0x5f6   : > { %v20525_v20 = vpop.f32.mrb[45].mxu1  ;;  %v8100_v59 = vadd.f32 %v8099_v63, %v8098_v34  ;;  %v8103_v10 = vsel %vm682_vm0, %v20523_v58, 0.0 }
 0x5f7   : > { %v8101_v18 = vsel %vm682_vm0, %v20525_v20, 0.0 }
 0x5f8   : > { %v8102_v3 = vadd.f32 %v8101_v18, %v8100_v59 }
 0x5f9   : > { %v20531_v22 = vpop.f32.mrb[46].mxu1 }
 0x5fa   : > { %v20533_v51 = vpop.f32.mrb[47].mxu1  ;;  %v8104_v56 = vadd.f32 %v8103_v10, %v8102_v3  ;;  %v8107_v7 = vsel %vm682_vm0, %v20531_v22, 0.0 }
 0x5fb   : > { %v8105_v31 = vsel %vm682_vm0, %v20533_v51, 0.0 }
 0x5fc   : > { %v8106_v60 = vadd.f32 %v8105_v31, %v8104_v56 }
 0x5fd   : > { %v20539_v8 = vpop.f32.mrb[48].mxu1 }
 0x5fe   : > { %v20541_v6 = vpop.f32.mrb[49].mxu1  ;;  %v8108_v54 = vadd.f32 %v8107_v7, %v8106_v60  ;;  %v8111_v1 = vsel %vm682_vm0, %v20539_v8, 0.0 }
 0x5ff   : > { %v8109_v4 = vsel %vm682_vm0, %v20541_v6, 0.0 }
 0x600   : > { %v8110_v12 = vadd.f32 %v8109_v4, %v8108_v54 }
 0x601   : > { %v20547_v25 = vpop.f32.mrb[50].mxu1 }
 0x602   : > { %v20549_v48 = vpop.f32.mrb[51].mxu1  ;;  %v8112_v16 = vadd.f32 %v8111_v1, %v8110_v12  ;;  %v8115_v27 = vsel %vm682_vm0, %v20547_v25, 0.0 }
 0x603   : > { %v8113_v24 = vsel %vm682_vm0, %v20549_v48, 0.0 }
 0x604   : > { %v8114_v42 = vadd.f32 %v8113_v24, %v8112_v16 }
 0x605   : > { %v20555_v13 = vpop.f32.mrb[52].mxu1 }
 0x606   : > { %v20557_v17 = vpop.f32.mrb[53].mxu1  ;;  %v8116_v11 = vadd.f32 %v8115_v27, %v8114_v42  ;;  %v8119_v0 = vsel %vm682_vm0, %v20555_v13, 0.0 }
 0x607   : > { %v8117_v38 = vsel %vm682_vm0, %v20557_v17, 0.0 }
 0x608   : > { %v8118_v61 = vadd.f32 %v8117_v38, %v8116_v11 }
 0x609   : > { %v15874_v55 = vpop.f32.mrb[54].mxu1 }
 0x60a   : > { %v7997_v9 = vpop.f32.mrb[55].mxu1  ;;  %v8120_v2 = vadd.f32 %v8119_v0, %v8118_v61  ;;  %v8123_v33 = vsel %vm682_vm0, %v15874_v55, 0.0 }
 0x60b   : > { %v8121_v35 = vsel %vm682_vm0, %v7997_v9, 0.0 }
 0x60c   : > { %v8122_v26 = vadd.f32 %v8121_v35, %v8120_v2 }
 0x60d   : > { %v15877_v32 = vpop.f32.mrb[56].mxu1 }
 0x60e   : > { %v8007_v47 = vpop.f32.mrb[57].mxu1  ;;  %v8124_v39 = vadd.f32 %v8123_v33, %v8122_v26  ;;  %v8127_v30 = vsel %vm682_vm0, %v15877_v32, 0.0 }
 0x60f   : > { %v8125_v36 = vsel %vm682_vm0, %v8007_v47, 0.0 }
 0x610   : > { %v8126_v23 = vadd.f32 %v8125_v36, %v8124_v39 }
 0x611   : > { %v15880_v45 = vpop.f32.mrb[58].mxu1 }
 0x612   : > { %v8017_v50 = vpop.f32.mrb[59].mxu1  ;;  %v8128_v37 = vadd.f32 %v8127_v30, %v8126_v23  ;;  %v8131_v53 = vsel %vm682_vm0, %v15880_v45, 0.0 }
 0x613   : > { %v8129_v15 = vsel %vm682_vm0, %v8017_v50, 0.0 }
 0x614   : > { %v8130_v5 = vadd.f32 %v8129_v15, %v8128_v37 }
 0x615   : > { %v15883_v43 = vpop.f32.mrb[60].mxu1 }
 0x616   : > { %v8027_v40 = vpop.f32.mrb[61].mxu1  ;;  %v8132_v34 = vadd.f32 %v8131_v53, %v8130_v5  ;;  %v8135_v18 = vsel %vm682_vm0, %v15883_v43, 0.0 }
 0x617   : > { %v8133_v63 = vsel %vm682_vm0, %v8027_v40, 0.0 }
 0x618   : > { %v8134_v59 = vadd.f32 %v8133_v63, %v8132_v34  ;;  %v8610_v34 = vld [vmem:[%s22765_s9 + $0x10] sm:$0xff] }
 0x619   : > { %v15886_v3 = vpop.f32.mrb[62].mxu1 }
 0x61a   : > { %v8037_v10 = vpop.f32.mrb[63].mxu1  ;;  %v8136_v56 = vadd.f32 %v8135_v18, %v8134_v59  ;;  %v8139_v7 = vsel %vm682_vm0, %v15886_v3, 0.0  ;;  %v8611_v18 = vld [vmem:[%s22765_s9 + $0x18] sm:$0xff] }
 0x61b   : > { %v8137_v31 = vsel %vm682_vm0, %v8037_v10, 0.0 }
 0x61c   : > { %v8138_v60 = vadd.f32 %v8137_v31, %v8136_v56 }
 0x61e   : > { %v8140_v54 = vadd.f32 %v8139_v7, %v8138_v60 }
 0x620   : > { %v8141_v4 = vrot.slane %v8140_v54, 4 }
 0x622   : > { %v8142_v12 = vadd.f32 %v8141_v4, %v8140_v54  ;;  %v16427_v54 = vpack.c.bf16 %v8611_v18, %v8610_v34 }
 0x624   : > { %v8143_v1 = vrot.slane %v8142_v12, 2  ;;  %16428 = vmatprep.subr.bf16.mxu0 %v16427_v54 }
 0x625   : > { %16430 = vmatpush3.bf16.msra.mxu0 %v16427_v54 }
 0x626   : > { %v8144_v16 = vadd.f32 %v8143_v1, %v8142_v12 }
 0x628   : > { %v8145_v24 = vrot.slane %v8144_v16, 1 }
 0x62a   : > { %v8146_v42 = vadd.f32 %v8145_v24, %v8144_v16 }
 0x62c   : > { %v8147_v27 = vmul.f32 0.00390625, %v8146_v42 }
 0x62e   : > { %v20574_v11 = vsub.f32 %v20479_v52, %v8147_v27  ;;  %v20577_v38 = vsub.f32 %v20475_v14, %v8147_v27  ;;  %v20580_v61 = vsub.f32 %v20485_v19, %v8147_v27  ;;  %v20583_v0 = vsub.f32 %v20483_v62, %v8147_v27 }
 0x62f   : > { %v20586_v2 = vsub.f32 %v20493_v44, %v8147_v27  ;;  %v20589_v35 = vsub.f32 %v20491_v28, %v8147_v27  ;;  %v20592_v26 = vsub.f32 %v20501_v49, %v8147_v27  ;;  %v20595_v52 = vsub.f32 %v20499_v46, %v8147_v27 }
 0x630   : > { %v20598_v14 = vsub.f32 %v20509_v29, %v8147_v27  ;;  %v20601_v19 = vsub.f32 %v20507_v21, %v8147_v27  ;;  %v20604_v62 = vsub.f32 %v20517_v41, %v8147_v27  ;;  %v20607_v44 = vsub.f32 %v20515_v57, %v8147_v27 }
 0x631   : > { %v20610_v28 = vsub.f32 %v20525_v20, %v8147_v27  ;;  %v20613_v49 = vsub.f32 %v20523_v58, %v8147_v27  ;;  %v20616_v46 = vsub.f32 %v20533_v51, %v8147_v27  ;;  %v20619_v29 = vsub.f32 %v20531_v22, %v8147_v27 }
 0x632   : > { %v20622_v21 = vsub.f32 %v20541_v6, %v8147_v27  ;;  %v20625_v41 = vsub.f32 %v20539_v8, %v8147_v27  ;;  %v20628_v57 = vsub.f32 %v20549_v48, %v8147_v27  ;;  %v20631_v20 = vsub.f32 %v20547_v25, %v8147_v27 }
 0x633   : > { %v20634_v58 = vsub.f32 %v20557_v17, %v8147_v27  ;;  %v20637_v51 = vsub.f32 %v20555_v13, %v8147_v27  ;;  %v20639_v22 = vsub.f32 %v7997_v9, %v8147_v27  ;;  %v20641_v33 = vsub.f32 %v15874_v55, %v8147_v27  ;;  %v8578_v9 = vld [vmem:[#allocation2 + $0x1] sm:$0xff] }
 0x634   : > { %v20643_v6 = vsub.f32 %v8007_v47, %v8147_v27  ;;  %v20645_v8 = vsub.f32 %v15877_v32, %v8147_v27  ;;  %v20647_v39 = vsub.f32 %v8017_v50, %v8147_v27  ;;  %v20649_v48 = vsub.f32 %v15880_v45, %v8147_v27  ;;  %15891 = vmatprep.mubr.msk.f32.mxu0 %vm682_vm0, %v8578_v9 }
 0x635   : > { %v20651_v25 = vsub.f32 %v8027_v40, %v8147_v27  ;;  %v20653_v36 = vsub.f32 %v15883_v43, %v8147_v27  ;;  %v20655_v17 = vsub.f32 %v8037_v10, %v8147_v27  ;;  %v20657_v13 = vsub.f32 %v15886_v3, %v8147_v27  ;;  %v8576_v3 = vld [vmem:[%s22765_s9] sm:$0xff]  ;;  %v8577_v10 = vld [vmem:[%s22765_s9 + $0x8] sm:$0xff] }
 0x636   : > { %v8180_v55 = vmul.f32 %v20574_v11, %v20574_v11  ;;  %v8181_v32 = vmul.f32 %v20577_v38, %v20577_v38  ;;  %v8182_v47 = vmul.f32 %v20580_v61, %v20580_v61  ;;  %v8183_v23 = vmul.f32 %v20583_v0, %v20583_v0  ;;  %v8579_v27 = vld [vmem:[#allocation2 + $0x9] sm:$0xff] }
 0x637   : > { %v8184_v37 = vmul.f32 %v20586_v2, %v20586_v2  ;;  %v8185_v53 = vmul.f32 %v20589_v35, %v20589_v35  ;;  %v8186_v63 = vmul.f32 %v20592_v26, %v20592_v26  ;;  %v8187_v31 = vmul.f32 %v20595_v52, %v20595_v52  ;;  %15892 = vmatmul.mubr.msk.f32.vlgmr.msra.gmra.mrb[32].mxu0 %vm682_vm0, %v8579_v27 }
 0x638   : > { %v8212_v30 = vsel %vm682_vm0, %v8180_v55, 0.0  ;;  %v8213_v45 = vsel %vm682_vm0, %v8181_v32, 0.0  ;;  %v8215_v15 = vsel %vm682_vm0, %v8182_v47, 0.0  ;;  %v8217_v43 = vsel %vm682_vm0, %v8183_v23, 0.0 }
 0x639   : > { %v8214_v50 = vadd.f32 %v8213_v45, %v8212_v30  ;;  %v8219_v59 = vsel %vm682_vm0, %v8184_v37, 0.0  ;;  %v8221_v60 = vsel %vm682_vm0, %v8185_v53, 0.0  ;;  %v16431_v4 = vpack.c.bf16 %v8577_v10, %v8576_v3 }
 0x63a   : > { %v8188_v12 = vmul.f32 %v20598_v14, %v20598_v14  ;;  %v8223_v1 = vsel %vm682_vm0, %v8186_v63, 0.0  ;;  %v8189_v24 = vmul.f32 %v20601_v19, %v20601_v19  ;;  %v8225_v42 = vsel %vm682_vm0, %v8187_v31, 0.0 }
 0x63b   : > { %v8216_v5 = vadd.f32 %v8215_v15, %v8214_v50  ;;  %16432 = vmatprep.subr.bf16.mxu0 %v16431_v4  ;;  %v8190_v55 = vmul.f32 %v20604_v62, %v20604_v62  ;;  %v8191_v23 = vmul.f32 %v20607_v44, %v20607_v44  ;;  %v8192_v50 = vmul.f32 %v20610_v28, %v20610_v28 }
 0x63c   : > { %v8227_v32 = vsel %vm682_vm0, %v8188_v12, 0.0  ;;  %v8229_v30 = vsel %vm682_vm0, %v8189_v24, 0.0  ;;  %16434 = vmatpush3.bf16.msra.mxu0 %v16431_v4  ;;  %v8196_v10 = vmul.f32 %v20622_v21, %v20622_v21  ;;  %v8198_v4 = vmul.f32 %v20628_v57, %v20628_v57 }
 0x63d   : > { %v8218_v40 = vadd.f32 %v8217_v43, %v8216_v5  ;;  %v8231_v37 = vsel %vm682_vm0, %v8190_v55, 0.0  ;;  %v8193_v5 = vmul.f32 %v20613_v49, %v20613_v49  ;;  %v8233_v53 = vsel %vm682_vm0, %v8191_v23, 0.0 }
 0x63e   : > { %v8235_v34 = vsel %vm682_vm0, %v8192_v50, 0.0  ;;  %v8243_v12 = vsel %vm682_vm0, %v8196_v10, 0.0  ;;  %v8200_v27 = vmul.f32 %v20634_v58, %v20634_v58 }
 0x63f   : > { %v8220_v56 = vadd.f32 %v8219_v59, %v8218_v40  ;;  %v8194_v40 = vmul.f32 %v20616_v46, %v20616_v46  ;;  %v8195_v59 = vmul.f32 %v20619_v29, %v20619_v29  ;;  %v8237_v18 = vsel %vm682_vm0, %v8193_v5, 0.0 }
 0x641   : > { %v8222_v7 = vadd.f32 %v8221_v60, %v8220_v56  ;;  %v8239_v56 = vsel %vm682_vm0, %v8194_v40, 0.0  ;;  %v8197_v60 = vmul.f32 %v20625_v41, %v20625_v41 }
 0x643   : > { %v8224_v16 = vadd.f32 %v8223_v1, %v8222_v7  ;;  %v8241_v7 = vsel %vm682_vm0, %v8195_v59, 0.0  ;;  %v8245_v24 = vsel %vm682_vm0, %v8197_v60, 0.0 }
 0x645   : > { %v8226_v9 = vadd.f32 %v8225_v42, %v8224_v16  ;;  %v8199_v16 = vmul.f32 %v20631_v20, %v20631_v20 }
 0x647   : > { %v8228_v47 = vadd.f32 %v8227_v32, %v8226_v9  ;;  %v8247_v9 = vsel %vm682_vm0, %v8198_v4, 0.0  ;;  %v8201_v32 = vmul.f32 %v20637_v51, %v20637_v51 }
 0x649   : > { %v8230_v45 = vadd.f32 %v8229_v30, %v8228_v47  ;;  %v8249_v47 = vsel %vm682_vm0, %v8199_v16, 0.0  ;;  %v8202_v30 = vmul.f32 %v20639_v22, %v20639_v22 }
 0x64b   : > { %v8232_v15 = vadd.f32 %v8231_v37, %v8230_v45  ;;  %v8251_v45 = vsel %vm682_vm0, %v8200_v27, 0.0  ;;  %v8203_v37 = vmul.f32 %v20641_v33, %v20641_v33  ;;  %v9286_v27 = vld [vmem:[%s22765_s9 + $0x20] sm:$0xff] }
 0x64d   : > { %v8234_v43 = vadd.f32 %v8233_v53, %v8232_v15  ;;  %v8253_v15 = vsel %vm682_vm0, %v8201_v32, 0.0  ;;  %v8204_v53 = vmul.f32 %v20643_v6, %v20643_v6 }
 0x64f   : > { %v8236_v63 = vadd.f32 %v8235_v34, %v8234_v43  ;;  %v8255_v43 = vsel %vm682_vm0, %v8202_v30, 0.0  ;;  %v8205_v34 = vmul.f32 %v20645_v8, %v20645_v8 }
 0x651   : > { %v8238_v3 = vadd.f32 %v8237_v18, %v8236_v63  ;;  %v8257_v63 = vsel %vm682_vm0, %v8203_v37, 0.0  ;;  %v8206_v18 = vmul.f32 %v20647_v39, %v20647_v39 }
 0x653   : > { %v8240_v31 = vadd.f32 %v8239_v56, %v8238_v3  ;;  %v8259_v3 = vsel %vm682_vm0, %v8204_v53, 0.0  ;;  %v8207_v56 = vmul.f32 %v20649_v48, %v20649_v48 }
 0x655   : > { %v8242_v54 = vadd.f32 %v8241_v7, %v8240_v31  ;;  %v8261_v31 = vsel %vm682_vm0, %v8205_v34, 0.0  ;;  %v8208_v7 = vmul.f32 %v20651_v25, %v20651_v25 }
 0x657   : > { %v8244_v1 = vadd.f32 %v8243_v12, %v8242_v54  ;;  %v8263_v54 = vsel %vm682_vm0, %v8206_v18, 0.0  ;;  %v8209_v12 = vmul.f32 %v20653_v36, %v20653_v36 }
 0x659   : > { %v8246_v42 = vadd.f32 %v8245_v24, %v8244_v1  ;;  %v8265_v1 = vsel %vm682_vm0, %v8207_v56, 0.0  ;;  %v8210_v24 = vmul.f32 %v20655_v17, %v20655_v17 }
 0x65b   : > { %v8248_v55 = vadd.f32 %v8247_v9, %v8246_v42  ;;  %v8267_v42 = vsel %vm682_vm0, %v8208_v7, 0.0  ;;  %v9287_v9 = vld [vmem:[%s22765_s9 + $0x28] sm:$0xff] }
 0x65c   : > { %v20770_v32 = vpack.c.bf16 %v9287_v9, %v9286_v27 }
 0x65d   : > { %v8250_v23 = vadd.f32 %v8249_v47, %v8248_v55  ;;  %v8211_v47 = vmul.f32 %v20657_v13, %v20657_v13 }
 0x65e   : > { %23248 = vst [vmem:[#allocation61_spill] sm:$0xff] %v20770_v32  ;;  %16436 = vmatprep.subr.bf16.mxu0 %v20770_v32  ;;  %v8416_v32 = vld [vmem:[%s17932_s30 + $0xb0] sm:$0xff] }
 0x65f   : > { %v8252_v50 = vadd.f32 %v8251_v45, %v8250_v23  ;;  %v8269_v23 = vsel %vm682_vm0, %v8209_v12, 0.0  ;;  %v8271_v45 = vsel %vm682_vm0, %v8210_v24, 0.0  ;;  %v8273_v37 = vsel %vm682_vm0, %v8211_v47, 0.0  ;;  %v8424_v24 = vld [vmem:[%s17932_s30 + $0xf0] sm:$0xff] }
 0x661   : > { %v8254_v5 = vadd.f32 %v8253_v15, %v8252_v50 }
 0x663   : > { %v8256_v40 = vadd.f32 %v8255_v43, %v8254_v5 }
 0x665   : > { %v8258_v59 = vadd.f32 %v8257_v63, %v8256_v40 }
 0x667   : > { %v8260_v10 = vadd.f32 %v8259_v3, %v8258_v59 }
 0x669   : > { %v8262_v60 = vadd.f32 %v8261_v31, %v8260_v10  ;;  %v20781_v10 = vld [vmem:[%s22768_s12] ss:$0 sm:$0xff] }
 0x66b   : > { %v8264_v4 = vadd.f32 %v8263_v54, %v8262_v60  ;;  %v20790_v54 = vld [vmem:[%s23249_s22] ss:$0 sm:$0xff]  ;;  %s608_s22 = sand.u32 1, %s17550_s21  }
 0x66c   : > { %s22505_s19 = sshll.u32 %s608_s22, 8  ;;  %s22715_s5 = scalar_lea.sflag [#allocation7], %s608_s22 }
 0x66d   : > { %v8266_v16 = vadd.f32 %v8265_v1, %v8264_v4  ;;  %s22518_s13 = scalar_lea.vmem [#allocation12], %s22505_s19 }
 0x66e   : > { %s13016_s26 = sshll.u32 %s22518_s13, 4  ;;  %s22709_s26 = int_to_ptr.vmem [resolvable:$true] %s13016_s26 }
 0x66f   : > { %v8268_v55 = vadd.f32 %v8267_v42, %v8266_v16 }
 0x671   : > { %v8270_v30 = vadd.f32 %v8269_v23, %v8268_v55 }
 0x673   : > { %v8272_v50 = vadd.f32 %v8271_v45, %v8270_v30 }
 0x675   : > { %v8274_v15 = vadd.f32 %v8273_v37, %v8272_v50 }
 0x677   : > { %v8275_v5 = vrot.slane %v8274_v15, 4 }
 0x679   : > { %v8276_v53 = vadd.f32 %v8275_v5, %v8274_v15 }
 0x67b   : > { %v8277_v43 = vrot.slane %v8276_v53, 2 }
 0x67d   : > { %v8278_v40 = vadd.f32 %v8277_v43, %v8276_v53 }
 0x67f   : > { %v8279_v34 = vrot.slane %v8278_v40, 1 }
 0x681   : > { %v8280_v63 = vadd.f32 %v8279_v34, %v8278_v40 }
 0x683   : > { %v8281_v59 = vmul.f32 0.00390625, %v8280_v63 }
 0x685   : > { %v8282_v18 = vadd.f32 1e-05, %v8281_v59 }
 0x687   : > { %17309 = vrsqrt.f32 %v8282_v18 }
 0x691   : > { %v17310_v3 = vpop.eup %17309 }
 0x692   : > { %v8314_v56 = vmul.f32 %v17310_v3, %v20655_v17  ;;  %v8284_v31 = vmul.f32 %v17310_v3, %v20574_v11  ;;  %v8285_v60 = vmul.f32 %v17310_v3, %v20577_v38  ;;  %v8286_v7 = vmul.f32 %v17310_v3, %v20580_v61 }
 0x693   : > { %v8287_v4 = vmul.f32 %v17310_v3, %v20583_v0  ;;  %v8288_v12 = vmul.f32 %v17310_v3, %v20586_v2  ;;  %v8289_v1 = vmul.f32 %v17310_v3, %v20589_v35  ;;  %v8290_v16 = vmul.f32 %v17310_v3, %v20592_v26 }
 0x694   : > { %v8353_v17 = vmul.f32 %v20781_v10, %v8314_v56  ;;  %v8291_v11 = vmul.f32 %v17310_v3, %v20595_v52  ;;  %v8292_v38 = vmul.f32 %v17310_v3, %v20598_v14  ;;  %v8293_v61 = vmul.f32 %v17310_v3, %v20601_v19 }
 0x695   : > { %v8294_v42 = vmul.f32 %v17310_v3, %v20604_v62  ;;  %v8295_v27 = vmul.f32 %v17310_v3, %v20607_v44  ;;  %v8296_v0 = vmul.f32 %v17310_v3, %v20610_v28  ;;  %v8297_v2 = vmul.f32 %v17310_v3, %v20613_v49 }
 0x696   : > { %v8392_v35 = vadd.f32 %v20790_v54, %v8353_v17  ;;  %v8298_v26 = vmul.f32 %v17310_v3, %v20616_v46  ;;  %v8299_v9 = vmul.f32 %v17310_v3, %v20619_v29  ;;  %v8300_v52 = vmul.f32 %v17310_v3, %v20622_v21 }
 0x697   : > { %v8301_v14 = vmul.f32 %v17310_v3, %v20625_v41  ;;  %v8302_v19 = vmul.f32 %v17310_v3, %v20628_v57  ;;  %v8303_v62 = vmul.f32 %v17310_v3, %v20631_v20  ;;  %v8304_v44 = vmul.f32 %v17310_v3, %v20634_v58 }
 0x698   : > { %v8456_v55 = vadd.f32 %v8424_v24, %v8392_v35  ;;  %v8305_v28 = vmul.f32 %v17310_v3, %v20637_v51  ;;  %v8306_v49 = vmul.f32 %v17310_v3, %v20639_v22  ;;  %v8307_v47 = vmul.f32 %v17310_v3, %v20641_v33 }
 0x699   : > { %v8308_v46 = vmul.f32 %v17310_v3, %v20643_v6  ;;  %v8309_v29 = vmul.f32 %v17310_v3, %v20645_v8  ;;  %v8310_v21 = vmul.f32 %v17310_v3, %v20647_v39  ;;  %v8311_v41 = vmul.f32 %v17310_v3, %v20649_v48 }
 0x69a   : > { %v8312_v57 = vmul.f32 %v17310_v3, %v20651_v25  ;;  %v8313_v20 = vmul.f32 %v17310_v3, %v20653_v36  ;;  %v8315_v58 = vmul.f32 %v17310_v3, %v20657_v13  ;;  %8542 = vst.msk [vmem:[#allocation2 + $0x181] sm:$0xff] %vm682_vm0, %v8456_v55  ;;  %v8323_v51 = vmul.f32 %v20781_v10, %v8284_v31 }
 0x69b   : > { %v8324_v22 = vmul.f32 %v20781_v10, %v8285_v60  ;;  %v8325_v33 = vmul.f32 %v20781_v10, %v8286_v7  ;;  %v8326_v6 = vmul.f32 %v20781_v10, %v8287_v4  ;;  %v8327_v8 = vmul.f32 %v20781_v10, %v8288_v12 }
 0x69c   : > { %v8328_v39 = vmul.f32 %v20781_v10, %v8289_v1  ;;  %v8329_v48 = vmul.f32 %v20781_v10, %v8290_v16  ;;  %v8330_v25 = vmul.f32 %v20781_v10, %v8291_v11  ;;  %v8331_v36 = vmul.f32 %v20781_v10, %v8292_v38 }
 0x69d   : > { %v8332_v13 = vmul.f32 %v20781_v10, %v8293_v61  ;;  %v8333_v23 = vmul.f32 %v20781_v10, %v8294_v42  ;;  %v8334_v30 = vmul.f32 %v20781_v10, %v8295_v27  ;;  %v8335_v45 = vmul.f32 %v20781_v10, %v8296_v0  ;;  %v8395_v0 = vld [vmem:[%s17932_s30 + $0x8] sm:$0xff] }
 0x69e   : > { %v8336_v50 = vmul.f32 %v20781_v10, %v8297_v2  ;;  %v8337_v37 = vmul.f32 %v20781_v10, %v8298_v26  ;;  %v8338_v15 = vmul.f32 %v20781_v10, %v8299_v9  ;;  %v8339_v5 = vmul.f32 %v20781_v10, %v8300_v52  ;;  %v8394_v2 = vld [vmem:[%s17932_s30] sm:$0xff] }
 0x69f   : > { %v8340_v53 = vmul.f32 %v20781_v10, %v8301_v14  ;;  %v8341_v43 = vmul.f32 %v20781_v10, %v8302_v19  ;;  %v8342_v40 = vmul.f32 %v20781_v10, %v8303_v62  ;;  %v8343_v34 = vmul.f32 %v20781_v10, %v8304_v44  ;;  %v8397_v14 = vld [vmem:[%s17932_s30 + $0x18] sm:$0xff]  ;;  %v8396_v19 = vld [vmem:[%s17932_s30 + $0x10] sm:$0xff]  ;;  %v8399_v62 = vld [vmem:[%s17932_s30 + $0x28] sm:$0xff] }
 0x6a0   : > { %v8344_v63 = vmul.f32 %v20781_v10, %v8305_v28  ;;  %v8345_v59 = vmul.f32 %v20781_v10, %v8306_v49  ;;  %v8346_v18 = vmul.f32 %v20781_v10, %v8307_v47  ;;  %v8347_v3 = vmul.f32 %v20781_v10, %v8308_v46  ;;  %v8398_v44 = vld [vmem:[%s17932_s30 + $0x20] sm:$0xff]  ;;  %v8401_v46 = vld [vmem:[%s17932_s30 + $0x38] sm:$0xff] }
 0x6a1   : > { %v8348_v56 = vmul.f32 %v20781_v10, %v8309_v29  ;;  %v8349_v31 = vmul.f32 %v20781_v10, %v8310_v21  ;;  %v8350_v60 = vmul.f32 %v20781_v10, %v8311_v41  ;;  %v8351_v7 = vmul.f32 %v20781_v10, %v8312_v57  ;;  %v8400_v29 = vld [vmem:[%s17932_s30 + $0x30] sm:$0xff]  ;;  %v8403_v21 = vld [vmem:[%s17932_s30 + $0x48] sm:$0xff]  ;;  %v8402_v41 = vld [vmem:[%s17932_s30 + $0x40] sm:$0xff] }
 0x6a2   : > { %v8352_v4 = vmul.f32 %v20781_v10, %v8313_v20  ;;  %v8354_v12 = vmul.f32 %v20781_v10, %v8315_v58  ;;  %v8362_v1 = vadd.f32 %v20790_v54, %v8323_v51  ;;  %v8363_v16 = vadd.f32 %v20790_v54, %v8324_v22  ;;  %v8405_v22 = vld [vmem:[%s17932_s30 + $0x58] sm:$0xff] }
 0x6a3   : > { %v8364_v17 = vadd.f32 %v20790_v54, %v8325_v33  ;;  %v8365_v11 = vadd.f32 %v20790_v54, %v8326_v6  ;;  %v8366_v38 = vadd.f32 %v20790_v54, %v8327_v8  ;;  %v8367_v61 = vadd.f32 %v20790_v54, %v8328_v39  ;;  %v8404_v33 = vld [vmem:[%s17932_s30 + $0x50] sm:$0xff]  ;;  %v8407_v6 = vld [vmem:[%s17932_s30 + $0x68] sm:$0xff] }
 0x6a4   : > { %v8368_v24 = vadd.f32 %v20790_v54, %v8329_v48  ;;  %v8369_v10 = vadd.f32 %v20790_v54, %v8330_v25  ;;  %v8370_v42 = vadd.f32 %v20790_v54, %v8331_v36  ;;  %v8371_v27 = vadd.f32 %v20790_v54, %v8332_v13  ;;  %v8406_v36 = vld [vmem:[%s17932_s30 + $0x60] sm:$0xff]  ;;  %v8409_v13 = vld [vmem:[%s17932_s30 + $0x78] sm:$0xff] }
 0x6a5   : > { %v8372_v35 = vadd.f32 %v20790_v54, %v8333_v23  ;;  %v8373_v26 = vadd.f32 %v20790_v54, %v8334_v30  ;;  %v8374_v9 = vadd.f32 %v20790_v54, %v8335_v45  ;;  %v8375_v52 = vadd.f32 %v20790_v54, %v8336_v50  ;;  %v8408_v23 = vld [vmem:[%s17932_s30 + $0x70] sm:$0xff] }
 0x6a6   : > { %v8376_v55 = vadd.f32 %v20790_v54, %v8337_v37  ;;  %v20877_v28 = vadd.f32 %v20790_v54, %v8338_v15  ;;  %v20880_v49 = vadd.f32 %v20790_v54, %v8339_v5  ;;  %v20883_v47 = vadd.f32 %v20790_v54, %v8340_v53  ;;  %v8411_v15 = vld [vmem:[%s17932_s30 + $0x88] sm:$0xff]  ;;  %v8410_v5 = vld [vmem:[%s17932_s30 + $0x80] sm:$0xff]  ;;  %v8413_v53 = vld [vmem:[%s17932_s30 + $0x98] sm:$0xff] }
 0x6a7   : > { %v8380_v57 = vadd.f32 %v20790_v54, %v8341_v43  ;;  %v20891_v20 = vadd.f32 %v20790_v54, %v8342_v40  ;;  %v20894_v58 = vadd.f32 %v20790_v54, %v8343_v34  ;;  %v20897_v51 = vadd.f32 %v20790_v54, %v8344_v63 }
 0x6a8   : > { %v8384_v8 = vadd.f32 %v20790_v54, %v8345_v59  ;;  %v20904_v39 = vadd.f32 %v20790_v54, %v8346_v18  ;;  %v20907_v48 = vadd.f32 %v20790_v54, %v8347_v3  ;;  %v20910_v25 = vadd.f32 %v20790_v54, %v8348_v56  ;;  %v8412_v59 = vld [vmem:[%s17932_s30 + $0x90] sm:$0xff]  ;;  %v8415_v18 = vld [vmem:[%s17932_s30 + $0xa8] sm:$0xff]  ;;  %v8414_v3 = vld [vmem:[%s17932_s30 + $0xa0] sm:$0xff] }
 0x6a9   : > { %v8388_v30 = vadd.f32 %v20790_v54, %v8349_v31  ;;  %v20917_v45 = vadd.f32 %v20790_v54, %v8350_v60  ;;  %v20920_v50 = vadd.f32 %v20790_v54, %v8351_v7  ;;  %v20923_v37 = vadd.f32 %v20790_v54, %v8352_v4  ;;  %v8417_v4 = vld [vmem:[%s17932_s30 + $0xb8] sm:$0xff] }
 0x6aa   : > { %23250 = vst [vmem:[#allocation67_spill] sm:$0xff] %v20910_v25  ;;  %v8393_v43 = vadd.f32 %v20790_v54, %v8354_v12  ;;  %v8426_v40 = vadd.f32 %v8394_v2, %v8362_v1  ;;  %v8427_v34 = vadd.f32 %v8395_v0, %v8363_v16  ;;  %v8428_v63 = vadd.f32 %v8396_v19, %v8364_v17  ;;  %v8418_v12 = vld [vmem:[%s17932_s30 + $0xc0] sm:$0xff]  ;;  %v8421_v1 = vld [vmem:[%s17932_s30 + $0xd8] sm:$0xff]  ;;  %v8420_v16 = vld [vmem:[%s17932_s30 + $0xd0] sm:$0xff] }
 0x6ab   : > { %23251 = vst [vmem:[#allocation69_spill] sm:$0xff] %v20917_v45  ;;  %23252 = vst [vmem:[#allocation19_spill] sm:$0xff] %v20920_v50  ;;  %v8429_v56 = vadd.f32 %v8397_v14, %v8365_v11  ;;  %v8430_v31 = vadd.f32 %v8398_v44, %v8366_v38  ;;  %v8431_v60 = vadd.f32 %v8399_v62, %v8367_v61 }
 0x6ac   : > { %23253 = vst [vmem:[#allocation49_spill] sm:$0xff] %v20923_v37  ;;  %v8432_v7 = vadd.f32 %v8400_v29, %v8368_v24  ;;  %v8419_v37 = vld [vmem:[%s17932_s30 + $0xc8] sm:$0xff]  ;;  %v8433_v50 = vadd.f32 %v8401_v46, %v8369_v10  ;;  %v8434_v45 = vadd.f32 %v8402_v41, %v8370_v42  ;;  %v8435_v25 = vadd.f32 %v8403_v21, %v8371_v27  ;;  %v8422_v10 = vld [vmem:[%s17932_s30 + $0xe0] sm:$0xff]  ;;  %v8425_v42 = vld [vmem:[%s17932_s30 + $0xf8] sm:$0xff] }
 0x6ad   : > { %v8436_v54 = vadd.f32 %v8404_v33, %v8372_v35  ;;  %8512 = vst.msk [vmem:[#allocation2 + $0x19] sm:$0xff] %vm682_vm0, %v8426_v40  ;;  %8513 = vst.msk [vmem:[#allocation2 + $0x21] sm:$0xff] %vm682_vm0, %v8427_v34  ;;  %v8437_v17 = vadd.f32 %v8405_v22, %v8373_v26  ;;  %v8438_v11 = vadd.f32 %v8406_v36, %v8374_v9  ;;  %v8423_v24 = vld [vmem:[%s17932_s30 + $0xe8] sm:$0xff] }
 0x6ae   : > { %8514 = vst.msk [vmem:[#allocation2 + $0x31] sm:$0xff] %vm682_vm0, %v8428_v63  ;;  %v8439_v38 = vadd.f32 %v8407_v6, %v8375_v52  ;;  %v8440_v61 = vadd.f32 %v8408_v23, %v8376_v55  ;;  %8515 = vst.msk [vmem:[#allocation2 + $0x39] sm:$0xff] %vm682_vm0, %v8429_v56  ;;  %v8441_v27 = vadd.f32 %v8409_v13, %v20877_v28 }
 0x6af   : > { %8516 = vst.msk [vmem:[#allocation2 + $0x49] sm:$0xff] %vm682_vm0, %v8430_v31  ;;  %8517 = vst.msk [vmem:[#allocation2 + $0x51] sm:$0xff] %vm682_vm0, %v8431_v60  ;;  %v8442_v0 = vadd.f32 %v8410_v5, %v20880_v49  ;;  %v8443_v2 = vadd.f32 %v8411_v15, %v20883_v47  ;;  %v8444_v35 = vadd.f32 %v8412_v59, %v8380_v57  ;;  %v8544_v31 = vld [vmem:[#allocation2] sm:$0xff] }
 0x6b0   : > { %8518 = vst.msk [vmem:[#allocation2 + $0x61] sm:$0xff] %vm682_vm0, %v8432_v7  ;;  %8519 = vst.msk [vmem:[#allocation2 + $0x69] sm:$0xff] %vm682_vm0, %v8433_v50  ;;  %v8445_v26 = vadd.f32 %v8413_v53, %v20891_v20  ;;  %v8446_v9 = vadd.f32 %v8414_v3, %v20894_v58  ;;  %v8447_v52 = vadd.f32 %v8415_v18, %v20897_v51  ;;  %v9673_v7 = vld [vmem:[%s22765_s9 + $0x30] sm:$0xff] }
 0x6b1   : > { %8520 = vst.msk [vmem:[#allocation2 + $0x79] sm:$0xff] %vm682_vm0, %v8434_v45  ;;  %8521 = vst.msk [vmem:[#allocation2 + $0x81] sm:$0xff] %vm682_vm0, %v8435_v25  ;;  %v8448_v14 = vadd.f32 %v8416_v32, %v8384_v8  ;;  %v8449_v19 = vadd.f32 %v8417_v4, %v20904_v39  ;;  %v8450_v62 = vadd.f32 %v8418_v12, %v20907_v48  ;;  %v23254_v44 = vld [vmem:[#allocation67_spill] sm:$0xff]  ;;  %v9674_v4 = vld [vmem:[%s22765_s9 + $0x38] sm:$0xff] }
 0x6b2   : > { %8522 = vst.msk [vmem:[#allocation2 + $0x91] sm:$0xff] %vm682_vm0, %v8436_v54  ;;  %8523 = vst.msk [vmem:[#allocation2 + $0x99] sm:$0xff] %vm682_vm0, %v8437_v17  ;;  %v8451_v55 = vadd.f32 %v8419_v37, %v23254_v44  ;;  %v8452_v28 = vadd.f32 %v8420_v16, %v8388_v30  ;;  %v23255_v32 = vld [vmem:[#allocation69_spill] sm:$0xff]  ;;  %v23256_v47 = vld [vmem:[#allocation19_spill] sm:$0xff]  ;;  %v8457_v41 = vadd.f32 %v8425_v42, %v8393_v43 }
 0x6b3   : > { %8524 = vst.msk [vmem:[#allocation2 + $0xa9] sm:$0xff] %vm682_vm0, %v8438_v11  ;;  %8525 = vst.msk [vmem:[#allocation2 + $0xb1] sm:$0xff] %vm682_vm0, %v8439_v38  ;;  %v8453_v49 = vadd.f32 %v8421_v1, %v23255_v32  ;;  %v8454_v46 = vadd.f32 %v8422_v10, %v23256_v47  ;;  %v23257_v29 = vld [vmem:[#allocation49_spill] sm:$0xff]  ;;  %v8545_v54 = vld [vmem:[#allocation2 + $0x8] sm:$0xff]  ;;  %v21111_v12 = vpack.c.bf16 %v9674_v4, %v9673_v7 }
 0x6b4   : > { %8526 = vst.msk [vmem:[#allocation2 + $0xc1] sm:$0xff] %vm682_vm0, %v8440_v61  ;;  %8527 = vst.msk [vmem:[#allocation2 + $0xc9] sm:$0xff] %vm682_vm0, %v8441_v27  ;;  %v8455_v21 = vadd.f32 %v8423_v24, %v23257_v29  ;;  %v20984_v57 = vld [vmem:[#allocation2 + $0x19] sm:$0xff]  ;;  %v20986_v20 = vld [vmem:[#allocation2 + $0x21] sm:$0xff] }
 0x6b5   : > { %8528 = vst.msk [vmem:[#allocation2 + $0xd9] sm:$0xff] %vm682_vm0, %v8442_v0  ;;  %8529 = vst.msk [vmem:[#allocation2 + $0xe1] sm:$0xff] %vm682_vm0, %v8443_v2  ;;  %15894 = vmatprep.mubr.msk.f32.mxu0 %vm682_vm0, %v20984_v57  ;;  %v20992_v58 = vld [vmem:[#allocation2 + $0x31] sm:$0xff]  ;;  %v20996_v51 = vld [vmem:[#allocation2 + $0x39] sm:$0xff] }
 0x6b6   : > { %8530 = vst.msk [vmem:[#allocation2 + $0xf1] sm:$0xff] %vm682_vm0, %v8444_v35  ;;  %8531 = vst.msk [vmem:[#allocation2 + $0xf9] sm:$0xff] %vm682_vm0, %v8445_v26  ;;  %15895 = vmatmul.mubr.msk.f32.gmra.mrb[34].mxu0 %vm682_vm0, %v20986_v20  ;;  %v21000_v22 = vld [vmem:[#allocation2 + $0x49] sm:$0xff]  ;;  %v21004_v33 = vld [vmem:[#allocation2 + $0x51] sm:$0xff] }
 0x6b7   : > { %8532 = vst.msk [vmem:[#allocation2 + $0x109] sm:$0xff] %vm682_vm0, %v8446_v9  ;;  %8533 = vst.msk [vmem:[#allocation2 + $0x111] sm:$0xff] %vm682_vm0, %v8447_v52  ;;  %15897 = vmatprep.mubr.msk.f32.mxu0 %vm682_vm0, %v20992_v58  ;;  %v21008_v6 = vld [vmem:[#allocation2 + $0x61] sm:$0xff]  ;;  %v21012_v8 = vld [vmem:[#allocation2 + $0x69] sm:$0xff] }
 0x6b8   : > { %8534 = vst.msk [vmem:[#allocation2 + $0x121] sm:$0xff] %vm682_vm0, %v8448_v14  ;;  %8535 = vst.msk [vmem:[#allocation2 + $0x129] sm:$0xff] %vm682_vm0, %v8449_v19  ;;  %v21016_v39 = vld [vmem:[#allocation2 + $0x79] sm:$0xff]  ;;  %v21020_v48 = vld [vmem:[#allocation2 + $0x81] sm:$0xff] }
 0x6b9   : > { %8536 = vst.msk [vmem:[#allocation2 + $0x139] sm:$0xff] %vm682_vm0, %v8450_v62  ;;  %8537 = vst.msk [vmem:[#allocation2 + $0x141] sm:$0xff] %vm682_vm0, %v8451_v55  ;;  %v21024_v25 = vld [vmem:[#allocation2 + $0x91] sm:$0xff]  ;;  %v21028_v36 = vld [vmem:[#allocation2 + $0x99] sm:$0xff] }
 0x6ba   : > { %8538 = vst.msk [vmem:[#allocation2 + $0x151] sm:$0xff] %vm682_vm0, %v8452_v28  ;;  %8539 = vst.msk [vmem:[#allocation2 + $0x159] sm:$0xff] %vm682_vm0, %v8453_v49  ;;  %15898 = vmatmul.mubr.msk.f32.gmra.mrb[36].mxu0 %vm682_vm0, %v20996_v51  ;;  %v21032_v13 = vld [vmem:[#allocation2 + $0xa9] sm:$0xff]  ;;  %v21036_v23 = vld [vmem:[#allocation2 + $0xb1] sm:$0xff] }
 0x6bb   : > { %8540 = vst.msk [vmem:[#allocation2 + $0x169] sm:$0xff] %vm682_vm0, %v8454_v46  ;;  %8541 = vst.msk [vmem:[#allocation2 + $0x171] sm:$0xff] %vm682_vm0, %v8455_v21  ;;  %15900 = vmatprep.mubr.msk.f32.mxu0 %vm682_vm0, %v21000_v22  ;;  %v21040_v30 = vld [vmem:[#allocation2 + $0xc1] sm:$0xff]  ;;  %v21044_v45 = vld [vmem:[#allocation2 + $0xc9] sm:$0xff] }
 0x6bc   : > { %8543 = vst.msk [vmem:[#allocation2 + $0x189] sm:$0xff] %vm682_vm0, %v8457_v41  ;;  %v21048_v50 = vld [vmem:[#allocation2 + $0xd9] sm:$0xff]  ;;  %v21052_v37 = vld [vmem:[#allocation2 + $0xe1] sm:$0xff]  ;;  %v21124_v11 = vld [vmem:[#allocation2 + $0x30] sm:$0xff] }
 0x6bd   : > { %v21056_v15 = vld [vmem:[#allocation2 + $0xf1] sm:$0xff]  ;;  %v21060_v5 = vld [vmem:[#allocation2 + $0xf9] sm:$0xff]  ;;  %v21132_v61 = vld [vmem:[#allocation2 + $0x48] sm:$0xff] }
 0x6be   : > { %15901 = vmatmul.mubr.msk.f32.gmra.mrb[38].mxu0 %vm682_vm0, %v21004_v33  ;;  %v21064_v53 = vld [vmem:[#allocation2 + $0x109] sm:$0xff]  ;;  %v21068_v43 = vld [vmem:[#allocation2 + $0x111] sm:$0xff]  ;;  %v23265_v16 = vld [vmem:[#allocation61_spill] sm:$0xff] }
 0x6bf   : > { %15903 = vmatprep.mubr.msk.f32.mxu0 %vm682_vm0, %v21008_v6  ;;  %v21072_v40 = vld [vmem:[#allocation2 + $0x121] sm:$0xff]  ;;  %v21076_v34 = vld [vmem:[#allocation2 + $0x129] sm:$0xff]  ;;  %v21114_v1 = vld [vmem:[#allocation2 + $0x18] sm:$0xff] }
 0x6c0   : > { %23258 = vst [vmem:[#allocation25_spill] sm:$0xff] %v21076_v34  ;;  %v21080_v63 = vld [vmem:[#allocation2 + $0x139] sm:$0xff]  ;;  %v21084_v59 = vld [vmem:[#allocation2 + $0x141] sm:$0xff]  ;;  %v21136_v24 = vld [vmem:[#allocation2 + $0x50] sm:$0xff] }
 0x6c1   : > { %23259 = vst [vmem:[#allocation50_spill] sm:$0xff] %v21080_v63  ;;  %23260 = vst [vmem:[#allocation21_spill] sm:$0xff] %v21084_v59  ;;  %v21088_v18 = vld [vmem:[#allocation2 + $0x151] sm:$0xff]  ;;  %v21092_v3 = vld [vmem:[#allocation2 + $0x159] sm:$0xff] }
 0x6c2   : > { %15904 = vmatmul.mubr.msk.f32.gmra.mrb[40].mxu0 %vm682_vm0, %v21012_v8  ;;  %23261 = vst [vmem:[#allocation22_spill] sm:$0xff] %v21088_v18  ;;  %23262 = vst [vmem:[#allocation35_spill] sm:$0xff] %v21092_v3  ;;  %v21096_v56 = vld [vmem:[#allocation2 + $0x169] sm:$0xff]  ;;  %v21100_v60 = vld [vmem:[#allocation2 + $0x171] sm:$0xff] }
 0x6c3   : > { %15906 = vmatprep.mubr.msk.f32.mxu0 %vm682_vm0, %v21016_v39  ;;  %23263 = vst [vmem:[#allocation23_spill] sm:$0xff] %v21096_v56  ;;  %23264 = vst [vmem:[#allocation36_spill] sm:$0xff] %v21100_v60  ;;  %v21120_v17 = vld [vmem:[#allocation2 + $0x20] sm:$0xff]  ;;  %v21128_v38 = vld [vmem:[#allocation2 + $0x38] sm:$0xff] }
 0x6c4   : > { %v21140_v10 = vld [vmem:[#allocation2 + $0x60] sm:$0xff]  ;;  %v21144_v42 = vld [vmem:[#allocation2 + $0x68] sm:$0xff]  ;;  %v21148_v27 = vld [vmem:[#allocation2 + $0x78] sm:$0xff] }
 0x6c5   : > { %v21152_v0 = vld [vmem:[#allocation2 + $0x80] sm:$0xff]  ;;  %v21156_v2 = vld [vmem:[#allocation2 + $0x90] sm:$0xff]  ;;  %v21160_v35 = vld [vmem:[#allocation2 + $0x98] sm:$0xff] }
 0x6c6   : > { %15907 = vmatmul.mubr.msk.f32.gmra.mrb[42].mxu0 %vm682_vm0, %v21020_v48  ;;  %v21164_v26 = vld [vmem:[#allocation2 + $0xa8] sm:$0xff]  ;;  %v21168_v9 = vld [vmem:[#allocation2 + $0xb0] sm:$0xff]  ;;  %v21172_v52 = vld [vmem:[#allocation2 + $0xc0] sm:$0xff] }
 0x6c7   : > { %15909 = vmatprep.mubr.msk.f32.mxu0 %vm682_vm0, %v21024_v25  ;;  %v21176_v14 = vld [vmem:[#allocation2 + $0xc8] sm:$0xff]  ;;  %v21180_v19 = vld [vmem:[#allocation2 + $0xd8] sm:$0xff]  ;;  %v21184_v62 = vld [vmem:[#allocation2 + $0xe0] sm:$0xff] }
 0x6c8   : > { %v21188_v44 = vld [vmem:[#allocation2 + $0xf0] sm:$0xff]  ;;  %v21192_v55 = vld [vmem:[#allocation2 + $0xf8] sm:$0xff]  ;;  %v21196_v28 = vld [vmem:[#allocation2 + $0x108] sm:$0xff] }
 0x6c9   : > { %v21200_v32 = vld [vmem:[#allocation2 + $0x110] sm:$0xff]  ;;  %v21204_v49 = vld [vmem:[#allocation2 + $0x120] sm:$0xff]  ;;  %v21208_v47 = vld [vmem:[#allocation2 + $0x128] sm:$0xff] }
 0x6ca   : > { %15910 = vmatmul.mubr.msk.f32.gmra.mrb[44].mxu0 %vm682_vm0, %v21028_v36  ;;  %v21212_v46 = vld [vmem:[#allocation2 + $0x138] sm:$0xff]  ;;  %v21216_v29 = vld [vmem:[#allocation2 + $0x140] sm:$0xff]  ;;  %v21220_v21 = vld [vmem:[#allocation2 + $0x150] sm:$0xff] }
 0x6cb   : > { %15912 = vmatprep.mubr.msk.f32.mxu0 %vm682_vm0, %v21032_v13  ;;  %v21224_v41 = vld [vmem:[#allocation2 + $0x158] sm:$0xff]  ;;  %v9254_v7 = vld [vmem:[#allocation2 + $0x2] sm:$0xff]  ;;  %v21232_v4 = vld [vmem:[#allocation2 + $0x170] sm:$0xff] }
 0x6ce   : > { %15913 = vmatmul.mubr.msk.f32.gmra.mrb[46].mxu0 %vm682_vm0, %v21036_v23 }
 0x6cf   : > { %15915 = vmatprep.mubr.msk.f32.mxu0 %vm682_vm0, %v21040_v30 }
 0x6d2   : > { %15916 = vmatmul.mubr.msk.f32.gmra.mrb[48].mxu0 %vm682_vm0, %v21044_v45 }
 0x6d3   : > { %15918 = vmatprep.mubr.msk.f32.mxu0 %vm682_vm0, %v21048_v50 }
 0x6d6   : > { %15919 = vmatmul.mubr.msk.f32.gmra.mrb[50].mxu0 %vm682_vm0, %v21052_v37 }
 0x6d7   : > { %15921 = vmatprep.mubr.msk.f32.mxu0 %vm682_vm0, %v21056_v15 }
 0x6da   : > { %15922 = vmatmul.mubr.msk.f32.gmra.mrb[52].mxu0 %vm682_vm0, %v21060_v5 }
 0x6db   : > { %15924 = vmatprep.mubr.msk.f32.mxu0 %vm682_vm0, %v21064_v53 }
 0x6de   : > { %15925 = vmatmul.mubr.msk.f32.gmra.mrb[54].mxu0 %vm682_vm0, %v21068_v43 }
 0x6df   : > { %15927 = vmatprep.mubr.msk.f32.mxu0 %vm682_vm0, %v21072_v40 }
 0x6e2   : > { %15928 = vmatmul.mubr.msk.f32.gmra.mrb[56].mxu0 %vm682_vm0, %v21076_v34 }
 0x6e3   : > { %15930 = vmatprep.mubr.msk.f32.mxu0 %vm682_vm0, %v21080_v63 }
 0x6e6   : > { %15931 = vmatmul.mubr.msk.f32.gmra.mrb[58].mxu0 %vm682_vm0, %v21084_v59 }
 0x6e7   : > { %15933 = vmatprep.mubr.msk.f32.mxu0 %vm682_vm0, %v21088_v18  ;;  %v21252_v18 = vld [vmem:[#allocation2 + $0x22] sm:$0xff] }
 0x6ea   : > { %15934 = vmatmul.mubr.msk.f32.gmra.mrb[60].mxu0 %vm682_vm0, %v21092_v3  ;;  %v21246_v3 = vld [vmem:[#allocation2 + $0x1a] sm:$0xff] }
 0x6eb   : > { %15936 = vmatprep.mubr.msk.f32.mxu0 %vm682_vm0, %v21096_v56 }
 0x6ee   : > { %15937 = vmatmul.mubr.msk.f32.gmra.mrb[62].mxu0 %vm682_vm0, %v21100_v60  ;;  %v9255_v60 = vld [vmem:[#allocation2 + $0xa] sm:$0xff] }
 0x6ef   : > { %15943 = vmatprep.mubr.msk.f32.mxu0 %vm682_vm0, %v8544_v31  ;;  %v21228_v31 = vld [vmem:[#allocation2 + $0x168] sm:$0xff] }
 0x6f2   : > { %15944 = vmatmul.mubr.msk.f32.vlgmr.msra.gmra.mrb[32].mxu0 %vm682_vm0, %v8545_v54  ;;  %v10060_v54 = vld [vmem:[%s22765_s9 + $0x40] sm:$0xff] }
 0x6f3   : > { %16438 = vmatpush3.bf16.msra.mxu0 %v23265_v16  ;;  %15946 = vmatprep.mubr.msk.f32.mxu0 %vm682_vm0, %v21114_v1  ;;  %v10061_v16 = vld [vmem:[%s22765_s9 + $0x48] sm:$0xff] }
 0x6f4   : > { %16440 = vmatprep.subr.bf16.mxu0 %v21111_v12  ;;  %v21243_v56 = vpack.c.bf16 %v10061_v16, %v10060_v54  ;;  %v21268_v54 = vld [vmem:[#allocation2 + $0x52] sm:$0xff]  ;;  %v21272_v16 = vld [vmem:[#allocation2 + $0x62] sm:$0xff] }
 0x6f5   : > { %23269 = vst [vmem:[#allocation55_spill] sm:$0xff] %v21268_v54  ;;  %23270 = vst [vmem:[#allocation72_spill] sm:$0xff] %v21272_v16 }
 0x6f6   : > { %15947 = vmatmul.mubr.msk.f32.gmra.mrb[34].mxu0 %vm682_vm0, %v21120_v17 }
 0x6f7   : > { %15949 = vmatprep.mubr.msk.f32.mxu0 %vm682_vm0, %v21124_v11 }
 0x6fa   : > { %15950 = vmatmul.mubr.msk.f32.gmra.mrb[36].mxu0 %vm682_vm0, %v21128_v38 }
 0x6fb   : > { %15952 = vmatprep.mubr.msk.f32.mxu0 %vm682_vm0, %v21132_v61 }
 0x6fe   : > { %15953 = vmatmul.mubr.msk.f32.gmra.mrb[38].mxu0 %vm682_vm0, %v21136_v24 }
 0x6ff   : > { %15955 = vmatprep.mubr.msk.f32.mxu0 %vm682_vm0, %v21140_v10 }
 0x702   : > { %15956 = vmatmul.mubr.msk.f32.gmra.mrb[40].mxu0 %vm682_vm0, %v21144_v42 }
 0x703   : > { %15958 = vmatprep.mubr.msk.f32.mxu0 %vm682_vm0, %v21148_v27 }
 0x706   : > { %15959 = vmatmul.mubr.msk.f32.gmra.mrb[42].mxu0 %vm682_vm0, %v21152_v0 }
 0x707   : > { %15961 = vmatprep.mubr.msk.f32.mxu0 %vm682_vm0, %v21156_v2 }
 0x70a   : > { %15962 = vmatmul.mubr.msk.f32.gmra.mrb[44].mxu0 %vm682_vm0, %v21160_v35 }
 0x70b   : > { %15964 = vmatprep.mubr.msk.f32.mxu0 %vm682_vm0, %v21164_v26 }
 0x70e   : > { %15965 = vmatmul.mubr.msk.f32.gmra.mrb[46].mxu0 %vm682_vm0, %v21168_v9 }
 0x70f   : > { %15967 = vmatprep.mubr.msk.f32.mxu0 %vm682_vm0, %v21172_v52 }
 0x712   : > { %15968 = vmatmul.mubr.msk.f32.gmra.mrb[48].mxu0 %vm682_vm0, %v21176_v14 }
 0x713   : > { %15970 = vmatprep.mubr.msk.f32.mxu0 %vm682_vm0, %v21180_v19 }
 0x716   : > { %15971 = vmatmul.mubr.msk.f32.gmra.mrb[50].mxu0 %vm682_vm0, %v21184_v62 }
 0x717   : > { %15973 = vmatprep.mubr.msk.f32.mxu0 %vm682_vm0, %v21188_v44 }
 0x71a   : > { %15974 = vmatmul.mubr.msk.f32.gmra.mrb[52].mxu0 %vm682_vm0, %v21192_v55 }
 0x71b   : > { %15976 = vmatprep.mubr.msk.f32.mxu0 %vm682_vm0, %v21196_v28 }
 0x71e   : > { %15977 = vmatmul.mubr.msk.f32.gmra.mrb[54].mxu0 %vm682_vm0, %v21200_v32 }
 0x71f   : > { %15979 = vmatprep.mubr.msk.f32.mxu0 %vm682_vm0, %v21204_v49 }
 0x722   : > { %15980 = vmatmul.mubr.msk.f32.gmra.mrb[56].mxu0 %vm682_vm0, %v21208_v47 }
 0x723   : > { %15982 = vmatprep.mubr.msk.f32.mxu0 %vm682_vm0, %v21212_v46 }
 0x726   : > { %15983 = vmatmul.mubr.msk.f32.gmra.mrb[58].mxu0 %vm682_vm0, %v21216_v29 }
 0x727   : > { %15985 = vmatprep.mubr.msk.f32.mxu0 %vm682_vm0, %v21220_v21 }
 0x72a   : > { %15986 = vmatmul.mubr.msk.f32.gmra.mrb[60].mxu0 %vm682_vm0, %v21224_v41 }
 0x72b   : > { %15988 = vmatprep.mubr.msk.f32.mxu0 %vm682_vm0, %v21228_v31 }
 0x72e   : > { %15989 = vmatmul.mubr.msk.f32.gmra.mrb[62].mxu0 %vm682_vm0, %v21232_v4 }
 0x72f   : > { %15995 = vmatprep.mubr.msk.f32.mxu0 %vm682_vm0, %v9254_v7  ;;  %v21256_v7 = vld [vmem:[#allocation2 + $0x32] sm:$0xff] }
 0x730   : > { %23266 = vst [vmem:[#allocation38_spill] sm:$0xff] %v21256_v7 }
 0x732   : > { %15996 = vmatmul.mubr.msk.f32.vlgmr.msra.gmra.mrb[32].mxu0 %vm682_vm0, %v9255_v60  ;;  %v21260_v60 = vld [vmem:[#allocation2 + $0x3a] sm:$0xff] }
 0x733   : > { %16442 = vmatpush3.bf16.msra.mxu0 %v21111_v12  ;;  %15998 = vmatprep.mubr.msk.f32.mxu0 %vm682_vm0, %v21246_v3  ;;  %23267 = vst [vmem:[#allocation39_spill] sm:$0xff] %v21260_v60  ;;  %v21264_v12 = vld [vmem:[#allocation2 + $0x4a] sm:$0xff] }
 0x734   : > { %16444 = vmatprep.subr.bf16.mxu0 %v21243_v56  ;;  %23268 = vst [vmem:[#allocation27_spill] sm:$0xff] %v21264_v12 }
 0x736   : > { %15999 = vmatmul.mubr.msk.f32.gmra.mrb[34].mxu0 %vm682_vm0, %v21252_v18 }
 0x737   : > { %16001 = vmatprep.mubr.msk.f32.mxu0 %vm682_vm0, %v21256_v7  ;;  %v21276_v7 = vld [vmem:[#allocation2 + $0x6a] sm:$0xff] }
 0x738   : > { %23271 = vst [vmem:[#allocation26_spill] sm:$0xff] %v21276_v7 }
 0x73a   : > { %16002 = vmatmul.mubr.msk.f32.gmra.mrb[36].mxu0 %vm682_vm0, %v21260_v60  ;;  %v21280_v60 = vld [vmem:[#allocation2 + $0x7a] sm:$0xff] }
 0x73b   : > { %16004 = vmatprep.mubr.msk.f32.mxu0 %vm682_vm0, %v21264_v12  ;;  %23272 = vst [vmem:[#allocation43_spill] sm:$0xff] %v21280_v60  ;;  %v21284_v12 = vld [vmem:[#allocation2 + $0x82] sm:$0xff] }
 0x73c   : > { %23273 = vst [vmem:[#allocation46_spill] sm:$0xff] %v21284_v12 }
 0x73e   : > { %16005 = vmatmul.mubr.msk.f32.gmra.mrb[38].mxu0 %vm682_vm0, %v21268_v54  ;;  %v21288_v54 = vld [vmem:[#allocation2 + $0x92] sm:$0xff] }
 0x73f   : > { %16007 = vmatprep.mubr.msk.f32.mxu0 %vm682_vm0, %v21272_v16  ;;  %23274 = vst [vmem:[#allocation54_spill] sm:$0xff] %v21288_v54  ;;  %v21292_v16 = vld [vmem:[#allocation2 + $0x9a] sm:$0xff] }
 0x740   : > { %23275 = vst [vmem:[#allocation56_spill] sm:$0xff] %v21292_v16 }
 0x742   : > { %16008 = vmatmul.mubr.msk.f32.gmra.mrb[40].mxu0 %vm682_vm0, %v21276_v7  ;;  %v21296_v7 = vld [vmem:[#allocation2 + $0xaa] sm:$0xff] }
 0x743   : > { %16010 = vmatprep.mubr.msk.f32.mxu0 %vm682_vm0, %v21280_v60  ;;  %23276 = vst [vmem:[#allocation63_spill] sm:$0xff] %v21296_v7  ;;  %v21300_v60 = vld [vmem:[#allocation2 + $0xb2] sm:$0xff] }
 0x744   : > { %23277 = vst [vmem:[#allocation70_spill] sm:$0xff] %v21300_v60 }
 0x746   : > { %16011 = vmatmul.mubr.msk.f32.gmra.mrb[42].mxu0 %vm682_vm0, %v21284_v12  ;;  %v21304_v12 = vld [vmem:[#allocation2 + $0xc2] sm:$0xff] }
 0x747   : > { %16013 = vmatprep.mubr.msk.f32.mxu0 %vm682_vm0, %v21288_v54  ;;  %23278 = vst [vmem:[#allocation73_spill] sm:$0xff] %v21304_v12  ;;  %v21308_v54 = vld [vmem:[#allocation2 + $0xca] sm:$0xff] }
 0x748   : > { %23279 = vst [vmem:[#allocation58_spill] sm:$0xff] %v21308_v54 }
 0x74a   : > { %16014 = vmatmul.mubr.msk.f32.gmra.mrb[44].mxu0 %vm682_vm0, %v21292_v16  ;;  %v21312_v16 = vld [vmem:[#allocation2 + $0xda] sm:$0xff] }
 0x74b   : > { %16016 = vmatprep.mubr.msk.f32.mxu0 %vm682_vm0, %v21296_v7  ;;  %23280 = vst [vmem:[#allocation59_spill] sm:$0xff] %v21312_v16  ;;  %v21316_v7 = vld [vmem:[#allocation2 + $0xe2] sm:$0xff] }
 0x74c   : > { %23281 = vst [vmem:[#allocation60_spill] sm:$0xff] %v21316_v7 }
 0x74e   : > { %16017 = vmatmul.mubr.msk.f32.gmra.mrb[46].mxu0 %vm682_vm0, %v21300_v60  ;;  %v21320_v60 = vld [vmem:[#allocation2 + $0xf2] sm:$0xff] }
 0x74f   : > { %16019 = vmatprep.mubr.msk.f32.mxu0 %vm682_vm0, %v21304_v12  ;;  %23282 = vst [vmem:[#allocation53_spill] sm:$0xff] %v21320_v60  ;;  %v21324_v12 = vld [vmem:[#allocation2 + $0xfa] sm:$0xff] }
 0x750   : > { %23283 = vst [vmem:[#allocation71_spill] sm:$0xff] %v21324_v12 }
 0x752   : > { %16020 = vmatmul.mubr.msk.f32.gmra.mrb[48].mxu0 %vm682_vm0, %v21308_v54  ;;  %v21328_v54 = vld [vmem:[#allocation2 + $0x10a] sm:$0xff] }
 0x753   : > { %16022 = vmatprep.mubr.msk.f32.mxu0 %vm682_vm0, %v21312_v16  ;;  %23284 = vst [vmem:[#allocation20_spill] sm:$0xff] %v21328_v54  ;;  %v21332_v16 = vld [vmem:[#allocation2 + $0x112] sm:$0xff] }
 0x754   : > { %23285 = vst [vmem:[#allocation51_spill] sm:$0xff] %v21332_v16 }
 0x756   : > { %16023 = vmatmul.mubr.msk.f32.gmra.mrb[50].mxu0 %vm682_vm0, %v21316_v7  ;;  %v21336_v7 = vld [vmem:[#allocation2 + $0x122] sm:$0xff] }
 0x757   : > { %16025 = vmatprep.mubr.msk.f32.mxu0 %vm682_vm0, %v21320_v60  ;;  %23286 = vst [vmem:[#allocation32_spill] sm:$0xff] %v21336_v7  ;;  %v21340_v60 = vld [vmem:[#allocation2 + $0x12a] sm:$0xff] }
 0x758   : > { %23287 = vst [vmem:[#allocation52_spill] sm:$0xff] %v21340_v60 }
 0x75a   : > { %16026 = vmatmul.mubr.msk.f32.gmra.mrb[52].mxu0 %vm682_vm0, %v21324_v12  ;;  %v21344_v12 = vld [vmem:[#allocation2 + $0x13a] sm:$0xff] }
 0x75b   : > { %16028 = vmatprep.mubr.msk.f32.mxu0 %vm682_vm0, %v21328_v54  ;;  %23288 = vst [vmem:[#allocation44_spill] sm:$0xff] %v21344_v12  ;;  %v21348_v54 = vld [vmem:[#allocation2 + $0x142] sm:$0xff] }
 0x75c   : > { %23289 = vst [vmem:[#allocation33_spill] sm:$0xff] %v21348_v54 }
 0x75e   : > { %16029 = vmatmul.mubr.msk.f32.gmra.mrb[54].mxu0 %vm682_vm0, %v21332_v16  ;;  %v21352_v16 = vld [vmem:[#allocation2 + $0x152] sm:$0xff] }
 0x75f   : > { %16031 = vmatprep.mubr.msk.f32.mxu0 %vm682_vm0, %v21336_v7  ;;  %23290 = vst [vmem:[#allocation47_spill] sm:$0xff] %v21352_v16  ;;  %v21356_v7 = vld [vmem:[#allocation2 + $0x15a] sm:$0xff] }
 0x760   : > { %23291 = vst [vmem:[#allocation48_spill] sm:$0xff] %v21356_v7 }
 0x762   : > { %16032 = vmatmul.mubr.msk.f32.gmra.mrb[56].mxu0 %vm682_vm0, %v21340_v60  ;;  %v21360_v60 = vld [vmem:[#allocation2 + $0x16a] sm:$0xff] }
 0x763   : > { %16034 = vmatprep.mubr.msk.f32.mxu0 %vm682_vm0, %v21344_v12  ;;  %v21364_v12 = vld [vmem:[#allocation2 + $0x172] sm:$0xff] }
 0x764   : > { %23292 = vst [vmem:[#allocation57_spill] sm:$0xff] %v21364_v12 }
 0x766   : > { %16035 = vmatmul.mubr.msk.f32.gmra.mrb[58].mxu0 %vm682_vm0, %v21348_v54  ;;  %v10447_v54 = vld [vmem:[%s22765_s9 + $0x50] sm:$0xff] }
 0x767   : > { %16037 = vmatprep.mubr.msk.f32.mxu0 %vm682_vm0, %v21352_v16  ;;  %v10448_v16 = vld [vmem:[%s22765_s9 + $0x58] sm:$0xff] }
 0x76a   : > { %16038 = vmatmul.mubr.msk.f32.gmra.mrb[60].mxu0 %vm682_vm0, %v21356_v7  ;;  %v16447_v7 = vpack.c.bf16 %v10448_v16, %v10447_v54  ;;  %v10835_v54 = vld [vmem:[%s22765_s9 + $0x68] sm:$0xff] }
 0x76b   : > { %16040 = vmatprep.mubr.msk.f32.mxu0 %vm682_vm0, %v21360_v60 }
 0x76e   : > { %16041 = vmatmul.mubr.msk.f32.gmra.mrb[62].mxu0 %vm682_vm0, %v21364_v12 }
 0x76f   : > { %16047 = vmatprep.mubr.msk.f32.mxu0 %vm682_vm0, %v21114_v1  ;;  %v21439_v1 = vld [vmem:[#allocation2 + $0x188] sm:$0xff] }
 0x772   : > { %16048 = vmatmul.mubr.msk.f32.vlgmr.msra.gmra.mrb[32].mxu0 %vm682_vm0, %v21120_v17  ;;  %v10834_v17 = vld [vmem:[%s22765_s9 + $0x60] sm:$0xff] }
 0x773   : > { %16446 = vmatpush3.bf16.msra.mxu0 %v21243_v56  ;;  %16050 = vmatprep.mubr.msk.f32.mxu0 %vm682_vm0, %v21124_v11  ;;  %v21435_v56 = vld [vmem:[#allocation2 + $0x180] sm:$0xff]  ;;  %v16451_v16 = vpack.c.bf16 %v10835_v54, %v10834_v17  ;;  %v23296_v17 = vld [vmem:[#allocation36_spill] sm:$0xff] }
 0x774   : > { %16448 = vmatprep.subr.bf16.mxu0 %v16447_v7  ;;  %v21509_v54 = vld [vmem:[#allocation2 + $0x181] sm:$0xff] }
 0x775   : > { %23297 = vst [vmem:[#allocation24_spill] sm:$0xff] %v21509_v54 }
 0x776   : > { %16051 = vmatmul.mubr.msk.f32.gmra.mrb[34].mxu0 %vm682_vm0, %v21128_v38 }
 0x777   : > { %16053 = vmatprep.mubr.msk.f32.mxu0 %vm682_vm0, %v21132_v61 }
 0x77a   : > { %16054 = vmatmul.mubr.msk.f32.gmra.mrb[36].mxu0 %vm682_vm0, %v21136_v24 }
 0x77b   : > { %16056 = vmatprep.mubr.msk.f32.mxu0 %vm682_vm0, %v21140_v10 }
 0x77e   : > { %16057 = vmatmul.mubr.msk.f32.gmra.mrb[38].mxu0 %vm682_vm0, %v21144_v42 }
 0x77f   : > { %16059 = vmatprep.mubr.msk.f32.mxu0 %vm682_vm0, %v21148_v27 }
 0x782   : > { %16060 = vmatmul.mubr.msk.f32.gmra.mrb[40].mxu0 %vm682_vm0, %v21152_v0 }
 0x783   : > { %16062 = vmatprep.mubr.msk.f32.mxu0 %vm682_vm0, %v21156_v2 }
 0x786   : > { %16063 = vmatmul.mubr.msk.f32.gmra.mrb[42].mxu0 %vm682_vm0, %v21160_v35 }
 0x787   : > { %16065 = vmatprep.mubr.msk.f32.mxu0 %vm682_vm0, %v21164_v26 }
 0x78a   : > { %16066 = vmatmul.mubr.msk.f32.gmra.mrb[44].mxu0 %vm682_vm0, %v21168_v9 }
 0x78b   : > { %16068 = vmatprep.mubr.msk.f32.mxu0 %vm682_vm0, %v21172_v52 }
 0x78e   : > { %16069 = vmatmul.mubr.msk.f32.gmra.mrb[46].mxu0 %vm682_vm0, %v21176_v14 }
 0x78f   : > { %16071 = vmatprep.mubr.msk.f32.mxu0 %vm682_vm0, %v21180_v19 }
 0x792   : > { %16072 = vmatmul.mubr.msk.f32.gmra.mrb[48].mxu0 %vm682_vm0, %v21184_v62 }
 0x793   : > { %16074 = vmatprep.mubr.msk.f32.mxu0 %vm682_vm0, %v21188_v44 }
 0x796   : > { %16075 = vmatmul.mubr.msk.f32.gmra.mrb[50].mxu0 %vm682_vm0, %v21192_v55 }
 0x797   : > { %16077 = vmatprep.mubr.msk.f32.mxu0 %vm682_vm0, %v21196_v28 }
 0x79a   : > { %16078 = vmatmul.mubr.msk.f32.gmra.mrb[52].mxu0 %vm682_vm0, %v21200_v32 }
 0x79b   : > { %16080 = vmatprep.mubr.msk.f32.mxu0 %vm682_vm0, %v21204_v49 }
 0x79e   : > { %16081 = vmatmul.mubr.msk.f32.gmra.mrb[54].mxu0 %vm682_vm0, %v21208_v47 }
 0x79f   : > { %16083 = vmatprep.mubr.msk.f32.mxu0 %vm682_vm0, %v21212_v46 }
 0x7a2   : > { %16084 = vmatmul.mubr.msk.f32.gmra.mrb[56].mxu0 %vm682_vm0, %v21216_v29 }
 0x7a3   : > { %16086 = vmatprep.mubr.msk.f32.mxu0 %vm682_vm0, %v21220_v21 }
 0x7a6   : > { %16087 = vmatmul.mubr.msk.f32.gmra.mrb[58].mxu0 %vm682_vm0, %v21224_v41 }
 0x7a7   : > { %16089 = vmatprep.mubr.msk.f32.mxu0 %vm682_vm0, %v21228_v31 }
 0x7aa   : > { %16090 = vmatmul.mubr.msk.f32.gmra.mrb[60].mxu0 %vm682_vm0, %v21232_v4 }
 0x7ab   : > { %16092 = vmatprep.mubr.msk.f32.mxu0 %vm682_vm0, %v21435_v56 }
 0x7ae   : > { %16093 = vmatmul.mubr.msk.f32.gmra.mrb[62].mxu0 %vm682_vm0, %v21439_v1 }
 0x7af   : > { %16099 = vmatprep.mubr.msk.f32.mxu0 %vm682_vm0, %v20984_v57  ;;  %v23293_v57 = vld [vmem:[#allocation22_spill] sm:$0xff] }
 0x7b2   : > { %16100 = vmatmul.mubr.msk.f32.vlgmr.msra.gmra.mrb[32].mxu0 %vm682_vm0, %v20986_v20  ;;  %v23294_v20 = vld [vmem:[#allocation35_spill] sm:$0xff] }
 0x7b3   : > { %16450 = vmatpush3.bf16.msra.mxu0 %v16447_v7  ;;  %16102 = vmatprep.mubr.msk.f32.mxu0 %vm682_vm0, %v20992_v58  ;;  %v23295_v7 = vld [vmem:[#allocation23_spill] sm:$0xff] }
 0x7b4   : > { %16452 = vmatprep.subr.bf16.mxu0 %v16451_v16 }
 0x7b6   : > { %16103 = vmatmul.mubr.msk.f32.gmra.mrb[34].mxu0 %vm682_vm0, %v20996_v51 }
 0x7b7   : > { %16105 = vmatprep.mubr.msk.f32.mxu0 %vm682_vm0, %v21000_v22 }
 0x7ba   : > { %16106 = vmatmul.mubr.msk.f32.gmra.mrb[36].mxu0 %vm682_vm0, %v21004_v33 }
 0x7bb   : > { %16108 = vmatprep.mubr.msk.f32.mxu0 %vm682_vm0, %v21008_v6 }
 0x7be   : > { %16109 = vmatmul.mubr.msk.f32.gmra.mrb[38].mxu0 %vm682_vm0, %v21012_v8 }
 0x7bf   : > { %16111 = vmatprep.mubr.msk.f32.mxu0 %vm682_vm0, %v21016_v39 }
 0x7c2   : > { %16112 = vmatmul.mubr.msk.f32.gmra.mrb[40].mxu0 %vm682_vm0, %v21020_v48 }
 0x7c3   : > { %16114 = vmatprep.mubr.msk.f32.mxu0 %vm682_vm0, %v21024_v25 }
 0x7c6   : > { %16115 = vmatmul.mubr.msk.f32.gmra.mrb[42].mxu0 %vm682_vm0, %v21028_v36 }
 0x7c7   : > { %16117 = vmatprep.mubr.msk.f32.mxu0 %vm682_vm0, %v21032_v13 }
 0x7ca   : > { %16118 = vmatmul.mubr.msk.f32.gmra.mrb[44].mxu0 %vm682_vm0, %v21036_v23 }
 0x7cb   : > { %16120 = vmatprep.mubr.msk.f32.mxu0 %vm682_vm0, %v21040_v30 }
 0x7ce   : > { %16121 = vmatmul.mubr.msk.f32.gmra.mrb[46].mxu0 %vm682_vm0, %v21044_v45 }
 0x7cf   : > { %16123 = vmatprep.mubr.msk.f32.mxu0 %vm682_vm0, %v21048_v50 }
 0x7d2   : > { %16124 = vmatmul.mubr.msk.f32.gmra.mrb[48].mxu0 %vm682_vm0, %v21052_v37 }
 0x7d3   : > { %16126 = vmatprep.mubr.msk.f32.mxu0 %vm682_vm0, %v21056_v15 }
 0x7d6   : > { %16127 = vmatmul.mubr.msk.f32.gmra.mrb[50].mxu0 %vm682_vm0, %v21060_v5 }
 0x7d7   : > { %16129 = vmatprep.mubr.msk.f32.mxu0 %vm682_vm0, %v21064_v53 }
 0x7da   : > { %16130 = vmatmul.mubr.msk.f32.gmra.mrb[52].mxu0 %vm682_vm0, %v21068_v43 }
 0x7db   : > { %16132 = vmatprep.mubr.msk.f32.mxu0 %vm682_vm0, %v21072_v40 }
 0x7de   : > { %16133 = vmatmul.mubr.msk.f32.gmra.mrb[54].mxu0 %vm682_vm0, %v21076_v34  ;;  %v23302_v34 = vld [vmem:[#allocation55_spill] sm:$0xff] }
 0x7df   : > { %16135 = vmatprep.mubr.msk.f32.mxu0 %vm682_vm0, %v21080_v63  ;;  %v21513_v63 = vld [vmem:[#allocation2 + $0x189] sm:$0xff] }
 0x7e0   : > { %23298 = vst [vmem:[#allocation37_spill] sm:$0xff] %v21513_v63 }
 0x7e2   : > { %16136 = vmatmul.mubr.msk.f32.gmra.mrb[56].mxu0 %vm682_vm0, %v21084_v59  ;;  %v23301_v59 = vld [vmem:[#allocation27_spill] sm:$0xff] }
 0x7e3   : > { %16138 = vmatprep.mubr.msk.f32.mxu0 %vm682_vm0, %v23293_v57  ;;  %v11221_v57 = vld [vmem:[%s22765_s9 + $0x70] sm:$0xff] }
 0x7e6   : > { %16139 = vmatmul.mubr.msk.f32.gmra.mrb[58].mxu0 %vm682_vm0, %v23294_v20  ;;  %v11222_v20 = vld [vmem:[%s22765_s9 + $0x78] sm:$0xff] }
 0x7e7   : > { %16141 = vmatprep.mubr.msk.f32.mxu0 %vm682_vm0, %v23295_v7  ;;  %v23300_v7 = vld [vmem:[#allocation39_spill] sm:$0xff] }
 0x7ea   : > { %16142 = vmatmul.mubr.msk.f32.gmra.mrb[60].mxu0 %vm682_vm0, %v23296_v17  ;;  %v16455_v17 = vpack.c.bf16 %v11222_v20, %v11221_v57  ;;  %v23307_v57 = vld [vmem:[#allocation54_spill] sm:$0xff]  ;;  %v23308_v20 = vld [vmem:[#allocation56_spill] sm:$0xff] }
 0x7eb   : > { %16144 = vmatprep.mubr.msk.f32.mxu0 %vm682_vm0, %v21509_v54  ;;  %v23299_v54 = vld [vmem:[#allocation38_spill] sm:$0xff] }
 0x7ee   : > { %16145 = vmatmul.mubr.msk.f32.gmra.mrb[62].mxu0 %vm682_vm0, %v21513_v63  ;;  %v23303_v63 = vld [vmem:[#allocation72_spill] sm:$0xff] }
 0x7ef   : > { %16151 = vmatprep.mubr.msk.f32.mxu0 %vm682_vm0, %v21246_v3  ;;  %v23304_v3 = vld [vmem:[#allocation26_spill] sm:$0xff] }
 0x7f2   : > { %16152 = vmatmul.mubr.msk.f32.vlgmr.msra.gmra.mrb[32].mxu0 %vm682_vm0, %v21252_v18  ;;  %v23305_v18 = vld [vmem:[#allocation43_spill] sm:$0xff] }
 0x7f3   : > { %16454 = vmatpush3.bf16.msra.mxu0 %v16451_v16  ;;  %16154 = vmatprep.mubr.msk.f32.mxu0 %vm682_vm0, %v23299_v54  ;;  %v23306_v16 = vld [vmem:[#allocation46_spill] sm:$0xff] }
 0x7f4   : > { %16456 = vmatprep.subr.bf16.mxu0 %v16455_v17 }
 0x7f6   : > { %16155 = vmatmul.mubr.msk.f32.gmra.mrb[34].mxu0 %vm682_vm0, %v23300_v7 }
 0x7f7   : > { %16157 = vmatprep.mubr.msk.f32.mxu0 %vm682_vm0, %v23301_v59  ;;  %v23309_v59 = vld [vmem:[#allocation63_spill] sm:$0xff] }
 0x7fa   : > { %16158 = vmatmul.mubr.msk.f32.gmra.mrb[36].mxu0 %vm682_vm0, %v23302_v34  ;;  %v23310_v34 = vld [vmem:[#allocation70_spill] sm:$0xff] }
 0x7fb   : > { %16160 = vmatprep.mubr.msk.f32.mxu0 %vm682_vm0, %v23303_v63  ;;  %v23311_v63 = vld [vmem:[#allocation73_spill] sm:$0xff] }
 0x7fe   : > { %16161 = vmatmul.mubr.msk.f32.gmra.mrb[38].mxu0 %vm682_vm0, %v23304_v3  ;;  %v23312_v3 = vld [vmem:[#allocation58_spill] sm:$0xff] }
 0x7ff   : > { %16163 = vmatprep.mubr.msk.f32.mxu0 %vm682_vm0, %v23305_v18  ;;  %v23313_v18 = vld [vmem:[#allocation59_spill] sm:$0xff] }
 0x802   : > { %16164 = vmatmul.mubr.msk.f32.gmra.mrb[40].mxu0 %vm682_vm0, %v23306_v16  ;;  %v23314_v16 = vld [vmem:[#allocation60_spill] sm:$0xff] }
 0x803   : > { %16166 = vmatprep.mubr.msk.f32.mxu0 %vm682_vm0, %v23307_v57  ;;  %v23315_v57 = vld [vmem:[#allocation53_spill] sm:$0xff] }
 0x806   : > { %16167 = vmatmul.mubr.msk.f32.gmra.mrb[42].mxu0 %vm682_vm0, %v23308_v20  ;;  %v23316_v20 = vld [vmem:[#allocation71_spill] sm:$0xff] }
 0x807   : > { %16169 = vmatprep.mubr.msk.f32.mxu0 %vm682_vm0, %v23309_v59  ;;  %v23317_v59 = vld [vmem:[#allocation20_spill] sm:$0xff] }
 0x80a   : > { %16170 = vmatmul.mubr.msk.f32.gmra.mrb[44].mxu0 %vm682_vm0, %v23310_v34  ;;  %v23318_v34 = vld [vmem:[#allocation51_spill] sm:$0xff] }
 0x80b   : > { %16172 = vmatprep.mubr.msk.f32.mxu0 %vm682_vm0, %v23311_v63  ;;  %v23319_v63 = vld [vmem:[#allocation32_spill] sm:$0xff] }
 0x80e   : > { %16173 = vmatmul.mubr.msk.f32.gmra.mrb[46].mxu0 %vm682_vm0, %v23312_v3  ;;  %v23320_v3 = vld [vmem:[#allocation52_spill] sm:$0xff] }
 0x80f   : > { %16175 = vmatprep.mubr.msk.f32.mxu0 %vm682_vm0, %v23313_v18  ;;  %v23321_v18 = vld [vmem:[#allocation44_spill] sm:$0xff] }
 0x812   : > { %16176 = vmatmul.mubr.msk.f32.gmra.mrb[48].mxu0 %vm682_vm0, %v23314_v16  ;;  %v23322_v16 = vld [vmem:[#allocation33_spill] sm:$0xff] }
 0x813   : > { %16178 = vmatprep.mubr.msk.f32.mxu0 %vm682_vm0, %v23315_v57  ;;  %v23323_v57 = vld [vmem:[#allocation47_spill] sm:$0xff] }
 0x816   : > { %16179 = vmatmul.mubr.msk.f32.gmra.mrb[50].mxu0 %vm682_vm0, %v23316_v20  ;;  %v23324_v20 = vld [vmem:[#allocation48_spill] sm:$0xff] }
 0x817   : > { %16181 = vmatprep.mubr.msk.f32.mxu0 %vm682_vm0, %v23317_v59 }
 0x81a   : > { %16182 = vmatmul.mubr.msk.f32.gmra.mrb[52].mxu0 %vm682_vm0, %v23318_v34 }
 0x81b   : > { %16184 = vmatprep.mubr.msk.f32.mxu0 %vm682_vm0, %v23319_v63  ;;  %v21583_v63 = vld [vmem:[#allocation2 + $0x182] sm:$0xff] }
 0x81e   : > { %16185 = vmatmul.mubr.msk.f32.gmra.mrb[54].mxu0 %vm682_vm0, %v23320_v3 }
 0x81f   : > { %16187 = vmatprep.mubr.msk.f32.mxu0 %vm682_vm0, %v23321_v18  ;;  %v21587_v18 = vld [vmem:[#allocation2 + $0x18a] sm:$0xff] }
 0x822   : > { %16188 = vmatmul.mubr.msk.f32.gmra.mrb[56].mxu0 %vm682_vm0, %v23322_v16 }
 0x823   : > { %16190 = vmatprep.mubr.msk.f32.mxu0 %vm682_vm0, %v23323_v57  ;;  %v11608_v57 = vld [vmem:[%s22765_s9 + $0x80] sm:$0xff] }
 0x826   : > { %16191 = vmatmul.mubr.msk.f32.gmra.mrb[58].mxu0 %vm682_vm0, %v23324_v20  ;;  %v11609_v20 = vld [vmem:[%s22765_s9 + $0x88] sm:$0xff] }
 0x827   : > { %16193 = vmatprep.mubr.msk.f32.mxu0 %vm682_vm0, %v21360_v60 }
 0x82a   : > { %16194 = vmatmul.mubr.msk.f32.gmra.mrb[60].mxu0 %vm682_vm0, %v21364_v12  ;;  %v16459_v12 = vpack.c.bf16 %v11609_v20, %v11608_v57 }
 0x82b   : > { %16196 = vmatprep.mubr.msk.f32.mxu0 %vm682_vm0, %v21583_v63 }
 0x82e   : > { %16197 = vmatmul.mubr.msk.f32.gmra.mrb[62].mxu0 %vm682_vm0, %v21587_v18 }
 0x82f   : > { %16203 = vmatprep.mubr.msk.f32.mxu0 %vm682_vm0, %v21124_v11  ;;  %v10832_v11 = vld [vmem:[#allocation2 + $0x198] sm:$0xff] }
 0x832   : > { %16204 = vmatmul.mubr.msk.f32.vlgmr.msra.gmra.mrb[32].mxu0 %vm682_vm0, %v21128_v38  ;;  %v10833_v38 = vld [vmem:[#allocation2 + $0x1a0] sm:$0xff] }
 0x833   : > { %16458 = vmatpush3.bf16.msra.mxu0 %v16455_v17  ;;  %16206 = vmatprep.mubr.msk.f32.mxu0 %vm682_vm0, %v21132_v61  ;;  %v23344_v61 = vld [vmem:[#allocation73_spill] sm:$0xff] }
 0x834   : > { %16460 = vmatprep.subr.bf16.mxu0 %v16459_v12 }
 0x836   : > { %16207 = vmatmul.mubr.msk.f32.gmra.mrb[34].mxu0 %vm682_vm0, %v21136_v24  ;;  %v23345_v24 = vld [vmem:[#allocation58_spill] sm:$0xff] }
 0x837   : > { %16209 = vmatprep.mubr.msk.f32.mxu0 %vm682_vm0, %v21140_v10  ;;  %v23346_v10 = vld [vmem:[#allocation59_spill] sm:$0xff] }
 0x83a   : > { %16210 = vmatmul.mubr.msk.f32.gmra.mrb[36].mxu0 %vm682_vm0, %v21144_v42  ;;  %v23347_v42 = vld [vmem:[#allocation60_spill] sm:$0xff] }
 0x83b   : > { %16212 = vmatprep.mubr.msk.f32.mxu0 %vm682_vm0, %v21148_v27  ;;  %v23348_v27 = vld [vmem:[#allocation53_spill] sm:$0xff] }
 0x83e   : > { %16213 = vmatmul.mubr.msk.f32.gmra.mrb[38].mxu0 %vm682_vm0, %v21152_v0  ;;  %v23349_v0 = vld [vmem:[#allocation71_spill] sm:$0xff] }
 0x83f   : > { %16215 = vmatprep.mubr.msk.f32.mxu0 %vm682_vm0, %v21156_v2  ;;  %v23350_v2 = vld [vmem:[#allocation32_spill] sm:$0xff] }
 0x842   : > { %16216 = vmatmul.mubr.msk.f32.gmra.mrb[40].mxu0 %vm682_vm0, %v21160_v35  ;;  %v23351_v35 = vld [vmem:[#allocation44_spill] sm:$0xff] }
 0x843   : > { %16218 = vmatprep.mubr.msk.f32.mxu0 %vm682_vm0, %v21164_v26  ;;  %v23352_v26 = vld [vmem:[#allocation47_spill] sm:$0xff] }
 0x846   : > { %16219 = vmatmul.mubr.msk.f32.gmra.mrb[42].mxu0 %vm682_vm0, %v21168_v9  ;;  %v23353_v9 = vld [vmem:[#allocation48_spill] sm:$0xff] }
 0x847   : > { %16221 = vmatprep.mubr.msk.f32.mxu0 %vm682_vm0, %v21172_v52  ;;  %v11607_v52 = vld [vmem:[#allocation2 + $0x1a2] sm:$0xff] }
 0x84a   : > { %16222 = vmatmul.mubr.msk.f32.gmra.mrb[44].mxu0 %vm682_vm0, %v21176_v14 }
 0x84b   : > { %16224 = vmatprep.mubr.msk.f32.mxu0 %vm682_vm0, %v21180_v19 }
 0x84e   : > { %16225 = vmatmul.mubr.msk.f32.gmra.mrb[46].mxu0 %vm682_vm0, %v21184_v62 }
 0x84f   : > { %16227 = vmatprep.mubr.msk.f32.mxu0 %vm682_vm0, %v21188_v44 }
 0x852   : > { %16228 = vmatmul.mubr.msk.f32.gmra.mrb[48].mxu0 %vm682_vm0, %v21192_v55 }
 0x853   : > { %16230 = vmatprep.mubr.msk.f32.mxu0 %vm682_vm0, %v21196_v28 }
 0x856   : > { %16231 = vmatmul.mubr.msk.f32.gmra.mrb[50].mxu0 %vm682_vm0, %v21200_v32 }
 0x857   : > { %16233 = vmatprep.mubr.msk.f32.mxu0 %vm682_vm0, %v21204_v49 }
 0x85a   : > { %16234 = vmatmul.mubr.msk.f32.gmra.mrb[52].mxu0 %vm682_vm0, %v21208_v47 }
 0x85b   : > { %16236 = vmatprep.mubr.msk.f32.mxu0 %vm682_vm0, %v21212_v46 }
 0x85e   : > { %16237 = vmatmul.mubr.msk.f32.gmra.mrb[54].mxu0 %vm682_vm0, %v21216_v29 }
 0x85f   : > { %16239 = vmatprep.mubr.msk.f32.mxu0 %vm682_vm0, %v21220_v21 }
 0x862   : > { %16240 = vmatmul.mubr.msk.f32.gmra.mrb[56].mxu0 %vm682_vm0, %v21224_v41 }
 0x863   : > { %16242 = vmatprep.mubr.msk.f32.mxu0 %vm682_vm0, %v21228_v31 }
 0x866   : > { %16243 = vmatmul.mubr.msk.f32.gmra.mrb[58].mxu0 %vm682_vm0, %v21232_v4 }
 0x867   : > { %16245 = vmatprep.mubr.msk.f32.mxu0 %vm682_vm0, %v21435_v56 }
 0x86a   : > { %16246 = vmatmul.mubr.msk.f32.gmra.mrb[60].mxu0 %vm682_vm0, %v21439_v1 }
 0x86b   : > { %16248 = vmatprep.mubr.msk.f32.mxu0 %vm682_vm0, %v10832_v11 }
 0x86e   : > { %16249 = vmatmul.mubr.msk.f32.gmra.mrb[62].mxu0 %vm682_vm0, %v10833_v38 }
 0x86f   : > { %16255 = vmatprep.mubr.msk.f32.mxu0 %vm682_vm0, %v20992_v58  ;;  %v23325_v58 = vld [vmem:[#allocation25_spill] sm:$0xff] }
 0x872   : > { %16256 = vmatmul.mubr.msk.f32.vlgmr.msra.gmra.mrb[32].mxu0 %vm682_vm0, %v20996_v51  ;;  %v23326_v51 = vld [vmem:[#allocation50_spill] sm:$0xff] }
 0x873   : > { %16462 = vmatpush3.bf16.msra.mxu0 %v16459_v12  ;;  %16258 = vmatprep.mubr.msk.f32.mxu0 %vm682_vm0, %v21000_v22  ;;  %v23327_v22 = vld [vmem:[#allocation21_spill] sm:$0xff] }
 0x876   : > { %16259 = vmatmul.mubr.msk.f32.gmra.mrb[34].mxu0 %vm682_vm0, %v21004_v33  ;;  %v23328_v33 = vld [vmem:[#allocation22_spill] sm:$0xff] }
 0x877   : > { %16261 = vmatprep.mubr.msk.f32.mxu0 %vm682_vm0, %v21008_v6  ;;  %v23329_v6 = vld [vmem:[#allocation35_spill] sm:$0xff] }
 0x87a   : > { %16262 = vmatmul.mubr.msk.f32.gmra.mrb[36].mxu0 %vm682_vm0, %v21012_v8  ;;  %v23330_v8 = vld [vmem:[#allocation23_spill] sm:$0xff] }
 0x87b   : > { %16264 = vmatprep.mubr.msk.f32.mxu0 %vm682_vm0, %v21016_v39  ;;  %v23331_v39 = vld [vmem:[#allocation36_spill] sm:$0xff] }
 0x87e   : > { %16265 = vmatmul.mubr.msk.f32.gmra.mrb[38].mxu0 %vm682_vm0, %v21020_v48  ;;  %v23332_v48 = vld [vmem:[#allocation24_spill] sm:$0xff] }
 0x87f   : > { %16267 = vmatprep.mubr.msk.f32.mxu0 %vm682_vm0, %v21024_v25  ;;  %v11219_v25 = vld [vmem:[#allocation2 + $0x199] sm:$0xff] }
 0x882   : > { %16268 = vmatmul.mubr.msk.f32.gmra.mrb[40].mxu0 %vm682_vm0, %v21028_v36  ;;  %v23333_v36 = vld [vmem:[#allocation37_spill] sm:$0xff] }
 0x883   : > { %16270 = vmatprep.mubr.msk.f32.mxu0 %vm682_vm0, %v21032_v13  ;;  %v11220_v13 = vld [vmem:[#allocation2 + $0x1a1] sm:$0xff] }
 0x886   : > { %16271 = vmatmul.mubr.msk.f32.gmra.mrb[42].mxu0 %vm682_vm0, %v21036_v23  ;;  %v23334_v23 = vld [vmem:[#allocation27_spill] sm:$0xff] }
 0x887   : > { %16273 = vmatprep.mubr.msk.f32.mxu0 %vm682_vm0, %v21040_v30  ;;  %v23335_v30 = vld [vmem:[#allocation55_spill] sm:$0xff] }
 0x88a   : > { %16274 = vmatmul.mubr.msk.f32.gmra.mrb[44].mxu0 %vm682_vm0, %v21044_v45  ;;  %v23336_v45 = vld [vmem:[#allocation72_spill] sm:$0xff] }
 0x88b   : > { %16276 = vmatprep.mubr.msk.f32.mxu0 %vm682_vm0, %v21048_v50  ;;  %v23337_v50 = vld [vmem:[#allocation26_spill] sm:$0xff] }
 0x88e   : > { %16277 = vmatmul.mubr.msk.f32.gmra.mrb[46].mxu0 %vm682_vm0, %v21052_v37  ;;  %v23338_v37 = vld [vmem:[#allocation43_spill] sm:$0xff] }
 0x88f   : > { %16279 = vmatprep.mubr.msk.f32.mxu0 %vm682_vm0, %v21056_v15  ;;  %v23339_v15 = vld [vmem:[#allocation46_spill] sm:$0xff] }
 0x892   : > { %16280 = vmatmul.mubr.msk.f32.gmra.mrb[48].mxu0 %vm682_vm0, %v21060_v5  ;;  %v23340_v5 = vld [vmem:[#allocation54_spill] sm:$0xff] }
 0x893   : > { %16282 = vmatprep.mubr.msk.f32.mxu0 %vm682_vm0, %v21064_v53  ;;  %v23341_v53 = vld [vmem:[#allocation56_spill] sm:$0xff] }
 0x896   : > { %16283 = vmatmul.mubr.msk.f32.gmra.mrb[50].mxu0 %vm682_vm0, %v21068_v43  ;;  %v23342_v43 = vld [vmem:[#allocation63_spill] sm:$0xff] }
 0x897   : > { %16285 = vmatprep.mubr.msk.f32.mxu0 %vm682_vm0, %v21072_v40  ;;  %v23343_v40 = vld [vmem:[#allocation70_spill] sm:$0xff] }
 0x89a   : > { %16286 = vmatmul.mubr.msk.f32.gmra.mrb[52].mxu0 %vm682_vm0, %v23325_v58 }
 0x89b   : > { %16288 = vmatprep.mubr.msk.f32.mxu0 %vm682_vm0, %v23326_v51 }
 0x89e   : > { %16289 = vmatmul.mubr.msk.f32.gmra.mrb[54].mxu0 %vm682_vm0, %v23327_v22 }
 0x89f   : > { %16291 = vmatprep.mubr.msk.f32.mxu0 %vm682_vm0, %v23328_v33 }
 0x8a2   : > { %16292 = vmatmul.mubr.msk.f32.gmra.mrb[56].mxu0 %vm682_vm0, %v23329_v6 }
 0x8a3   : > { %16294 = vmatprep.mubr.msk.f32.mxu0 %vm682_vm0, %v23330_v8 }
 0x8a6   : > { %16295 = vmatmul.mubr.msk.f32.gmra.mrb[58].mxu0 %vm682_vm0, %v23331_v39 }
 0x8a7   : > { %16297 = vmatprep.mubr.msk.f32.mxu0 %vm682_vm0, %v23332_v48 }
 0x8aa   : > { %16298 = vmatmul.mubr.msk.f32.gmra.mrb[60].mxu0 %vm682_vm0, %v23333_v36 }
 0x8ab   : > { %16300 = vmatprep.mubr.msk.f32.mxu0 %vm682_vm0, %v11219_v25 }
 0x8ae   : > { %16301 = vmatmul.mubr.msk.f32.gmra.mrb[62].mxu0 %vm682_vm0, %v11220_v13 }
 0x8af   : > { %16307 = vmatprep.mubr.msk.f32.mxu0 %vm682_vm0, %v23299_v54 }
 0x8b2   : > { %16308 = vmatmul.mubr.msk.f32.vlgmr.msra.gmra.mrb[32].mxu0 %vm682_vm0, %v23300_v7 }
 0x8b3   : > { %16310 = vmatprep.mubr.msk.f32.mxu0 %vm682_vm0, %v23334_v23 }
 0x8b6   : > { %16311 = vmatmul.mubr.msk.f32.gmra.mrb[34].mxu0 %vm682_vm0, %v23335_v30 }
 0x8b7   : > { %16313 = vmatprep.mubr.msk.f32.mxu0 %vm682_vm0, %v23336_v45 }
 0x8ba   : > { %16314 = vmatmul.mubr.msk.f32.gmra.mrb[36].mxu0 %vm682_vm0, %v23337_v50 }
 0x8bb   : > { %16316 = vmatprep.mubr.msk.f32.mxu0 %vm682_vm0, %v23338_v37 }
 0x8be   : > { %16317 = vmatmul.mubr.msk.f32.gmra.mrb[38].mxu0 %vm682_vm0, %v23339_v15 }
 0x8bf   : > { %16319 = vmatprep.mubr.msk.f32.mxu0 %vm682_vm0, %v23340_v5 }
 0x8c2   : > { %16320 = vmatmul.mubr.msk.f32.gmra.mrb[40].mxu0 %vm682_vm0, %v23341_v53 }
 0x8c3   : > { %16322 = vmatprep.mubr.msk.f32.mxu0 %vm682_vm0, %v23342_v43 }
 0x8c6   : > { %16323 = vmatmul.mubr.msk.f32.gmra.mrb[42].mxu0 %vm682_vm0, %v23343_v40 }
 0x8c7   : > { %16325 = vmatprep.mubr.msk.f32.mxu0 %vm682_vm0, %v23344_v61 }
 0x8ca   : > { %16326 = vmatmul.mubr.msk.f32.gmra.mrb[44].mxu0 %vm682_vm0, %v23345_v24 }
 0x8cb   : > { %16328 = vmatprep.mubr.msk.f32.mxu0 %vm682_vm0, %v23346_v10 }
 0x8ce   : > { %16329 = vmatmul.mubr.msk.f32.gmra.mrb[46].mxu0 %vm682_vm0, %v23347_v42 }
 0x8cf   : > { %16331 = vmatprep.mubr.msk.f32.mxu0 %vm682_vm0, %v23348_v27 }
 0x8d2   : > { %16332 = vmatmul.mubr.msk.f32.gmra.mrb[48].mxu0 %vm682_vm0, %v23349_v0 }
 0x8d3   : > { %16334 = vmatprep.mubr.msk.f32.mxu0 %vm682_vm0, %v23317_v59  ;;  %v11606_v59 = vld [vmem:[#allocation2 + $0x19a] sm:$0xff] }
 0x8d6   : > { %16335 = vmatmul.mubr.msk.f32.gmra.mrb[50].mxu0 %vm682_vm0, %v23318_v34  ;;  %v23354_v34 = vld [vmem:[#allocation57_spill] sm:$0xff] }
 0x8d7   : > { %16337 = vmatprep.mubr.msk.f32.mxu0 %vm682_vm0, %v23350_v2 }
 0x8da   : > { %16338 = vmatmul.mubr.msk.f32.gmra.mrb[52].mxu0 %vm682_vm0, %v23320_v3 }
 0x8db   : > { %16340 = vmatprep.mubr.msk.f32.mxu0 %vm682_vm0, %v23351_v35 }
 0x8de   : > { %16341 = vmatmul.mubr.msk.f32.gmra.mrb[54].mxu0 %vm682_vm0, %v23322_v16 }
 0x8df   : > { %16343 = vmatprep.mubr.msk.f32.mxu0 %vm682_vm0, %v23352_v26 }
 0x8e2   : > { %16344 = vmatmul.mubr.msk.f32.gmra.mrb[56].mxu0 %vm682_vm0, %v23353_v9 }
 0x8e3   : > { %16346 = vmatprep.mubr.msk.f32.mxu0 %vm682_vm0, %v21360_v60 }
 0x8e6   : > { %16347 = vmatmul.mubr.msk.f32.gmra.mrb[58].mxu0 %vm682_vm0, %v23354_v34 }
 0x8e7   : > { %16349 = vmatprep.mubr.msk.f32.mxu0 %vm682_vm0, %v21583_v63 }
 0x8ea   : > { %16350 = vmatmul.mubr.msk.f32.gmra.mrb[60].mxu0 %vm682_vm0, %v21587_v18 }
 0x8eb   : > { %16352 = vmatprep.mubr.msk.f32.mxu0 %vm682_vm0, %v11606_v59 }
 0x8ee   : > { %16353 = vmatmul.mubr.msk.f32.gmra.mrb[62].mxu0 %vm682_vm0, %v11607_v52 }
 0x985   : > { %v21783_v14 = vpop.f32.mrb[32].mxu0 }
 0x986   : > { %v11964_v19 = vsel %vm682_vm0, %v21783_v14, 0.0  ;;  %v21787_v62 = vpop.f32.mrb[33].mxu0 }
 0x987   : > { %v11963_v44 = vsel %vm682_vm0, %v21787_v62, 0.0 }
 0x988   : > { %v11965_v63 = vadd.f32 %v11964_v19, %v11963_v44 }
 0x989   : > { %v21791_v55 = vpop.f32.mrb[34].mxu0 }
 0x98a   : > { %v21793_v28 = vpop.f32.mrb[35].mxu0  ;;  %v11968_v47 = vsel %vm682_vm0, %v21791_v55, 0.0 }
 0x98b   : > { %v11966_v32 = vsel %vm682_vm0, %v21793_v28, 0.0 }
 0x98c   : > { %v11967_v49 = vadd.f32 %v11966_v32, %v11965_v63 }
 0x98d   : > { %v21799_v46 = vpop.f32.mrb[36].mxu0 }
 0x98e   : > { %v21801_v29 = vpop.f32.mrb[37].mxu0  ;;  %v11969_v21 = vadd.f32 %v11968_v47, %v11967_v49  ;;  %v11972_v4 = vsel %vm682_vm0, %v21799_v46, 0.0 }
 0x98f   : > { %v11970_v41 = vsel %vm682_vm0, %v21801_v29, 0.0 }
 0x990   : > { %v11971_v31 = vadd.f32 %v11970_v41, %v11969_v21 }
 0x991   : > { %v21807_v60 = vpop.f32.mrb[38].mxu0 }
 0x992   : > { %v21809_v12 = vpop.f32.mrb[39].mxu0  ;;  %v11973_v56 = vadd.f32 %v11972_v4, %v11971_v31  ;;  %v11976_v17 = vsel %vm682_vm0, %v21807_v60, 0.0 }
 0x993   : > { %v11974_v1 = vsel %vm682_vm0, %v21809_v12, 0.0 }
 0x994   : > { %v11975_v7 = vadd.f32 %v11974_v1, %v11973_v56 }
 0x995   : > { %v21815_v54 = vpop.f32.mrb[40].mxu0 }
 0x996   : > { %v21817_v3 = vpop.f32.mrb[41].mxu0  ;;  %v11977_v18 = vadd.f32 %v11976_v17, %v11975_v7  ;;  %v11980_v20 = vsel %vm682_vm0, %v21815_v54, 0.0 }
 0x997   : > { %v11978_v16 = vsel %vm682_vm0, %v21817_v3, 0.0 }
 0x998   : > { %v11979_v57 = vadd.f32 %v11978_v16, %v11977_v18 }
 0x999   : > { %v21823_v11 = vpop.f32.mrb[42].mxu0 }
 0x99a   : > { %v21825_v38 = vpop.f32.mrb[43].mxu0  ;;  %v11981_v58 = vadd.f32 %v11980_v20, %v11979_v57  ;;  %v11984_v33 = vsel %vm682_vm0, %v21823_v11, 0.0 }
 0x99b   : > { %v11982_v51 = vsel %vm682_vm0, %v21825_v38, 0.0 }
 0x99c   : > { %v11983_v22 = vadd.f32 %v11982_v51, %v11981_v58 }
 0x99d   : > { %v21831_v6 = vpop.f32.mrb[44].mxu0 }
 0x99e   : > { %v21833_v8 = vpop.f32.mrb[45].mxu0  ;;  %v11985_v39 = vadd.f32 %v11984_v33, %v11983_v22  ;;  %v11988_v36 = vsel %vm682_vm0, %v21831_v6, 0.0 }
 0x99f   : > { %v11986_v48 = vsel %vm682_vm0, %v21833_v8, 0.0 }
 0x9a0   : > { %v11987_v25 = vadd.f32 %v11986_v48, %v11985_v39 }
 0x9a1   : > { %v21839_v13 = vpop.f32.mrb[46].mxu0 }
 0x9a2   : > { %v21841_v23 = vpop.f32.mrb[47].mxu0  ;;  %v11989_v30 = vadd.f32 %v11988_v36, %v11987_v25  ;;  %v11992_v37 = vsel %vm682_vm0, %v21839_v13, 0.0 }
 0x9a3   : > { %v11990_v45 = vsel %vm682_vm0, %v21841_v23, 0.0 }
 0x9a4   : > { %v11991_v50 = vadd.f32 %v11990_v45, %v11989_v30 }
 0x9a5   : > { %v21847_v15 = vpop.f32.mrb[48].mxu0 }
 0x9a6   : > { %v21849_v5 = vpop.f32.mrb[49].mxu0  ;;  %v11993_v53 = vadd.f32 %v11992_v37, %v11991_v50  ;;  %v11996_v61 = vsel %vm682_vm0, %v21847_v15, 0.0 }
 0x9a7   : > { %v11994_v43 = vsel %vm682_vm0, %v21849_v5, 0.0 }
 0x9a8   : > { %v11995_v40 = vadd.f32 %v11994_v43, %v11993_v53 }
 0x9a9   : > { %v21855_v24 = vpop.f32.mrb[50].mxu0 }
 0x9aa   : > { %v21857_v10 = vpop.f32.mrb[51].mxu0  ;;  %v11997_v42 = vadd.f32 %v11996_v61, %v11995_v40  ;;  %v12000_v2 = vsel %vm682_vm0, %v21855_v24, 0.0 }
 0x9ab   : > { %v11998_v27 = vsel %vm682_vm0, %v21857_v10, 0.0 }
 0x9ac   : > { %v11999_v0 = vadd.f32 %v11998_v27, %v11997_v42 }
 0x9ad   : > { %v21863_v35 = vpop.f32.mrb[52].mxu0 }
 0x9ae   : > { %v21865_v26 = vpop.f32.mrb[53].mxu0  ;;  %v12001_v9 = vadd.f32 %v12000_v2, %v11999_v0  ;;  %v12004_v52 = vsel %vm682_vm0, %v21863_v35, 0.0  ;;  %v12033_v2 = vld [vmem:[%s22770_s14] sm:$0x3] }
 0x9af   : > { %v12002_v34 = vsel %vm682_vm0, %v21865_v26, 0.0 }
 0x9b0   : > { %v12003_v59 = vadd.f32 %v12002_v34, %v12001_v9 }
 0x9b1   : > { %v21871_v19 = vpop.f32.mrb[54].mxu0 }
 0x9b2   : > { %v21873_v44 = vpop.f32.mrb[55].mxu0  ;;  %v12005_v63 = vadd.f32 %v12004_v52, %v12003_v59  ;;  %v12008_v47 = vsel %vm682_vm0, %v21871_v19, 0.0 }
 0x9b3   : > { %v12006_v32 = vsel %vm682_vm0, %v21873_v44, 0.0 }
 0x9b4   : > { %v12007_v49 = vadd.f32 %v12006_v32, %v12005_v63  ;;  %v17564_v63 = vmov 1966171168  }
 0x9b5   : > { %v21879_v21 = vpop.f32.mrb[56].mxu0  ;;  %v12058_v32 = vunpack.c.l.s4 %v17564_v63 }
 0x9b6   : > { %v21881_v41 = vpop.f32.mrb[57].mxu0  ;;  %v12009_v31 = vadd.f32 %v12008_v47, %v12007_v49  ;;  %v12012_v1 = vsel %vm682_vm0, %v21879_v21, 0.0  ;;  %v12060_v49 = vlaneseq  ;;  %v12052_v47 = vstv %s13990_s23  ;;  %s12119_s23 = sld [smem:[#allocation5]] }
 0x9b7   : > { %v12010_v4 = vsel %vm682_vm0, %v21881_v41, 0.0 }
 0x9b8   : > { %v12011_v56 = vadd.f32 %v12010_v4, %v12009_v31  ;;  %v12059_v31 = vunpack.c.0.s8 %v12058_v32  ;;  %v21911_v4 = vshrl.u32 %v12060_v49, 7 }
 0x9b9   : > { %v21887_v7 = vpop.f32.mrb[58].mxu0 }
 0x9ba   : > { %v21889_v17 = vpop.f32.mrb[59].mxu0  ;;  %v12013_v18 = vadd.f32 %v12012_v1, %v12011_v56  ;;  %v12016_v20 = vsel %vm682_vm0, %v21887_v7, 0.0 }
 0x9bb   : > { %v12014_v16 = vsel %vm682_vm0, %v21889_v17, 0.0 }
 0x9bc   : > { %v12015_v57 = vadd.f32 %v12014_v16, %v12013_v18  ;;  %v12034_v18 = vld [vmem:[%s22771_s15] sm:$0x3]  ;;  %v12042_v16 = vstv %s12041_s0  ;;  %s13992_s0 = sld [smem:[#allocation9 + $0x1]] }
 0x9bd   : > { %v21895_v58 = vpop.f32.mrb[60].mxu0 }
 0x9be   : > { %v21897_v51 = vpop.f32.mrb[61].mxu0  ;;  %v12017_v22 = vadd.f32 %v12016_v20, %v12015_v57  ;;  %v12020_v48 = vsel %vm682_vm0, %v21895_v58, 0.0  ;;  %v12062_v57 = vsub.s32 %v12059_v31, %v21911_v4 }
 0x9bf   : > { %v12018_v33 = vsel %vm682_vm0, %v21897_v51, 0.0 }
 0x9c0   : > { %v12019_v39 = vadd.f32 %v12018_v33, %v12017_v22 }
 0x9c1   : > { %v16354_v25 = vpop.f32.mrb[62].mxu0 }
 0x9c2   : > { %v21903_v36 = vpop.f32.mrb[63].mxu0  ;;  %v12021_v30 = vadd.f32 %v12020_v48, %v12019_v39  ;;  %v12024_v37 = vsel %vm682_vm0, %v16354_v25, 0.0 }
 0x9c3   : > { %v12022_v45 = vsel %vm682_vm0, %v21903_v36, 0.0 }
 0x9c4   : > { %v12023_v50 = vadd.f32 %v12022_v45, %v12021_v30  ;;  %v12035_v45 = vld [vmem:[%s22772_s16] sm:$0x1] }
 0x9c6   : > { %v12025_v53 = vadd.f32 %v12024_v37, %v12023_v50 }
 0x9c8   : > { %v12026_v43 = vrot.slane %v12025_v53, 4 }
 0x9ca   : > { %v12027_v40 = vadd.f32 %v12026_v43, %v12025_v53 }
 0x9cc   : > { %v12028_v61 = vrot.slane %v12027_v40, 2 }
 0x9ce   : > { %v12029_v42 = vadd.f32 %v12028_v61, %v12027_v40 }
 0x9d0   : > { %v12030_v27 = vrot.slane %v12029_v42, 1 }
 0x9d2   : > { %v12031_v0 = vadd.f32 %v12030_v27, %v12029_v42 }
 0x9d4   : > { %v12032_v9 = vmul.f32 0.00390625, %v12031_v0  ;;  %v12083_v0 = vsub.s32 0, %v21911_v4 }
 0x9d6   : > { %v12036_v34 = vmul.f32 %v12033_v2, %v12032_v9 }
 0x9d8   : > { %v12048_v59 = vsel %vm12047_vm2, %v12036_v34, 0.0  ;;  %v12038_v52 = vsel %vm12037_vm3, %v12036_v34, 0.0  ;;  %v21926_v34 = vld [vmem:[%s22773_s17] sm:$0x3] }
 0x9d9   : > { %12049 = vadd.xlane.f32.xlu0 %v12048_v59  ;;  %v21929_v59 = vrot.slane %v21926_v34, %v12083_v0 }
 0x9dd   : > { %12039 = vadd.xlane.f32.xlu0 %v12038_v52 }
 0xa66   : > { %v12050_v56 = vpop.xlane.xlu0 %12049 }
 0xa67   : > { %v12053_v1 = vadd.f32 %v12052_v47, %v12050_v56 }
 0xa69   : > { %v12054_v20 = vmax.f32 %v12053_v1, 0.0 }
 0xa6a   : > { %v12040_v22 = vpop.xlane.xlu0 %12039 }
 0xa6b   : > { %v12055_v33 = vmul.f32 %v12054_v20, %v12034_v18  ;;  %v12043_v39 = vadd.f32 %v12042_v16, %v12040_v22 }
 0xa6d   : > { %v12063_v48 = vrot.slane %v12055_v33, %v12062_v57  ;;  %v12044_v30 = vmax.f32 %v12043_v39, 0.0 }
 0xa6f   : > { %v12064_v50 = vcombine.high %v12063_v48, %v12063_v48  ;;  %v12045_v37 = vmul.f32 %v12044_v30, %v12034_v18 }
 0xa71   : > { %v12071_v53 = vrot.slane %v12064_v50, %v12062_v57  ;;  %v12046_v43 = vadd.f32 %v12045_v37, %v12035_v45 }
 0xa73   : > { %v12073_v40 = vadd.f32 %v12071_v53, %v12046_v43 }
 0xa75   : > { %v13991_v61 = vmul.f32 -1.442695, %v12073_v40 }
 0xa77   : > { %17311 = vpow2.f32 %v13991_v61 }
 0xa81   : > { %v17312_v42 = vpop.eup %17311 }
 0xa82   : > { %v12077_v27 = vadd.f32 1.0, %v17312_v42 }
 0xa84   : > { %17313 = vrcp.f32 %v12077_v27 }
 0xa8e   : > { %v17314_v2 = vpop.eup %17313 }
 0xa8f   : > { %v21921_v9 = vrot.slane %v17314_v2, %v12083_v0 }
 0xa91   : > { %v21933_v52 = vmul.f32 %v21921_v9, %v21787_v62  ;;  %v21937_v63 = vmul.f32 %v21921_v9, %v21793_v28  ;;  %v21941_v32 = vmul.f32 %v21783_v14, %v21921_v9  ;;  %v21945_v49 = vmul.f32 %v21921_v9, %v21801_v29 }
 0xa92   : > { %v21948_v47 = vmul.f32 %v16354_v25, %v21921_v9  ;;  %v21956_v28 = vmul.f32 %v21791_v55, %v21921_v9  ;;  %v21960_v14 = vmul.f32 %v21921_v9, %v21809_v12  ;;  %v21970_v55 = vmul.f32 %v21799_v46, %v21921_v9 }
 0xa93   : > { %v12128_v31 = vmul.f32 %v21929_v59, %v21937_v63  ;;  %v12126_v62 = vmul.f32 %v21929_v59, %v21933_v52  ;;  %v12130_v25 = vmul.f32 %v21929_v59, %v21945_v49  ;;  %v12127_v1 = vmul.f32 %v21929_v59, %v21941_v32 }
 0xa94   : > { %23355 = vst [vmem:[#allocation40_spill] sm:$0xff] %v21948_v47  ;;  %v21974_v12 = vmul.f32 %v21921_v9, %v21817_v3  ;;  %v12132_v57 = vmul.f32 %v21929_v59, %v21960_v14  ;;  %v12129_v20 = vmul.f32 %v21929_v59, %v21956_v28  ;;  %v21984_v46 = vmul.f32 %v21807_v60, %v21921_v9 }
 0xa95   : > { %v12164_v29 = vsel %vm682_vm0, %v12128_v31, 0.0  ;;  %v12158_v56 = vsel %vm682_vm0, %v12126_v62, 0.0  ;;  %v12170_v18 = vsel %vm682_vm0, %v12130_v25, 0.0  ;;  %v12161_v16 = vsel %vm682_vm0, %v12127_v1, 0.0 }
 0xa96   : > { %12165 = vadd.xlane.f32.xlu0 %v12164_v29  ;;  %12159 = vadd.xlane.f32.xlu1 %v12158_v56  ;;  %v21988_v3 = vmul.f32 %v21921_v9, %v21825_v38  ;;  %v12176_v22 = vsel %vm682_vm0, %v12132_v57, 0.0  ;;  %v12167_v33 = vsel %vm682_vm0, %v12129_v20, 0.0  ;;  %v12134_v39 = vmul.f32 %v21929_v59, %v21974_v12 }
 0xa97   : > { %v12131_v48 = vmul.f32 %v21929_v59, %v21970_v55  ;;  %v21998_v60 = vmul.f32 %v21815_v54, %v21921_v9  ;;  %v22002_v38 = vmul.f32 %v21921_v9, %v21833_v8  ;;  %v12133_v37 = vmul.f32 %v21929_v59, %v21984_v46 }
 0xa98   : > { %v12182_v30 = vsel %vm682_vm0, %v12134_v39, 0.0  ;;  %v12136_v50 = vmul.f32 %v21929_v59, %v21988_v3  ;;  %v22012_v54 = vmul.f32 %v21823_v11, %v21921_v9  ;;  %v22016_v8 = vmul.f32 %v21921_v9, %v21841_v23 }
 0xa99   : > { %v12173_v45 = vsel %vm682_vm0, %v12131_v48, 0.0  ;;  %v12179_v43 = vsel %vm682_vm0, %v12133_v37, 0.0  ;;  %v12138_v40 = vmul.f32 %v21929_v59, %v22002_v38  ;;  %v12135_v61 = vmul.f32 %v21929_v59, %v21998_v60 }
 0xa9a   : > { %12171 = vadd.xlane.f32.xlu0 %v12170_v18  ;;  %12162 = vadd.xlane.f32.xlu1 %v12161_v16  ;;  %v12188_v53 = vsel %vm682_vm0, %v12136_v50, 0.0  ;;  %v22026_v11 = vmul.f32 %v21831_v6, %v21921_v9  ;;  %v22030_v23 = vmul.f32 %v21921_v9, %v21849_v5  ;;  %v12140_v0 = vmul.f32 %v21929_v59, %v22016_v8 }
 0xa9b   : > { %v12194_v42 = vsel %vm682_vm0, %v12138_v40, 0.0  ;;  %v12185_v27 = vsel %vm682_vm0, %v12135_v61, 0.0  ;;  %v12137_v2 = vmul.f32 %v21929_v59, %v22012_v54  ;;  %v22040_v6 = vmul.f32 %v21839_v13, %v21921_v9 }
 0xa9c   : > { %v22044_v5 = vmul.f32 %v21921_v9, %v21857_v10  ;;  %v12200_v31 = vsel %vm682_vm0, %v12140_v0, 0.0  ;;  %v12142_v29 = vmul.f32 %v21929_v59, %v22030_v23  ;;  %v12139_v56 = vmul.f32 %v21929_v59, %v22026_v11 }
 0xa9d   : > { %23356 = vst [vmem:[#allocation41_spill] sm:$0xff] %v22040_v6  ;;  %v12191_v62 = vsel %vm682_vm0, %v12137_v2, 0.0  ;;  %v22054_v13 = vmul.f32 %v21847_v15, %v21921_v9  ;;  %v22058_v10 = vmul.f32 %v21921_v9, %v21865_v26  ;;  %v12141_v16 = vmul.f32 %v21929_v59, %v22040_v6 }
 0xa9e   : > { %12177 = vadd.xlane.f32.xlu0 %v12176_v22  ;;  %12168 = vadd.xlane.f32.xlu1 %v12167_v33  ;;  %v12206_v25 = vsel %vm682_vm0, %v12142_v29, 0.0  ;;  %v12197_v1 = vsel %vm682_vm0, %v12139_v56, 0.0  ;;  %v12144_v18 = vmul.f32 %v21929_v59, %v22044_v5  ;;  %v22068_v15 = vmul.f32 %v21855_v24, %v21921_v9 }
 0xa9f   : > { %23357 = vst [vmem:[#allocation28_spill] sm:$0xff] %v22054_v13  ;;  %23358 = vst [vmem:[#allocation42_spill] sm:$0xff] %v22058_v10  ;;  %v22072_v26 = vmul.f32 %v21921_v9, %v21873_v44  ;;  %v12203_v20 = vsel %vm682_vm0, %v12141_v16, 0.0  ;;  %v12146_v22 = vmul.f32 %v21929_v59, %v22058_v10  ;;  %v12143_v33 = vmul.f32 %v21929_v59, %v22054_v13 }
 0xaa0   : > { %23359 = vst [vmem:[#allocation29_spill] sm:$0xff] %v22068_v15  ;;  %v12212_v57 = vsel %vm682_vm0, %v12144_v18, 0.0  ;;  %v22082_v24 = vmul.f32 %v21863_v35, %v21921_v9  ;;  %v22086_v44 = vmul.f32 %v21921_v9, %v21881_v41  ;;  %v22096_v35 = vmul.f32 %v21871_v19, %v21921_v9 }
 0xaa1   : > { %23360 = vst [vmem:[#allocation30_spill] sm:$0xff] %v22072_v26  ;;  %v12218_v39 = vsel %vm682_vm0, %v12146_v22, 0.0  ;;  %v12209_v48 = vsel %vm682_vm0, %v12143_v33, 0.0  ;;  %v22100_v41 = vmul.f32 %v21921_v9, %v21889_v17  ;;  %v22110_v19 = vmul.f32 %v21879_v21, %v21921_v9 }
 0xaa2   : > { %12183 = vadd.xlane.f32.xlu0 %v12182_v30  ;;  %12174 = vadd.xlane.f32.xlu1 %v12173_v45  ;;  %23361 = vst [vmem:[#allocation45_spill] sm:$0xff] %v22082_v24  ;;  %23362 = vst [vmem:[#allocation31_spill] sm:$0xff] %v22086_v44  ;;  %v12148_v30 = vmul.f32 %v21929_v59, %v22072_v26  ;;  %v12145_v45 = vmul.f32 %v21929_v59, %v22068_v15  ;;  %v12388_v0 = vsub.s32 1, %v21911_v4 }
 0xaa3   : > { %23363 = vst [vmem:[#allocation34_spill] sm:$0xff] %v22096_v35  ;;  %23364 = vst [vmem:[#allocation62_spill] sm:$0xff] %v22100_v41  ;;  %v22114_v17 = vmul.f32 %v21921_v9, %v21897_v51  ;;  %v22125_v21 = vmul.f32 %v21887_v7, %v21921_v9  ;;  %v22129_v51 = vmul.f32 %v21921_v9, %v21903_v36 }
 0xaa4   : > { %v12224_v50 = vsel %vm682_vm0, %v12148_v30, 0.0  ;;  %v12215_v37 = vsel %vm682_vm0, %v12145_v45, 0.0  ;;  %23365 = vst [vmem:[#allocation64_spill] sm:$0xff] %v22110_v19  ;;  %v12151_v29 = vmul.f32 %v21929_v59, %v22110_v19  ;;  %v22138_v4 = vrot.slane %v21926_v34, %v12388_v0 }
 0xaa5   : > { %23366 = vst [vmem:[#allocation65_spill] sm:$0xff] %v22114_v17  ;;  %23367 = vst [vmem:[#allocation66_spill] sm:$0xff] %v22125_v21  ;;  %v22142_v7 = vmul.f32 %v21895_v58, %v21921_v9  ;;  %v12157_v22 = vmul.f32 %v21929_v59, %v21948_v47 }
 0xaa6   : > { %12189 = vadd.xlane.f32.xlu0 %v12188_v53  ;;  %12180 = vadd.xlane.f32.xlu1 %v12179_v43  ;;  %v12150_v53 = vmul.f32 %v21929_v59, %v22086_v44  ;;  %v12147_v43 = vmul.f32 %v21929_v59, %v22082_v24  ;;  %23368 = vst [vmem:[#allocation68_spill] sm:$0xff] %v22129_v51  ;;  %v12233_v56 = vsel %vm682_vm0, %v12151_v29, 0.0 }
 0xaa7   : > { %23369 = vst [vmem:[#allocation67_spill] sm:$0xff] %v22142_v7  ;;  %v12390_v58 = vmul.f32 %v22138_v4, %v21933_v52  ;;  %v12155_v9 = vmul.f32 %v21929_v59, %v22142_v7  ;;  %v12391_v30 = vmul.f32 %v22138_v4, %v21941_v32  ;;  %v12400_v0 = vmul.f32 %v22138_v4, %v21988_v3 }
 0xaa8   : > { %v12230_v40 = vsel %vm682_vm0, %v12150_v53, 0.0  ;;  %v12221_v61 = vsel %vm682_vm0, %v12147_v43, 0.0  ;;  %v12402_v29 = vmul.f32 %v22138_v4, %v22002_v38 }
 0xaa9   : > { %v12422_v16 = vsel %vm682_vm0, %v12390_v58, 0.0 }
 0xaaa   : > { %12195 = vadd.xlane.f32.xlu0 %v12194_v42  ;;  %12186 = vadd.xlane.f32.xlu1 %v12185_v27  ;;  %v12152_v42 = vmul.f32 %v21929_v59, %v22100_v41  ;;  %v12149_v27 = vmul.f32 %v21929_v59, %v22096_v35 }
 0xaac   : > { %v12236_v2 = vsel %vm682_vm0, %v12152_v42, 0.0 }
 0xaae   : > { %12201 = vadd.xlane.f32.xlu0 %v12200_v31  ;;  %12192 = vadd.xlane.f32.xlu1 %v12191_v62  ;;  %v12227_v31 = vsel %vm682_vm0, %v12149_v27, 0.0  ;;  %v12154_v62 = vmul.f32 %v21929_v59, %v22114_v17 }
 0xab0   : > { %v12242_v36 = vsel %vm682_vm0, %v12154_v62, 0.0 }
 0xab2   : > { %12207 = vadd.xlane.f32.xlu0 %v12206_v25  ;;  %12198 = vadd.xlane.f32.xlu1 %v12197_v1  ;;  %v12156_v25 = vmul.f32 %v21929_v59, %v22129_v51  ;;  %v12153_v1 = vmul.f32 %v21929_v59, %v22125_v21  ;;  %v12396_v59 = vmul.f32 %v22138_v4, %v21960_v14 }
 0xab4   : > { %v12248_v18 = vsel %vm682_vm0, %v12156_v25, 0.0  ;;  %v12239_v34 = vsel %vm682_vm0, %v12153_v1, 0.0  ;;  %v12440_v53 = vsel %vm682_vm0, %v12396_v59, 0.0  ;;  %v12404_v1 = vmul.f32 %v22138_v4, %v22016_v8 }
 0xab6   : > { %12213 = vadd.xlane.f32.xlu0 %v12212_v57  ;;  %12204 = vadd.xlane.f32.xlu1 %v12203_v20  ;;  %v12245_v57 = vsel %vm682_vm0, %v12155_v9, 0.0  ;;  %v12392_v20 = vmul.f32 %v22138_v4, %v21937_v63  ;;  %v12406_v9 = vmul.f32 %v22138_v4, %v22030_v23 }
 0xab8   : > { %v12428_v33 = vsel %vm682_vm0, %v12392_v20, 0.0 }
 0xaba   : > { %12219 = vadd.xlane.f32.xlu0 %v12218_v39  ;;  %12210 = vadd.xlane.f32.xlu1 %v12209_v48  ;;  %v12251_v39 = vsel %vm682_vm0, %v12157_v22, 0.0  ;;  %v12394_v48 = vmul.f32 %v22138_v4, %v21945_v49  ;;  %v12408_v22 = vmul.f32 %v22138_v4, %v22044_v5 }
 0xabc   : > { %v12434_v45 = vsel %vm682_vm0, %v12394_v48, 0.0 }
 0xabe   : > { %12225 = vadd.xlane.f32.xlu0 %v12224_v50  ;;  %12216 = vadd.xlane.f32.xlu1 %v12215_v37  ;;  %v12425_v50 = vsel %vm682_vm0, %v12391_v30, 0.0  ;;  %v12393_v37 = vmul.f32 %v22138_v4, %v21956_v28  ;;  %v12410_v30 = vmul.f32 %v22138_v4, %v22058_v10 }
 0xac0   : > { %v12431_v43 = vsel %vm682_vm0, %v12393_v37, 0.0  ;;  %v12412_v37 = vmul.f32 %v22138_v4, %v22072_v26 }
 0xac2   : > { %12231 = vadd.xlane.f32.xlu0 %v12230_v40  ;;  %12222 = vadd.xlane.f32.xlu1 %v12221_v61  ;;  %v12398_v40 = vmul.f32 %v22138_v4, %v21974_v12  ;;  %v12395_v61 = vmul.f32 %v22138_v4, %v21970_v55 }
 0xac4   : > { %v12446_v42 = vsel %vm682_vm0, %v12398_v40, 0.0  ;;  %v12437_v27 = vsel %vm682_vm0, %v12395_v61, 0.0  ;;  %v12414_v61 = vmul.f32 %v22138_v4, %v22086_v44 }
 0xac6   : > { %12237 = vadd.xlane.f32.xlu0 %v12236_v2  ;;  %12228 = vadd.xlane.f32.xlu1 %v12227_v31  ;;  %v12397_v2 = vmul.f32 %v22138_v4, %v21984_v46  ;;  %v12452_v31 = vsel %vm682_vm0, %v12400_v0, 0.0 }
 0xac8   : > { %v12443_v62 = vsel %vm682_vm0, %v12397_v2, 0.0  ;;  %v12416_v2 = vmul.f32 %v22138_v4, %v22100_v41 }
 0xaca   : > { %12243 = vadd.xlane.f32.xlu0 %v12242_v36  ;;  %12234 = vadd.xlane.f32.xlu1 %v12233_v56  ;;  %v12399_v36 = vmul.f32 %v22138_v4, %v21998_v60  ;;  %v12458_v56 = vsel %vm682_vm0, %v12402_v29, 0.0 }
 0xacc   : > { %v12449_v25 = vsel %vm682_vm0, %v12399_v36, 0.0  ;;  %v12418_v36 = vmul.f32 %v22138_v4, %v22114_v17 }
 0xace   : > { %12249 = vadd.xlane.f32.xlu0 %v12248_v18  ;;  %12240 = vadd.xlane.f32.xlu1 %v12239_v34  ;;  %v12401_v18 = vmul.f32 %v22138_v4, %v22012_v54  ;;  %v12464_v34 = vsel %vm682_vm0, %v12404_v1, 0.0 }
 0xad0   : > { %v12455_v58 = vsel %vm682_vm0, %v12401_v18, 0.0  ;;  %v12420_v18 = vmul.f32 %v22138_v4, %v22129_v51  ;;  %v22292_v51 = vstv %s12119_s23  ;;  %s22707_s23 = scalar_lea.hbm %s22774_s18, %s14032_s24 }
 0xad2   : > { %12423 = vadd.xlane.f32.xlu0 %v12422_v16  ;;  %12246 = vadd.xlane.f32.xlu1 %v12245_v57  ;;  %v12403_v16 = vmul.f32 %v22138_v4, %v22026_v11  ;;  %v12470_v57 = vsel %vm682_vm0, %v12406_v9, 0.0 }
 0xad4   : > { %v12461_v20 = vsel %vm682_vm0, %v12403_v16, 0.0  ;;  %v12419_v16 = vmul.f32 %v22138_v4, %v22142_v7 }
 0xad6   : > { %12429 = vadd.xlane.f32.xlu0 %v12428_v33  ;;  %12252 = vadd.xlane.f32.xlu1 %v12251_v39  ;;  %v12405_v33 = vmul.f32 %v22138_v4, %v22040_v6  ;;  %v12476_v39 = vsel %vm682_vm0, %v12408_v22, 0.0 }
 0xad8   : > { %v12467_v48 = vsel %vm682_vm0, %v12405_v33, 0.0 }
 0xada   : > { %12435 = vadd.xlane.f32.xlu0 %v12434_v45  ;;  %12426 = vadd.xlane.f32.xlu1 %v12425_v50  ;;  %v12407_v45 = vmul.f32 %v22138_v4, %v22054_v13  ;;  %v12482_v50 = vsel %vm682_vm0, %v12410_v30, 0.0 }
 0xadc   : > { %v12473_v59 = vsel %vm682_vm0, %v12407_v45, 0.0 }
 0xade   : > { %12441 = vadd.xlane.f32.xlu0 %v12440_v53  ;;  %12432 = vadd.xlane.f32.xlu1 %v12431_v43  ;;  %v12409_v53 = vmul.f32 %v22138_v4, %v22068_v15  ;;  %v12488_v43 = vsel %vm682_vm0, %v12412_v37, 0.0 }
 0xae0   : > { %v12479_v40 = vsel %vm682_vm0, %v12409_v53, 0.0 }
 0xae2   : > { %12447 = vadd.xlane.f32.xlu0 %v12446_v42  ;;  %12438 = vadd.xlane.f32.xlu1 %v12437_v27  ;;  %v12411_v42 = vmul.f32 %v22138_v4, %v22082_v24  ;;  %v12494_v27 = vsel %vm682_vm0, %v12414_v61, 0.0 }
 0xae4   : > { %v12485_v0 = vsel %vm682_vm0, %v12411_v42, 0.0 }
 0xae6   : > { %12453 = vadd.xlane.f32.xlu0 %v12452_v31  ;;  %12444 = vadd.xlane.f32.xlu1 %v12443_v62  ;;  %v12413_v31 = vmul.f32 %v22138_v4, %v22096_v35  ;;  %v12500_v62 = vsel %vm682_vm0, %v12416_v2, 0.0 }
 0xae8   : > { %v12491_v29 = vsel %vm682_vm0, %v12413_v31, 0.0 }
 0xaea   : > { %12459 = vadd.xlane.f32.xlu0 %v12458_v56  ;;  %12450 = vadd.xlane.f32.xlu1 %v12449_v25  ;;  %v12415_v56 = vmul.f32 %v22138_v4, %v22110_v19  ;;  %v12506_v25 = vsel %vm682_vm0, %v12418_v36, 0.0 }
 0xaec   : > { %v12497_v1 = vsel %vm682_vm0, %v12415_v56, 0.0 }
 0xaee   : > { %12465 = vadd.xlane.f32.xlu0 %v12464_v34  ;;  %12456 = vadd.xlane.f32.xlu1 %v12455_v58  ;;  %v12417_v34 = vmul.f32 %v22138_v4, %v22125_v21  ;;  %v12512_v58 = vsel %vm682_vm0, %v12420_v18, 0.0 }
 0xaf0   : > { %v12503_v9 = vsel %vm682_vm0, %v12417_v34, 0.0 }
 0xaf2   : > { %12471 = vadd.xlane.f32.xlu0 %v12470_v57  ;;  %12462 = vadd.xlane.f32.xlu1 %v12461_v20  ;;  %v12509_v57 = vsel %vm682_vm0, %v12419_v16, 0.0  ;;  %v12421_v20 = vmul.f32 %v22138_v4, %v21948_v47 }
 0xaf4   : > { %v12515_v22 = vsel %vm682_vm0, %v12421_v20, 0.0 }
 0xaf6   : > { %12477 = vadd.xlane.f32.xlu0 %v12476_v39  ;;  %12468 = vadd.xlane.f32.xlu1 %v12467_v48 }
 0xafa   : > { %12483 = vadd.xlane.f32.xlu0 %v12482_v50  ;;  %12474 = vadd.xlane.f32.xlu1 %v12473_v59 }
 0xafe   : > { %12489 = vadd.xlane.f32.xlu0 %v12488_v43  ;;  %12480 = vadd.xlane.f32.xlu1 %v12479_v40 }
 0xb02   : > { %12495 = vadd.xlane.f32.xlu0 %v12494_v27  ;;  %12486 = vadd.xlane.f32.xlu1 %v12485_v0 }
 0xb06   : > { %12501 = vadd.xlane.f32.xlu0 %v12500_v62  ;;  %12492 = vadd.xlane.f32.xlu1 %v12491_v29  ;;  %v22266_v62 = vstv %s12254_s25 }
 0xb0a   : > { %12507 = vadd.xlane.f32.xlu0 %v12506_v25  ;;  %12498 = vadd.xlane.f32.xlu1 %v12497_v1 }
 0xb0e   : > { %12513 = vadd.xlane.f32.xlu0 %v12512_v58  ;;  %12504 = vadd.xlane.f32.xlu1 %v12503_v9 }
 0xb12   : > { %12510 = vadd.xlane.f32.xlu1 %v12509_v57 }
 0xb16   : > { %12516 = vadd.xlane.f32.xlu1 %v12515_v22 }
 0xb23   : > { %v12166_v33 = vpop.xlane.xlu0 %12165  ;;  %v12160_v39 = vpop.xlane.xlu1 %12159 }
 0xb24   : > { %v12258_v29 = vadd.f32 %v22266_v62, %v12166_v33  ;;  %v12256_v25 = vadd.f32 %v22266_v62, %v12160_v39  ;;  %v22284_v33 = vstv %s12320_s29 }
 0xb26   : > { %v12290_v16 = vmax.f32 %v12258_v29, 0.0  ;;  %v12288_v39 = vmax.f32 %v12256_v25, 0.0 }
 0xb27   : > { %v12172_v48 = vpop.xlane.xlu0 %12171  ;;  %v12163_v30 = vpop.xlane.xlu1 %12162 }
 0xb28   : > { %v12260_v1 = vadd.f32 %v22266_v62, %v12172_v48  ;;  %v12257_v18 = vadd.f32 %v22266_v62, %v12163_v30  ;;  %v12322_v19 = vmul.f32 %v22284_v33, %v12288_v39 }
 0xb2a   : > { %v12292_v48 = vmax.f32 %v12260_v1, 0.0  ;;  %v12289_v30 = vmax.f32 %v12257_v18, 0.0 }
 0xb2b   : > { %v12178_v45 = vpop.xlane.xlu0 %12177  ;;  %v12169_v50 = vpop.xlane.xlu1 %12168 }
 0xb2c   : > { %v12262_v34 = vadd.f32 %v22266_v62, %v12178_v45  ;;  %v12259_v58 = vadd.f32 %v22266_v62, %v12169_v50  ;;  %v12324_v50 = vmul.f32 %v22284_v33, %v12290_v16  ;;  %v12326_v25 = vmul.f32 %v22284_v33, %v12292_v48 }
 0xb2d   : > { %v12323_v1 = vmul.f32 %v22284_v33, %v12289_v30  ;;  %v22302_v16 = vstv %s13992_s0  ;;  %s17565_s0 = smov [#allocation12]  }
 0xb2e   : > { %v12294_v47 = vmax.f32 %v12262_v34, 0.0  ;;  %v12291_v45 = vmax.f32 %v12259_v58, 0.0  ;;  %v22307_v39 = vadd.f32 %v12324_v50, %v22292_v51 }
 0xb2f   : > { %v12184_v59 = vpop.xlane.xlu0 %12183  ;;  %v12175_v37 = vpop.xlane.xlu1 %12174  ;;  %v22320_v50 = vadd.f32 %v12323_v1, %v22292_v51 }
 0xb30   : > { %v12264_v9 = vadd.f32 %v22266_v62, %v12184_v59  ;;  %v12261_v57 = vadd.f32 %v22266_v62, %v12175_v37  ;;  %v12328_v18 = vmul.f32 %v22284_v33, %v12294_v47 }
 0xb32   : > { %v12296_v7 = vmax.f32 %v12264_v9, 0.0  ;;  %v12293_v59 = vmax.f32 %v12261_v57, 0.0  ;;  %v22304_v57 = vstv %s13993_s1  ;;  %s17492_s1 = sshll.u32 %s17565_s0, 4  ;;  %s17493_s1 = int_to_ptr.vmem [resolvable:$false] %s17492_s1 }
 0xb33   : > { %v12190_v53 = vpop.xlane.xlu0 %12189  ;;  %v12181_v43 = vpop.xlane.xlu1 %12180  ;;  %s17494_s19 = scalar_lea.vmem %s17493_s1, 8192  ;;  %p17495_p9 = scmp.lt.s32.totalorder %s22709_s26, %s17493_s1 }
 0xb34   : > { %v12266_v21 = vadd.f32 %v22266_v62, %v12190_v53  ;;  %v12263_v34 = vadd.f32 %v22266_v62, %v12181_v43  ;;  %v12325_v53 = vmul.f32 %v22284_v33, %v12291_v45  ;;  %v12330_v9 = vmul.f32 %v22284_v33, %v12296_v7 }
 0xb35   : > { %v12327_v48 = vmul.f32 %v22284_v33, %v12293_v59  ;;  %v22315_v45 = vadd.f32 %v12326_v25, %v22292_v51  ;;  %v22323_v59 = vadd.f32 %v12328_v18, %v22292_v51 }
 0xb36   : > { %v12298_v30 = vmax.f32 %v12266_v21, 0.0  ;;  %v12295_v21 = vmax.f32 %v12263_v34, 0.0  ;;  %v22326_v41 = vadd.f32 %v12325_v53, %v22292_v51 }
 0xb37   : > { %v12196_v40 = vpop.xlane.xlu0 %12195  ;;  %v12187_v61 = vpop.xlane.xlu1 %12186 }
 0xb38   : > { %v12268_v58 = vadd.f32 %v22266_v62, %v12196_v40  ;;  %v12265_v47 = vadd.f32 %v22266_v62, %v12187_v61  ;;  %v22312_v40 = vadd.f32 %v12322_v19, %v22292_v51  ;;  %v22329_v19 = vadd.f32 %v12330_v9, %v22292_v51 }
 0xb3a   : > { %v12300_v61 = vmax.f32 %v12268_v58, 0.0  ;;  %v12297_v1 = vmax.f32 %v12265_v47, 0.0 }
 0xb3b   : > { %v22254_v42 = vpop.xlane.xlu0 %12201  ;;  %v22256_v27 = vpop.xlane.xlu1 %12192 }
 0xb3c   : > { %v12270_v18 = vadd.f32 %v22266_v62, %v22254_v42 }
 0xb3f   : > { %v22258_v4 = vpop.xlane.xlu0 %12207  ;;  %v22260_v0 = vpop.xlane.xlu1 %12198 }
 0xb40   : > { %v12272_v42 = vadd.f32 %v22266_v62, %v22258_v4 }
 0xb43   : > { %v22262_v2 = vpop.xlane.xlu0 %12213  ;;  %v22264_v31 = vpop.xlane.xlu1 %12204 }
 0xb47   : > { %v22269_v36 = vpop.xlane.xlu0 %12219  ;;  %v22271_v56 = vpop.xlane.xlu1 %12210 }
 0xb4b   : > { %v22280_v20 = vpop.xlane.xlu0 %12225  ;;  %v22282_v22 = vpop.xlane.xlu1 %12216 }
 0xb4f   : > { %v22288_v29 = vpop.xlane.xlu0 %12231  ;;  %v22290_v37 = vpop.xlane.xlu1 %12222 }
 0xb53   : > { %v12238_v17 = vpop.xlane.xlu0 %12237  ;;  %v12229_v43 = vpop.xlane.xlu1 %12228 }
 0xb54   : > { %v12282_v7 = vadd.f32 %v22266_v62, %v12238_v17  ;;  %v12279_v35 = vadd.f32 %v22266_v62, %v12229_v43  ;;  %v22332_v17 = vadd.f32 %v12327_v48, %v22292_v51  ;;  %v12332_v43 = vmul.f32 %v22284_v33, %v12298_v30 }
 0xb55   : > { %v12334_v48 = vmul.f32 %v22284_v33, %v12300_v61  ;;  %v12267_v30 = vadd.f32 %v22266_v62, %v22256_v27  ;;  %v12302_v61 = vmax.f32 %v12270_v18, 0.0  ;;  %v12269_v27 = vadd.f32 %v22266_v62, %v22260_v0 }
 0xb56   : > { %v12314_v25 = vmax.f32 %v12282_v7, 0.0  ;;  %v12311_v24 = vmax.f32 %v12279_v35, 0.0  ;;  %v12329_v35 = vmul.f32 %v22284_v33, %v12295_v21  ;;  %v12331_v21 = vmul.f32 %v22284_v33, %v12297_v1 }
 0xb57   : > { %v12244_v44 = vpop.xlane.xlu0 %12243  ;;  %v12235_v34 = vpop.xlane.xlu1 %12234  ;;  %v12299_v1 = vmax.f32 %v12267_v30, 0.0  ;;  %v12304_v18 = vmax.f32 %v12272_v42, 0.0 }
 0xb58   : > { %v12348_v58 = vmul.f32 %v22284_v33, %v12314_v25  ;;  %v12345_v53 = vmul.f32 %v22284_v33, %v12311_v24  ;;  %v12284_v9 = vadd.f32 %v22266_v62, %v12244_v44  ;;  %v12281_v7 = vadd.f32 %v22266_v62, %v12235_v34 }
 0xb59   : > { %v22354_v34 = vadd.f32 %v12332_v43, %v22292_v51  ;;  %v22367_v43 = vadd.f32 %v12334_v48, %v22292_v51  ;;  %v12274_v48 = vadd.f32 %v22266_v62, %v22262_v2  ;;  %v12276_v2 = vadd.f32 %v22266_v62, %v22269_v36 }
 0xb5a   : > { %v22348_v47 = vadd.f32 %v12348_v58, %v22292_v51  ;;  %v22351_v25 = vadd.f32 %v12345_v53, %v22292_v51  ;;  %v12316_v24 = vmax.f32 %v12284_v9, 0.0  ;;  %v12313_v44 = vmax.f32 %v12281_v7, 0.0 }
 0xb5b   : > { %v12250_v15 = vpop.xlane.xlu0 %12249  ;;  %v12241_v26 = vpop.xlane.xlu1 %12240  ;;  %v22364_v7 = vadd.f32 %v12329_v35, %v22292_v51  ;;  %v12301_v35 = vmax.f32 %v12269_v27, 0.0 }
 0xb5c   : > { %v12350_v4 = vmul.f32 %v22284_v33, %v12316_v24  ;;  %v12347_v58 = vmul.f32 %v22284_v33, %v12313_v44  ;;  %v12286_v53 = vadd.f32 %v22266_v62, %v12250_v15  ;;  %v12283_v9 = vadd.f32 %v22266_v62, %v12241_v26 }
 0xb5d   : > { %v22376_v15 = vadd.f32 %v12331_v21, %v22292_v51  ;;  %v12336_v26 = vmul.f32 %v22284_v33, %v12302_v61  ;;  %v12338_v21 = vmul.f32 %v22284_v33, %v12304_v18  ;;  %v12271_v61 = vadd.f32 %v22266_v62, %v22264_v31 }
 0xb5e   : > { %v22370_v0 = vadd.f32 %v12350_v4, %v22292_v51  ;;  %v22373_v13 = vadd.f32 %v12347_v58, %v22292_v51  ;;  %v12318_v24 = vmax.f32 %v12286_v53, 0.0  ;;  %v12315_v44 = vmax.f32 %v12283_v9, 0.0 }
 0xb5f   : > { %v12424_v10 = vpop.xlane.xlu0 %12423  ;;  %v12247_v30 = vpop.xlane.xlu1 %12246  ;;  %v12333_v9 = vmul.f32 %v22284_v33, %v12299_v1  ;;  %v12335_v1 = vmul.f32 %v22284_v33, %v12301_v35  ;;  %v12306_v18 = vmax.f32 %v12274_v48, 0.0  ;;  %v12273_v31 = vadd.f32 %v22266_v62, %v22271_v56 }
 0xb60   : > { %23370 = vst [vmem:[#allocation69_spill] sm:$0xff] %v22370_v0  ;;  %23371 = vst [vmem:[#allocation19_spill] sm:$0xff] %v22373_v13  ;;  %v12352_v42 = vmul.f32 %v22284_v33, %v12318_v24  ;;  %v12349_v4 = vmul.f32 %v22284_v33, %v12315_v44  ;;  %v12520_v58 = vadd.f32 %v22302_v16, %v12424_v10  ;;  %v12303_v35 = vmax.f32 %v12271_v61, 0.0 }
 0xb61   : > { %v12285_v53 = vadd.f32 %v22266_v62, %v12247_v30  ;;  %v22398_v30 = vadd.f32 %v12336_v26, %v22292_v51  ;;  %v22411_v26 = vadd.f32 %v12338_v21, %v22292_v51  ;;  %v12308_v48 = vmax.f32 %v12276_v2, 0.0 }
 0xb62   : > { %v22392_v27 = vadd.f32 %v12352_v42, %v22292_v51  ;;  %v22395_v24 = vadd.f32 %v12349_v4, %v22292_v51  ;;  %v12552_v44 = vmax.f32 %v12520_v58, 0.0 }
 0xb63   : > { %v12317_v10 = vmax.f32 %v12285_v53, 0.0  ;;  %v12430_v13 = vpop.xlane.xlu0 %12429  ;;  %v12253_v0 = vpop.xlane.xlu1 %12252  ;;  %v22408_v53 = vadd.f32 %v12333_v9, %v22292_v51  ;;  %v12278_v9 = vadd.f32 %v22266_v62, %v22280_v20 }
 0xb64   : > { %23372 = vst [vmem:[#allocation49_spill] sm:$0xff] %v22392_v27  ;;  %23373 = vst [vmem:[#allocation61_spill] sm:$0xff] %v22395_v24  ;;  %v12586_v36 = vmul.f32 %v22304_v57, %v12552_v44  ;;  %v12522_v4 = vadd.f32 %v22302_v16, %v12430_v13  ;;  %v12287_v58 = vadd.f32 %v22266_v62, %v12253_v0  ;;  %v12305_v0 = vmax.f32 %v12273_v31, 0.0 }
 0xb65   : > { %v12351_v42 = vmul.f32 %v22284_v33, %v12317_v10  ;;  %v22418_v10 = vadd.f32 %v12335_v1, %v22292_v51  ;;  %v12340_v13 = vmul.f32 %v22284_v33, %v12306_v18  ;;  %v12342_v1 = vmul.f32 %v22284_v33, %v12308_v48 }
 0xb66   : > { %v12618_v56 = vadd.f32 %v12586_v36, %v22312_v40  ;;  %v12554_v44 = vmax.f32 %v12522_v4, 0.0  ;;  %v12319_v27 = vmax.f32 %v12287_v58, 0.0  ;;  %v12275_v18 = vadd.f32 %v22266_v62, %v22282_v22 }
 0xb67   : > { %v22415_v24 = vadd.f32 %v12351_v42, %v22292_v51  ;;  %v12436_v21 = vpop.xlane.xlu0 %12435  ;;  %v12427_v6 = vpop.xlane.xlu1 %12426  ;;  %v12337_v42 = vmul.f32 %v22284_v33, %v12303_v35  ;;  %v12310_v35 = vmax.f32 %v12278_v9, 0.0 }
 0xb68   : > { %v13994_v61 = vmul.f32 -1.442695, %v12618_v56  ;;  %v12588_v2 = vmul.f32 %v22304_v57, %v12554_v44  ;;  %v12353_v40 = vmul.f32 %v22284_v33, %v12319_v27  ;;  %v12524_v36 = vadd.f32 %v22302_v16, %v12436_v21 }
 0xb69   : > { %23374 = vst [vmem:[#allocation38_spill] sm:$0xff] %v22415_v24  ;;  %v12521_v31 = vadd.f32 %v22302_v16, %v12427_v6  ;;  %v22436_v27 = vadd.f32 %v12340_v13, %v22292_v51  ;;  %v12339_v56 = vmul.f32 %v22284_v33, %v12305_v0  ;;  %v12307_v13 = vmax.f32 %v12275_v18, 0.0 }
 0xb6a   : > { %17315 = vpow2.f32 %v13994_v61  ;;  %v12620_v20 = vadd.f32 %v12588_v2, %v22307_v39  ;;  %v22433_v4 = vadd.f32 %v12353_v40, %v22292_v51  ;;  %v12556_v58 = vmax.f32 %v12524_v36, 0.0 }
 0xb6b   : > { %v12553_v44 = vmax.f32 %v12521_v31, 0.0  ;;  %v12442_v48 = vpop.xlane.xlu0 %12441  ;;  %v12433_v21 = vpop.xlane.xlu1 %12432  ;;  %v22443_v61 = vadd.f32 %v12337_v42, %v22292_v51  ;;  %v22446_v2 = vadd.f32 %v12342_v1, %v22292_v51  ;;  %v22451_v31 = vadd.f32 %v12339_v56, %v22292_v51 }
 0xb6c   : > { %v13996_v24 = vmul.f32 -1.442695, %v12620_v20  ;;  %v12590_v22 = vmul.f32 %v22304_v57, %v12556_v58  ;;  %v12526_v6 = vadd.f32 %v22302_v16, %v12442_v48  ;;  %v12523_v39 = vadd.f32 %v22302_v16, %v12433_v21 }
 0xb6d   : > { %v12587_v0 = vmul.f32 %v22304_v57, %v12553_v44  ;;  %v12344_v20 = vmul.f32 %v22284_v33, %v12310_v35  ;;  %v12280_v42 = vadd.f32 %v22266_v62, %v22288_v29  ;;  %v12341_v21 = vmul.f32 %v22284_v33, %v12307_v13 }
 0xb6e   : > { %17317 = vpow2.f32 %v13996_v24  ;;  %v12622_v9 = vadd.f32 %v12590_v22, %v22315_v45  ;;  %v12558_v40 = vmax.f32 %v12526_v6, 0.0  ;;  %v12555_v36 = vmax.f32 %v12523_v39, 0.0 }
 0xb6f   : > { %v12619_v58 = vadd.f32 %v12587_v0, %v22320_v50  ;;  %v12448_v1 = vpop.xlane.xlu0 %12447  ;;  %v12439_v48 = vpop.xlane.xlu1 %12438  ;;  %v12277_v56 = vadd.f32 %v22266_v62, %v22290_v37  ;;  %v22467_v39 = vadd.f32 %v12344_v20, %v22292_v51  ;;  %v12312_v0 = vmax.f32 %v12280_v42, 0.0 }
 0xb70   : > { %v13998_v18 = vmul.f32 -1.442695, %v12622_v9  ;;  %v12592_v44 = vmul.f32 %v22304_v57, %v12558_v40  ;;  %v12589_v24 = vmul.f32 %v22304_v57, %v12555_v36  ;;  %v12528_v45 = vadd.f32 %v22302_v16, %v12448_v1 }
 0xb71   : > { %v13995_v35 = vmul.f32 -1.442695, %v12619_v58  ;;  %v12525_v22 = vadd.f32 %v22302_v16, %v12439_v48  ;;  %v12309_v42 = vmax.f32 %v12277_v56, 0.0 }
 0xb72   : > { %17319 = vpow2.f32 %v13998_v18  ;;  %v12624_v29 = vadd.f32 %v12592_v44, %v22323_v59  ;;  %v12621_v50 = vadd.f32 %v12589_v24, %v22326_v41  ;;  %v12560_v6 = vmax.f32 %v12528_v45, 0.0 }
 0xb73   : > { %17321 = vpow2.f32 %v13995_v35  ;;  %v12557_v9 = vmax.f32 %v12525_v22, 0.0  ;;  %v12454_v40 = vpop.xlane.xlu0 %12453  ;;  %v12445_v13 = vpop.xlane.xlu1 %12444  ;;  %v22472_v59 = vadd.f32 %v12341_v21, %v22292_v51  ;;  %v12346_v24 = vmul.f32 %v22284_v33, %v12312_v0 }
 0xb74   : > { %v17316_v36 = vpop.eup %17315  ;;  %v14000_v1 = vmul.f32 -1.442695, %v12624_v29  ;;  %v13997_v62 = vmul.f32 -1.442695, %v12621_v50  ;;  %v12594_v37 = vmul.f32 %v22304_v57, %v12560_v6  ;;  %v12530_v58 = vadd.f32 %v22302_v16, %v12454_v40 }
 0xb75   : > { %v12746_v41 = vadd.f32 1.0, %v17316_v36  ;;  %v12591_v48 = vmul.f32 %v22304_v57, %v12557_v9  ;;  %v12527_v20 = vadd.f32 %v22302_v16, %v12445_v13  ;;  %v12343_v0 = vmul.f32 %v22284_v33, %v12309_v42 }
 0xb76   : > { %17323 = vpow2.f32 %v14000_v1  ;;  %v12626_v18 = vadd.f32 %v12594_v37, %v22329_v19  ;;  %v12562_v44 = vmax.f32 %v12530_v58, 0.0  ;;  %v22486_v1 = vadd.f32 %v12346_v24, %v22292_v51 }
 0xb77   : > { %17325 = vrcp.f32 %v12746_v41  ;;  %v12623_v45 = vadd.f32 %v12591_v48, %v22332_v17  ;;  %v12559_v35 = vmax.f32 %v12527_v20, 0.0  ;;  %v12460_v22 = vpop.xlane.xlu0 %12459  ;;  %v12451_v29 = vpop.xlane.xlu1 %12450 }
 0xb78   : > { %v17318_v21 = vpop.eup %17317  ;;  %17327 = vpow2.f32 %v13997_v62  ;;  %v14002_v50 = vmul.f32 -1.442695, %v12626_v18  ;;  %v12596_v6 = vmul.f32 %v22304_v57, %v12562_v44  ;;  %v12532_v9 = vadd.f32 %v22302_v16, %v12460_v22 }
 0xb79   : > { %v12748_v56 = vadd.f32 1.0, %v17318_v21  ;;  %v13999_v40 = vmul.f32 -1.442695, %v12623_v45  ;;  %v12593_v19 = vmul.f32 %v22304_v57, %v12559_v35  ;;  %v12529_v13 = vadd.f32 %v22302_v16, %v12451_v29 }
 0xb7a   : > { %17329 = vpow2.f32 %v14002_v50  ;;  %v12628_v17 = vadd.f32 %v12596_v6, %v22354_v34  ;;  %v12564_v36 = vmax.f32 %v12532_v9, 0.0  ;;  %v22495_v29 = vadd.f32 %v12343_v0, %v22292_v51 }
 0xb7b   : > { %17331 = vrcp.f32 %v12748_v56  ;;  %v12625_v62 = vadd.f32 %v12593_v19, %v22364_v7  ;;  %v12561_v37 = vmax.f32 %v12529_v13, 0.0  ;;  %v12466_v58 = vpop.xlane.xlu0 %12465  ;;  %v12457_v41 = vpop.xlane.xlu1 %12456 }
 0xb7c   : > { %v17320_v48 = vpop.eup %17319  ;;  %17333 = vpow2.f32 %v13999_v40  ;;  %v14004_v20 = vmul.f32 -1.442695, %v12628_v17  ;;  %v12598_v18 = vmul.f32 %v22304_v57, %v12564_v36  ;;  %v12534_v33 = vadd.f32 %v22302_v16, %v12466_v58  ;;  %v12874_v17 = vld [vmem:[%s17932_s30] sm:$0xff] }
 0xb7d   : > { %v17322_v42 = vpop.eup %17321  ;;  %v12750_v34 = vadd.f32 1.0, %v17320_v48  ;;  %v14001_v44 = vmul.f32 -1.442695, %v12625_v62  ;;  %v12595_v24 = vmul.f32 %v22304_v57, %v12561_v37  ;;  %v12531_v45 = vadd.f32 %v22302_v16, %v12457_v41 }
 0xb7e   : > { %v12747_v35 = vadd.f32 1.0, %v17322_v42  ;;  %17335 = vpow2.f32 %v14004_v20  ;;  %v12630_v7 = vadd.f32 %v12598_v18, %v22367_v43  ;;  %v12566_v22 = vmax.f32 %v12534_v33, 0.0 }
 0xb7f   : > { %17337 = vrcp.f32 %v12750_v34  ;;  %v12627_v21 = vadd.f32 %v12595_v24, %v22376_v15  ;;  %v12563_v50 = vmax.f32 %v12531_v45, 0.0  ;;  %v12472_v6 = vpop.xlane.xlu0 %12471  ;;  %v12463_v9 = vpop.xlane.xlu1 %12462  ;;  %v12876_v45 = vld [vmem:[%s17932_s30 + $0x10] sm:$0xff] }
 0xb80   : > { %v17324_v56 = vpop.eup %17323  ;;  %17339 = vrcp.f32 %v12747_v35  ;;  %v14006_v40 = vmul.f32 -1.442695, %v12630_v7  ;;  %v12600_v19 = vmul.f32 %v22304_v57, %v12566_v22  ;;  %v12536_v13 = vadd.f32 %v22302_v16, %v12472_v6 }
 0xb81   : > { %v17326_v43 = vpop.eup %17325  ;;  %v12752_v36 = vadd.f32 1.0, %v17324_v56  ;;  %17341 = vpow2.f32 %v14001_v44  ;;  %v14003_v51 = vmul.f32 -1.442695, %v12627_v21  ;;  %v12597_v0 = vmul.f32 %v22304_v57, %v12563_v50 }
 0xb82   : > { %v17328_v62 = vpop.eup %17327  ;;  %v12842_v15 = vmul.f32 %v17326_v43, %v21933_v52  ;;  %17343 = vpow2.f32 %v14006_v40  ;;  %v12632_v37 = vadd.f32 %v12600_v19, %v22398_v30  ;;  %v12568_v58 = vmax.f32 %v12536_v13, 0.0 }
 0xb83   : > { %17345 = vrcp.f32 %v12752_v36  ;;  %v12749_v41 = vadd.f32 1.0, %v17328_v62  ;;  %v12629_v48 = vadd.f32 %v12597_v0, %v22408_v53  ;;  %v12533_v20 = vadd.f32 %v22302_v16, %v12463_v9  ;;  %v12478_v18 = vpop.xlane.xlu0 %12477  ;;  %v12469_v33 = vpop.xlane.xlu1 %12468  ;;  %v12878_v36 = vld [vmem:[%s17932_s30 + $0x20] sm:$0xff] }
 0xb84   : > { %v17330_v42 = vpop.eup %17329  ;;  %v12906_v34 = vadd.f32 %v12874_v17, %v12842_v15  ;;  %17347 = vpow2.f32 %v14003_v51  ;;  %v14008_v44 = vmul.f32 -1.442695, %v12632_v37  ;;  %v12602_v24 = vmul.f32 %v22304_v57, %v12568_v58 }
 0xb85   : > { %v17332_v52 = vpop.eup %17331  ;;  %17349 = vrcp.f32 %v12749_v41  ;;  %v12754_v30 = vadd.f32 1.0, %v17330_v42  ;;  %v14005_v35 = vmul.f32 -1.442695, %v12629_v48  ;;  %v12565_v7 = vmax.f32 %v12533_v20, 0.0  ;;  %v12875_v41 = vld [vmem:[%s17932_s30 + $0x8] sm:$0xff] }
 0xb86   : > { %v17334_v22 = vpop.eup %17333  ;;  %v12938_v21 = vmax.f32 %v12906_v34, 0.0  ;;  %v12844_v53 = vmul.f32 %v17332_v52, %v21937_v63  ;;  %17351 = vpow2.f32 %v14008_v44  ;;  %v12634_v50 = vadd.f32 %v12602_v24, %v22411_v26 }
 0xb87   : > { %17353 = vrcp.f32 %v12754_v30  ;;  %v12751_v6 = vadd.f32 1.0, %v17334_v22  ;;  %v12599_v9 = vmul.f32 %v22304_v57, %v12565_v7  ;;  %v12538_v56 = vadd.f32 %v22302_v16, %v12478_v18  ;;  %v12484_v40 = vpop.xlane.xlu0 %12483  ;;  %v12475_v19 = vpop.xlane.xlu1 %12474 }
 0xb88   : > { %v17336_v13 = vpop.eup %17335  ;;  %12970 = vst.msk [vmem:[%s22518_s13] sm:$0xff] %vm682_vm0, %v12938_v21  ;;  %v12908_v63 = vadd.f32 %v12876_v45, %v12844_v53  ;;  %17355 = vpow2.f32 %v14005_v35  ;;  %v14010_v43 = vmul.f32 -1.442695, %v12634_v50  ;;  %v12535_v26 = vadd.f32 %v22302_v16, %v12469_v33  ;;  %v12880_v35 = vld [vmem:[%s17932_s30 + $0x30] sm:$0xff] }
 0xb89   : > { %v17338_v17 = vpop.eup %17337  ;;  %17357 = vrcp.f32 %v12751_v6  ;;  %v12756_v51 = vadd.f32 1.0, %v17336_v13  ;;  %v12631_v0 = vadd.f32 %v12599_v9, %v22418_v10  ;;  %v12570_v62 = vmax.f32 %v12538_v56, 0.0 }
 0xb8a   : > { %v17340_v15 = vpop.eup %17339  ;;  %v12940_v37 = vmax.f32 %v12908_v63, 0.0  ;;  %v12846_v58 = vmul.f32 %v17338_v17, %v21945_v49  ;;  %17359 = vpow2.f32 %v14010_v43  ;;  %v12567_v48 = vmax.f32 %v12535_v26, 0.0 }
 0xb8b   : > { %v17342_v20 = vpop.eup %17341  ;;  %v12843_v18 = vmul.f32 %v17340_v15, %v21941_v32  ;;  %17361 = vrcp.f32 %v12756_v51  ;;  %v14007_v33 = vmul.f32 -1.442695, %v12631_v0  ;;  %v12604_v42 = vmul.f32 %v22304_v57, %v12570_v62  ;;  %v22529_v34 = vpop.xlane.xlu1 %12480 }
 0xb8c   : > { %v17344_v44 = vpop.eup %17343  ;;  %12972 = vst.msk [vmem:[%s22518_s13 + $0x10] sm:$0xff] %vm682_vm0, %v12940_v37  ;;  %v12910_v10 = vadd.f32 %v12878_v36, %v12846_v58  ;;  %v12753_v24 = vadd.f32 1.0, %v17342_v20  ;;  %v12601_v49 = vmul.f32 %v22304_v57, %v12567_v48  ;;  %v12540_v52 = vadd.f32 %v22302_v16, %v12484_v40  ;;  %v12490_v22 = vpop.xlane.xlu0 %12489  ;;  %v12877_v40 = vld [vmem:[%s17932_s30 + $0x18] sm:$0xff]  ;;  %v12879_v20 = vld [vmem:[%s17932_s30 + $0x28] sm:$0xff] }
 0xb8d   : > { %v17346_v45 = vpop.eup %17345  ;;  %v12907_v30 = vadd.f32 %v12875_v41, %v12843_v18  ;;  %v12758_v32 = vadd.f32 1.0, %v17344_v44  ;;  %17363 = vpow2.f32 %v14007_v33  ;;  %v12636_v7 = vadd.f32 %v12604_v42, %v22436_v27 }
 0xb8e   : > { %v17348_v21 = vpop.eup %17347  ;;  %v12942_v53 = vmax.f32 %v12910_v10, 0.0  ;;  %v12848_v50 = vmul.f32 %v17346_v45, %v21960_v14  ;;  %17365 = vrcp.f32 %v12753_v24  ;;  %v12633_v6 = vadd.f32 %v12601_v49, %v22443_v61  ;;  %v12882_v61 = vld [vmem:[%s17932_s30 + $0x40] sm:$0xff] }
 0xb8f   : > { %v17350_v9 = vpop.eup %17349  ;;  %v12939_v56 = vmax.f32 %v12907_v30, 0.0  ;;  %17367 = vrcp.f32 %v12758_v32  ;;  %v12755_v13 = vadd.f32 1.0, %v17348_v21  ;;  %v14012_v63 = vmul.f32 -1.442695, %v12636_v7  ;;  %v22543_v36 = vpop.xlane.xlu1 %12486 }
 0xb90   : > { %v17352_v43 = vpop.eup %17351  ;;  %12974 = vst.msk [vmem:[%s22518_s13 + $0x20] sm:$0xff] %vm682_vm0, %v12942_v53  ;;  %v12912_v27 = vadd.f32 %v12880_v35, %v12848_v50  ;;  %v12845_v26 = vmul.f32 %v17350_v9, %v21956_v28  ;;  %v14009_v17 = vmul.f32 -1.442695, %v12633_v6  ;;  %v12572_v14 = vmax.f32 %v12540_v52, 0.0  ;;  %v12496_v44 = vpop.xlane.xlu0 %12495  ;;  %v12884_v52 = vld [vmem:[%s17932_s30 + $0x50] sm:$0xff] }
 0xb91   : > { %v17354_v51 = vpop.eup %17353  ;;  %12971 = vst.msk [vmem:[%s22518_s13 + $0x8] sm:$0xff] %vm682_vm0, %v12939_v56  ;;  %17369 = vrcp.f32 %v12755_v13  ;;  %v12760_v0 = vadd.f32 1.0, %v17352_v43  ;;  %v12537_v62 = vadd.f32 %v22302_v16, %v12475_v19  ;;  %v12542_v15 = vadd.f32 %v22302_v16, %v12490_v22  ;;  %v12881_v13 = vld [vmem:[%s17932_s30 + $0x38] sm:$0xff] }
 0xb92   : > { %v17356_v37 = vpop.eup %17355  ;;  %v12944_v58 = vmax.f32 %v12912_v27, 0.0  ;;  %v12909_v41 = vadd.f32 %v12877_v40, %v12845_v26  ;;  %v12850_v28 = vmul.f32 %v17354_v51, %v21974_v12  ;;  %17371 = vpow2.f32 %v14012_v63  ;;  %v12886_v26 = vld [vmem:[%s17932_s30 + $0x60] sm:$0xff] }
 0xb93   : > { %v17358_v48 = vpop.eup %17357  ;;  %17373 = vrcp.f32 %v12760_v0  ;;  %v12757_v18 = vadd.f32 1.0, %v17356_v37  ;;  %v12606_v33 = vmul.f32 %v22304_v57, %v12572_v14  ;;  %v12569_v42 = vmax.f32 %v12537_v62, 0.0 }
 0xb94   : > { %v17360_v10 = vpop.eup %17359  ;;  %12976 = vst.msk [vmem:[%s22518_s13 + $0x30] sm:$0xff] %vm682_vm0, %v12944_v58  ;;  %v12941_v19 = vmax.f32 %v12909_v41, 0.0  ;;  %v12914_v24 = vadd.f32 %v12882_v61, %v12850_v28  ;;  %v12847_v49 = vmul.f32 %v17358_v48, %v21970_v55  ;;  %17375 = vpow2.f32 %v14009_v17  ;;  %v22562_v55 = vpop.xlane.xlu1 %12492 }
 0xb95   : > { %v17362_v12 = vpop.eup %17361  ;;  %17377 = vrcp.f32 %v12757_v18  ;;  %v12762_v45 = vadd.f32 1.0, %v17360_v10  ;;  %v12638_v30 = vadd.f32 %v12606_v33, %v22446_v2  ;;  %v12603_v35 = vmul.f32 %v22304_v57, %v12569_v42  ;;  %v12502_v14 = vpop.xlane.xlu0 %12501  ;;  %v12888_v33 = vld [vmem:[%s17932_s30 + $0x70] sm:$0xff] }
 0xb96   : > { %12973 = vst.msk [vmem:[%s22518_s13 + $0x18] sm:$0xff] %vm682_vm0, %v12941_v19  ;;  %v12946_v32 = vmax.f32 %v12914_v24, 0.0  ;;  %v12911_v7 = vadd.f32 %v12879_v20, %v12847_v49  ;;  %v12852_v22 = vmul.f32 %v17362_v12, %v21988_v3  ;;  %v12574_v21 = vmax.f32 %v12542_v15, 0.0  ;;  %v12883_v15 = vld [vmem:[%s17932_s30 + $0x48] sm:$0xff] }
 0xb97   : > { %v17364_v53 = vpop.eup %17363  ;;  %17379 = vrcp.f32 %v12762_v45  ;;  %v14014_v50 = vmul.f32 -1.442695, %v12638_v30  ;;  %v12635_v6 = vadd.f32 %v12603_v35, %v22451_v31  ;;  %v12539_v2 = vadd.f32 %v22302_v16, %v22529_v34 }
 0xb98   : > { %v17366_v9 = vpop.eup %17365  ;;  %12978 = vst.msk [vmem:[%s22518_s13 + $0x40] sm:$0xff] %vm682_vm0, %v12946_v32  ;;  %v12943_v56 = vmax.f32 %v12911_v7, 0.0  ;;  %v12916_v40 = vadd.f32 %v12884_v52, %v12852_v22  ;;  %v12759_v3 = vadd.f32 1.0, %v17364_v53  ;;  %v12608_v63 = vmul.f32 %v22304_v57, %v12574_v21  ;;  %v22585_v48 = vpop.xlane.xlu1 %12498  ;;  %v12890_v21 = vld [vmem:[%s17932_s30 + $0x80] sm:$0xff] }
 0xb99   : > { %v17368_v43 = vpop.eup %17367  ;;  %v12849_v27 = vmul.f32 %v17366_v9, %v21984_v46  ;;  %17381 = vpow2.f32 %v14014_v50  ;;  %v14011_v31 = vmul.f32 -1.442695, %v12635_v6  ;;  %v12571_v17 = vmax.f32 %v12539_v2, 0.0  ;;  %v12508_v35 = vpop.xlane.xlu0 %12507 }
 0xb9a   : > { %12975 = vst.msk [vmem:[%s22518_s13 + $0x28] sm:$0xff] %vm682_vm0, %v12943_v56  ;;  %v12948_v34 = vmax.f32 %v12916_v40, 0.0  ;;  %v12854_v51 = vmul.f32 %v17368_v43, %v22002_v38  ;;  %17383 = vrcp.f32 %v12759_v3  ;;  %v12640_v61 = vadd.f32 %v12608_v63, %v22467_v39 }
 0xb9b   : > { %v17370_v0 = vpop.eup %17369  ;;  %v12913_v62 = vadd.f32 %v12881_v13, %v12849_v27  ;;  %17385 = vpow2.f32 %v14011_v31  ;;  %v12605_v46 = vmul.f32 %v22304_v57, %v12571_v17  ;;  %v12544_v37 = vadd.f32 %v22302_v16, %v12496_v44 }
 0xb9c   : > { %v17372_v58 = vpop.eup %17371  ;;  %12980 = vst.msk [vmem:[%s22518_s13 + $0x50] sm:$0xff] %vm682_vm0, %v12948_v34  ;;  %v12918_v41 = vadd.f32 %v12886_v26, %v12854_v51  ;;  %v12851_v28 = vmul.f32 %v17370_v0, %v21998_v60  ;;  %v14016_v38 = vmul.f32 -1.442695, %v12640_v61  ;;  %v12541_v39 = vadd.f32 %v22302_v16, %v22543_v36  ;;  %v12885_v36 = vld [vmem:[%s17932_s30 + $0x58] sm:$0xff]  ;;  %v12887_v26 = vld [vmem:[%s17932_s30 + $0x68] sm:$0xff] }
 0xb9d   : > { %v17374_v20 = vpop.eup %17373  ;;  %v12945_v18 = vmax.f32 %v12913_v62, 0.0  ;;  %v12764_v42 = vadd.f32 1.0, %v17372_v58  ;;  %v12637_v44 = vadd.f32 %v12605_v46, %v22472_v59  ;;  %v12576_v10 = vmax.f32 %v12544_v37, 0.0  ;;  %v12514_v61 = vpop.xlane.xlu0 %12513 }
 0xb9e   : > { %v17376_v19 = vpop.eup %17375  ;;  %v12950_v24 = vmax.f32 %v12918_v41, 0.0  ;;  %v12915_v49 = vadd.f32 %v12883_v15, %v12851_v28  ;;  %v12856_v60 = vmul.f32 %v17374_v20, %v22016_v8  ;;  %17387 = vpow2.f32 %v14016_v38 }
 0xb9f   : > { %v17378_v12 = vpop.eup %17377  ;;  %12977 = vst.msk [vmem:[%s22518_s13 + $0x38] sm:$0xff] %vm682_vm0, %v12945_v18  ;;  %17389 = vrcp.f32 %v12764_v42  ;;  %v12761_v52 = vadd.f32 1.0, %v17376_v19  ;;  %v14013_v45 = vmul.f32 -1.442695, %v12637_v44  ;;  %v12610_v30 = vmul.f32 %v22304_v57, %v12576_v10 }
 0xba0   : > { %12982 = vst.msk [vmem:[%s22518_s13 + $0x60] sm:$0xff] %vm682_vm0, %v12950_v24  ;;  %v12947_v59 = vmax.f32 %v12915_v49, 0.0  ;;  %v12920_v32 = vadd.f32 %v12888_v33, %v12856_v60  ;;  %v12853_v7 = vmul.f32 %v17378_v12, %v22012_v54  ;;  %v12573_v8 = vmax.f32 %v12541_v39, 0.0  ;;  %v12505_v54 = vpop.xlane.xlu1 %12504  ;;  %v12892_v33 = vld [vmem:[%s17932_s30 + $0x90] sm:$0xff]  ;;  %v12889_v49 = vld [vmem:[%s17932_s30 + $0x78] sm:$0xff] }
 0xba1   : > { %v17380_v22 = vpop.eup %17379  ;;  %17391 = vrcp.f32 %v12761_v52  ;;  %v12642_v53 = vadd.f32 %v12610_v30, %v22486_v1  ;;  %v12546_v50 = vadd.f32 %v22302_v16, %v12502_v14  ;;  %v12543_v6 = vadd.f32 %v22302_v16, %v22562_v55 }
 0xba2   : > { %12979 = vst.msk [vmem:[%s22518_s13 + $0x48] sm:$0xff] %vm682_vm0, %v12947_v59  ;;  %v12952_v2 = vmax.f32 %v12920_v32, 0.0  ;;  %v12917_v9 = vadd.f32 %v12885_v36, %v12853_v7  ;;  %v12858_v56 = vmul.f32 %v17380_v22, %v22030_v23  ;;  %17393 = vpow2.f32 %v14013_v45  ;;  %v23375_v45 = vld [vmem:[#allocation41_spill] sm:$0xff] }
 0xba3   : > { %v17382_v40 = vpop.eup %17381  ;;  %v14018_v13 = vmul.f32 -1.442695, %v12642_v53  ;;  %v12607_v3 = vmul.f32 %v22304_v57, %v12573_v8  ;;  %v12578_v1 = vmax.f32 %v12546_v50, 0.0  ;;  %v12575_v63 = vmax.f32 %v12543_v6, 0.0  ;;  %v23377_v6 = vld [vmem:[#allocation19_spill] sm:$0xff] }
 0xba4   : > { %v17384_v43 = vpop.eup %17383  ;;  %12984 = vst.msk [vmem:[%s22518_s13 + $0x70] sm:$0xff] %vm682_vm0, %v12952_v2  ;;  %v12949_v55 = vmax.f32 %v12917_v9, 0.0  ;;  %v12922_v27 = vadd.f32 %v12890_v21, %v12858_v56  ;;  %v12766_v31 = vadd.f32 1.0, %v17382_v40  ;;  %v12548_v17 = vadd.f32 %v22302_v16, %v12508_v35  ;;  %v12511_v39 = vpop.xlane.xlu1 %12510  ;;  %v23378_v9 = vld [vmem:[#allocation49_spill] sm:$0xff] }
 0xba5   : > { %v17386_v14 = vpop.eup %17385  ;;  %v12855_v23 = vmul.f32 %v17384_v43, %v22026_v11  ;;  %17395 = vpow2.f32 %v14018_v13  ;;  %v12639_v34 = vadd.f32 %v12607_v3, %v22495_v29  ;;  %v12612_v51 = vmul.f32 %v22304_v57, %v12578_v1  ;;  %v12894_v1 = vld [vmem:[%s17932_s30 + $0xa0] sm:$0xff] }
 0xba6   : > { %12981 = vst.msk [vmem:[%s22518_s13 + $0x58] sm:$0xff] %vm682_vm0, %v12949_v55  ;;  %v12954_v0 = vmax.f32 %v12922_v27, 0.0  ;;  %17397 = vrcp.f32 %v12766_v31  ;;  %v12763_v62 = vadd.f32 1.0, %v17386_v14  ;;  %v12609_v15 = vmul.f32 %v22304_v57, %v12575_v63  ;;  %v23379_v55 = vld [vmem:[#allocation42_spill] sm:$0xff] }
 0xba7   : > { %v12919_v46 = vadd.f32 %v12887_v26, %v12855_v23  ;;  %v14015_v37 = vmul.f32 -1.442695, %v12639_v34  ;;  %v12644_v58 = vadd.f32 %v12612_v51, %v22348_v47  ;;  %v12580_v41 = vmax.f32 %v12548_v17, 0.0  ;;  %v12891_v23 = vld [vmem:[%s17932_s30 + $0x88] sm:$0xff]  ;;  %v23380_v34 = vld [vmem:[#allocation61_spill] sm:$0xff] }
 0xba8   : > { %v17388_v11 = vpop.eup %17387  ;;  %12986 = vst.msk [vmem:[%s22518_s13 + $0x80] sm:$0xff] %vm682_vm0, %v12954_v0  ;;  %17399 = vrcp.f32 %v12763_v62  ;;  %v12641_v29 = vadd.f32 %v12609_v15, %v22351_v25  ;;  %v12545_v28 = vadd.f32 %v22302_v16, %v22585_v48  ;;  %v12550_v38 = vadd.f32 %v22302_v16, %v12514_v61  ;;  %v12517_v40 = vpop.xlane.xlu1 %12516  ;;  %v23381_v15 = vld [vmem:[#allocation28_spill] sm:$0xff] }
 0xba9   : > { %v17390_v20 = vpop.eup %17389  ;;  %v12951_v18 = vmax.f32 %v12919_v46, 0.0  ;;  %v12768_v42 = vadd.f32 1.0, %v17388_v11  ;;  %17401 = vpow2.f32 %v14015_v37  ;;  %v14020_v47 = vmul.f32 -1.442695, %v12644_v58  ;;  %v23382_v37 = vld [vmem:[#allocation38_spill] sm:$0xff] }
 0xbaa   : > { %v12860_v44 = vmul.f32 %v17390_v20, %v22044_v5  ;;  %v14017_v10 = vmul.f32 -1.442695, %v12641_v29  ;;  %v12614_v19 = vmul.f32 %v22304_v57, %v12580_v41  ;;  %v12577_v24 = vmax.f32 %v12545_v28, 0.0  ;;  %v23376_v5 = vld [vmem:[#allocation69_spill] sm:$0xff]  ;;  %v12896_v20 = vld [vmem:[%s17932_s30 + $0xb0] sm:$0xff] }
 0xbab   : > { %v17392_v25 = vpop.eup %17391  ;;  %12983 = vst.msk [vmem:[%s22518_s13 + $0x68] sm:$0xff] %vm682_vm0, %v12951_v18  ;;  %17403 = vrcp.f32 %v12768_v42  ;;  %v12582_v48 = vmax.f32 %v12550_v38, 0.0  ;;  %v12547_v60 = vadd.f32 %v22302_v16, %v12505_v54  ;;  %v12549_v12 = vadd.f32 %v22302_v16, %v12511_v39 }
 0xbac   : > { %v17394_v36 = vpop.eup %17393  ;;  %v12924_v52 = vadd.f32 %v12892_v33, %v12860_v44  ;;  %v12857_v30 = vmul.f32 %v17392_v25, %v23375_v45  ;;  %17405 = vpow2.f32 %v14020_v47  ;;  %v12646_v35 = vadd.f32 %v12614_v19, %v23376_v5  ;;  %v23383_v33 = vld [vmem:[#allocation30_spill] sm:$0xff] }
 0xbad   : > { %v12765_v59 = vadd.f32 1.0, %v17394_v36  ;;  %17407 = vpow2.f32 %v14017_v10  ;;  %v12611_v32 = vmul.f32 %v22304_v57, %v12577_v24  ;;  %v12616_v7 = vmul.f32 %v22304_v57, %v12582_v48  ;;  %v23384_v36 = vld [vmem:[#allocation29_spill] sm:$0xff] }
 0xbae   : > { %v12956_v8 = vmax.f32 %v12924_v52, 0.0  ;;  %v12921_v22 = vadd.f32 %v12889_v49, %v12857_v30  ;;  %v14022_v21 = vmul.f32 -1.442695, %v12646_v35  ;;  %v12579_v53 = vmax.f32 %v12547_v60, 0.0  ;;  %v12893_v60 = vld [vmem:[%s17932_s30 + $0x98] sm:$0xff] }
 0xbaf   : > { %v17396_v50 = vpop.eup %17395  ;;  %17409 = vrcp.f32 %v12765_v59  ;;  %v12643_v2 = vadd.f32 %v12611_v32, %v23377_v6  ;;  %v12648_v56 = vadd.f32 %v12616_v7, %v23378_v9  ;;  %v12581_v54 = vmax.f32 %v12549_v12, 0.0  ;;  %v12898_v59 = vld [vmem:[%s17932_s30 + $0xc0] sm:$0xff]  ;;  %v23385_v32 = vld [vmem:[#allocation31_spill] sm:$0xff] }
 0xbb0   : > { %v17398_v13 = vpop.eup %17397  ;;  %12988 = vst.msk [vmem:[%s22518_s13 + $0x90] sm:$0xff] %vm682_vm0, %v12956_v8  ;;  %v12953_v3 = vmax.f32 %v12921_v22, 0.0  ;;  %v12770_v63 = vadd.f32 1.0, %v17396_v50  ;;  %17411 = vpow2.f32 %v14022_v21  ;;  %v12613_v43 = vmul.f32 %v22304_v57, %v12579_v53 }
 0xbb1   : > { %v12862_v27 = vmul.f32 %v17398_v13, %v23379_v55  ;;  %v14019_v26 = vmul.f32 -1.442695, %v12643_v2  ;;  %v14024_v31 = vmul.f32 -1.442695, %v12648_v56  ;;  %v12615_v17 = vmul.f32 %v22304_v57, %v12581_v54  ;;  %v12895_v2 = vld [vmem:[%s17932_s30 + $0xa8] sm:$0xff]  ;;  %v23386_v54 = vld [vmem:[#allocation45_spill] sm:$0xff] }
 0xbb2   : > { %v17400_v14 = vpop.eup %17399  ;;  %12985 = vst.msk [vmem:[%s22518_s13 + $0x78] sm:$0xff] %vm682_vm0, %v12953_v3  ;;  %17413 = vrcp.f32 %v12770_v63  ;;  %v12645_v51 = vadd.f32 %v12613_v43, %v23380_v34  ;;  %v12551_v61 = vadd.f32 %v22302_v16, %v12517_v40  ;;  %v12900_v43 = vld [vmem:[%s17932_s30 + $0xd0] sm:$0xff] }
 0xbb3   : > { %v17402_v0 = vpop.eup %17401  ;;  %v12926_v62 = vadd.f32 %v12894_v1, %v12862_v27  ;;  %v12859_v46 = vmul.f32 %v17400_v14, %v23381_v15  ;;  %17415 = vpow2.f32 %v14019_v26  ;;  %v12647_v58 = vadd.f32 %v12615_v17, %v23382_v37  ;;  %v23387_v26 = vld [vmem:[#allocation62_spill] sm:$0xff]  ;;  %v12897_v17 = vld [vmem:[%s17932_s30 + $0xb8] sm:$0xff]  ;;  %v12902_v15 = vld [vmem:[%s17932_s30 + $0xe0] sm:$0xff] }
 0xbb4   : > { %v12767_v41 = vadd.f32 1.0, %v17402_v0  ;;  %17417 = vpow2.f32 %v14024_v31  ;;  %v14021_v11 = vmul.f32 -1.442695, %v12645_v51  ;;  %v12583_v29 = vmax.f32 %v12551_v61, 0.0 }
 0xbb5   : > { %v17404_v28 = vpop.eup %17403  ;;  %v12958_v38 = vmax.f32 %v12926_v62, 0.0  ;;  %v12923_v39 = vadd.f32 %v12891_v23, %v12859_v46  ;;  %v14023_v18 = vmul.f32 -1.442695, %v12647_v58  ;;  %v23388_v23 = vld [vmem:[#allocation34_spill] sm:$0xff]  ;;  %v23389_v58 = vld [vmem:[#allocation65_spill] sm:$0xff] }
 0xbb6   : > { %v17406_v16 = vpop.eup %17405  ;;  %v12864_v42 = vmul.f32 %v17404_v28, %v23383_v33  ;;  %17419 = vrcp.f32 %v12767_v41  ;;  %v12617_v47 = vmul.f32 %v22304_v57, %v12583_v29 }
 0xbb7   : > { %v17408_v44 = vpop.eup %17407  ;;  %12990 = vst.msk [vmem:[%s22518_s13 + $0xa0] sm:$0xff] %vm682_vm0, %v12958_v38  ;;  %v12955_v10 = vmax.f32 %v12923_v39, 0.0  ;;  %v12772_v19 = vadd.f32 1.0, %v17406_v16  ;;  %17421 = vpow2.f32 %v14021_v11  ;;  %v12899_v38 = vld [vmem:[%s17932_s30 + $0xc8] sm:$0xff]  ;;  %v12904_v16 = vld [vmem:[%s17932_s30 + $0xf0] sm:$0xff] }
 0xbb8   : > { %v12928_v24 = vadd.f32 %v12896_v20, %v12864_v42  ;;  %v12769_v25 = vadd.f32 1.0, %v17408_v44  ;;  %17423 = vpow2.f32 %v14023_v18  ;;  %v12649_v49 = vadd.f32 %v12617_v47, %v22433_v4  ;;  %v23390_v20 = vld [vmem:[#allocation64_spill] sm:$0xff] }
 0xbb9   : > { %v17410_v48 = vpop.eup %17409  ;;  %12987 = vst.msk [vmem:[%s22518_s13 + $0x88] sm:$0xff] %vm682_vm0, %v12955_v10  ;;  %17425 = vrcp.f32 %v12772_v19  ;;  %v23391_v42 = vld [vmem:[#allocation68_spill] sm:$0xff] }
 0xbba   : > { %v17412_v12 = vpop.eup %17411  ;;  %v12960_v57 = vmax.f32 %v12928_v24, 0.0  ;;  %v12861_v52 = vmul.f32 %v17410_v48, %v23384_v36  ;;  %17427 = vrcp.f32 %v12769_v25  ;;  %v14025_v45 = vmul.f32 -1.442695, %v12649_v49  ;;  %v12901_v24 = vld [vmem:[%s17932_s30 + $0xd8] sm:$0xff]  ;;  %v23392_v48 = vld [vmem:[#allocation66_spill] sm:$0xff]  ;;  %v23393_v36 = vld [vmem:[#allocation67_spill] sm:$0xff] }
 0xbbb   : > { %v12774_v30 = vadd.f32 1.0, %v17412_v12  ;;  %v12903_v12 = vld [vmem:[%s17932_s30 + $0xe8] sm:$0xff] }
 0xbbc   : > { %v17414_v5 = vpop.eup %17413  ;;  %12992 = vst.msk [vmem:[%s22518_s13 + $0xb0] sm:$0xff] %vm682_vm0, %v12960_v57  ;;  %v12925_v35 = vadd.f32 %v12893_v60, %v12861_v52  ;;  %17429 = vpow2.f32 %v14025_v45 }
 0xbbd   : > { %v17416_v4 = vpop.eup %17415  ;;  %v12866_v7 = vmul.f32 %v17414_v5, %v23385_v32  ;;  %17431 = vrcp.f32 %v12774_v30  ;;  %v23394_v32 = vld [vmem:[#allocation40_spill] sm:$0xff] }
 0xbbe   : > { %v17418_v8 = vpop.eup %17417  ;;  %v12957_v22 = vmax.f32 %v12925_v35, 0.0  ;;  %v12771_v21 = vadd.f32 1.0, %v17416_v4 }
 0xbbf   : > { %v12930_v53 = vadd.f32 %v12898_v59, %v12866_v7  ;;  %v12776_v50 = vadd.f32 1.0, %v17418_v8  ;;  %v12905_v59 = vld [vmem:[%s17932_s30 + $0xf8] sm:$0xff]  ;;  %s17488_s30 = scalar_lea.vmem %s22709_s26, 4096 }
 0xbc0   : > { %v17420_v6 = vpop.eup %17419  ;;  %12989 = vst.msk [vmem:[%s22518_s13 + $0x98] sm:$0xff] %vm682_vm0, %v12957_v22  ;;  %17433 = vrcp.f32 %v12771_v21  ;;  %p17489_p1 = scmp.ne.s32.totalorder %s22709_s26, %s17488_s30  ;;  %p17496_p7 = scmp.lt.s32.totalorder %s17494_s19, %s17488_s30 }
 0xbc1   : > { %v17422_v9 = vpop.eup %17421  ;;  %v12962_v56 = vmax.f32 %v12930_v53, 0.0  ;;  %v12863_v40 = vmul.f32 %v17420_v6, %v23386_v54  ;;  %17435 = vrcp.f32 %v12776_v50 }
 0xbc2   : > { %v17424_v13 = vpop.eup %17423  ;;  %v12773_v3 = vadd.f32 1.0, %v17422_v9  ;;  %p17490_p3 = pnand %p17489_p1, %p23395_p2  ;;  %p17497_p5 = por %p17496_p7, %p17495_p9 }
 0xbc3   : > { %v17426_v1 = vpop.eup %17425  ;;  %12994 = vst.msk [vmem:[%s22518_s13 + $0xc0] sm:$0xff] %vm682_vm0, %v12962_v56  ;;  %v12927_v63 = vadd.f32 %v12895_v2, %v12863_v40  ;;  %v12775_v55 = vadd.f32 1.0, %v17424_v13 }
 0xbc4   : > { %v17428_v27 = vpop.eup %17427  ;;  %v12868_v31 = vmul.f32 %v17426_v1, %v23387_v26  ;;  %17437 = vrcp.f32 %v12773_v3  ;;  %p17491_p4 = pneg %p17490_p3 }
 0xbc5   : > { %v12959_v14 = vmax.f32 %v12927_v63, 0.0  ;;  %v12865_v34 = vmul.f32 %v17428_v27, %v23388_v23  ;;  %17439 = vrcp.f32 %v12775_v55 }
 0xbc6   : > { %v17430_v51 = vpop.eup %17429  ;;  %v12932_v61 = vadd.f32 %v12900_v43, %v12868_v31  ;;  %p17498_p6 = pnand %p17497_p5, %p17491_p4 }
 0xbc7   : > { %v17432_v0 = vpop.eup %17431  ;;  %12991 = vst.msk [vmem:[%s22518_s13 + $0xa8] sm:$0xff] %vm682_vm0, %v12959_v14  ;;  %v12929_v62 = vadd.f32 %v12897_v17, %v12865_v34  ;;  %v12777_v46 = vadd.f32 1.0, %v17430_v51 }
 0xbc8   : > { %v12964_v37 = vmax.f32 %v12932_v61, 0.0  ;;  %v12870_v41 = vmul.f32 %v17432_v0, %v23389_v58 }
 0xbc9   : > { %v12961_v11 = vmax.f32 %v12929_v62, 0.0  ;;  %17441 = vrcp.f32 %v12777_v46 }
 0xbca   : > { %v17434_v29 = vpop.eup %17433  ;;  %12996 = vst.msk [vmem:[%s22518_s13 + $0xd0] sm:$0xff] %vm682_vm0, %v12964_v37  ;;  %v12934_v28 = vadd.f32 %v12902_v15, %v12870_v41 }
 0xbcb   : > { %v17436_v39 = vpop.eup %17435  ;;  %12993 = vst.msk [vmem:[%s22518_s13 + $0xb8] sm:$0xff] %vm682_vm0, %v12961_v11  ;;  %v12867_v18 = vmul.f32 %v17434_v29, %v23390_v20 }
 0xbcc   : > { %v12966_v33 = vmax.f32 %v12934_v28, 0.0  ;;  %v12872_v47 = vmul.f32 %v17436_v39, %v23391_v42 }
 0xbcd   : > { %v12931_v44 = vadd.f32 %v12899_v38, %v12867_v18 }
 0xbce   : > { %v17438_v10 = vpop.eup %17437  ;;  %12998 = vst.msk [vmem:[%s22518_s13 + $0xe0] sm:$0xff] %vm682_vm0, %v12966_v33  ;;  %v12936_v19 = vadd.f32 %v12904_v16, %v12872_v47 }
 0xbcf   : > { %v17440_v25 = vpop.eup %17439  ;;  %v12963_v49 = vmax.f32 %v12931_v44, 0.0  ;;  %v12869_v60 = vmul.f32 %v17438_v10, %v23392_v48 }
 0xbd0   : > { %v12968_v57 = vmax.f32 %v12936_v19, 0.0  ;;  %v12871_v52 = vmul.f32 %v17440_v25, %v23393_v36 }
 0xbd1   : > { %12995 = vst.msk [vmem:[%s22518_s13 + $0xc8] sm:$0xff] %vm682_vm0, %v12963_v49  ;;  %v12933_v45 = vadd.f32 %v12901_v24, %v12869_v60 }
 0xbd2   : > { %13000 = vst.msk [vmem:[%s22518_s13 + $0xf0] sm:$0xff] %vm682_vm0, %v12968_v57  ;;  %v12935_v30 = vadd.f32 %v12903_v12, %v12871_v52 }
 0xbd3   : > { %v17442_v5 = vpop.eup %17441  ;;  %v12965_v35 = vmax.f32 %v12933_v45, 0.0 }
 0xbd4   : > { %v12967_v4 = vmax.f32 %v12935_v30, 0.0  ;;  %v12873_v7 = vmul.f32 %v17442_v5, %v23394_v32 }
 0xbd5   : > { %12997 = vst.msk [vmem:[%s22518_s13 + $0xd8] sm:$0xff] %vm682_vm0, %v12965_v35 }
 0xbd6   : > { %12999 = vst.msk [vmem:[%s22518_s13 + $0xe8] sm:$0xff] %vm682_vm0, %v12967_v4  ;;  %v12937_v8 = vadd.f32 %v12905_v59, %v12873_v7 }
 0xbd8   : > { %v12969_v22 = vmax.f32 %v12937_v8, 0.0 }
 0xbda   : > { %13001 = vst.msk [vmem:[%s22518_s13 + $0xf8] sm:$0xff] %vm682_vm0, %v12969_v22 }
 0xbdb   : > { %17501 = shalt.err (!%p17498_p6)
}
 0xbdc   : > { %s17502_s22 = scalar_lea.hbm %s22707_s23, 4096  ;;  %s17506_s25 = scalar_lea.hbm %s22774_s18, 8192 }
 0xbdd   : > { %p17503_p10 = scmp.ne.s32.totalorder %s22707_s23, %s17502_s22  ;;  %p17507_p11 = scmp.lt.u32.totalorder %s22707_s23, %s22774_s18 }
 0xbde   : > { %p17508_p13 = scmp.lt.u32.totalorder %s17506_s25, %s17502_s22  ;;  %p17510_p1 = scmp.lt.u32.totalorder %s17502_s22, %s22707_s23 }
 0xbdf   : > { %p17504_p8 = pnand %p17503_p10, %p23395_p2 }
 0xbe0   : > { %p17509_p12 = por %p17508_p13, %p17507_p11 }
 0xbe1   : > { %p17505_p0 = pneg %p17504_p8 }
 0xbe2   : > { %p17511_p3 = por %p17510_p1, %p17509_p12 }
 0xbe4   : > { %p17512_p4 = pnand %p17511_p3, %p17505_p0 }
 0xbe6   : > { %17515 = shalt.err (!%p17512_p4)
}
 0xbe7   : > { %s17566_s30 = smov 128   ;;  %s17567_s1 = smov 8  }
 0xbe8   : > { %17245 = dma.vmem_to_hbm [thread:$0]  (%p23395_p2), %s22709_s26, 4096, %s22707_s23, %s22715_s5, %s17566_s30, %s17566_s30, %s17567_s1  }
 0xbe9 PF: > { %p17267_p9 = scmp.ge.s32.totalorder %s17558_s2, 2  ;;  %s13031_s19 = sand.u32 1, %s17546_s20  }
 0xbea   : > { %p23396_p7 = scmp.ne.s32.totalorder %s22994_s28, 0  ;;  %s13032_s22 = scalar_lea.sflag [#allocation7], %s13031_s19 }
 0xbec   : > { %p17258_p5 = pnand %p17267_p9, %p23396_p7 }
 0xbee   : > { %17541 = dma.done.wait (!%p17258_p5), %s13032_s22, 4096  }
 0xbef   : > { %17543 = vsyncadd (!%p17258_p5), %s13032_s22, 4294963200  ;;  %s23397_s2 = sld [smem:[#allocation17_spill]]  ;;  %s23398_s13 = sld [smem:[#allocation16_spill]] }
 0xbf0   : > { %s23399_s22 = sld [smem:[#allocation18_spill]]  ;;  %s23400_s20 = smov %s17550_s21 }
 0xbf5   : > { %p33_p6 = scmp.ge.s32.totalorder %s23397_s2, 4   ;;  %s23401_s21 = smov %s23398_s13 }
 0xbf7   :  { %35 = sbr.rel (!%p33_p6) target bundleno = 16 (0x10), region = 142 }
 0xbfe   :  { %13037 = vsyncpa [#allocation7], 1 }
 0xbff   :  { %13039 = vsyncpa [#allocation7 + $0x1], 1 }
 0xc00   :  { %13040 = vsyncpa [#allocation8], 1 }
 0xc01   :  { %13042 = vsyncpa [#allocation8 + $0x1], 1 }
 0xc02   :  { %13043 = vsyncpa [#allocation10], 1 }

</bundles_post_ra>
